<compile_context>
chip_gen: v5e
topology: v5e:2x2
jax: 0.10.0
libtpu: 0.0.40
codegen_flags: <defaults>
</compile_context>

<pallas_src>
import jax
import jax.numpy as jnp
from jax.experimental import pallas as pl
from jax.experimental.pallas import tpu as pltpu  # noqa: F401  (kept for parity)

HIDDEN = 64      # logical LSTM hidden size
HP = 128         # lane-padded hidden size (one full vreg lane width)
FC = 32
CRIT = 16
NPARAM = 3


# ---------------------------------------------------------------------------
# math helpers (in-kernel)
# ---------------------------------------------------------------------------
def _sigmoid(z):
    # 1/(1+exp(-z)) with the divide moved to the EUP via approx reciprocal.
    return pl.reciprocal(1.0 + jnp.exp(-z), approx=True)


def _softplus(z):
    # matches torch.nn.Softplus(beta=1, threshold=20)
    return jnp.where(z > 20.0, z, jnp.log1p(jnp.exp(jnp.minimum(z, 20.0))))


# ---------------------------------------------------------------------------
# Single fused kernel: 2-layer LSTM (unrolled over time) + fc/critic/alpha/beta
# ---------------------------------------------------------------------------
def net_kernel(x_ref, w0_ref, b0_ref, w1_ref, b1_ref,
               wfc_ref, bfc_ref, wc1_ref, bc1_ref, wc2_ref, bc2_ref,
               wab_ref, bab_ref, out_ref):
    T = x_ref.shape[0]

    w0 = w0_ref[...]          # (2*HP, 4*HP)  fused [W_ih; W_hh], gate-padded
    b0 = b0_ref[...]          # (1, 4*HP)
    w1 = w1_ref[...]
    b1 = b1_ref[...]

    def cell(xh, c, w, b):
        # One fused MXU op per cell: (1, 2*HP) @ (2*HP, 4*HP)
        gates = jnp.dot(xh, w, preferred_element_type=jnp.float32) + b
        # PyTorch gate order i, f, g, o — each gate occupies a full 128-lane
        # block, so every slice below is lane-aligned.
        i = _sigmoid(gates[:, 0 * HP:1 * HP])
        f = _sigmoid(gates[:, 1 * HP:2 * HP])
        g = jnp.tanh(gates[:, 2 * HP:3 * HP])
        o = _sigmoid(gates[:, 3 * HP:4 * HP])
        c_new = f * c + i * g
        h_new = o * jnp.tanh(c_new)
        # Pad lanes (64:128) stay exactly 0: gates_pad = 0 -> g_pad = 0,
        # c_pad stays 0, h_pad = o_pad * tanh(0) = 0.
        return h_new, c_new

    zeros = jnp.zeros((1, HP), jnp.float32)
    h0, c0, h1, c1 = zeros, zeros, zeros, zeros

    hs = []
    for t in range(T):                      # fully unrolled at trace time
        x_t = x_ref[t:t + 1, :]             # (1, HP), real input in lanes 0:F
        h0, c0 = cell(jnp.concatenate([x_t, h0], axis=-1), c0, w0, b0)
        h1, c1 = cell(jnp.concatenate([h0, h1], axis=-1), c1, w1, b1)
        hs.append(h1)

    hist = jnp.concatenate(hs, axis=0)      # (T, HP); lanes 64:128 are all 0

    # fc head (padded wfc rows 64:128 are 0, so no slicing of `hist` needed)
    xfc = jnp.maximum(
        jnp.dot(hist, wfc_ref[...], preferred_element_type=jnp.float32)
        + bfc_ref[...], 0.0)                                     # (T, FC)

    # critic: 32 -> 16 -> 1
    hc = jnp.maximum(
        jnp.dot(xfc, wc1_ref[...], preferred_element_type=jnp.float32)
        + bc1_ref[...], 0.0)                                     # (T, CRIT)
    v = (jnp.dot(hc, wc2_ref[...], preferred_element_type=jnp.float32)
         + bc2_ref[...])                                         # (T, 1)

    # alpha|beta fused into one matmul, then softplus + 1
    ab = _softplus(
        jnp.dot(xfc, wab_ref[...], preferred_element_type=jnp.float32)
        + bab_ref[...]) + 1.0                                    # (T, 2*NPARAM)

    # Pack [alpha(3) | beta(3) | v(1) | zeros] into one lane-dense (T, 128) tile.
    packed = jnp.concatenate(
        [ab, v, jnp.zeros((T, HP - 2 * NPARAM - 1), jnp.float32)], axis=-1)
    out_ref[...] = packed


# ---------------------------------------------------------------------------
# JAX wrapper
# ---------------------------------------------------------------------------
@jax.jit
def net_forward(x, params):
    # x: (T, B, F) — PyTorch default (seq, batch, feature) layout.
    T, B, F = x.shape
    # Only the last batch element's hidden trajectory is ever consumed
    # (lstm_out[:, -1, :]); feed just that row, lane-padded to 128 (layout only).
    x_last = x[:, -1, :]                                         # (T, F)
    x_pad = jnp.zeros((T, HP), jnp.float32).at[:, :F].set(x_last)

    packed = pl.pallas_call(
        net_kernel,
        out_shape=jax.ShapeDtypeStruct((T, HP), jnp.float32),
    )(x_pad, *params)

    alpha = packed[:, 0:NPARAM]
    beta = packed[:, NPARAM:2 * NPARAM]
    v = packed[:, 2 * NPARAM:2 * NPARAM + 1]
    return alpha, beta, v


# ---------------------------------------------------------------------------
# Parameter construction (deterministic, synthetic) in the kernel's padded /
# fused layout.  Logical weights follow the PyTorch shapes (transposed so the
# kernel does x @ W); padding is pure zero-filled layout.
# ---------------------------------------------------------------------------
def init_params(key, input_size):
    def u(k, shape, scale):
        return jax.random.uniform(k, shape, jnp.float32, -scale, scale)

    keys = jax.random.split(key, 16)
    s_lstm = 1.0 / jnp.sqrt(HIDDEN)

    # logical LSTM weights, (in, 4*HIDDEN), PyTorch gate order i,f,g,o;
    # b_ih + b_hh pre-summed into one bias per layer.
    wih0 = u(keys[0], (input_size, 4 * HIDDEN), s_lstm)
    whh0 = u(keys[1], (HIDDEN, 4 * HIDDEN), s_lstm)
    b0 = u(keys[2], (1, 4 * HIDDEN), s_lstm) + u(keys[3], (1, 4 * HIDDEN), s_lstm)
    wih1 = u(keys[4], (HIDDEN, 4 * HIDDEN), s_lstm)
    whh1 = u(keys[5], (HIDDEN, 4 * HIDDEN), s_lstm)
    b1 = u(keys[6], (1, 4 * HIDDEN), s_lstm) + u(keys[7], (1, 4 * HIDDEN), s_lstm)

    # logical heads, (in, out)
    wfc = u(keys[8], (HIDDEN, FC), 1.0 / jnp.sqrt(HIDDEN))
    bfc = u(keys[9], (1, FC), 1.0 / jnp.sqrt(HIDDEN))
    wc1 = u(keys[10], (FC, CRIT), 1.0 / jnp.sqrt(FC))
    bc1 = u(keys[11], (1, CRIT), 1.0 / jnp.sqrt(FC))
    wc2 = u(keys[12], (CRIT, 1), 1.0 / jnp.sqrt(CRIT))
    bc2 = u(keys[13], (1, 1), 1.0 / jnp.sqrt(CRIT))
    wa = u(keys[14], (FC, NPARAM), 1.0 / jnp.sqrt(FC))
    ba = jnp.zeros((1, NPARAM), jnp.float32)
    wb = u(keys[15], (FC, NPARAM), 1.0 / jnp.sqrt(FC))
    bb = jnp.zeros((1, NPARAM), jnp.float32)

    # --- repack into padded / fused kernel layout ----------------------------
    def pad_gate_cols(w):
        # (in, 4*HIDDEN) -> (in, 4*HP): each gate block zero-padded 64 -> 128 cols
        blocks = [jnp.pad(w[:, k * HIDDEN:(k + 1) * HIDDEN],
                          ((0, 0), (0, HP - HIDDEN))) for k in range(4)]
        return jnp.concatenate(blocks, axis=1)

    def fuse_layer(w_ih, w_hh, bias, in_rows):
        # Fused weight consumed by concat([x_pad_or_h0, h], -1) @ W  (2*HP, 4*HP)
        w_ih_p = jnp.zeros((HP, 4 * HP), jnp.float32).at[:in_rows, :].set(
            pad_gate_cols(w_ih))
        w_hh_p = jnp.zeros((HP, 4 * HP), jnp.float32).at[:HIDDEN, :].set(
            pad_gate_cols(w_hh))
        return jnp.concatenate([w_ih_p, w_hh_p], axis=0), pad_gate_cols(bias)

    w0f, b0f = fuse_layer(wih0, whh0, b0, input_size)
    w1f, b1f = fuse_layer(wih1, whh1, b1, HIDDEN)

    wfc_p = jnp.zeros((HP, FC), jnp.float32).at[:HIDDEN, :].set(wfc)
    wab = jnp.concatenate([wa, wb], axis=1)        # (FC, 6)
    bab = jnp.concatenate([ba, bb], axis=1)        # (1, 6)

    return (w0f, b0f, w1f, b1f, wfc_p, bfc, wc1, bc1, wc2, bc2, wab, bab)


if __name__ == "__main__":
    SEQ, BATCH, INPUT_SIZE = 8, 2, 16
    key = jax.random.PRNGKey(0)
    kx, kp = jax.random.split(key)

    x = jax.random.normal(kx, (SEQ, BATCH, INPUT_SIZE), jnp.float32)
    params = init_params(kp, INPUT_SIZE)

    alpha, beta, v = net_forward(x, params)
    jax.block_until_ready((alpha, beta, v))

    assert alpha.shape == (SEQ, NPARAM)
    assert beta.shape == (SEQ, NPARAM)
    assert v.shape == (SEQ, 1)
    assert bool(jnp.all(alpha > 1.0)) and bool(jnp.all(beta > 1.0))
    print("KERNEL_OK")
</pallas_src>

<mosaic_0001>
module attributes {stable_mosaic.version = 11 : i64} {
  func.func @net_kernel(%arg0: memref<8x128xf32, #tpu.memory_space<vmem>>, %arg1: memref<256x512xf32, #tpu.memory_space<vmem>>, %arg2: memref<1x512xf32, #tpu.memory_space<vmem>>, %arg3: memref<256x512xf32, #tpu.memory_space<vmem>>, %arg4: memref<1x512xf32, #tpu.memory_space<vmem>>, %arg5: memref<128x32xf32, #tpu.memory_space<vmem>>, %arg6: memref<1x32xf32, #tpu.memory_space<vmem>>, %arg7: memref<32x16xf32, #tpu.memory_space<vmem>>, %arg8: memref<1x16xf32, #tpu.memory_space<vmem>>, %arg9: memref<16x1xf32, #tpu.memory_space<vmem>>, %arg10: memref<1x1xf32, #tpu.memory_space<vmem>>, %arg11: memref<32x6xf32, #tpu.memory_space<vmem>>, %arg12: memref<1x6xf32, #tpu.memory_space<vmem>>, %arg13: memref<8x128xf32, #tpu.memory_space<vmem>>) attributes {dimension_semantics = [], scalar_prefetch = 0 : i64, scratch_operands = 0 : i64, tpu.core_type = #tpu.core_type<tc>} {
    %c0 = arith.constant 0 : index
    %c0_0 = arith.constant 0 : index
    %0 = vector.load %arg1[%c0, %c0_0] : memref<256x512xf32, #tpu.memory_space<vmem>>, vector<256x512xf32>
    %c0_1 = arith.constant 0 : index
    %c0_2 = arith.constant 0 : index
    %1 = vector.load %arg2[%c0_1, %c0_2] : memref<1x512xf32, #tpu.memory_space<vmem>>, vector<1x512xf32>
    %c0_3 = arith.constant 0 : index
    %c0_4 = arith.constant 0 : index
    %2 = vector.load %arg3[%c0_3, %c0_4] : memref<256x512xf32, #tpu.memory_space<vmem>>, vector<256x512xf32>
    %c0_5 = arith.constant 0 : index
    %c0_6 = arith.constant 0 : index
    %3 = vector.load %arg4[%c0_5, %c0_6] : memref<1x512xf32, #tpu.memory_space<vmem>>, vector<1x512xf32>
    %cst = arith.constant 0.000000e+00 : f32
    %4 = vector.broadcast %cst : f32 to vector<1x128xf32>
    %c0_7 = arith.constant 0 : index
    %c0_8 = arith.constant 0 : index
    %5 = vector.load %arg0[%c0_7, %c0_8] : memref<8x128xf32, #tpu.memory_space<vmem>>, vector<1x128xf32>
    %6 = tpu.concatenate %5, %4 in 1 : vector<1x128xf32>, vector<1x128xf32> -> vector<1x256xf32>
    %cst_9 = arith.constant dense<0.000000e+00> : vector<1x512xf32>
    %7 = tpu.matmul %6, %0, %cst_9 {dimension_numbers = #tpu.dot_dimension_numbers<[1], [0], [0], [1], [0, 0, 1, 1], [], []>} : vector<1x256xf32>, vector<256x512xf32>, vector<1x512xf32> -> vector<1x512xf32>
    %8 = arith.addf %7, %1 : vector<1x512xf32>
    %9 = vector.extract_strided_slice %8 {offsets = [0, 0], sizes = [1, 128], strides = [1, 1]} : vector<1x512xf32> to vector<1x128xf32>
    %cst_10 = arith.constant 0.000000e+00 : f32
    %10 = vector.broadcast %cst_10 : f32 to vector<1x128xf32>
    %11 = arith.subf %10, %9 : vector<1x128xf32>
    %12 = math.exp %11 : vector<1x128xf32>
    %cst_11 = arith.constant 1.000000e+00 : f32
    %13 = vector.broadcast %cst_11 : f32 to vector<1x128xf32>
    %14 = arith.addf %13, %12 : vector<1x128xf32>
    %15 = tpu.reciprocal %14 {approx = true} : vector<1x128xf32> -> vector<1x128xf32>
    %16 = vector.extract_strided_slice %8 {offsets = [0, 128], sizes = [1, 128], strides = [1, 1]} : vector<1x512xf32> to vector<1x128xf32>
    %cst_12 = arith.constant 0.000000e+00 : f32
    %17 = vector.broadcast %cst_12 : f32 to vector<1x128xf32>
    %18 = arith.subf %17, %16 : vector<1x128xf32>
    %19 = math.exp %18 : vector<1x128xf32>
    %cst_13 = arith.constant 1.000000e+00 : f32
    %20 = vector.broadcast %cst_13 : f32 to vector<1x128xf32>
    %21 = arith.addf %20, %19 : vector<1x128xf32>
    %22 = tpu.reciprocal %21 {approx = true} : vector<1x128xf32> -> vector<1x128xf32>
    %23 = vector.extract_strided_slice %8 {offsets = [0, 256], sizes = [1, 128], strides = [1, 1]} : vector<1x512xf32> to vector<1x128xf32>
    %24 = math.tanh %23 : vector<1x128xf32>
    %25 = vector.extract_strided_slice %8 {offsets = [0, 384], sizes = [1, 128], strides = [1, 1]} : vector<1x512xf32> to vector<1x128xf32>
    %cst_14 = arith.constant 0.000000e+00 : f32
    %26 = vector.broadcast %cst_14 : f32 to vector<1x128xf32>
    %27 = arith.subf %26, %25 : vector<1x128xf32>
    %28 = math.exp %27 : vector<1x128xf32>
    %cst_15 = arith.constant 1.000000e+00 : f32
    %29 = vector.broadcast %cst_15 : f32 to vector<1x128xf32>
    %30 = arith.addf %29, %28 : vector<1x128xf32>
    %31 = tpu.reciprocal %30 {approx = true} : vector<1x128xf32> -> vector<1x128xf32>
    %32 = arith.mulf %22, %4 : vector<1x128xf32>
    %33 = arith.mulf %15, %24 : vector<1x128xf32>
    %34 = arith.addf %32, %33 : vector<1x128xf32>
    %35 = math.tanh %34 : vector<1x128xf32>
    %36 = arith.mulf %31, %35 : vector<1x128xf32>
    %37 = tpu.concatenate %36, %4 in 1 : vector<1x128xf32>, vector<1x128xf32> -> vector<1x256xf32>
    %cst_16 = arith.constant dense<0.000000e+00> : vector<1x512xf32>
    %38 = tpu.matmul %37, %2, %cst_16 {dimension_numbers = #tpu.dot_dimension_numbers<[1], [0], [0], [1], [0, 0, 1, 1], [], []>} : vector<1x256xf32>, vector<256x512xf32>, vector<1x512xf32> -> vector<1x512xf32>
    %39 = arith.addf %38, %3 : vector<1x512xf32>
    %40 = vector.extract_strided_slice %39 {offsets = [0, 0], sizes = [1, 128], strides = [1, 1]} : vector<1x512xf32> to vector<1x128xf32>
    %cst_17 = arith.constant 0.000000e+00 : f32
    %41 = vector.broadcast %cst_17 : f32 to vector<1x128xf32>
    %42 = arith.subf %41, %40 : vector<1x128xf32>
    %43 = math.exp %42 : vector<1x128xf32>
    %cst_18 = arith.constant 1.000000e+00 : f32
    %44 = vector.broadcast %cst_18 : f32 to vector<1x128xf32>
    %45 = arith.addf %44, %43 : vector<1x128xf32>
    %46 = tpu.reciprocal %45 {approx = true} : vector<1x128xf32> -> vector<1x128xf32>
    %47 = vector.extract_strided_slice %39 {offsets = [0, 128], sizes = [1, 128], strides = [1, 1]} : vector<1x512xf32> to vector<1x128xf32>
    %cst_19 = arith.constant 0.000000e+00 : f32
    %48 = vector.broadcast %cst_19 : f32 to vector<1x128xf32>
    %49 = arith.subf %48, %47 : vector<1x128xf32>
    %50 = math.exp %49 : vector<1x128xf32>
    %cst_20 = arith.constant 1.000000e+00 : f32
    %51 = vector.broadcast %cst_20 : f32 to vector<1x128xf32>
    %52 = arith.addf %51, %50 : vector<1x128xf32>
    %53 = tpu.reciprocal %52 {approx = true} : vector<1x128xf32> -> vector<1x128xf32>
    %54 = vector.extract_strided_slice %39 {offsets = [0, 256], sizes = [1, 128], strides = [1, 1]} : vector<1x512xf32> to vector<1x128xf32>
    %55 = math.tanh %54 : vector<1x128xf32>
    %56 = vector.extract_strided_slice %39 {offsets = [0, 384], sizes = [1, 128], strides = [1, 1]} : vector<1x512xf32> to vector<1x128xf32>
    %cst_21 = arith.constant 0.000000e+00 : f32
    %57 = vector.broadcast %cst_21 : f32 to vector<1x128xf32>
    %58 = arith.subf %57, %56 : vector<1x128xf32>
    %59 = math.exp %58 : vector<1x128xf32>
    %cst_22 = arith.constant 1.000000e+00 : f32
    %60 = vector.broadcast %cst_22 : f32 to vector<1x128xf32>
    %61 = arith.addf %60, %59 : vector<1x128xf32>
    %62 = tpu.reciprocal %61 {approx = true} : vector<1x128xf32> -> vector<1x128xf32>
    %63 = arith.mulf %53, %4 : vector<1x128xf32>
    %64 = arith.mulf %46, %55 : vector<1x128xf32>
    %65 = arith.addf %63, %64 : vector<1x128xf32>
    %66 = math.tanh %65 : vector<1x128xf32>
    %67 = arith.mulf %62, %66 : vector<1x128xf32>
    %c1 = arith.constant 1 : index
    %c0_23 = arith.constant 0 : index
    %68 = vector.load %arg0[%c1, %c0_23] : memref<8x128xf32, #tpu.memory_space<vmem>>, vector<1x128xf32>
    %69 = tpu.concatenate %68, %36 in 1 : vector<1x128xf32>, vector<1x128xf32> -> vector<1x256xf32>
    %cst_24 = arith.constant dense<0.000000e+00> : vector<1x512xf32>
    %70 = tpu.matmul %69, %0, %cst_24 {dimension_numbers = #tpu.dot_dimension_numbers<[1], [0], [0], [1], [0, 0, 1, 1], [], []>} : vector<1x256xf32>, vector<256x512xf32>, vector<1x512xf32> -> vector<1x512xf32>
    %71 = arith.addf %70, %1 : vector<1x512xf32>
    %72 = vector.extract_strided_slice %71 {offsets = [0, 0], sizes = [1, 128], strides = [1, 1]} : vector<1x512xf32> to vector<1x128xf32>
    %cst_25 = arith.constant 0.000000e+00 : f32
    %73 = vector.broadcast %cst_25 : f32 to vector<1x128xf32>
    %74 = arith.subf %73, %72 : vector<1x128xf32>
    %75 = math.exp %74 : vector<1x128xf32>
    %cst_26 = arith.constant 1.000000e+00 : f32
    %76 = vector.broadcast %cst_26 : f32 to vector<1x128xf32>
    %77 = arith.addf %76, %75 : vector<1x128xf32>
    %78 = tpu.reciprocal %77 {approx = true} : vector<1x128xf32> -> vector<1x128xf32>
    %79 = vector.extract_strided_slice %71 {offsets = [0, 128], sizes = [1, 128], strides = [1, 1]} : vector<1x512xf32> to vector<1x128xf32>
    %cst_27 = arith.constant 0.000000e+00 : f32
    %80 = vector.broadcast %cst_27 : f32 to vector<1x128xf32>
    %81 = arith.subf %80, %79 : vector<1x128xf32>
    %82 = math.exp %81 : vector<1x128xf32>
    %cst_28 = arith.constant 1.000000e+00 : f32
    %83 = vector.broadcast %cst_28 : f32 to vector<1x128xf32>
    %84 = arith.addf %83, %82 : vector<1x128xf32>
    %85 = tpu.reciprocal %84 {approx = true} : vector<1x128xf32> -> vector<1x128xf32>
    %86 = vector.extract_strided_slice %71 {offsets = [0, 256], sizes = [1, 128], strides = [1, 1]} : vector<1x512xf32> to vector<1x128xf32>
    %87 = math.tanh %86 : vector<1x128xf32>
    %88 = vector.extract_strided_slice %71 {offsets = [0, 384], sizes = [1, 128], strides = [1, 1]} : vector<1x512xf32> to vector<1x128xf32>
    %cst_29 = arith.constant 0.000000e+00 : f32
    %89 = vector.broadcast %cst_29 : f32 to vector<1x128xf32>
    %90 = arith.subf %89, %88 : vector<1x128xf32>
    %91 = math.exp %90 : vector<1x128xf32>
    %cst_30 = arith.constant 1.000000e+00 : f32
    %92 = vector.broadcast %cst_30 : f32 to vector<1x128xf32>
    %93 = arith.addf %92, %91 : vector<1x128xf32>
    %94 = tpu.reciprocal %93 {approx = true} : vector<1x128xf32> -> vector<1x128xf32>
    %95 = arith.mulf %85, %34 : vector<1x128xf32>
    %96 = arith.mulf %78, %87 : vector<1x128xf32>
    %97 = arith.addf %95, %96 : vector<1x128xf32>
    %98 = math.tanh %97 : vector<1x128xf32>
    %99 = arith.mulf %94, %98 : vector<1x128xf32>
    %100 = tpu.concatenate %99, %67 in 1 : vector<1x128xf32>, vector<1x128xf32> -> vector<1x256xf32>
    %cst_31 = arith.constant dense<0.000000e+00> : vector<1x512xf32>
    %101 = tpu.matmul %100, %2, %cst_31 {dimension_numbers = #tpu.dot_dimension_numbers<[1], [0], [0], [1], [0, 0, 1, 1], [], []>} : vector<1x256xf32>, vector<256x512xf32>, vector<1x512xf32> -> vector<1x512xf32>
    %102 = arith.addf %101, %3 : vector<1x512xf32>
    %103 = vector.extract_strided_slice %102 {offsets = [0, 0], sizes = [1, 128], strides = [1, 1]} : vector<1x512xf32> to vector<1x128xf32>
    %cst_32 = arith.constant 0.000000e+00 : f32
    %104 = vector.broadcast %cst_32 : f32 to vector<1x128xf32>
    %105 = arith.subf %104, %103 : vector<1x128xf32>
    %106 = math.exp %105 : vector<1x128xf32>
    %cst_33 = arith.constant 1.000000e+00 : f32
    %107 = vector.broadcast %cst_33 : f32 to vector<1x128xf32>
    %108 = arith.addf %107, %106 : vector<1x128xf32>
    %109 = tpu.reciprocal %108 {approx = true} : vector<1x128xf32> -> vector<1x128xf32>
    %110 = vector.extract_strided_slice %102 {offsets = [0, 128], sizes = [1, 128], strides = [1, 1]} : vector<1x512xf32> to vector<1x128xf32>
    %cst_34 = arith.constant 0.000000e+00 : f32
    %111 = vector.broadcast %cst_34 : f32 to vector<1x128xf32>
    %112 = arith.subf %111, %110 : vector<1x128xf32>
    %113 = math.exp %112 : vector<1x128xf32>
    %cst_35 = arith.constant 1.000000e+00 : f32
    %114 = vector.broadcast %cst_35 : f32 to vector<1x128xf32>
    %115 = arith.addf %114, %113 : vector<1x128xf32>
    %116 = tpu.reciprocal %115 {approx = true} : vector<1x128xf32> -> vector<1x128xf32>
    %117 = vector.extract_strided_slice %102 {offsets = [0, 256], sizes = [1, 128], strides = [1, 1]} : vector<1x512xf32> to vector<1x128xf32>
    %118 = math.tanh %117 : vector<1x128xf32>
    %119 = vector.extract_strided_slice %102 {offsets = [0, 384], sizes = [1, 128], strides = [1, 1]} : vector<1x512xf32> to vector<1x128xf32>
    %cst_36 = arith.constant 0.000000e+00 : f32
    %120 = vector.broadcast %cst_36 : f32 to vector<1x128xf32>
    %121 = arith.subf %120, %119 : vector<1x128xf32>
    %122 = math.exp %121 : vector<1x128xf32>
    %cst_37 = arith.constant 1.000000e+00 : f32
    %123 = vector.broadcast %cst_37 : f32 to vector<1x128xf32>
    %124 = arith.addf %123, %122 : vector<1x128xf32>
    %125 = tpu.reciprocal %124 {approx = true} : vector<1x128xf32> -> vector<1x128xf32>
    %126 = arith.mulf %116, %65 : vector<1x128xf32>
    %127 = arith.mulf %109, %118 : vector<1x128xf32>
    %128 = arith.addf %126, %127 : vector<1x128xf32>
    %129 = math.tanh %128 : vector<1x128xf32>
    %130 = arith.mulf %125, %129 : vector<1x128xf32>
    %c2 = arith.constant 2 : index
    %c0_38 = arith.constant 0 : index
    %131 = vector.load %arg0[%c2, %c0_38] : memref<8x128xf32, #tpu.memory_space<vmem>>, vector<1x128xf32>
    %132 = tpu.concatenate %131, %99 in 1 : vector<1x128xf32>, vector<1x128xf32> -> vector<1x256xf32>
    %cst_39 = arith.constant dense<0.000000e+00> : vector<1x512xf32>
    %133 = tpu.matmul %132, %0, %cst_39 {dimension_numbers = #tpu.dot_dimension_numbers<[1], [0], [0], [1], [0, 0, 1, 1], [], []>} : vector<1x256xf32>, vector<256x512xf32>, vector<1x512xf32> -> vector<1x512xf32>
    %134 = arith.addf %133, %1 : vector<1x512xf32>
    %135 = vector.extract_strided_slice %134 {offsets = [0, 0], sizes = [1, 128], strides = [1, 1]} : vector<1x512xf32> to vector<1x128xf32>
    %cst_40 = arith.constant 0.000000e+00 : f32
    %136 = vector.broadcast %cst_40 : f32 to vector<1x128xf32>
    %137 = arith.subf %136, %135 : vector<1x128xf32>
    %138 = math.exp %137 : vector<1x128xf32>
    %cst_41 = arith.constant 1.000000e+00 : f32
    %139 = vector.broadcast %cst_41 : f32 to vector<1x128xf32>
    %140 = arith.addf %139, %138 : vector<1x128xf32>
    %141 = tpu.reciprocal %140 {approx = true} : vector<1x128xf32> -> vector<1x128xf32>
    %142 = vector.extract_strided_slice %134 {offsets = [0, 128], sizes = [1, 128], strides = [1, 1]} : vector<1x512xf32> to vector<1x128xf32>
    %cst_42 = arith.constant 0.000000e+00 : f32
    %143 = vector.broadcast %cst_42 : f32 to vector<1x128xf32>
    %144 = arith.subf %143, %142 : vector<1x128xf32>
    %145 = math.exp %144 : vector<1x128xf32>
    %cst_43 = arith.constant 1.000000e+00 : f32
    %146 = vector.broadcast %cst_43 : f32 to vector<1x128xf32>
    %147 = arith.addf %146, %145 : vector<1x128xf32>
    %148 = tpu.reciprocal %147 {approx = true} : vector<1x128xf32> -> vector<1x128xf32>
    %149 = vector.extract_strided_slice %134 {offsets = [0, 256], sizes = [1, 128], strides = [1, 1]} : vector<1x512xf32> to vector<1x128xf32>
    %150 = math.tanh %149 : vector<1x128xf32>
    %151 = vector.extract_strided_slice %134 {offsets = [0, 384], sizes = [1, 128], strides = [1, 1]} : vector<1x512xf32> to vector<1x128xf32>
    %cst_44 = arith.constant 0.000000e+00 : f32
    %152 = vector.broadcast %cst_44 : f32 to vector<1x128xf32>
    %153 = arith.subf %152, %151 : vector<1x128xf32>
    %154 = math.exp %153 : vector<1x128xf32>
    %cst_45 = arith.constant 1.000000e+00 : f32
    %155 = vector.broadcast %cst_45 : f32 to vector<1x128xf32>
    %156 = arith.addf %155, %154 : vector<1x128xf32>
    %157 = tpu.reciprocal %156 {approx = true} : vector<1x128xf32> -> vector<1x128xf32>
    %158 = arith.mulf %148, %97 : vector<1x128xf32>
    %159 = arith.mulf %141, %150 : vector<1x128xf32>
    %160 = arith.addf %158, %159 : vector<1x128xf32>
    %161 = math.tanh %160 : vector<1x128xf32>
    %162 = arith.mulf %157, %161 : vector<1x128xf32>
    %163 = tpu.concatenate %162, %130 in 1 : vector<1x128xf32>, vector<1x128xf32> -> vector<1x256xf32>
    %cst_46 = arith.constant dense<0.000000e+00> : vector<1x512xf32>
    %164 = tpu.matmul %163, %2, %cst_46 {dimension_numbers = #tpu.dot_dimension_numbers<[1], [0], [0], [1], [0, 0, 1, 1], [], []>} : vector<1x256xf32>, vector<256x512xf32>, vector<1x512xf32> -> vector<1x512xf32>
    %165 = arith.addf %164, %3 : vector<1x512xf32>
    %166 = vector.extract_strided_slice %165 {offsets = [0, 0], sizes = [1, 128], strides = [1, 1]} : vector<1x512xf32> to vector<1x128xf32>
    %cst_47 = arith.constant 0.000000e+00 : f32
    %167 = vector.broadcast %cst_47 : f32 to vector<1x128xf32>
    %168 = arith.subf %167, %166 : vector<1x128xf32>
    %169 = math.exp %168 : vector<1x128xf32>
    %cst_48 = arith.constant 1.000000e+00 : f32
    %170 = vector.broadcast %cst_48 : f32 to vector<1x128xf32>
    %171 = arith.addf %170, %169 : vector<1x128xf32>
    %172 = tpu.reciprocal %171 {approx = true} : vector<1x128xf32> -> vector<1x128xf32>
    %173 = vector.extract_strided_slice %165 {offsets = [0, 128], sizes = [1, 128], strides = [1, 1]} : vector<1x512xf32> to vector<1x128xf32>
    %cst_49 = arith.constant 0.000000e+00 : f32
    %174 = vector.broadcast %cst_49 : f32 to vector<1x128xf32>
    %175 = arith.subf %174, %173 : vector<1x128xf32>
    %176 = math.exp %175 : vector<1x128xf32>
    %cst_50 = arith.constant 1.000000e+00 : f32
    %177 = vector.broadcast %cst_50 : f32 to vector<1x128xf32>
    %178 = arith.addf %177, %176 : vector<1x128xf32>
    %179 = tpu.reciprocal %178 {approx = true} : vector<1x128xf32> -> vector<1x128xf32>
    %180 = vector.extract_strided_slice %165 {offsets = [0, 256], sizes = [1, 128], strides = [1, 1]} : vector<1x512xf32> to vector<1x128xf32>
    %181 = math.tanh %180 : vector<1x128xf32>
    %182 = vector.extract_strided_slice %165 {offsets = [0, 384], sizes = [1, 128], strides = [1, 1]} : vector<1x512xf32> to vector<1x128xf32>
    %cst_51 = arith.constant 0.000000e+00 : f32
    %183 = vector.broadcast %cst_51 : f32 to vector<1x128xf32>
    %184 = arith.subf %183, %182 : vector<1x128xf32>
    %185 = math.exp %184 : vector<1x128xf32>
    %cst_52 = arith.constant 1.000000e+00 : f32
    %186 = vector.broadcast %cst_52 : f32 to vector<1x128xf32>
    %187 = arith.addf %186, %185 : vector<1x128xf32>
    %188 = tpu.reciprocal %187 {approx = true} : vector<1x128xf32> -> vector<1x128xf32>
    %189 = arith.mulf %179, %128 : vector<1x128xf32>
    %190 = arith.mulf %172, %181 : vector<1x128xf32>
    %191 = arith.addf %189, %190 : vector<1x128xf32>
    %192 = math.tanh %191 : vector<1x128xf32>
    %193 = arith.mulf %188, %192 : vector<1x128xf32>
    %c3 = arith.constant 3 : index
    %c0_53 = arith.constant 0 : index
    %194 = vector.load %arg0[%c3, %c0_53] : memref<8x128xf32, #tpu.memory_space<vmem>>, vector<1x128xf32>
    %195 = tpu.concatenate %194, %162 in 1 : vector<1x128xf32>, vector<1x128xf32> -> vector<1x256xf32>
    %cst_54 = arith.constant dense<0.000000e+00> : vector<1x512xf32>
    %196 = tpu.matmul %195, %0, %cst_54 {dimension_numbers = #tpu.dot_dimension_numbers<[1], [0], [0], [1], [0, 0, 1, 1], [], []>} : vector<1x256xf32>, vector<256x512xf32>, vector<1x512xf32> -> vector<1x512xf32>
    %197 = arith.addf %196, %1 : vector<1x512xf32>
    %198 = vector.extract_strided_slice %197 {offsets = [0, 0], sizes = [1, 128], strides = [1, 1]} : vector<1x512xf32> to vector<1x128xf32>
    %cst_55 = arith.constant 0.000000e+00 : f32
    %199 = vector.broadcast %cst_55 : f32 to vector<1x128xf32>
    %200 = arith.subf %199, %198 : vector<1x128xf32>
    %201 = math.exp %200 : vector<1x128xf32>
    %cst_56 = arith.constant 1.000000e+00 : f32
    %202 = vector.broadcast %cst_56 : f32 to vector<1x128xf32>
    %203 = arith.addf %202, %201 : vector<1x128xf32>
    %204 = tpu.reciprocal %203 {approx = true} : vector<1x128xf32> -> vector<1x128xf32>
    %205 = vector.extract_strided_slice %197 {offsets = [0, 128], sizes = [1, 128], strides = [1, 1]} : vector<1x512xf32> to vector<1x128xf32>
    %cst_57 = arith.constant 0.000000e+00 : f32
    %206 = vector.broadcast %cst_57 : f32 to vector<1x128xf32>
    %207 = arith.subf %206, %205 : vector<1x128xf32>
    %208 = math.exp %207 : vector<1x128xf32>
    %cst_58 = arith.constant 1.000000e+00 : f32
    %209 = vector.broadcast %cst_58 : f32 to vector<1x128xf32>
    %210 = arith.addf %209, %208 : vector<1x128xf32>
    %211 = tpu.reciprocal %210 {approx = true} : vector<1x128xf32> -> vector<1x128xf32>
    %212 = vector.extract_strided_slice %197 {offsets = [0, 256], sizes = [1, 128], strides = [1, 1]} : vector<1x512xf32> to vector<1x128xf32>
    %213 = math.tanh %212 : vector<1x128xf32>
    %214 = vector.extract_strided_slice %197 {offsets = [0, 384], sizes = [1, 128], strides = [1, 1]} : vector<1x512xf32> to vector<1x128xf32>
    %cst_59 = arith.constant 0.000000e+00 : f32
    %215 = vector.broadcast %cst_59 : f32 to vector<1x128xf32>
    %216 = arith.subf %215, %214 : vector<1x128xf32>
    %217 = math.exp %216 : vector<1x128xf32>
    %cst_60 = arith.constant 1.000000e+00 : f32
    %218 = vector.broadcast %cst_60 : f32 to vector<1x128xf32>
    %219 = arith.addf %218, %217 : vector<1x128xf32>
    %220 = tpu.reciprocal %219 {approx = true} : vector<1x128xf32> -> vector<1x128xf32>
    %221 = arith.mulf %211, %160 : vector<1x128xf32>
    %222 = arith.mulf %204, %213 : vector<1x128xf32>
    %223 = arith.addf %221, %222 : vector<1x128xf32>
    %224 = math.tanh %223 : vector<1x128xf32>
    %225 = arith.mulf %220, %224 : vector<1x128xf32>
    %226 = tpu.concatenate %225, %193 in 1 : vector<1x128xf32>, vector<1x128xf32> -> vector<1x256xf32>
    %cst_61 = arith.constant dense<0.000000e+00> : vector<1x512xf32>
    %227 = tpu.matmul %226, %2, %cst_61 {dimension_numbers = #tpu.dot_dimension_numbers<[1], [0], [0], [1], [0, 0, 1, 1], [], []>} : vector<1x256xf32>, vector<256x512xf32>, vector<1x512xf32> -> vector<1x512xf32>
    %228 = arith.addf %227, %3 : vector<1x512xf32>
    %229 = vector.extract_strided_slice %228 {offsets = [0, 0], sizes = [1, 128], strides = [1, 1]} : vector<1x512xf32> to vector<1x128xf32>
    %cst_62 = arith.constant 0.000000e+00 : f32
    %230 = vector.broadcast %cst_62 : f32 to vector<1x128xf32>
    %231 = arith.subf %230, %229 : vector<1x128xf32>
    %232 = math.exp %231 : vector<1x128xf32>
    %cst_63 = arith.constant 1.000000e+00 : f32
    %233 = vector.broadcast %cst_63 : f32 to vector<1x128xf32>
    %234 = arith.addf %233, %232 : vector<1x128xf32>
    %235 = tpu.reciprocal %234 {approx = true} : vector<1x128xf32> -> vector<1x128xf32>
    %236 = vector.extract_strided_slice %228 {offsets = [0, 128], sizes = [1, 128], strides = [1, 1]} : vector<1x512xf32> to vector<1x128xf32>
    %cst_64 = arith.constant 0.000000e+00 : f32
    %237 = vector.broadcast %cst_64 : f32 to vector<1x128xf32>
    %238 = arith.subf %237, %236 : vector<1x128xf32>
    %239 = math.exp %238 : vector<1x128xf32>
    %cst_65 = arith.constant 1.000000e+00 : f32
    %240 = vector.broadcast %cst_65 : f32 to vector<1x128xf32>
    %241 = arith.addf %240, %239 : vector<1x128xf32>
    %242 = tpu.reciprocal %241 {approx = true} : vector<1x128xf32> -> vector<1x128xf32>
    %243 = vector.extract_strided_slice %228 {offsets = [0, 256], sizes = [1, 128], strides = [1, 1]} : vector<1x512xf32> to vector<1x128xf32>
    %244 = math.tanh %243 : vector<1x128xf32>
    %245 = vector.extract_strided_slice %228 {offsets = [0, 384], sizes = [1, 128], strides = [1, 1]} : vector<1x512xf32> to vector<1x128xf32>
    %cst_66 = arith.constant 0.000000e+00 : f32
    %246 = vector.broadcast %cst_66 : f32 to vector<1x128xf32>
    %247 = arith.subf %246, %245 : vector<1x128xf32>
    %248 = math.exp %247 : vector<1x128xf32>
    %cst_67 = arith.constant 1.000000e+00 : f32
    %249 = vector.broadcast %cst_67 : f32 to vector<1x128xf32>
    %250 = arith.addf %249, %248 : vector<1x128xf32>
    %251 = tpu.reciprocal %250 {approx = true} : vector<1x128xf32> -> vector<1x128xf32>
    %252 = arith.mulf %242, %191 : vector<1x128xf32>
    %253 = arith.mulf %235, %244 : vector<1x128xf32>
    %254 = arith.addf %252, %253 : vector<1x128xf32>
    %255 = math.tanh %254 : vector<1x128xf32>
    %256 = arith.mulf %251, %255 : vector<1x128xf32>
    %c4 = arith.constant 4 : index
    %c0_68 = arith.constant 0 : index
    %257 = vector.load %arg0[%c4, %c0_68] : memref<8x128xf32, #tpu.memory_space<vmem>>, vector<1x128xf32>
    %258 = tpu.concatenate %257, %225 in 1 : vector<1x128xf32>, vector<1x128xf32> -> vector<1x256xf32>
    %cst_69 = arith.constant dense<0.000000e+00> : vector<1x512xf32>
    %259 = tpu.matmul %258, %0, %cst_69 {dimension_numbers = #tpu.dot_dimension_numbers<[1], [0], [0], [1], [0, 0, 1, 1], [], []>} : vector<1x256xf32>, vector<256x512xf32>, vector<1x512xf32> -> vector<1x512xf32>
    %260 = arith.addf %259, %1 : vector<1x512xf32>
    %261 = vector.extract_strided_slice %260 {offsets = [0, 0], sizes = [1, 128], strides = [1, 1]} : vector<1x512xf32> to vector<1x128xf32>
    %cst_70 = arith.constant 0.000000e+00 : f32
    %262 = vector.broadcast %cst_70 : f32 to vector<1x128xf32>
    %263 = arith.subf %262, %261 : vector<1x128xf32>
    %264 = math.exp %263 : vector<1x128xf32>
    %cst_71 = arith.constant 1.000000e+00 : f32
    %265 = vector.broadcast %cst_71 : f32 to vector<1x128xf32>
    %266 = arith.addf %265, %264 : vector<1x128xf32>
    %267 = tpu.reciprocal %266 {approx = true} : vector<1x128xf32> -> vector<1x128xf32>
    %268 = vector.extract_strided_slice %260 {offsets = [0, 128], sizes = [1, 128], strides = [1, 1]} : vector<1x512xf32> to vector<1x128xf32>
    %cst_72 = arith.constant 0.000000e+00 : f32
    %269 = vector.broadcast %cst_72 : f32 to vector<1x128xf32>
    %270 = arith.subf %269, %268 : vector<1x128xf32>
    %271 = math.exp %270 : vector<1x128xf32>
    %cst_73 = arith.constant 1.000000e+00 : f32
    %272 = vector.broadcast %cst_73 : f32 to vector<1x128xf32>
    %273 = arith.addf %272, %271 : vector<1x128xf32>
    %274 = tpu.reciprocal %273 {approx = true} : vector<1x128xf32> -> vector<1x128xf32>
    %275 = vector.extract_strided_slice %260 {offsets = [0, 256], sizes = [1, 128], strides = [1, 1]} : vector<1x512xf32> to vector<1x128xf32>
    %276 = math.tanh %275 : vector<1x128xf32>
    %277 = vector.extract_strided_slice %260 {offsets = [0, 384], sizes = [1, 128], strides = [1, 1]} : vector<1x512xf32> to vector<1x128xf32>
    %cst_74 = arith.constant 0.000000e+00 : f32
    %278 = vector.broadcast %cst_74 : f32 to vector<1x128xf32>
    %279 = arith.subf %278, %277 : vector<1x128xf32>
    %280 = math.exp %279 : vector<1x128xf32>
    %cst_75 = arith.constant 1.000000e+00 : f32
    %281 = vector.broadcast %cst_75 : f32 to vector<1x128xf32>
    %282 = arith.addf %281, %280 : vector<1x128xf32>
    %283 = tpu.reciprocal %282 {approx = true} : vector<1x128xf32> -> vector<1x128xf32>
    %284 = arith.mulf %274, %223 : vector<1x128xf32>
    %285 = arith.mulf %267, %276 : vector<1x128xf32>
    %286 = arith.addf %284, %285 : vector<1x128xf32>
    %287 = math.tanh %286 : vector<1x128xf32>
    %288 = arith.mulf %283, %287 : vector<1x128xf32>
    %289 = tpu.concatenate %288, %256 in 1 : vector<1x128xf32>, vector<1x128xf32> -> vector<1x256xf32>
    %cst_76 = arith.constant dense<0.000000e+00> : vector<1x512xf32>
    %290 = tpu.matmul %289, %2, %cst_76 {dimension_numbers = #tpu.dot_dimension_numbers<[1], [0], [0], [1], [0, 0, 1, 1], [], []>} : vector<1x256xf32>, vector<256x512xf32>, vector<1x512xf32> -> vector<1x512xf32>
    %291 = arith.addf %290, %3 : vector<1x512xf32>
    %292 = vector.extract_strided_slice %291 {offsets = [0, 0], sizes = [1, 128], strides = [1, 1]} : vector<1x512xf32> to vector<1x128xf32>
    %cst_77 = arith.constant 0.000000e+00 : f32
    %293 = vector.broadcast %cst_77 : f32 to vector<1x128xf32>
    %294 = arith.subf %293, %292 : vector<1x128xf32>
    %295 = math.exp %294 : vector<1x128xf32>
    %cst_78 = arith.constant 1.000000e+00 : f32
    %296 = vector.broadcast %cst_78 : f32 to vector<1x128xf32>
    %297 = arith.addf %296, %295 : vector<1x128xf32>
    %298 = tpu.reciprocal %297 {approx = true} : vector<1x128xf32> -> vector<1x128xf32>
    %299 = vector.extract_strided_slice %291 {offsets = [0, 128], sizes = [1, 128], strides = [1, 1]} : vector<1x512xf32> to vector<1x128xf32>
    %cst_79 = arith.constant 0.000000e+00 : f32
    %300 = vector.broadcast %cst_79 : f32 to vector<1x128xf32>
    %301 = arith.subf %300, %299 : vector<1x128xf32>
    %302 = math.exp %301 : vector<1x128xf32>
    %cst_80 = arith.constant 1.000000e+00 : f32
    %303 = vector.broadcast %cst_80 : f32 to vector<1x128xf32>
    %304 = arith.addf %303, %302 : vector<1x128xf32>
    %305 = tpu.reciprocal %304 {approx = true} : vector<1x128xf32> -> vector<1x128xf32>
    %306 = vector.extract_strided_slice %291 {offsets = [0, 256], sizes = [1, 128], strides = [1, 1]} : vector<1x512xf32> to vector<1x128xf32>
    %307 = math.tanh %306 : vector<1x128xf32>
    %308 = vector.extract_strided_slice %291 {offsets = [0, 384], sizes = [1, 128], strides = [1, 1]} : vector<1x512xf32> to vector<1x128xf32>
    %cst_81 = arith.constant 0.000000e+00 : f32
    %309 = vector.broadcast %cst_81 : f32 to vector<1x128xf32>
    %310 = arith.subf %309, %308 : vector<1x128xf32>
    %311 = math.exp %310 : vector<1x128xf32>
    %cst_82 = arith.constant 1.000000e+00 : f32
    %312 = vector.broadcast %cst_82 : f32 to vector<1x128xf32>
    %313 = arith.addf %312, %311 : vector<1x128xf32>
    %314 = tpu.reciprocal %313 {approx = true} : vector<1x128xf32> -> vector<1x128xf32>
    %315 = arith.mulf %305, %254 : vector<1x128xf32>
    %316 = arith.mulf %298, %307 : vector<1x128xf32>
    %317 = arith.addf %315, %316 : vector<1x128xf32>
    %318 = math.tanh %317 : vector<1x128xf32>
    %319 = arith.mulf %314, %318 : vector<1x128xf32>
    %c5 = arith.constant 5 : index
    %c0_83 = arith.constant 0 : index
    %320 = vector.load %arg0[%c5, %c0_83] : memref<8x128xf32, #tpu.memory_space<vmem>>, vector<1x128xf32>
    %321 = tpu.concatenate %320, %288 in 1 : vector<1x128xf32>, vector<1x128xf32> -> vector<1x256xf32>
    %cst_84 = arith.constant dense<0.000000e+00> : vector<1x512xf32>
    %322 = tpu.matmul %321, %0, %cst_84 {dimension_numbers = #tpu.dot_dimension_numbers<[1], [0], [0], [1], [0, 0, 1, 1], [], []>} : vector<1x256xf32>, vector<256x512xf32>, vector<1x512xf32> -> vector<1x512xf32>
    %323 = arith.addf %322, %1 : vector<1x512xf32>
    %324 = vector.extract_strided_slice %323 {offsets = [0, 0], sizes = [1, 128], strides = [1, 1]} : vector<1x512xf32> to vector<1x128xf32>
    %cst_85 = arith.constant 0.000000e+00 : f32
    %325 = vector.broadcast %cst_85 : f32 to vector<1x128xf32>
    %326 = arith.subf %325, %324 : vector<1x128xf32>
    %327 = math.exp %326 : vector<1x128xf32>
    %cst_86 = arith.constant 1.000000e+00 : f32
    %328 = vector.broadcast %cst_86 : f32 to vector<1x128xf32>
    %329 = arith.addf %328, %327 : vector<1x128xf32>
    %330 = tpu.reciprocal %329 {approx = true} : vector<1x128xf32> -> vector<1x128xf32>
    %331 = vector.extract_strided_slice %323 {offsets = [0, 128], sizes = [1, 128], strides = [1, 1]} : vector<1x512xf32> to vector<1x128xf32>
    %cst_87 = arith.constant 0.000000e+00 : f32
    %332 = vector.broadcast %cst_87 : f32 to vector<1x128xf32>
    %333 = arith.subf %332, %331 : vector<1x128xf32>
    %334 = math.exp %333 : vector<1x128xf32>
    %cst_88 = arith.constant 1.000000e+00 : f32
    %335 = vector.broadcast %cst_88 : f32 to vector<1x128xf32>
    %336 = arith.addf %335, %334 : vector<1x128xf32>
    %337 = tpu.reciprocal %336 {approx = true} : vector<1x128xf32> -> vector<1x128xf32>
    %338 = vector.extract_strided_slice %323 {offsets = [0, 256], sizes = [1, 128], strides = [1, 1]} : vector<1x512xf32> to vector<1x128xf32>
    %339 = math.tanh %338 : vector<1x128xf32>
    %340 = vector.extract_strided_slice %323 {offsets = [0, 384], sizes = [1, 128], strides = [1, 1]} : vector<1x512xf32> to vector<1x128xf32>
    %cst_89 = arith.constant 0.000000e+00 : f32
    %341 = vector.broadcast %cst_89 : f32 to vector<1x128xf32>
    %342 = arith.subf %341, %340 : vector<1x128xf32>
    %343 = math.exp %342 : vector<1x128xf32>
    %cst_90 = arith.constant 1.000000e+00 : f32
    %344 = vector.broadcast %cst_90 : f32 to vector<1x128xf32>
    %345 = arith.addf %344, %343 : vector<1x128xf32>
    %346 = tpu.reciprocal %345 {approx = true} : vector<1x128xf32> -> vector<1x128xf32>
    %347 = arith.mulf %337, %286 : vector<1x128xf32>
    %348 = arith.mulf %330, %339 : vector<1x128xf32>
    %349 = arith.addf %347, %348 : vector<1x128xf32>
    %350 = math.tanh %349 : vector<1x128xf32>
    %351 = arith.mulf %346, %350 : vector<1x128xf32>
    %352 = tpu.concatenate %351, %319 in 1 : vector<1x128xf32>, vector<1x128xf32> -> vector<1x256xf32>
    %cst_91 = arith.constant dense<0.000000e+00> : vector<1x512xf32>
    %353 = tpu.matmul %352, %2, %cst_91 {dimension_numbers = #tpu.dot_dimension_numbers<[1], [0], [0], [1], [0, 0, 1, 1], [], []>} : vector<1x256xf32>, vector<256x512xf32>, vector<1x512xf32> -> vector<1x512xf32>
    %354 = arith.addf %353, %3 : vector<1x512xf32>
    %355 = vector.extract_strided_slice %354 {offsets = [0, 0], sizes = [1, 128], strides = [1, 1]} : vector<1x512xf32> to vector<1x128xf32>
    %cst_92 = arith.constant 0.000000e+00 : f32
    %356 = vector.broadcast %cst_92 : f32 to vector<1x128xf32>
    %357 = arith.subf %356, %355 : vector<1x128xf32>
    %358 = math.exp %357 : vector<1x128xf32>
    %cst_93 = arith.constant 1.000000e+00 : f32
    %359 = vector.broadcast %cst_93 : f32 to vector<1x128xf32>
    %360 = arith.addf %359, %358 : vector<1x128xf32>
    %361 = tpu.reciprocal %360 {approx = true} : vector<1x128xf32> -> vector<1x128xf32>
    %362 = vector.extract_strided_slice %354 {offsets = [0, 128], sizes = [1, 128], strides = [1, 1]} : vector<1x512xf32> to vector<1x128xf32>
    %cst_94 = arith.constant 0.000000e+00 : f32
    %363 = vector.broadcast %cst_94 : f32 to vector<1x128xf32>
    %364 = arith.subf %363, %362 : vector<1x128xf32>
    %365 = math.exp %364 : vector<1x128xf32>
    %cst_95 = arith.constant 1.000000e+00 : f32
    %366 = vector.broadcast %cst_95 : f32 to vector<1x128xf32>
    %367 = arith.addf %366, %365 : vector<1x128xf32>
    %368 = tpu.reciprocal %367 {approx = true} : vector<1x128xf32> -> vector<1x128xf32>
    %369 = vector.extract_strided_slice %354 {offsets = [0, 256], sizes = [1, 128], strides = [1, 1]} : vector<1x512xf32> to vector<1x128xf32>
    %370 = math.tanh %369 : vector<1x128xf32>
    %371 = vector.extract_strided_slice %354 {offsets = [0, 384], sizes = [1, 128], strides = [1, 1]} : vector<1x512xf32> to vector<1x128xf32>
    %cst_96 = arith.constant 0.000000e+00 : f32
    %372 = vector.broadcast %cst_96 : f32 to vector<1x128xf32>
    %373 = arith.subf %372, %371 : vector<1x128xf32>
    %374 = math.exp %373 : vector<1x128xf32>
    %cst_97 = arith.constant 1.000000e+00 : f32
    %375 = vector.broadcast %cst_97 : f32 to vector<1x128xf32>
    %376 = arith.addf %375, %374 : vector<1x128xf32>
    %377 = tpu.reciprocal %376 {approx = true} : vector<1x128xf32> -> vector<1x128xf32>
    %378 = arith.mulf %368, %317 : vector<1x128xf32>
    %379 = arith.mulf %361, %370 : vector<1x128xf32>
    %380 = arith.addf %378, %379 : vector<1x128xf32>
    %381 = math.tanh %380 : vector<1x128xf32>
    %382 = arith.mulf %377, %381 : vector<1x128xf32>
    %c6 = arith.constant 6 : index
    %c0_98 = arith.constant 0 : index
    %383 = vector.load %arg0[%c6, %c0_98] : memref<8x128xf32, #tpu.memory_space<vmem>>, vector<1x128xf32>
    %384 = tpu.concatenate %383, %351 in 1 : vector<1x128xf32>, vector<1x128xf32> -> vector<1x256xf32>
    %cst_99 = arith.constant dense<0.000000e+00> : vector<1x512xf32>
    %385 = tpu.matmul %384, %0, %cst_99 {dimension_numbers = #tpu.dot_dimension_numbers<[1], [0], [0], [1], [0, 0, 1, 1], [], []>} : vector<1x256xf32>, vector<256x512xf32>, vector<1x512xf32> -> vector<1x512xf32>
    %386 = arith.addf %385, %1 : vector<1x512xf32>
    %387 = vector.extract_strided_slice %386 {offsets = [0, 0], sizes = [1, 128], strides = [1, 1]} : vector<1x512xf32> to vector<1x128xf32>
    %cst_100 = arith.constant 0.000000e+00 : f32
    %388 = vector.broadcast %cst_100 : f32 to vector<1x128xf32>
    %389 = arith.subf %388, %387 : vector<1x128xf32>
    %390 = math.exp %389 : vector<1x128xf32>
    %cst_101 = arith.constant 1.000000e+00 : f32
    %391 = vector.broadcast %cst_101 : f32 to vector<1x128xf32>
    %392 = arith.addf %391, %390 : vector<1x128xf32>
    %393 = tpu.reciprocal %392 {approx = true} : vector<1x128xf32> -> vector<1x128xf32>
    %394 = vector.extract_strided_slice %386 {offsets = [0, 128], sizes = [1, 128], strides = [1, 1]} : vector<1x512xf32> to vector<1x128xf32>
    %cst_102 = arith.constant 0.000000e+00 : f32
    %395 = vector.broadcast %cst_102 : f32 to vector<1x128xf32>
    %396 = arith.subf %395, %394 : vector<1x128xf32>
    %397 = math.exp %396 : vector<1x128xf32>
    %cst_103 = arith.constant 1.000000e+00 : f32
    %398 = vector.broadcast %cst_103 : f32 to vector<1x128xf32>
    %399 = arith.addf %398, %397 : vector<1x128xf32>
    %400 = tpu.reciprocal %399 {approx = true} : vector<1x128xf32> -> vector<1x128xf32>
    %401 = vector.extract_strided_slice %386 {offsets = [0, 256], sizes = [1, 128], strides = [1, 1]} : vector<1x512xf32> to vector<1x128xf32>
    %402 = math.tanh %401 : vector<1x128xf32>
    %403 = vector.extract_strided_slice %386 {offsets = [0, 384], sizes = [1, 128], strides = [1, 1]} : vector<1x512xf32> to vector<1x128xf32>
    %cst_104 = arith.constant 0.000000e+00 : f32
    %404 = vector.broadcast %cst_104 : f32 to vector<1x128xf32>
    %405 = arith.subf %404, %403 : vector<1x128xf32>
    %406 = math.exp %405 : vector<1x128xf32>
    %cst_105 = arith.constant 1.000000e+00 : f32
    %407 = vector.broadcast %cst_105 : f32 to vector<1x128xf32>
    %408 = arith.addf %407, %406 : vector<1x128xf32>
    %409 = tpu.reciprocal %408 {approx = true} : vector<1x128xf32> -> vector<1x128xf32>
    %410 = arith.mulf %400, %349 : vector<1x128xf32>
    %411 = arith.mulf %393, %402 : vector<1x128xf32>
    %412 = arith.addf %410, %411 : vector<1x128xf32>
    %413 = math.tanh %412 : vector<1x128xf32>
    %414 = arith.mulf %409, %413 : vector<1x128xf32>
    %415 = tpu.concatenate %414, %382 in 1 : vector<1x128xf32>, vector<1x128xf32> -> vector<1x256xf32>
    %cst_106 = arith.constant dense<0.000000e+00> : vector<1x512xf32>
    %416 = tpu.matmul %415, %2, %cst_106 {dimension_numbers = #tpu.dot_dimension_numbers<[1], [0], [0], [1], [0, 0, 1, 1], [], []>} : vector<1x256xf32>, vector<256x512xf32>, vector<1x512xf32> -> vector<1x512xf32>
    %417 = arith.addf %416, %3 : vector<1x512xf32>
    %418 = vector.extract_strided_slice %417 {offsets = [0, 0], sizes = [1, 128], strides = [1, 1]} : vector<1x512xf32> to vector<1x128xf32>
    %cst_107 = arith.constant 0.000000e+00 : f32
    %419 = vector.broadcast %cst_107 : f32 to vector<1x128xf32>
    %420 = arith.subf %419, %418 : vector<1x128xf32>
    %421 = math.exp %420 : vector<1x128xf32>
    %cst_108 = arith.constant 1.000000e+00 : f32
    %422 = vector.broadcast %cst_108 : f32 to vector<1x128xf32>
    %423 = arith.addf %422, %421 : vector<1x128xf32>
    %424 = tpu.reciprocal %423 {approx = true} : vector<1x128xf32> -> vector<1x128xf32>
    %425 = vector.extract_strided_slice %417 {offsets = [0, 128], sizes = [1, 128], strides = [1, 1]} : vector<1x512xf32> to vector<1x128xf32>
    %cst_109 = arith.constant 0.000000e+00 : f32
    %426 = vector.broadcast %cst_109 : f32 to vector<1x128xf32>
    %427 = arith.subf %426, %425 : vector<1x128xf32>
    %428 = math.exp %427 : vector<1x128xf32>
    %cst_110 = arith.constant 1.000000e+00 : f32
    %429 = vector.broadcast %cst_110 : f32 to vector<1x128xf32>
    %430 = arith.addf %429, %428 : vector<1x128xf32>
    %431 = tpu.reciprocal %430 {approx = true} : vector<1x128xf32> -> vector<1x128xf32>
    %432 = vector.extract_strided_slice %417 {offsets = [0, 256], sizes = [1, 128], strides = [1, 1]} : vector<1x512xf32> to vector<1x128xf32>
    %433 = math.tanh %432 : vector<1x128xf32>
    %434 = vector.extract_strided_slice %417 {offsets = [0, 384], sizes = [1, 128], strides = [1, 1]} : vector<1x512xf32> to vector<1x128xf32>
    %cst_111 = arith.constant 0.000000e+00 : f32
    %435 = vector.broadcast %cst_111 : f32 to vector<1x128xf32>
    %436 = arith.subf %435, %434 : vector<1x128xf32>
    %437 = math.exp %436 : vector<1x128xf32>
    %cst_112 = arith.constant 1.000000e+00 : f32
    %438 = vector.broadcast %cst_112 : f32 to vector<1x128xf32>
    %439 = arith.addf %438, %437 : vector<1x128xf32>
    %440 = tpu.reciprocal %439 {approx = true} : vector<1x128xf32> -> vector<1x128xf32>
    %441 = arith.mulf %431, %380 : vector<1x128xf32>
    %442 = arith.mulf %424, %433 : vector<1x128xf32>
    %443 = arith.addf %441, %442 : vector<1x128xf32>
    %444 = math.tanh %443 : vector<1x128xf32>
    %445 = arith.mulf %440, %444 : vector<1x128xf32>
    %c7 = arith.constant 7 : index
    %c0_113 = arith.constant 0 : index
    %446 = vector.load %arg0[%c7, %c0_113] : memref<8x128xf32, #tpu.memory_space<vmem>>, vector<1x128xf32>
    %447 = tpu.concatenate %446, %414 in 1 : vector<1x128xf32>, vector<1x128xf32> -> vector<1x256xf32>
    %cst_114 = arith.constant dense<0.000000e+00> : vector<1x512xf32>
    %448 = tpu.matmul %447, %0, %cst_114 {dimension_numbers = #tpu.dot_dimension_numbers<[1], [0], [0], [1], [0, 0, 1, 1], [], []>} : vector<1x256xf32>, vector<256x512xf32>, vector<1x512xf32> -> vector<1x512xf32>
    %449 = arith.addf %448, %1 : vector<1x512xf32>
    %450 = vector.extract_strided_slice %449 {offsets = [0, 0], sizes = [1, 128], strides = [1, 1]} : vector<1x512xf32> to vector<1x128xf32>
    %cst_115 = arith.constant 0.000000e+00 : f32
    %451 = vector.broadcast %cst_115 : f32 to vector<1x128xf32>
    %452 = arith.subf %451, %450 : vector<1x128xf32>
    %453 = math.exp %452 : vector<1x128xf32>
    %cst_116 = arith.constant 1.000000e+00 : f32
    %454 = vector.broadcast %cst_116 : f32 to vector<1x128xf32>
    %455 = arith.addf %454, %453 : vector<1x128xf32>
    %456 = tpu.reciprocal %455 {approx = true} : vector<1x128xf32> -> vector<1x128xf32>
    %457 = vector.extract_strided_slice %449 {offsets = [0, 128], sizes = [1, 128], strides = [1, 1]} : vector<1x512xf32> to vector<1x128xf32>
    %cst_117 = arith.constant 0.000000e+00 : f32
    %458 = vector.broadcast %cst_117 : f32 to vector<1x128xf32>
    %459 = arith.subf %458, %457 : vector<1x128xf32>
    %460 = math.exp %459 : vector<1x128xf32>
    %cst_118 = arith.constant 1.000000e+00 : f32
    %461 = vector.broadcast %cst_118 : f32 to vector<1x128xf32>
    %462 = arith.addf %461, %460 : vector<1x128xf32>
    %463 = tpu.reciprocal %462 {approx = true} : vector<1x128xf32> -> vector<1x128xf32>
    %464 = vector.extract_strided_slice %449 {offsets = [0, 256], sizes = [1, 128], strides = [1, 1]} : vector<1x512xf32> to vector<1x128xf32>
    %465 = math.tanh %464 : vector<1x128xf32>
    %466 = vector.extract_strided_slice %449 {offsets = [0, 384], sizes = [1, 128], strides = [1, 1]} : vector<1x512xf32> to vector<1x128xf32>
    %cst_119 = arith.constant 0.000000e+00 : f32
    %467 = vector.broadcast %cst_119 : f32 to vector<1x128xf32>
    %468 = arith.subf %467, %466 : vector<1x128xf32>
    %469 = math.exp %468 : vector<1x128xf32>
    %cst_120 = arith.constant 1.000000e+00 : f32
    %470 = vector.broadcast %cst_120 : f32 to vector<1x128xf32>
    %471 = arith.addf %470, %469 : vector<1x128xf32>
    %472 = tpu.reciprocal %471 {approx = true} : vector<1x128xf32> -> vector<1x128xf32>
    %473 = arith.mulf %463, %412 : vector<1x128xf32>
    %474 = arith.mulf %456, %465 : vector<1x128xf32>
    %475 = arith.addf %473, %474 : vector<1x128xf32>
    %476 = math.tanh %475 : vector<1x128xf32>
    %477 = arith.mulf %472, %476 : vector<1x128xf32>
    %478 = tpu.concatenate %477, %445 in 1 : vector<1x128xf32>, vector<1x128xf32> -> vector<1x256xf32>
    %cst_121 = arith.constant dense<0.000000e+00> : vector<1x512xf32>
    %479 = tpu.matmul %478, %2, %cst_121 {dimension_numbers = #tpu.dot_dimension_numbers<[1], [0], [0], [1], [0, 0, 1, 1], [], []>} : vector<1x256xf32>, vector<256x512xf32>, vector<1x512xf32> -> vector<1x512xf32>
    %480 = arith.addf %479, %3 : vector<1x512xf32>
    %481 = vector.extract_strided_slice %480 {offsets = [0, 0], sizes = [1, 128], strides = [1, 1]} : vector<1x512xf32> to vector<1x128xf32>
    %cst_122 = arith.constant 0.000000e+00 : f32
    %482 = vector.broadcast %cst_122 : f32 to vector<1x128xf32>
    %483 = arith.subf %482, %481 : vector<1x128xf32>
    %484 = math.exp %483 : vector<1x128xf32>
    %cst_123 = arith.constant 1.000000e+00 : f32
    %485 = vector.broadcast %cst_123 : f32 to vector<1x128xf32>
    %486 = arith.addf %485, %484 : vector<1x128xf32>
    %487 = tpu.reciprocal %486 {approx = true} : vector<1x128xf32> -> vector<1x128xf32>
    %488 = vector.extract_strided_slice %480 {offsets = [0, 128], sizes = [1, 128], strides = [1, 1]} : vector<1x512xf32> to vector<1x128xf32>
    %cst_124 = arith.constant 0.000000e+00 : f32
    %489 = vector.broadcast %cst_124 : f32 to vector<1x128xf32>
    %490 = arith.subf %489, %488 : vector<1x128xf32>
    %491 = math.exp %490 : vector<1x128xf32>
    %cst_125 = arith.constant 1.000000e+00 : f32
    %492 = vector.broadcast %cst_125 : f32 to vector<1x128xf32>
    %493 = arith.addf %492, %491 : vector<1x128xf32>
    %494 = tpu.reciprocal %493 {approx = true} : vector<1x128xf32> -> vector<1x128xf32>
    %495 = vector.extract_strided_slice %480 {offsets = [0, 256], sizes = [1, 128], strides = [1, 1]} : vector<1x512xf32> to vector<1x128xf32>
    %496 = math.tanh %495 : vector<1x128xf32>
    %497 = vector.extract_strided_slice %480 {offsets = [0, 384], sizes = [1, 128], strides = [1, 1]} : vector<1x512xf32> to vector<1x128xf32>
    %cst_126 = arith.constant 0.000000e+00 : f32
    %498 = vector.broadcast %cst_126 : f32 to vector<1x128xf32>
    %499 = arith.subf %498, %497 : vector<1x128xf32>
    %500 = math.exp %499 : vector<1x128xf32>
    %cst_127 = arith.constant 1.000000e+00 : f32
    %501 = vector.broadcast %cst_127 : f32 to vector<1x128xf32>
    %502 = arith.addf %501, %500 : vector<1x128xf32>
    %503 = tpu.reciprocal %502 {approx = true} : vector<1x128xf32> -> vector<1x128xf32>
    %504 = arith.mulf %494, %443 : vector<1x128xf32>
    %505 = arith.mulf %487, %496 : vector<1x128xf32>
    %506 = arith.addf %504, %505 : vector<1x128xf32>
    %507 = math.tanh %506 : vector<1x128xf32>
    %508 = arith.mulf %503, %507 : vector<1x128xf32>
    %509 = tpu.concatenate %67, %130, %193, %256, %319, %382, %445, %508 in 0 : vector<1x128xf32>, vector<1x128xf32>, vector<1x128xf32>, vector<1x128xf32>, vector<1x128xf32>, vector<1x128xf32>, vector<1x128xf32>, vector<1x128xf32> -> vector<8x128xf32>
    %c0_128 = arith.constant 0 : index
    %c0_129 = arith.constant 0 : index
    %510 = vector.load %arg5[%c0_128, %c0_129] : memref<128x32xf32, #tpu.memory_space<vmem>>, vector<128x32xf32>
    %cst_130 = arith.constant dense<0.000000e+00> : vector<8x32xf32>
    %511 = tpu.matmul %509, %510, %cst_130 {dimension_numbers = #tpu.dot_dimension_numbers<[1], [0], [0], [1], [0, 0, 1, 1], [], []>} : vector<8x128xf32>, vector<128x32xf32>, vector<8x32xf32> -> vector<8x32xf32>
    %c0_131 = arith.constant 0 : index
    %c0_132 = arith.constant 0 : index
    %512 = vector.load %arg6[%c0_131, %c0_132] : memref<1x32xf32, #tpu.memory_space<vmem>>, vector<1x32xf32>
    %513 = vector.broadcast %512 : vector<1x32xf32> to vector<8x32xf32>
    %514 = arith.addf %511, %513 : vector<8x32xf32>
    %cst_133 = arith.constant 0.000000e+00 : f32
    %515 = vector.broadcast %cst_133 : f32 to vector<8x32xf32>
    %516 = arith.maximumf %514, %515 : vector<8x32xf32>
    %c0_134 = arith.constant 0 : index
    %c0_135 = arith.constant 0 : index
    %517 = vector.load %arg7[%c0_134, %c0_135] : memref<32x16xf32, #tpu.memory_space<vmem>>, vector<32x16xf32>
    %cst_136 = arith.constant dense<0.000000e+00> : vector<8x16xf32>
    %518 = tpu.matmul %516, %517, %cst_136 {dimension_numbers = #tpu.dot_dimension_numbers<[1], [0], [0], [1], [0, 0, 1, 1], [], []>} : vector<8x32xf32>, vector<32x16xf32>, vector<8x16xf32> -> vector<8x16xf32>
    %c0_137 = arith.constant 0 : index
    %c0_138 = arith.constant 0 : index
    %519 = vector.load %arg8[%c0_137, %c0_138] : memref<1x16xf32, #tpu.memory_space<vmem>>, vector<1x16xf32>
    %520 = vector.broadcast %519 : vector<1x16xf32> to vector<8x16xf32>
    %521 = arith.addf %518, %520 : vector<8x16xf32>
    %cst_139 = arith.constant 0.000000e+00 : f32
    %522 = vector.broadcast %cst_139 : f32 to vector<8x16xf32>
    %523 = arith.maximumf %521, %522 : vector<8x16xf32>
    %c0_140 = arith.constant 0 : index
    %c0_141 = arith.constant 0 : index
    %524 = vector.load %arg9[%c0_140, %c0_141] : memref<16x1xf32, #tpu.memory_space<vmem>>, vector<16x1xf32>
    %cst_142 = arith.constant dense<0.000000e+00> : vector<8x1xf32>
    %525 = tpu.matmul %523, %524, %cst_142 {dimension_numbers = #tpu.dot_dimension_numbers<[1], [0], [0], [1], [0, 0, 1, 1], [], []>} : vector<8x16xf32>, vector<16x1xf32>, vector<8x1xf32> -> vector<8x1xf32>
    %c0_143 = arith.constant 0 : index
    %c0_144 = arith.constant 0 : index
    %526 = vector.load %arg10[%c0_143, %c0_144] : memref<1x1xf32, #tpu.memory_space<vmem>>, vector<1x1xf32>
    %527 = vector.broadcast %526 : vector<1x1xf32> to vector<8x1xf32>
    %528 = arith.addf %525, %527 : vector<8x1xf32>
    %c0_145 = arith.constant 0 : index
    %c0_146 = arith.constant 0 : index
    %529 = vector.load %arg11[%c0_145, %c0_146] : memref<32x6xf32, #tpu.memory_space<vmem>>, vector<32x6xf32>
    %cst_147 = arith.constant dense<0.000000e+00> : vector<8x6xf32>
    %530 = tpu.matmul %516, %529, %cst_147 {dimension_numbers = #tpu.dot_dimension_numbers<[1], [0], [0], [1], [0, 0, 1, 1], [], []>} : vector<8x32xf32>, vector<32x6xf32>, vector<8x6xf32> -> vector<8x6xf32>
    %c0_148 = arith.constant 0 : index
    %c0_149 = arith.constant 0 : index
    %531 = vector.load %arg12[%c0_148, %c0_149] : memref<1x6xf32, #tpu.memory_space<vmem>>, vector<1x6xf32>
    %532 = vector.broadcast %531 : vector<1x6xf32> to vector<8x6xf32>
    %533 = arith.addf %530, %532 : vector<8x6xf32>
    %cst_150 = arith.constant 2.000000e+01 : f32
    %534 = vector.broadcast %cst_150 : f32 to vector<8x6xf32>
    %535 = arith.cmpf ogt, %533, %534 : vector<8x6xf32>
    %cst_151 = arith.constant 2.000000e+01 : f32
    %536 = vector.broadcast %cst_151 : f32 to vector<8x6xf32>
    %537 = arith.minimumf %533, %536 : vector<8x6xf32>
    %538 = math.exp %537 : vector<8x6xf32>
    %539 = math.log1p %538 : vector<8x6xf32>
    %540 = arith.select %535, %533, %539 : vector<8x6xi1>, vector<8x6xf32>
    %cst_152 = arith.constant 1.000000e+00 : f32
    %541 = vector.broadcast %cst_152 : f32 to vector<8x6xf32>
    %542 = arith.addf %540, %541 : vector<8x6xf32>
    %cst_153 = arith.constant 0.000000e+00 : f32
    %543 = vector.broadcast %cst_153 : f32 to vector<8x121xf32>
    %544 = tpu.concatenate %542, %528, %543 in 1 : vector<8x6xf32>, vector<8x1xf32>, vector<8x121xf32> -> vector<8x128xf32>
    %c0_154 = arith.constant 0 : index
    %c0_155 = arith.constant 0 : index
    %545 = vector.load %arg13[%c0_154, %c0_155] : memref<8x128xf32, #tpu.memory_space<vmem>>, vector<8x128xf32>
    tpu.vector_store %arg13[%c0_154, %c0_155], %544 {strides = array<i32>} : memref<8x128xf32, #tpu.memory_space<vmem>>, vector<8x128xf32>,
    return
  }
}

</mosaic_0001>

<bundles_post_ra>
// kernel: net_forward.1
= control target key start
LH: loop header
LB: loop body
LE: loop exit
PB: predicated region body
PF: predicated region fallthrough
CT: control target
= control target key end

     0   :  { %s8890_s0 = inlined_call_operand.vmem [shape: f32[8,128], index: 0, kind: input, shape index: {}]   ;;  %s8891_s1 = inlined_call_operand.hbm [shape: f32[256,512], index: 1, kind: input, shape index: {}]   ;;  %s8892_s2 = inlined_call_operand.vmem [shape: f32[1,512], index: 2, kind: input, shape index: {}]   ;;  %s8893_s3 = inlined_call_operand.hbm [shape: f32[256,512], index: 3, kind: input, shape index: {}]   ;;  %s8894_s4 = inlined_call_operand.vmem [shape: f32[1,512], index: 4, kind: input, shape index: {}]   ;;  %s8895_s5 = inlined_call_operand.vmem [shape: f32[128,32], index: 5, kind: input, shape index: {}]   ;;  %s8896_s6 = inlined_call_operand.vmem [shape: f32[1,32], index: 6, kind: input, shape index: {}]   ;;  %s8897_s7 = inlined_call_operand.vmem [shape: f32[32,16], index: 7, kind: input, shape index: {}]   ;;  %s8898_s8 = inlined_call_operand.vmem [shape: f32[1,16], index: 8, kind: input, shape index: {}]   ;;  %s8899_s9 = inlined_call_operand.vmem [shape: f32[16,1], index: 9, kind: input, shape index: {}]   ;;  %s8900_s10 = inlined_call_operand.<no memory space> [shape: f32[1,1], index: 10, kind: input, shape index: {}]   ;;  %s8901_s11 = inlined_call_operand.vmem [shape: f32[32,6], index: 11, kind: input, shape index: {}]   ;;  %s8902_s12 = inlined_call_operand.vmem [shape: f32[1,6], index: 12, kind: input, shape index: {}]   ;;  %s8903_s13 = inlined_call_operand.vmem [shape: f32[8,128], index: 13, kind: output, shape index: {}]  }
   0x1   :  { %v18_v0 = vstv %s8900_s10 }
   0x2   :  { %19 = vst [vmem:[#allocation2] sm:$0x1] %v18_v0 }
   0x3   :  { %20 = vsyncpa [#allocation4], 0  ;;  %s28_s29 = sshll.u32 %s8891_s1, 4  ;;  %s29_s29 = int_to_ptr.hbm [resolvable:$true] %s28_s29 }
   0x4   :  { %21 = vsyncpa [#allocation6], 0  ;;  %s4610_s30 = smov [#allocation3]   ;;  %s43_s17 = sshll.u32 %s8893_s3, 4  ;;  %s44_s17 = int_to_ptr.hbm [resolvable:$true] %s43_s17 }
   0x5   :  { %s30_s14 = sshll.u32 %s4610_s30, 4  ;;  %s4611_s18 = smov 512   ;;  %s31_s14 = int_to_ptr.vmem [resolvable:$true] %s30_s14 }
   0x6   :  { %s4612_s19 = smov 32   ;;  %s4613_s10 = smov [#allocation5]  }
   0x7   :  { %36 = dma.hbm_to_vmem [thread:$0]  %s29_s29, 16384, %s31_s14, [#allocation4], %s4611_s18, %s4611_s18, %s4612_s19  }
   0x8   :  { %s45_s20 = sshll.u32 %s4613_s10, 4  ;;  %s46_s20 = int_to_ptr.vmem [resolvable:$true] %s45_s20 }
   0x9   :  { %51 = dma.hbm_to_vmem [thread:$0]  %s44_s17, 16384, %s46_s20, [#allocation6], %s4611_s18, %s4611_s18, %s4612_s19  }
   0xa   :  { %4606 = dma.done.wait [#allocation4], 16384  }
   0xb   :  { %4607 = vsyncadd [#allocation4], 4294950912 }
   0xc   :  { %4608 = dma.done.wait [#allocation6], 16384  }
   0xd   :  { %4609 = vsyncadd [#allocation6], 4294950912  ;;  %v139_v1 = vld [vmem:[#allocation3 + $0x1e8] sm:$0xff]  ;;  %v138_v7 = vld [vmem:[#allocation3 + $0x1e0] sm:$0xff]  ;;  %vm3279_vm0 = vcmask 1040384   ;;  %vm3281_vm1 = vcmask 1041408  }
   0xe   :  { %v135_v2 = vld [vmem:[#allocation3 + $0x1c8] sm:$0xff]  ;;  %386 = vmatpush.msra.mxu2 %v139_v1  ;;  %v134_v8 = vld [vmem:[#allocation3 + $0x1c0] sm:$0xff]  ;;  %346 = vmatpush.msra.mxu0 %v138_v7  ;;  %v141_v61 = vld [vmem:[#allocation3 + $0x1f8] sm:$0xff]  ;;  %vm3283_vm2 = vcmask 1042432   ;;  %vm3285_vm3 = vcmask 1043456   ;;  %vm3287_vm4 = vcmask 1044480  }
   0xf   :  { %v4695_v3 = vld [vmem:[#allocation3 + $0x3e8] sm:$0xff]  ;;  %v4703_v9 = vld [vmem:[#allocation3 + $0x3e0] sm:$0xff]  ;;  %v4783_v62 = vld [vmem:[#allocation3 + $0x3f8] sm:$0xff]  ;;  %vm3289_vm5 = vcmask 1045504   ;;  %vm3291_vm6 = vcmask 1046528   ;;  %vm3342_vm7 = vcmask 261120  }
  0x10   :  { %406 = vmatpush.msra.mxu3 %v4695_v3  ;;  %v4698_v4 = vld [vmem:[#allocation3 + $0x3c8] sm:$0xff]  ;;  %387 = vmatpush.msra.mxu2 %v135_v2  ;;  %v130_v12 = vld [vmem:[#allocation3 + $0x1a0] sm:$0xff]  ;;  %v137_v1 = vld [vmem:[#allocation3 + $0x1d8] sm:$0xff]  ;;  %vm3373_vm8 = vcmask 130048   ;;  %vm3444_vm11 = vcmask 48128   ;;  %vm3446_vm12 = vcmask 56320  }
  0x11   :  { %v131_v5 = vld [vmem:[#allocation3 + $0x1a8] sm:$0xff]  ;;  %366 = vmatpush.msra.mxu1 %v4703_v9  ;;  %v4709_v13 = vld [vmem:[#allocation3 + $0x3c0] sm:$0xff]  ;;  %347 = vmatpush.msra.mxu0 %v134_v8  ;;  %v4789_v2 = vld [vmem:[#allocation3 + $0x3d8] sm:$0xff] }
  0x12   :  { %v4700_v6 = vld [vmem:[#allocation3 + $0x3a8] sm:$0xff]  ;;  %407 = vmatpush.msra.mxu3 %v4698_v4  ;;  %388 = vmatpush.msra.mxu2 %v131_v5  ;;  %v4714_v16 = vld [vmem:[#allocation3 + $0x3a0] sm:$0xff]  ;;  %v133_v8 = vld [vmem:[#allocation3 + $0x1b8] sm:$0xff] }
  0x13   :  { %v127_v10 = vld [vmem:[#allocation3 + $0x188] sm:$0xff]  ;;  %367 = vmatpush.msra.mxu1 %v4709_v13  ;;  %v126_v17 = vld [vmem:[#allocation3 + $0x180] sm:$0xff]  ;;  %348 = vmatpush.msra.mxu0 %v130_v12  ;;  %v140_v12 = vld [vmem:[#allocation3 + $0x1f0] sm:$0xff] }
  0x14   :  { %v4705_v11 = vld [vmem:[#allocation3 + $0x388] sm:$0xff]  ;;  %408 = vmatpush.msra.mxu3 %v4700_v6  ;;  %389 = vmatpush.msra.mxu2 %v127_v10  ;;  %v4717_v18 = vld [vmem:[#allocation3 + $0x380] sm:$0xff]  ;;  %v4794_v10 = vld [vmem:[#allocation3 + $0x3b8] sm:$0xff] }
  0x15   :  { %v123_v14 = vld [vmem:[#allocation3 + $0x168] sm:$0xff]  ;;  %368 = vmatpush.msra.mxu1 %v4714_v16  ;;  %v122_v21 = vld [vmem:[#allocation3 + $0x160] sm:$0xff]  ;;  %349 = vmatpush.msra.mxu0 %v126_v17  ;;  %v129_v17 = vld [vmem:[#allocation3 + $0x198] sm:$0xff] }
  0x16   :  { %v4711_v15 = vld [vmem:[#allocation3 + $0x368] sm:$0xff]  ;;  %409 = vmatpush.msra.mxu3 %v4705_v11  ;;  %390 = vmatpush.msra.mxu2 %v123_v14  ;;  %v4723_v22 = vld [vmem:[#allocation3 + $0x360] sm:$0xff]  ;;  %v4798_v14 = vld [vmem:[#allocation3 + $0x3f0] sm:$0xff] }
  0x17   :  { %v119_v19 = vld [vmem:[#allocation3 + $0x148] sm:$0xff]  ;;  %369 = vmatpush.msra.mxu1 %v4717_v18  ;;  %v118_v25 = vld [vmem:[#allocation3 + $0x140] sm:$0xff]  ;;  %350 = vmatpush.msra.mxu0 %v122_v21  ;;  %v136_v21 = vld [vmem:[#allocation3 + $0x1d0] sm:$0xff] }
  0x18   :  { %v4719_v20 = vld [vmem:[#allocation3 + $0x348] sm:$0xff]  ;;  %410 = vmatpush.msra.mxu3 %v4711_v15  ;;  %391 = vmatpush.msra.mxu2 %v119_v19  ;;  %v4729_v26 = vld [vmem:[#allocation3 + $0x340] sm:$0xff]  ;;  %v4800_v19 = vld [vmem:[#allocation3 + $0x398] sm:$0xff] }
  0x19   :  { %v115_v23 = vld [vmem:[#allocation3 + $0x128] sm:$0xff]  ;;  %370 = vmatpush.msra.mxu1 %v4723_v22  ;;  %v114_v29 = vld [vmem:[#allocation3 + $0x120] sm:$0xff]  ;;  %351 = vmatpush.msra.mxu0 %v118_v25  ;;  %v125_v25 = vld [vmem:[#allocation3 + $0x178] sm:$0xff] }
  0x1a   :  { %v4725_v24 = vld [vmem:[#allocation3 + $0x328] sm:$0xff]  ;;  %411 = vmatpush.msra.mxu3 %v4719_v20  ;;  %392 = vmatpush.msra.mxu2 %v115_v23  ;;  %v4735_v30 = vld [vmem:[#allocation3 + $0x320] sm:$0xff]  ;;  %v4804_v23 = vld [vmem:[#allocation3 + $0x3d0] sm:$0xff] }
  0x1b   :  { %v111_v27 = vld [vmem:[#allocation3 + $0x108] sm:$0xff]  ;;  %371 = vmatpush.msra.mxu1 %v4729_v26  ;;  %v110_v33 = vld [vmem:[#allocation3 + $0x100] sm:$0xff]  ;;  %352 = vmatpush.msra.mxu0 %v114_v29  ;;  %v132_v29 = vld [vmem:[#allocation3 + $0x1b0] sm:$0xff] }
  0x1c   :  { %v4731_v28 = vld [vmem:[#allocation3 + $0x308] sm:$0xff]  ;;  %412 = vmatpush.msra.mxu3 %v4725_v24  ;;  %393 = vmatpush.msra.mxu2 %v111_v27  ;;  %v4741_v34 = vld [vmem:[#allocation3 + $0x300] sm:$0xff]  ;;  %v4807_v27 = vld [vmem:[#allocation3 + $0x378] sm:$0xff] }
  0x1d   :  { %v107_v31 = vld [vmem:[#allocation3 + $0xe8] sm:$0xff]  ;;  %372 = vmatpush.msra.mxu1 %v4735_v30  ;;  %v106_v37 = vld [vmem:[#allocation3 + $0xe0] sm:$0xff]  ;;  %353 = vmatpush.msra.mxu0 %v110_v33  ;;  %v121_v33 = vld [vmem:[#allocation3 + $0x158] sm:$0xff] }
  0x1e   :  { %v4737_v32 = vld [vmem:[#allocation3 + $0x2e8] sm:$0xff]  ;;  %413 = vmatpush.msra.mxu3 %v4731_v28  ;;  %394 = vmatpush.msra.mxu2 %v107_v31  ;;  %v4747_v38 = vld [vmem:[#allocation3 + $0x2e0] sm:$0xff]  ;;  %v4810_v31 = vld [vmem:[#allocation3 + $0x3b0] sm:$0xff] }
  0x1f   :  { %v103_v35 = vld [vmem:[#allocation3 + $0xc8] sm:$0xff]  ;;  %373 = vmatpush.msra.mxu1 %v4741_v34  ;;  %v102_v41 = vld [vmem:[#allocation3 + $0xc0] sm:$0xff]  ;;  %354 = vmatpush.msra.mxu0 %v106_v37  ;;  %v128_v37 = vld [vmem:[#allocation3 + $0x190] sm:$0xff] }
  0x20   :  { %v4743_v36 = vld [vmem:[#allocation3 + $0x2c8] sm:$0xff]  ;;  %414 = vmatpush.msra.mxu3 %v4737_v32  ;;  %395 = vmatpush.msra.mxu2 %v103_v35  ;;  %v4753_v42 = vld [vmem:[#allocation3 + $0x2c0] sm:$0xff]  ;;  %v4813_v35 = vld [vmem:[#allocation3 + $0x358] sm:$0xff] }
  0x21   :  { %v99_v39 = vld [vmem:[#allocation3 + $0xa8] sm:$0xff]  ;;  %374 = vmatpush.msra.mxu1 %v4747_v38  ;;  %v98_v45 = vld [vmem:[#allocation3 + $0xa0] sm:$0xff]  ;;  %355 = vmatpush.msra.mxu0 %v102_v41  ;;  %v117_v41 = vld [vmem:[#allocation3 + $0x138] sm:$0xff] }
  0x22   :  { %v4749_v40 = vld [vmem:[#allocation3 + $0x2a8] sm:$0xff]  ;;  %415 = vmatpush.msra.mxu3 %v4743_v36  ;;  %396 = vmatpush.msra.mxu2 %v99_v39  ;;  %v4759_v46 = vld [vmem:[#allocation3 + $0x2a0] sm:$0xff]  ;;  %v4816_v39 = vld [vmem:[#allocation3 + $0x390] sm:$0xff] }
  0x23   :  { %v95_v43 = vld [vmem:[#allocation3 + $0x88] sm:$0xff]  ;;  %375 = vmatpush.msra.mxu1 %v4753_v42  ;;  %v94_v49 = vld [vmem:[#allocation3 + $0x80] sm:$0xff]  ;;  %356 = vmatpush.msra.mxu0 %v98_v45  ;;  %v113_v45 = vld [vmem:[#allocation3 + $0x118] sm:$0xff] }
  0x24   :  { %v4755_v44 = vld [vmem:[#allocation3 + $0x288] sm:$0xff]  ;;  %416 = vmatpush.msra.mxu3 %v4749_v40  ;;  %397 = vmatpush.msra.mxu2 %v95_v43  ;;  %v4765_v50 = vld [vmem:[#allocation3 + $0x280] sm:$0xff]  ;;  %v4819_v43 = vld [vmem:[#allocation3 + $0x338] sm:$0xff] }
  0x25   :  { %v91_v47 = vld [vmem:[#allocation3 + $0x68] sm:$0xff]  ;;  %376 = vmatpush.msra.mxu1 %v4759_v46  ;;  %v90_v53 = vld [vmem:[#allocation3 + $0x60] sm:$0xff]  ;;  %357 = vmatpush.msra.mxu0 %v94_v49  ;;  %v4822_v49 = vld [vmem:[#allocation3 + $0x370] sm:$0xff] }
  0x26   :  { %v4761_v48 = vld [vmem:[#allocation3 + $0x268] sm:$0xff]  ;;  %417 = vmatpush.msra.mxu3 %v4755_v44  ;;  %398 = vmatpush.msra.mxu2 %v91_v47  ;;  %v4771_v54 = vld [vmem:[#allocation3 + $0x260] sm:$0xff]  ;;  %v124_v47 = vld [vmem:[#allocation3 + $0x170] sm:$0xff] }
  0x27   :  { %v87_v51 = vld [vmem:[#allocation3 + $0x48] sm:$0xff]  ;;  %377 = vmatpush.msra.mxu1 %v4765_v50  ;;  %v86_v57 = vld [vmem:[#allocation3 + $0x40] sm:$0xff]  ;;  %358 = vmatpush.msra.mxu0 %v90_v53  ;;  %v4825_v53 = vld [vmem:[#allocation3 + $0x318] sm:$0xff] }
  0x28   :  { %v4767_v52 = vld [vmem:[#allocation3 + $0x248] sm:$0xff]  ;;  %418 = vmatpush.msra.mxu3 %v4761_v48  ;;  %399 = vmatpush.msra.mxu2 %v87_v51  ;;  %v4777_v58 = vld [vmem:[#allocation3 + $0x240] sm:$0xff]  ;;  %v109_v51 = vld [vmem:[#allocation3 + $0xf8] sm:$0xff] }
  0x29   :  { %v83_v55 = vld [vmem:[#allocation3 + $0x28] sm:$0xff]  ;;  %378 = vmatpush.msra.mxu1 %v4771_v54  ;;  %359 = vmatpush.msra.mxu0 %v86_v57  ;;  %v82_v63 = vld [vmem:[#allocation3 + $0x20] sm:$0xff]  ;;  %v4828_v57 = vld [vmem:[#allocation3 + $0x2f8] sm:$0xff] }
  0x2a   :  { %v4773_v56 = vld [vmem:[#allocation3 + $0x228] sm:$0xff]  ;;  %419 = vmatpush.msra.mxu3 %v4767_v52  ;;  %400 = vmatpush.msra.mxu2 %v83_v55  ;;  %v4786_v0 = vld [vmem:[#allocation3 + $0x220] sm:$0xff]  ;;  %v120_v55 = vld [vmem:[#allocation3 + $0x150] sm:$0xff] }
  0x2b   :  { %v79_v59 = vld [vmem:[#allocation3 + $0x8] sm:$0xff]  ;;  %379 = vmatpush.msra.mxu1 %v4777_v58  ;;  %v78_v5 = vld [vmem:[#allocation3] sm:$0xff]  ;;  %360 = vmatpush.msra.mxu0 %v82_v63  ;;  %v4837_v63 = vld [vmem:[#allocation3 + $0x350] sm:$0xff] }
  0x2c   :  { %v4779_v60 = vld [vmem:[#allocation3 + $0x208] sm:$0xff]  ;;  %420 = vmatpush.msra.mxu3 %v4773_v56  ;;  %401 = vmatpush.msra.mxu2 %v79_v59  ;;  %v4792_v7 = vld [vmem:[#allocation3 + $0x200] sm:$0xff]  ;;  %v4833_v59 = vld [vmem:[%s8890_s0] sm:$0x1] }
  0x2d   :  { %380 = vmatpush.msra.mxu1 %v4786_v0  ;;  %361 = vmatpush.msra.mxu0 %v78_v5  ;;  %v4840_v5 = vld [vmem:[#allocation3 + $0x2d8] sm:$0xff] }
  0x2e   :  { %421 = vmatpush.msra.mxu3 %v4779_v60  ;;  %466 = vmatpush.msrb.mxu2 %v141_v61  ;;  %v116_v61 = vld [vmem:[#allocation3 + $0x130] sm:$0xff] }
  0x2f   :  { %381 = vmatpush.msra.mxu1 %v4792_v7  ;;  %426 = vmatpush.msrb.mxu0 %v140_v12  ;;  %v101_v12 = vld [vmem:[#allocation3 + $0xb8] sm:$0xff] }
  0x30   :  { %486 = vmatpush.msrb.mxu3 %v4783_v62  ;;  %467 = vmatpush.msrb.mxu2 %v137_v1  ;;  %v105_v1 = vld [vmem:[#allocation3 + $0xd8] sm:$0xff] }
  0x31   :  { %446 = vmatpush.msrb.mxu1 %v4798_v14  ;;  %427 = vmatpush.msrb.mxu0 %v136_v21  ;;  %v4847_v21 = vld [vmem:[#allocation3 + $0x2b8] sm:$0xff] }
  0x32   :  { %487 = vmatpush.msrb.mxu3 %v4789_v2  ;;  %468 = vmatpush.msrb.mxu2 %v133_v8  ;;  %v112_v8 = vld [vmem:[#allocation3 + $0x110] sm:$0xff]  ;;  %9594 = vst [vmem:[#allocation9_spill] sm:$0xff] %v4847_v21 }
  0x33   :  { %447 = vmatpush.msrb.mxu1 %v4804_v23  ;;  %428 = vmatpush.msrb.mxu0 %v132_v29  ;;  %v8907_v29 = vmov 0.0  }
  0x34   :  { %488 = vmatpush.msrb.mxu3 %v4794_v10  ;;  %469 = vmatpush.msrb.mxu2 %v129_v17  ;;  %v4844_v17 = vld [vmem:[#allocation3 + $0x330] sm:$0xff] }
  0x35   :  { %448 = vmatpush.msrb.mxu1 %v4810_v31  ;;  %429 = vmatpush.msrb.mxu0 %v128_v37  ;;  %v4850_v37 = vld [vmem:[#allocation3 + $0x310] sm:$0xff] }
  0x36   :  { %489 = vmatpush.msrb.mxu3 %v4800_v19  ;;  %470 = vmatpush.msrb.mxu2 %v125_v25  ;;  %v108_v25 = vld [vmem:[#allocation3 + $0xf0] sm:$0xff] }
  0x37   :  { %449 = vmatpush.msrb.mxu1 %v4816_v39  ;;  %430 = vmatpush.msrb.mxu0 %v124_v47  ;;  %v104_v47 = vld [vmem:[#allocation3 + $0xd0] sm:$0xff] }
  0x38   :  { %490 = vmatpush.msrb.mxu3 %v4807_v27  ;;  %471 = vmatpush.msrb.mxu2 %v121_v33  ;;  %v97_v33 = vld [vmem:[#allocation3 + $0x98] sm:$0xff] }
  0x39   :  { %450 = vmatpush.msrb.mxu1 %v4822_v49  ;;  %431 = vmatpush.msrb.mxu0 %v120_v55  ;;  %v4859_v55 = vld [vmem:[#allocation3 + $0x278] sm:$0xff] }
  0x3a   :  { %491 = vmatpush.msrb.mxu3 %v4813_v35  ;;  %472 = vmatpush.msrb.mxu2 %v117_v41  ;;  %v4853_v41 = vld [vmem:[#allocation3 + $0x298] sm:$0xff]  ;;  %9596 = vst [vmem:[#allocation11_spill] sm:$0xff] %v4859_v55 }
  0x3b   :  { %402 = vmatmul.f32.vlgmr.msra.gmra.mxu2 %v4833_v59  ;;  %432 = vmatpush.msrb.mxu0 %v116_v61  ;;  %9595 = vst [vmem:[#allocation10_spill] sm:$0xff] %v4853_v41  ;;  %v89_v61 = vld [vmem:[#allocation3 + $0x58] sm:$0xff] }
  0x3c   :  { %492 = vmatpush.msrb.mxu3 %v4819_v43  ;;  %473 = vmatpush.msrb.mxu2 %v113_v45  ;;  %v93_v45 = vld [vmem:[#allocation3 + $0x78] sm:$0xff] }
  0x3d   :  { %451 = vmatpush.msrb.mxu1 %v4837_v63  ;;  %422 = vmatmul.f32.vlgmr.msra.gmra.mxu3 %v8907_v29 }
  0x3e   :  { %493 = vmatpush.msrb.mxu3 %v4825_v53  ;;  %474 = vmatpush.msrb.mxu2 %v109_v51  ;;  %v4857_v51 = vld [vmem:[#allocation3 + $0x2f0] sm:$0xff] }
  0x3f   :  { %433 = vmatpush.msrb.mxu0 %v112_v8  ;;  %452 = vmatpush.msrb.mxu1 %v4844_v17  ;;  %v4863_v8 = vld [vmem:[#allocation3 + $0x2d0] sm:$0xff] }
  0x40   :  { %494 = vmatpush.msrb.mxu3 %v4828_v57  ;;  %475 = vmatpush.msrb.mxu2 %v105_v1  ;;  %v100_v1 = vld [vmem:[#allocation3 + $0xb0] sm:$0xff]  ;;  %9597 = vst [vmem:[#allocation12_spill] sm:$0xff] %v4863_v8 }
  0x41   :  { %434 = vmatpush.msrb.mxu0 %v108_v25  ;;  %453 = vmatpush.msrb.mxu1 %v4850_v37  ;;  %v4867_v25 = vld [vmem:[#allocation3 + $0x258] sm:$0xff] }
  0x42   :  { %495 = vmatpush.msrb.mxu3 %v4840_v5  ;;  %476 = vmatpush.msrb.mxu2 %v101_v12  ;;  %v85_v12 = vld [vmem:[#allocation3 + $0x38] sm:$0xff]  ;;  %9598 = vst [vmem:[#allocation13_spill] sm:$0xff] %v4867_v25 }
  0x43   :  { %362 = vmatmul.f32.vlgmr.msra.gmra.mxu0 %v4833_v59  ;;  %454 = vmatpush.msrb.mxu1 %v4857_v51 }
  0x44   :  { %496 = vmatpush.msrb.mxu3 %v4847_v21  ;;  %477 = vmatpush.msrb.mxu2 %v97_v33  ;;  %v96_v33 = vld [vmem:[#allocation3 + $0x90] sm:$0xff] }
  0x45   :  { %435 = vmatpush.msrb.mxu0 %v104_v47  ;;  %382 = vmatmul.f32.vlgmr.msra.gmra.mxu1 %v8907_v29  ;;  %v4873_v47 = vld [vmem:[#allocation3 + $0x238] sm:$0xff]  ;;  %v92_v21 = vld [vmem:[#allocation3 + $0x70] sm:$0xff] }
  0x46   :  { %497 = vmatpush.msrb.mxu3 %v4853_v41  ;;  %478 = vmatpush.msrb.mxu2 %v93_v45  ;;  %v4870_v41 = vld [vmem:[#allocation3 + $0x2b0] sm:$0xff]  ;;  %v81_v45 = vld [vmem:[#allocation3 + $0x18] sm:$0xff]  ;;  %9600 = vst [vmem:[#allocation15_spill] sm:$0xff] %v4873_v47 }
  0x47   :  { %9599 = vst [vmem:[#allocation14_spill] sm:$0xff] %v4870_v41  ;;  %436 = vmatpush.msrb.mxu0 %v100_v1  ;;  %455 = vmatpush.msrb.mxu1 %v4863_v8  ;;  %v88_v1 = vld [vmem:[#allocation3 + $0x50] sm:$0xff]  ;;  %v5092_v8 = vld [vmem:[#allocation5 + $0xe0] sm:$0xff] }
  0x48   :  { %498 = vmatpush.msrb.mxu3 %v4859_v55  ;;  %479 = vmatpush.msrb.mxu2 %v89_v61  ;;  %v4877_v55 = vld [vmem:[#allocation3 + $0x290] sm:$0xff]  ;;  %v4879_v61 = vld [vmem:[#allocation3 + $0x218] sm:$0xff]  ;;  %9673 = vst [vmem:[#allocation87_spill] sm:$0xff] %v5092_v8 }
  0x49   :  { %437 = vmatpush.msrb.mxu0 %v96_v33  ;;  %456 = vmatpush.msrb.mxu1 %v4870_v41  ;;  %9601 = vst [vmem:[#allocation16_spill] sm:$0xff] %v4877_v55  ;;  %v4883_v29 = vld [vmem:[#allocation3 + $0x270] sm:$0xff]  ;;  %v5009_v41 = vld [vmem:[#allocation5 + $0x220] sm:$0xff] }
  0x4a   :  { %480 = vmatpush.msrb.mxu2 %v85_v12  ;;  %499 = vmatpush.msrb.mxu3 %v4867_v25  ;;  %9602 = vst [vmem:[#allocation17_spill] sm:$0xff] %v4879_v61  ;;  %v4885_v12 = vld [vmem:[#allocation5 + $0x3e8] sm:$0xff]  ;;  %v4889_v33 = vld [vmem:[#allocation3 + $0x30] sm:$0xff]  ;;  %v9606_v25 = vmov 0.0  }
  0x4b   :  { %438 = vmatpush.msrb.mxu0 %v92_v21  ;;  %9603 = vst [vmem:[#allocation18_spill] sm:$0xff] %v4883_v29  ;;  %457 = vmatpush.msrb.mxu1 %v4877_v55  ;;  %v4897_v21 = vld [vmem:[#allocation3 + $0x10] sm:$0xff] }
  0x4c   :  { %481 = vmatpush.msrb.mxu2 %v81_v45  ;;  %500 = vmatpush.msrb.mxu3 %v4873_v47  ;;  %9604 = vst [vmem:[#allocation19_spill] sm:$0xff] %v4885_v12  ;;  %v4892_v45 = vld [vmem:[#allocation3 + $0x250] sm:$0xff]  ;;  %v4894_v47 = vld [vmem:[#allocation5 + $0x3c8] sm:$0xff] }
  0x4d   :  { %482 = vmatmul.f32.vlgmr.msrb.gmra.mxu2 %v4833_v59  ;;  %9605 = vst [vmem:[#allocation20_spill] sm:$0xff] %v4889_v33  ;;  %439 = vmatpush.msrb.mxu0 %v88_v1  ;;  %v4901_v55 = vld [vmem:[#allocation3 + $0x230] sm:$0xff] }
  0x4e   :  { %501 = vmatpush.msrb.mxu3 %v4879_v61  ;;  %9607 = vst [vmem:[#allocation21_spill] sm:$0xff] %v4892_v45  ;;  %458 = vmatpush.msrb.mxu1 %v4883_v29  ;;  %v4905_v61 = vld [vmem:[#allocation5 + $0x3a8] sm:$0xff]  ;;  %v4908_v1 = vld [vmem:[#allocation3 + $0x210] sm:$0xff] }
  0x4f   :  { %502 = vmatmul.f32.vlgmr.msrb.gmra.mxu3 %v9606_v25  ;;  %9608 = vst [vmem:[#allocation22_spill] sm:$0xff] %v4894_v47  ;;  %440 = vmatpush.msrb.mxu0 %v4889_v33  ;;  %v4912_v29 = vld [vmem:[#allocation5 + $0x388] sm:$0xff] }
  0x50   :  { %9609 = vst [vmem:[#allocation23_spill] sm:$0xff] %v4897_v21  ;;  %596 = vmatpush.msra.mxu3 %v4885_v12  ;;  %459 = vmatpush.msrb.mxu1 %v4892_v45  ;;  %v4914_v12 = vld [vmem:[#allocation5 + $0x3e0] sm:$0xff]  ;;  %v4918_v33 = vld [vmem:[#allocation5 + $0x368] sm:$0xff] }
  0x51   :  { %9610 = vst [vmem:[#allocation24_spill] sm:$0xff] %v4901_v55  ;;  %441 = vmatpush.msrb.mxu0 %v4897_v21  ;;  %v4925_v21 = vld [vmem:[#allocation5 + $0x348] sm:$0xff]  ;;  %v4992_v45 = vld [vmem:[#allocation5 + $0x1e0] sm:$0xff] }
  0x52   :  { %597 = vmatpush.msra.mxu3 %v4894_v47  ;;  %9611 = vst [vmem:[#allocation25_spill] sm:$0xff] %v4905_v61  ;;  %460 = vmatpush.msrb.mxu1 %v4901_v55  ;;  %v4921_v47 = vld [vmem:[#allocation5 + $0x3c0] sm:$0xff]  ;;  %v4937_v55 = vld [vmem:[#allocation5 + $0x308] sm:$0xff] }
  0x53   :  { %9612 = vst [vmem:[#allocation26_spill] sm:$0xff] %v4908_v1  ;;  %442 = vmatmul.f32.vlgmr.msrb.gmra.mxu0 %v4833_v59  ;;  %v4927_v59 = vld [vmem:[#allocation5 + $0x3a0] sm:$0xff] }
  0x54   :  { %9613 = vst [vmem:[#allocation27_spill] sm:$0xff] %v4912_v29  ;;  %598 = vmatpush.msra.mxu3 %v4905_v61  ;;  %461 = vmatpush.msrb.mxu1 %v4908_v1  ;;  %v4931_v61 = vld [vmem:[#allocation5 + $0x328] sm:$0xff]  ;;  %v4933_v1 = vld [vmem:[#allocation5 + $0x380] sm:$0xff] }
  0x55   :  { %9614 = vst [vmem:[#allocation28_spill] sm:$0xff] %v4914_v12  ;;  %462 = vmatmul.f32.vlgmr.msrb.gmra.mxu1 %v9606_v25  ;;  %536 = vmatpush.msra.mxu0 %v4992_v45 }
  0x56   :  { %9615 = vst [vmem:[#allocation29_spill] sm:$0xff] %v4918_v33  ;;  %599 = vmatpush.msra.mxu3 %v4912_v29  ;;  %556 = vmatpush.msra.mxu1 %v4914_v12  ;;  %v4939_v29 = vld [vmem:[#allocation5 + $0x360] sm:$0xff]  ;;  %v4943_v12 = vld [vmem:[#allocation5 + $0x2e8] sm:$0xff] }
  0x57   :  { %9616 = vst [vmem:[#allocation30_spill] sm:$0xff] %v4921_v47 }
  0x58   :  { %9617 = vst [vmem:[#allocation31_spill] sm:$0xff] %v4925_v21  ;;  %600 = vmatpush.msra.mxu3 %v4918_v33  ;;  %557 = vmatpush.msra.mxu1 %v4921_v47  ;;  %v4945_v33 = vld [vmem:[#allocation5 + $0x340] sm:$0xff]  ;;  %v4949_v47 = vld [vmem:[#allocation5 + $0x2c8] sm:$0xff] }
  0x59   :  { %9618 = vst [vmem:[#allocation32_spill] sm:$0xff] %v4927_v59 }
  0x5a   :  { %9619 = vst [vmem:[#allocation33_spill] sm:$0xff] %v4931_v61  ;;  %601 = vmatpush.msra.mxu3 %v4925_v21  ;;  %558 = vmatpush.msra.mxu1 %v4927_v59  ;;  %v4951_v21 = vld [vmem:[#allocation5 + $0x320] sm:$0xff]  ;;  %v4955_v59 = vld [vmem:[#allocation5 + $0x2a8] sm:$0xff] }
  0x5b   :  { %9620 = vst [vmem:[#allocation34_spill] sm:$0xff] %v4933_v1 }
  0x5c   :  { %9621 = vst [vmem:[#allocation35_spill] sm:$0xff] %v4937_v55  ;;  %602 = vmatpush.msra.mxu3 %v4931_v61  ;;  %559 = vmatpush.msra.mxu1 %v4933_v1  ;;  %v4957_v61 = vld [vmem:[#allocation5 + $0x300] sm:$0xff]  ;;  %v4961_v1 = vld [vmem:[#allocation5 + $0x288] sm:$0xff] }
  0x5d   :  { %9622 = vst [vmem:[#allocation36_spill] sm:$0xff] %v4939_v29 }
  0x5e   :  { %9623 = vst [vmem:[#allocation37_spill] sm:$0xff] %v4943_v12  ;;  %603 = vmatpush.msra.mxu3 %v4937_v55  ;;  %560 = vmatpush.msra.mxu1 %v4939_v29  ;;  %v4963_v55 = vld [vmem:[#allocation5 + $0x2e0] sm:$0xff]  ;;  %v4967_v29 = vld [vmem:[#allocation5 + $0x268] sm:$0xff] }
  0x5f   :  { %9624 = vst [vmem:[#allocation38_spill] sm:$0xff] %v4945_v33 }
  0x60   :  { %9625 = vst [vmem:[#allocation39_spill] sm:$0xff] %v4949_v47  ;;  %604 = vmatpush.msra.mxu3 %v4943_v12  ;;  %561 = vmatpush.msra.mxu1 %v4945_v33  ;;  %v4969_v12 = vld [vmem:[#allocation5 + $0x2c0] sm:$0xff]  ;;  %v4973_v33 = vld [vmem:[#allocation5 + $0x248] sm:$0xff] }
  0x61   :  { %9626 = vst [vmem:[#allocation40_spill] sm:$0xff] %v4951_v21 }
  0x62   :  { %9627 = vst [vmem:[#allocation41_spill] sm:$0xff] %v4955_v59  ;;  %605 = vmatpush.msra.mxu3 %v4949_v47  ;;  %562 = vmatpush.msra.mxu1 %v4951_v21  ;;  %v4975_v47 = vld [vmem:[#allocation5 + $0x2a0] sm:$0xff]  ;;  %v4979_v21 = vld [vmem:[#allocation5 + $0x228] sm:$0xff] }
  0x63   :  { %9628 = vst [vmem:[#allocation42_spill] sm:$0xff] %v4957_v61 }
  0x64   :  { %9629 = vst [vmem:[#allocation43_spill] sm:$0xff] %v4961_v1  ;;  %606 = vmatpush.msra.mxu3 %v4955_v59  ;;  %563 = vmatpush.msra.mxu1 %v4957_v61  ;;  %v4981_v59 = vld [vmem:[#allocation5 + $0x280] sm:$0xff] }
  0x65   :  { %9630 = vst [vmem:[#allocation44_spill] sm:$0xff] %v4963_v55  ;;  %v4985_v61 = vld [vmem:[#allocation5 + $0x260] sm:$0xff] }
  0x66   :  { %9631 = vst [vmem:[#allocation45_spill] sm:$0xff] %v4967_v29  ;;  %607 = vmatpush.msra.mxu3 %v4961_v1  ;;  %564 = vmatpush.msra.mxu1 %v4963_v55  ;;  %v4987_v1 = vld [vmem:[#allocation5 + $0x208] sm:$0xff]  ;;  %v4990_v55 = vld [vmem:[#allocation5 + $0x3f8] sm:$0xff] }
  0x67   :  { %9632 = vst [vmem:[#allocation46_spill] sm:$0xff] %v4969_v12 }
  0x68   :  { %9633 = vst [vmem:[#allocation47_spill] sm:$0xff] %v4973_v33  ;;  %608 = vmatpush.msra.mxu3 %v4967_v29  ;;  %565 = vmatpush.msra.mxu1 %v4969_v12  ;;  %v4994_v29 = vld [vmem:[#allocation5 + $0x1e8] sm:$0xff]  ;;  %v4997_v12 = vld [vmem:[#allocation5 + $0x240] sm:$0xff] }
  0x69   :  { %9634 = vst [vmem:[#allocation48_spill] sm:$0xff] %v4975_v47  ;;  %576 = vmatpush.msra.mxu2 %v4994_v29 }
  0x6a   :  { %9635 = vst [vmem:[#allocation49_spill] sm:$0xff] %v4979_v21  ;;  %609 = vmatpush.msra.mxu3 %v4973_v33  ;;  %566 = vmatpush.msra.mxu1 %v4975_v47  ;;  %v5001_v33 = vld [vmem:[#allocation5 + $0x3d8] sm:$0xff]  ;;  %v5004_v47 = vld [vmem:[#allocation5 + $0x1c0] sm:$0xff] }
  0x6b   :  { %9636 = vst [vmem:[#allocation50_spill] sm:$0xff] %v4981_v59  ;;  %537 = vmatpush.msra.mxu0 %v5004_v47 }
  0x6c   :  { %9637 = vst [vmem:[#allocation51_spill] sm:$0xff] %v4985_v61  ;;  %610 = vmatpush.msra.mxu3 %v4979_v21  ;;  %567 = vmatpush.msra.mxu1 %v4981_v59  ;;  %v5006_v21 = vld [vmem:[#allocation5 + $0x1c8] sm:$0xff]  ;;  %v5012_v59 = vld [vmem:[#allocation5 + $0x3b8] sm:$0xff] }
  0x6d   :  { %9638 = vst [vmem:[#allocation52_spill] sm:$0xff] %v4987_v1  ;;  %577 = vmatpush.msra.mxu2 %v5006_v21 }
  0x6e   :  { %9639 = vst [vmem:[#allocation53_spill] sm:$0xff] %v4990_v55  ;;  %611 = vmatpush.msra.mxu3 %v4987_v1  ;;  %568 = vmatpush.msra.mxu1 %v4985_v61  ;;  %v5018_v1 = vld [vmem:[#allocation5 + $0x1a8] sm:$0xff]  ;;  %v5024_v61 = vld [vmem:[#allocation5 + $0x398] sm:$0xff] }
  0x6f   :  { %9640 = vst [vmem:[#allocation54_spill] sm:$0xff] %v4992_v45  ;;  %v5016_v45 = vld [vmem:[#allocation5 + $0x1a0] sm:$0xff]  ;;  %578 = vmatpush.msra.mxu2 %v5018_v1  ;;  %612 = vmatmul.f32.vlgmr.msra.gmra.mxu3 %v9606_v25 }
  0x70   :  { %9641 = vst [vmem:[#allocation55_spill] sm:$0xff] %v4994_v29  ;;  %676 = vmatpush.msrb.mxu3 %v4990_v55  ;;  %569 = vmatpush.msra.mxu1 %v4997_v12  ;;  %v5021_v29 = vld [vmem:[#allocation5 + $0x200] sm:$0xff] }
  0x71   :  { %9642 = vst [vmem:[#allocation56_spill] sm:$0xff] %v4997_v12  ;;  %538 = vmatpush.msra.mxu0 %v5016_v45  ;;  %v5028_v55 = vld [vmem:[#allocation5 + $0x180] sm:$0xff]  ;;  %v5036_v12 = vld [vmem:[#allocation5 + $0x378] sm:$0xff] }
  0x72   :  { %9643 = vst [vmem:[#allocation57_spill] sm:$0xff] %v5001_v33  ;;  %677 = vmatpush.msrb.mxu3 %v5001_v33  ;;  %570 = vmatpush.msra.mxu1 %v5009_v41  ;;  %v5040_v33 = vld [vmem:[#allocation5 + $0x160] sm:$0xff] }
  0x73   :  { %9644 = vst [vmem:[#allocation58_spill] sm:$0xff] %v5004_v47  ;;  %v5030_v47 = vld [vmem:[#allocation5 + $0x188] sm:$0xff]  ;;  %539 = vmatpush.msra.mxu0 %v5028_v55 }
  0x74   :  { %9645 = vst [vmem:[#allocation59_spill] sm:$0xff] %v5006_v21  ;;  %v5033_v21 = vld [vmem:[#allocation5 + $0x3f0] sm:$0xff]  ;;  %678 = vmatpush.msrb.mxu3 %v5012_v59  ;;  %579 = vmatpush.msra.mxu2 %v5030_v47 }
  0x75   :  { %9646 = vst [vmem:[#allocation60_spill] sm:$0xff] %v5009_v41  ;;  %571 = vmatpush.msra.mxu1 %v5021_v29  ;;  %v5049_v41 = vld [vmem:[#allocation5 + $0x358] sm:$0xff]  ;;  %540 = vmatpush.msra.mxu0 %v5040_v33 }
  0x76   :  { %9647 = vst [vmem:[#allocation61_spill] sm:$0xff] %v5012_v59  ;;  %679 = vmatpush.msrb.mxu3 %v5024_v61  ;;  %v5052_v59 = vld [vmem:[#allocation5 + $0x140] sm:$0xff]  ;;  %572 = vmatmul.f32.vlgmr.msra.gmra.mxu1 %v9606_v25 }
  0x77   :  { %9648 = vst [vmem:[#allocation62_spill] sm:$0xff] %v5016_v45  ;;  %v5046_v45 = vld [vmem:[#allocation5 + $0x168] sm:$0xff]  ;;  %636 = vmatpush.msrb.mxu1 %v5033_v21  ;;  %541 = vmatpush.msra.mxu0 %v5052_v59 }
  0x78   :  { %9649 = vst [vmem:[#allocation63_spill] sm:$0xff] %v5018_v1  ;;  %v5043_v1 = vld [vmem:[#allocation5 + $0x3d0] sm:$0xff]  ;;  %680 = vmatpush.msrb.mxu3 %v5036_v12  ;;  %580 = vmatpush.msra.mxu2 %v5046_v45 }
  0x79   :  { %9650 = vst [vmem:[#allocation64_spill] sm:$0xff] %v5021_v29  ;;  %637 = vmatpush.msrb.mxu1 %v5043_v1  ;;  %v5076_v29 = vld [vmem:[#allocation5 + $0x370] sm:$0xff] }
  0x7a   :  { %9651 = vst [vmem:[#allocation65_spill] sm:$0xff] %v5024_v61  ;;  %v5062_v61 = vld [vmem:[#allocation5 + $0x148] sm:$0xff]  ;;  %681 = vmatpush.msrb.mxu3 %v5049_v41 }
  0x7b   :  { %9652 = vst [vmem:[#allocation66_spill] sm:$0xff] %v5028_v55  ;;  %v5054_v55 = vld [vmem:[#allocation5 + $0x3b0] sm:$0xff]  ;;  %581 = vmatpush.msra.mxu2 %v5062_v61 }
  0x7c   :  { %9653 = vst [vmem:[#allocation67_spill] sm:$0xff] %v5030_v47  ;;  %v5059_v47 = vld [vmem:[#allocation5 + $0x338] sm:$0xff]  ;;  %638 = vmatpush.msrb.mxu1 %v5054_v55 }
  0x7d   :  { %9654 = vst [vmem:[#allocation68_spill] sm:$0xff] %v5033_v21  ;;  %v5064_v21 = vld [vmem:[#allocation5 + $0x390] sm:$0xff]  ;;  %682 = vmatpush.msrb.mxu3 %v5059_v47 }
  0x7e   :  { %9655 = vst [vmem:[#allocation69_spill] sm:$0xff] %v5036_v12  ;;  %v5071_v12 = vld [vmem:[#allocation5 + $0x318] sm:$0xff]  ;;  %639 = vmatpush.msrb.mxu1 %v5064_v21 }
  0x7f   :  { %9656 = vst [vmem:[#allocation70_spill] sm:$0xff] %v5040_v33  ;;  %v5068_v33 = vld [vmem:[#allocation5 + $0x120] sm:$0xff]  ;;  %683 = vmatpush.msrb.mxu3 %v5071_v12 }
  0x80   :  { %9657 = vst [vmem:[#allocation71_spill] sm:$0xff] %v5043_v1  ;;  %v5074_v1 = vld [vmem:[#allocation5 + $0x128] sm:$0xff]  ;;  %542 = vmatpush.msra.mxu0 %v5068_v33  ;;  %640 = vmatpush.msrb.mxu1 %v5076_v29 }
  0x81   :  { %9658 = vst [vmem:[#allocation72_spill] sm:$0xff] %v5046_v45  ;;  %v5080_v45 = vld [vmem:[#allocation5 + $0x100] sm:$0xff]  ;;  %582 = vmatpush.msra.mxu2 %v5074_v1 }
  0x82   :  { %9659 = vst [vmem:[#allocation73_spill] sm:$0xff] %v5049_v41  ;;  %v5086_v41 = vld [vmem:[#allocation5 + $0x108] sm:$0xff]  ;;  %543 = vmatpush.msra.mxu0 %v5080_v45 }
  0x83   :  { %9660 = vst [vmem:[#allocation74_spill] sm:$0xff] %v5052_v59  ;;  %v5083_v59 = vld [vmem:[#allocation5 + $0x2f8] sm:$0xff]  ;;  %583 = vmatpush.msra.mxu2 %v5086_v41 }
  0x84   :  { %9661 = vst [vmem:[#allocation75_spill] sm:$0xff] %v5054_v55  ;;  %v5088_v55 = vld [vmem:[#allocation5 + $0x350] sm:$0xff]  ;;  %684 = vmatpush.msrb.mxu3 %v5083_v59  ;;  %544 = vmatpush.msra.mxu0 %v5092_v8  ;;  %v5128_v8 = vld [vmem:[#allocation5 + $0x80] sm:$0xff] }
  0x85   :  { %9662 = vst [vmem:[#allocation76_spill] sm:$0xff] %v5059_v47  ;;  %v5098_v47 = vld [vmem:[#allocation5 + $0xe8] sm:$0xff]  ;;  %641 = vmatpush.msrb.mxu1 %v5088_v55 }
  0x86   :  { %9663 = vst [vmem:[#allocation77_spill] sm:$0xff] %v5062_v61  ;;  %v5095_v61 = vld [vmem:[#allocation5 + $0x2d8] sm:$0xff]  ;;  %584 = vmatpush.msra.mxu2 %v5098_v47 }
  0x87   :  { %9664 = vst [vmem:[#allocation78_spill] sm:$0xff] %v5064_v21  ;;  %v5100_v21 = vld [vmem:[#allocation5 + $0x330] sm:$0xff]  ;;  %685 = vmatpush.msrb.mxu3 %v5095_v61 }
  0x88   :  { %9665 = vst [vmem:[#allocation79_spill] sm:$0xff] %v5068_v33  ;;  %v5104_v33 = vld [vmem:[#allocation5 + $0xc0] sm:$0xff]  ;;  %642 = vmatpush.msrb.mxu1 %v5100_v21 }
  0x89   :  { %9666 = vst [vmem:[#allocation80_spill] sm:$0xff] %v5071_v12  ;;  %v5110_v12 = vld [vmem:[#allocation5 + $0xc8] sm:$0xff]  ;;  %545 = vmatpush.msra.mxu0 %v5104_v33 }
  0x8a   :  { %9667 = vst [vmem:[#allocation81_spill] sm:$0xff] %v5074_v1  ;;  %v5107_v1 = vld [vmem:[#allocation5 + $0x2b8] sm:$0xff]  ;;  %585 = vmatpush.msra.mxu2 %v5110_v12 }
  0x8b   :  { %9668 = vst [vmem:[#allocation82_spill] sm:$0xff] %v5076_v29  ;;  %v5112_v29 = vld [vmem:[#allocation5 + $0x310] sm:$0xff]  ;;  %686 = vmatpush.msrb.mxu3 %v5107_v1 }
  0x8c   :  { %9669 = vst [vmem:[#allocation83_spill] sm:$0xff] %v5080_v45  ;;  %v5116_v45 = vld [vmem:[#allocation5 + $0xa0] sm:$0xff]  ;;  %643 = vmatpush.msrb.mxu1 %v5112_v29 }
  0x8d   :  { %9670 = vst [vmem:[#allocation84_spill] sm:$0xff] %v5083_v59  ;;  %v5122_v59 = vld [vmem:[#allocation5 + $0xa8] sm:$0xff]  ;;  %546 = vmatpush.msra.mxu0 %v5116_v45 }
  0x8e   :  { %9671 = vst [vmem:[#allocation85_spill] sm:$0xff] %v5086_v41  ;;  %v5119_v41 = vld [vmem:[#allocation5 + $0x298] sm:$0xff]  ;;  %586 = vmatpush.msra.mxu2 %v5122_v59 }
  0x8f   :  { %9672 = vst [vmem:[#allocation86_spill] sm:$0xff] %v5088_v55  ;;  %v5124_v55 = vld [vmem:[#allocation5 + $0x2f0] sm:$0xff]  ;;  %687 = vmatpush.msrb.mxu3 %v5119_v41  ;;  %547 = vmatpush.msra.mxu0 %v5128_v8 }
  0x90   :  { %9674 = vst [vmem:[#allocation88_spill] sm:$0xff] %v5095_v61  ;;  %v5134_v61 = vld [vmem:[#allocation5 + $0x88] sm:$0xff]  ;;  %644 = vmatpush.msrb.mxu1 %v5124_v55 }
  0x91   :  { %9675 = vst [vmem:[#allocation89_spill] sm:$0xff] %v5098_v47  ;;  %v5131_v47 = vld [vmem:[#allocation5 + $0x278] sm:$0xff]  ;;  %587 = vmatpush.msra.mxu2 %v5134_v61 }
  0x92   :  { %9676 = vst [vmem:[#allocation90_spill] sm:$0xff] %v5100_v21  ;;  %v5136_v21 = vld [vmem:[#allocation5 + $0x2d0] sm:$0xff]  ;;  %688 = vmatpush.msrb.mxu3 %v5131_v47 }
  0x93   :  { %9677 = vst [vmem:[#allocation91_spill] sm:$0xff] %v5104_v33  ;;  %v5141_v33 = vld [vmem:[#allocation5 + $0x258] sm:$0xff]  ;;  %645 = vmatpush.msrb.mxu1 %v5136_v21 }
  0x94   :  { %9678 = vst [vmem:[#allocation92_spill] sm:$0xff] %v5107_v1  ;;  %v5151_v1 = vld [vmem:[#allocation5 + $0x290] sm:$0xff]  ;;  %689 = vmatpush.msrb.mxu3 %v5141_v33 }
  0x95   :  { %9679 = vst [vmem:[#allocation93_spill] sm:$0xff] %v5110_v12  ;;  %v5144_v12 = vld [vmem:[#allocation5 + $0x2b0] sm:$0xff] }
  0x96   :  { %9680 = vst [vmem:[#allocation94_spill] sm:$0xff] %v5116_v45  ;;  %v5149_v45 = vld [vmem:[#allocation5 + $0x238] sm:$0xff]  ;;  %646 = vmatpush.msrb.mxu1 %v5144_v12 }
  0x97   :  { %9681 = vst [vmem:[#allocation95_spill] sm:$0xff] %v5119_v41  ;;  %v5157_v41 = vld [vmem:[#allocation5 + $0x270] sm:$0xff]  ;;  %690 = vmatpush.msrb.mxu3 %v5149_v45 }
  0x98   :  { %9682 = vst [vmem:[#allocation96_spill] sm:$0xff] %v5122_v59  ;;  %v5155_v59 = vld [vmem:[#allocation5 + $0x218] sm:$0xff]  ;;  %647 = vmatpush.msrb.mxu1 %v5151_v1 }
  0x99   :  { %9683 = vst [vmem:[#allocation97_spill] sm:$0xff] %v5128_v8  ;;  %v5161_v8 = vld [vmem:[#allocation5 + $0x250] sm:$0xff]  ;;  %691 = vmatpush.msrb.mxu3 %v5155_v59 }
  0x9a   :  { %9684 = vst [vmem:[#allocation98_spill] sm:$0xff] %v5134_v61  ;;  %648 = vmatpush.msrb.mxu1 %v5157_v41  ;;  %v5166_v61 = vld [vmem:[#allocation5 + $0x230] sm:$0xff]  ;;  %692 = vmatmul.f32.vlgmr.msrb.gmra.mxu3 %v9606_v25 }
  0x9b   :  { %9685 = vst [vmem:[#allocation99_spill] sm:$0xff] %v5141_v33  ;;  %778 = vmatpush.msra.mxu3 %v4695_v3  ;;  %v5171_v33 = vld [vmem:[#allocation5 + $0x210] sm:$0xff]  ;;  %v5191_v3 = vld [vmem:[#allocation5 + $0x60] sm:$0xff] }
  0x9c   :  { %649 = vmatpush.msrb.mxu1 %v5161_v8  ;;  %548 = vmatpush.msra.mxu0 %v5191_v3 }
  0x9d   :  { %779 = vmatpush.msra.mxu3 %v4698_v4  ;;  %v5193_v4 = vld [vmem:[#allocation5 + $0x68] sm:$0xff] }
  0x9e   :  { %650 = vmatpush.msrb.mxu1 %v5166_v61  ;;  %588 = vmatpush.msra.mxu2 %v5193_v4 }
  0x9f   :  { %780 = vmatpush.msra.mxu3 %v4700_v6  ;;  %v5201_v6 = vld [vmem:[#allocation5 + $0x40] sm:$0xff] }
  0xa0   :  { %651 = vmatpush.msrb.mxu1 %v5171_v33  ;;  %549 = vmatpush.msra.mxu0 %v5201_v6 }
  0xa1   :  { %781 = vmatpush.msra.mxu3 %v4705_v11  ;;  %652 = vmatmul.f32.vlgmr.msrb.gmra.mxu1 %v9606_v25  ;;  %v5208_v11 = vld [vmem:[#allocation5 + $0x20] sm:$0xff]  ;;  %v9693_v25 = vld [vmem:[#allocation12_spill] sm:$0xff] }
  0xa2   :  { %738 = vmatpush.msra.mxu1 %v4703_v9  ;;  %v5203_v9 = vld [vmem:[#allocation5 + $0x48] sm:$0xff]  ;;  %550 = vmatpush.msra.mxu0 %v5208_v11 }
  0xa3   :  { %782 = vmatpush.msra.mxu3 %v4711_v15  ;;  %589 = vmatpush.msra.mxu2 %v5203_v9  ;;  %v5216_v15 = vld [vmem:[#allocation5] sm:$0xff] }
  0xa4   :  { %739 = vmatpush.msra.mxu1 %v4709_v13  ;;  %v5210_v13 = vld [vmem:[#allocation5 + $0x28] sm:$0xff]  ;;  %551 = vmatpush.msra.mxu0 %v5216_v15 }
  0xa5   :  { %783 = vmatpush.msra.mxu3 %v4719_v20  ;;  %590 = vmatpush.msra.mxu2 %v5210_v13  ;;  %v5225_v20 = vld [vmem:[#allocation5 + $0x1f8] sm:$0xff] }
  0xa6   :  { %740 = vmatpush.msra.mxu1 %v4714_v16  ;;  %v5218_v16 = vld [vmem:[#allocation5 + $0x8] sm:$0xff] }
  0xa7   :  { %784 = vmatpush.msra.mxu3 %v4725_v24  ;;  %591 = vmatpush.msra.mxu2 %v5218_v16  ;;  %v5232_v24 = vld [vmem:[#allocation5 + $0x1d8] sm:$0xff] }
  0xa8   :  { %741 = vmatpush.msra.mxu1 %v4717_v18  ;;  %v5223_v18 = vld [vmem:[#allocation5 + $0x1f0] sm:$0xff] }
  0xa9   :  { %785 = vmatpush.msra.mxu3 %v4731_v28  ;;  %616 = vmatpush.msrb.mxu0 %v5223_v18  ;;  %v5240_v28 = vld [vmem:[#allocation5 + $0x1b8] sm:$0xff] }
  0xaa   :  { %742 = vmatpush.msra.mxu1 %v4723_v22  ;;  %656 = vmatpush.msrb.mxu2 %v5225_v20  ;;  %v5230_v22 = vld [vmem:[#allocation5 + $0x1d0] sm:$0xff] }
  0xab   :  { %786 = vmatpush.msra.mxu3 %v4737_v32  ;;  %617 = vmatpush.msrb.mxu0 %v5230_v22  ;;  %v5248_v32 = vld [vmem:[#allocation5 + $0x198] sm:$0xff] }
  0xac   :  { %743 = vmatpush.msra.mxu1 %v4729_v26  ;;  %657 = vmatpush.msrb.mxu2 %v5232_v24  ;;  %v5238_v26 = vld [vmem:[#allocation5 + $0x1b0] sm:$0xff] }
  0xad   :  { %787 = vmatpush.msra.mxu3 %v4743_v36  ;;  %618 = vmatpush.msrb.mxu0 %v5238_v26  ;;  %v5258_v36 = vld [vmem:[#allocation5 + $0x178] sm:$0xff] }
  0xae   :  { %744 = vmatpush.msra.mxu1 %v4735_v30  ;;  %658 = vmatpush.msrb.mxu2 %v5240_v28  ;;  %v5246_v30 = vld [vmem:[#allocation5 + $0x190] sm:$0xff] }
  0xaf   :  { %788 = vmatpush.msra.mxu3 %v4749_v40  ;;  %619 = vmatpush.msrb.mxu0 %v5246_v30  ;;  %v5265_v40 = vld [vmem:[#allocation5 + $0x158] sm:$0xff] }
  0xb0   :  { %745 = vmatpush.msra.mxu1 %v4741_v34  ;;  %659 = vmatpush.msrb.mxu2 %v5248_v32  ;;  %v5256_v34 = vld [vmem:[#allocation5 + $0x170] sm:$0xff] }
  0xb1   :  { %789 = vmatpush.msra.mxu3 %v4755_v44  ;;  %620 = vmatpush.msrb.mxu0 %v5256_v34  ;;  %v5273_v44 = vld [vmem:[#allocation5 + $0x138] sm:$0xff] }
  0xb2   :  { %746 = vmatpush.msra.mxu1 %v4747_v38  ;;  %660 = vmatpush.msrb.mxu2 %v5258_v36  ;;  %v5263_v38 = vld [vmem:[#allocation5 + $0x150] sm:$0xff] }
  0xb3   :  { %790 = vmatpush.msra.mxu3 %v4761_v48  ;;  %621 = vmatpush.msrb.mxu0 %v5263_v38  ;;  %v5284_v48 = vld [vmem:[#allocation5 + $0x110] sm:$0xff] }
  0xb4   :  { %747 = vmatpush.msra.mxu1 %v4753_v42  ;;  %661 = vmatpush.msrb.mxu2 %v5265_v40  ;;  %v5271_v42 = vld [vmem:[#allocation5 + $0x130] sm:$0xff] }
  0xb5   :  { %791 = vmatpush.msra.mxu3 %v4767_v52  ;;  %622 = vmatpush.msrb.mxu0 %v5271_v42  ;;  %v5292_v52 = vld [vmem:[#allocation5 + $0xf0] sm:$0xff] }
  0xb6   :  { %748 = vmatpush.msra.mxu1 %v4759_v46  ;;  %662 = vmatpush.msrb.mxu2 %v5273_v44  ;;  %v5281_v46 = vld [vmem:[%s8892_s2] sm:$0xf] }
  0xb7   :  { %792 = vmatpush.msra.mxu3 %v4773_v56  ;;  %623 = vmatpush.msrb.mxu0 %v5284_v48  ;;  %v5298_v56 = vperm.slane %v5281_v46, 1 }
  0xb8   :  { %749 = vmatpush.msra.mxu1 %v4765_v50  ;;  %v5286_v50 = vld [vmem:[#allocation5 + $0x118] sm:$0xff] }
  0xb9   :  { %793 = vmatpush.msra.mxu3 %v4779_v60  ;;  %663 = vmatpush.msrb.mxu2 %v5286_v50  ;;  %9686 = vst [vmem:[#allocation100_spill] sm:$0xff] %v5298_v56  ;;  %v5305_v60 = vld [vmem:[#allocation5 + $0xd8] sm:$0xff] }
  0xba   :  { %750 = vmatpush.msra.mxu1 %v4771_v54  ;;  %v5294_v54 = vld [vmem:[#allocation5 + $0xf8] sm:$0xff]  ;;  %624 = vmatpush.msrb.mxu0 %v5292_v52 }
  0xbb   :  { %858 = vmatpush.msrb.mxu3 %v4783_v62  ;;  %664 = vmatpush.msrb.mxu2 %v5294_v54  ;;  %v5309_v62 = vperm.slane %v5281_v46, 0 }
  0xbc   :  { %751 = vmatpush.msra.mxu1 %v4777_v58  ;;  %v5303_v58 = vld [vmem:[#allocation5 + $0xd0] sm:$0xff] }
  0xbd   :  { %859 = vmatpush.msrb.mxu3 %v4789_v2  ;;  %9687 = vst [vmem:[#allocation101_spill] sm:$0xff] %v5309_v62  ;;  %625 = vmatpush.msrb.mxu0 %v5303_v58  ;;  %v5314_v2 = vld [vmem:[#allocation5 + $0xb0] sm:$0xff] }
  0xbe   :  { %752 = vmatpush.msra.mxu1 %v4786_v0  ;;  %665 = vmatpush.msrb.mxu2 %v5305_v60  ;;  %v403_v0 = vpop.f32.mrf.mxu2 }
  0xbf   :  { %860 = vmatpush.msrb.mxu3 %v4794_v10  ;;  %v404_v10 = vadd.f32 %v403_v0, %v5298_v56  ;;  %626 = vmatpush.msrb.mxu0 %v5314_v2  ;;  %v5348_v0 = vld [vmem:[#allocation5 + $0x30] sm:$0xff]  ;;  %v9708_v56 = vld [vmem:[#allocation17_spill] sm:$0xff] }
  0xc0   :  { %753 = vmatpush.msra.mxu1 %v4792_v7  ;;  %v5316_v7 = vld [vmem:[#allocation5 + $0xb8] sm:$0xff] }
  0xc1   :  { %861 = vmatpush.msrb.mxu3 %v4800_v19  ;;  %666 = vmatpush.msrb.mxu2 %v5316_v7  ;;  %v5323_v19 = vld [vmem:[#allocation5 + $0x90] sm:$0xff] }
  0xc2   :  { %818 = vmatpush.msrb.mxu1 %v4798_v14  ;;  %v363_v14 = vpop.f32.mrf.mxu0  ;;  %627 = vmatpush.msrb.mxu0 %v5323_v19 }
  0xc3   :  { %862 = vmatpush.msrb.mxu3 %v4807_v27  ;;  %v364_v27 = vadd.f32 %v363_v14, %v5309_v62  ;;  %v9696_v14 = vld [vmem:[#allocation10_spill] sm:$0xff] }
  0xc4   :  { %819 = vmatpush.msrb.mxu1 %v4804_v23  ;;  %v5325_v23 = vld [vmem:[#allocation5 + $0x98] sm:$0xff] }
  0xc5   :  { %863 = vmatpush.msrb.mxu3 %v4813_v35  ;;  %667 = vmatpush.msrb.mxu2 %v5325_v23  ;;  %v5332_v35 = vld [vmem:[#allocation5 + $0x70] sm:$0xff] }
  0xc6   :  { %820 = vmatpush.msrb.mxu1 %v4810_v31  ;;  %v423_v31 = vpop.f32.mrf.mxu3  ;;  %9688 = vst [vmem:[#allocation102_spill] sm:$0xff] %v5332_v35  ;;  %628 = vmatpush.msrb.mxu0 %v5332_v35 }
  0xc7   :  { %864 = vmatpush.msrb.mxu3 %v4819_v43  ;;  %v383_v43 = vpop.f32.mrf.mxu1 }
  0xc8   :  { %821 = vmatpush.msrb.mxu1 %v4816_v39  ;;  %v5334_v39 = vld [vmem:[#allocation5 + $0x78] sm:$0xff] }
  0xc9   :  { %865 = vmatpush.msrb.mxu3 %v4825_v53  ;;  %9689 = vst [vmem:[#allocation103_spill] sm:$0xff] %v5334_v39  ;;  %668 = vmatpush.msrb.mxu2 %v5334_v39  ;;  %v384_v53 = vadd.f32 %v383_v43, %v364_v27  ;;  %v5356_v43 = vld [vmem:[#allocation5 + $0x10] sm:$0xff] }
  0xca   :  { %822 = vmatpush.msrb.mxu1 %v4822_v49  ;;  %v424_v49 = vadd.f32 %v423_v31, %v404_v10  ;;  %v5350_v10 = vld [vmem:[#allocation5 + $0x38] sm:$0xff]  ;;  %v9697_v31 = vld [vmem:[#allocation14_spill] sm:$0xff]  ;;  %9698 = vst [vmem:[#allocation10_spill] sm:$0xff] %v5356_v43 }
  0xcb   :  { %866 = vmatpush.msrb.mxu3 %v4828_v57  ;;  %v5340_v57 = vld [vmem:[#allocation5 + $0x50] sm:$0xff]  ;;  %9695 = vst [vmem:[#allocation12_spill] sm:$0xff] %v5350_v10 }
  0xcc   :  { %823 = vmatpush.msrb.mxu1 %v4837_v63  ;;  %9690 = vst [vmem:[#allocation104_spill] sm:$0xff] %v5340_v57  ;;  %v5342_v63 = vld [vmem:[#allocation5 + $0x58] sm:$0xff]  ;;  %629 = vmatpush.msrb.mxu0 %v5340_v57 }
  0xcd   :  { %867 = vmatpush.msrb.mxu3 %v4840_v5  ;;  %9691 = vst [vmem:[#allocation105_spill] sm:$0xff] %v5342_v63  ;;  %669 = vmatpush.msrb.mxu2 %v5342_v63  ;;  %v506_v5 = vsub.f32 0.0, %v384_v53  ;;  %v9700_v53 = vld [vmem:[#allocation11_spill] sm:$0xff]  ;;  %v9710_v63 = vld [vmem:[#allocation26_spill] sm:$0xff] }
  0xce   :  { %824 = vmatpush.msrb.mxu1 %v4844_v17  ;;  %v9692_v17 = vld [vmem:[#allocation9_spill] sm:$0xff]  ;;  %630 = vmatpush.msrb.mxu0 %v5348_v0 }
  0xcf   :  { %868 = vmatpush.msrb.mxu3 %v9692_v17  ;;  %9694 = vst [vmem:[#allocation9_spill] sm:$0xff] %v5348_v0  ;;  %670 = vmatpush.msrb.mxu2 %v5350_v10  ;;  %v507_v27 = vmul.f32 1.442695, %v506_v5  ;;  %v9701_v17 = vld [vmem:[#allocation16_spill] sm:$0xff]  ;;  %v5366_v5 = vperm.slane %v5281_v46, 3 }
  0xd0   :  { %825 = vmatpush.msrb.mxu1 %v4850_v37  ;;  %v511_v37 = vsub.f32 0.0, %v424_v49  ;;  %v5358_v49 = vld [vmem:[#allocation5 + $0x18] sm:$0xff]  ;;  %631 = vmatpush.msrb.mxu0 %v5356_v43  ;;  %v443_v62 = vpop.f32.mrf.mxu0 }
  0xd1   :  { %869 = vmatpush.msrb.mxu3 %v9696_v14  ;;  %9699 = vst [vmem:[#allocation14_spill] sm:$0xff] %v5358_v49  ;;  %671 = vmatpush.msrb.mxu2 %v5358_v49  ;;  %v9705_v14 = vld [vmem:[#allocation18_spill] sm:$0xff] }
  0xd2   :  { %826 = vmatpush.msrb.mxu1 %v4857_v51  ;;  %v512_v51 = vmul.f32 1.442695, %v511_v37  ;;  %v9702_v37 = vld [vmem:[#allocation13_spill] sm:$0xff]  ;;  %9703 = vst [vmem:[#allocation11_spill] sm:$0xff] %v5366_v5  ;;  %v503_v10 = vpop.f32.mrf.mxu3 }
  0xd3   :  { %870 = vmatpush.msrb.mxu3 %v9700_v53  ;;  %v9707_v53 = vld [vmem:[#allocation21_spill] sm:$0xff] }
  0xd4   :  { %827 = vmatpush.msrb.mxu1 %v9693_v25  ;;  %3468 = vpow2.f32 %v512_v51  ;;  %v5369_v25 = vperm.slane %v5281_v46, 2  ;;  %v483_v51 = vpop.f32.mrf.mxu2  ;;  %v9709_v46 = vld [vmem:[#allocation24_spill] sm:$0xff] }
  0xd5   :  { %3470 = vpow2.f32 %v507_v27  ;;  %871 = vmatpush.msrb.mxu3 %v9702_v37 }
  0xd6   :  { %828 = vmatpush.msrb.mxu1 %v9697_v31  ;;  %9704 = vst [vmem:[#allocation16_spill] sm:$0xff] %v5369_v25  ;;  %v9706_v31 = vld [vmem:[#allocation15_spill] sm:$0xff]  ;;  %v444_v43 = vadd.f32 %v443_v62, %v5369_v25 }
  0xd7   :  { %872 = vmatpush.msrb.mxu3 %v9706_v31  ;;  %v463_v31 = vpop.f32.mrf.mxu1 }
  0xd8   :  { %829 = vmatpush.msrb.mxu1 %v9701_v17  ;;  %v484_v17 = vadd.f32 %v483_v51, %v5366_v5 }
  0xd9   :  { %873 = vmatpush.msrb.mxu3 %v9708_v56  ;;  %v464_v56 = vadd.f32 %v463_v31, %v444_v43  ;;  %v5382_v43 = vld [vmem:[#allocation3 + $0x1e0] sm:$0xff] }
  0xda   :  { %830 = vmatpush.msrb.mxu1 %v9705_v14  ;;  %v3469_v27 = vpop.eup %3468  ;;  %v504_v14 = vadd.f32 %v503_v10, %v484_v17  ;;  %v9713_v17 = vld [vmem:[#allocation30_spill] sm:$0xff]  ;;  %v5404_v31 = vld [vmem:[#allocation3 + $0x180] sm:$0xff] }
  0xdb   :  { %v3471_v37 = vpop.eup %3470  ;;  %v514_v49 = vadd.f32 1.0, %v3469_v27 }
  0xdc   :  { %831 = vmatpush.msrb.mxu1 %v9707_v53  ;;  %v509_v0 = vadd.f32 1.0, %v3471_v37  ;;  %v517_v53 = vsub.f32 0.0, %v504_v14  ;;  %v5400_v37 = vld [vmem:[#allocation3 + $0x1a8] sm:$0xff] }
  0xdd   :  { %3472 = vrcp.f32 %v514_v49  ;;  %v5392_v49 = vld [vmem:[#allocation3 + $0x1c8] sm:$0xff] }
  0xde   :  { %832 = vmatpush.msrb.mxu1 %v9709_v46  ;;  %3474 = vrcp.f32 %v509_v0  ;;  %v518_v57 = vmul.f32 1.442695, %v517_v53  ;;  %v9714_v14 = vld [vmem:[#allocation22_spill] sm:$0xff]  ;;  %v9715_v53 = vld [vmem:[#allocation32_spill] sm:$0xff] }
  0xdf   :  { %3476 = vtanh.f32 %v464_v56  ;;  %v5408_v56 = vld [vmem:[#allocation3 + $0x188] sm:$0xff] }
  0xe0   :  { %833 = vmatpush.msrb.mxu1 %v9710_v63  ;;  %3478 = vpow2.f32 %v518_v57  ;;  %v5385_v57 = vld [vmem:[#allocation3 + $0x1e8] sm:$0xff] }
  0xe3   :  { %v3473_v51 = vpop.eup %3472 }
  0xe4   :  { %v3475_v5 = vpop.eup %3474  ;;  %v522_v27 = vmul.f32 0.0, %v3473_v51  ;;  %v5411_v51 = vld [vmem:[#allocation3 + $0x160] sm:$0xff] }
  0xe5   :  { %v3477_v39 = vpop.eup %3476 }
  0xe6   :  { %v523_v62 = vmul.f32 %v3477_v39, %v3475_v5  ;;  %v3479_v25 = vpop.eup %3478  ;;  %v5388_v39 = vld [vmem:[#allocation3 + $0x1c0] sm:$0xff]  ;;  %v9712_v5 = vld [vmem:[#allocation19_spill] sm:$0xff] }
  0xe7   :  { %v520_v35 = vadd.f32 1.0, %v3479_v25  ;;  %v5396_v25 = vld [vmem:[#allocation3 + $0x1a0] sm:$0xff] }
  0xe8   :  { %v5379_v46 = vadd.f32 %v523_v62, %v522_v27  ;;  %v5414_v27 = vld [vmem:[#allocation3 + $0x168] sm:$0xff]  ;;  %v5417_v62 = vld [vmem:[#allocation3 + $0x140] sm:$0xff] }
  0xe9   :  { %3480 = vrcp.f32 %v520_v35  ;;  %v9711_v35 = vld [vmem:[#allocation28_spill] sm:$0xff]  ;;  %9716 = vst [vmem:[#allocation13_spill] sm:$0xff] %v5417_v62 }
  0xea   :  { %3482 = vtanh.f32 %v5379_v46 }
  0xef   :  { %v3481_v10 = vpop.eup %3480 }
  0xf0   :  { %v3483_v63 = vpop.eup %3482 }
  0xf1   :  { %v526_v0 = vmul.f32 %v3483_v63, %v3481_v10  ;;  %v5420_v10 = vld [vmem:[#allocation3 + $0x148] sm:$0xff]  ;;  %v9718_v63 = vld [vmem:[#allocation25_spill] sm:$0xff] }
  0xf2   :  { %9717 = vst [vmem:[#allocation18_spill] sm:$0xff] %v5420_v10 }
  0xf3   :  { %552 = vmatmul.f32.vlgmr.msra.gmra.mxu0 %v526_v0  ;;  %592 = vmatmul.f32.vlgmr.msra.gmra.mxu2 %v526_v0 }
  0xf4   :  { %718 = vmatpush.msra.mxu0 %v5382_v43  ;;  %754 = vmatmul.f32.vlgmr.msra.gmra.mxu1 %v526_v0 }
  0xf5   :  { %758 = vmatpush.msra.mxu2 %v5385_v57  ;;  %794 = vmatmul.f32.vlgmr.msra.gmra.mxu3 %v526_v0 }
  0xf6   :  { %719 = vmatpush.msra.mxu0 %v5388_v39  ;;  %919 = vmatpush.msra.mxu1 %v9711_v35  ;;  %v5424_v35 = vld [vmem:[#allocation3 + $0x120] sm:$0xff] }
  0xf7   :  { %759 = vmatpush.msra.mxu2 %v5392_v49  ;;  %959 = vmatpush.msra.mxu3 %v9712_v5  ;;  %9719 = vst [vmem:[#allocation15_spill] sm:$0xff] %v5424_v35  ;;  %v9720_v5 = vld [vmem:[#allocation34_spill] sm:$0xff] }
  0xf8   :  { %720 = vmatpush.msra.mxu0 %v5396_v25  ;;  %920 = vmatpush.msra.mxu1 %v9713_v17  ;;  %v5428_v17 = vld [vmem:[#allocation3 + $0x128] sm:$0xff] }
  0xf9   :  { %760 = vmatpush.msra.mxu2 %v5400_v37  ;;  %960 = vmatpush.msra.mxu3 %v9714_v14  ;;  %9721 = vst [vmem:[#allocation21_spill] sm:$0xff] %v5428_v17  ;;  %v5432_v14 = vld [vmem:[#allocation3 + $0x100] sm:$0xff] }
  0xfa   :  { %721 = vmatpush.msra.mxu0 %v5404_v31  ;;  %921 = vmatpush.msra.mxu1 %v9715_v53  ;;  %9723 = vst [vmem:[#allocation17_spill] sm:$0xff] %v5432_v14  ;;  %v9724_v53 = vld [vmem:[#allocation36_spill] sm:$0xff] }
  0xfb   :  { %761 = vmatpush.msra.mxu2 %v5408_v56  ;;  %632 = vmatmul.f32.vlgmr.msrb.gmra.mxu0 %v526_v0 }
  0xfc   :  { %672 = vmatmul.f32.vlgmr.msrb.gmra.mxu2 %v526_v0  ;;  %722 = vmatpush.msra.mxu0 %v5411_v51 }
  0xfd   :  { %762 = vmatpush.msra.mxu2 %v5414_v27  ;;  %834 = vmatmul.f32.vlgmr.msrb.gmra.mxu1 %v526_v0 }
  0xfe   :  { %874 = vmatmul.f32.vlgmr.msrb.gmra.mxu3 %v526_v0  ;;  %723 = vmatpush.msra.mxu0 %v5417_v62  ;;  %v9722_v0 = vld [vmem:[#allocation27_spill] sm:$0xff] }
  0xff   :  { %763 = vmatpush.msra.mxu2 %v5420_v10  ;;  %961 = vmatpush.msra.mxu3 %v9718_v63  ;;  %v5436_v10 = vld [vmem:[#allocation3 + $0x108] sm:$0xff]  ;;  %v9726_v63 = vld [vmem:[#allocation29_spill] sm:$0xff]  ;;  %v5525_v62 = vld [vmem:[#allocation3 + $0x1b0] sm:$0xff] }
 0x100   :  { %724 = vmatpush.msra.mxu0 %v5424_v35  ;;  %922 = vmatpush.msra.mxu1 %v9720_v5  ;;  %9725 = vst [vmem:[#allocation24_spill] sm:$0xff] %v5436_v10  ;;  %v5440_v35 = vld [vmem:[#allocation3 + $0xe0] sm:$0xff]  ;;  %v9728_v5 = vld [vmem:[#allocation38_spill] sm:$0xff] }
 0x101   :  { %764 = vmatpush.msra.mxu2 %v5428_v17  ;;  %962 = vmatpush.msra.mxu3 %v9722_v0  ;;  %9727 = vst [vmem:[#allocation26_spill] sm:$0xff] %v5440_v35  ;;  %v5444_v17 = vld [vmem:[#allocation3 + $0xe8] sm:$0xff]  ;;  %v9730_v0 = vld [vmem:[#allocation31_spill] sm:$0xff] }
 0x102   :  { %725 = vmatpush.msra.mxu0 %v5432_v14  ;;  %923 = vmatpush.msra.mxu1 %v9724_v53  ;;  %9729 = vst [vmem:[#allocation28_spill] sm:$0xff] %v5444_v17  ;;  %v5448_v14 = vld [vmem:[#allocation3 + $0xc0] sm:$0xff]  ;;  %v9732_v53 = vld [vmem:[#allocation40_spill] sm:$0xff] }
 0x103   :  { %765 = vmatpush.msra.mxu2 %v5436_v10  ;;  %963 = vmatpush.msra.mxu3 %v9726_v63  ;;  %9731 = vst [vmem:[#allocation19_spill] sm:$0xff] %v5448_v14  ;;  %v5452_v10 = vld [vmem:[#allocation3 + $0xc8] sm:$0xff]  ;;  %v9734_v63 = vld [vmem:[#allocation33_spill] sm:$0xff] }
 0x104   :  { %726 = vmatpush.msra.mxu0 %v5440_v35  ;;  %924 = vmatpush.msra.mxu1 %v9728_v5  ;;  %9733 = vst [vmem:[#allocation30_spill] sm:$0xff] %v5452_v10  ;;  %v5456_v35 = vld [vmem:[#allocation3 + $0xa0] sm:$0xff]  ;;  %v9736_v5 = vld [vmem:[#allocation42_spill] sm:$0xff] }
 0x105   :  { %766 = vmatpush.msra.mxu2 %v5444_v17  ;;  %964 = vmatpush.msra.mxu3 %v9730_v0  ;;  %9735 = vst [vmem:[#allocation22_spill] sm:$0xff] %v5456_v35  ;;  %v5460_v17 = vld [vmem:[#allocation3 + $0xa8] sm:$0xff]  ;;  %v9738_v0 = vld [vmem:[#allocation35_spill] sm:$0xff] }
 0x106   :  { %727 = vmatpush.msra.mxu0 %v5448_v14  ;;  %925 = vmatpush.msra.mxu1 %v9732_v53  ;;  %9737 = vst [vmem:[#allocation32_spill] sm:$0xff] %v5460_v17  ;;  %v5464_v14 = vld [vmem:[#allocation3 + $0x80] sm:$0xff]  ;;  %v9740_v53 = vld [vmem:[#allocation44_spill] sm:$0xff] }
 0x107   :  { %767 = vmatpush.msra.mxu2 %v5452_v10  ;;  %965 = vmatpush.msra.mxu3 %v9734_v63  ;;  %9739 = vst [vmem:[#allocation25_spill] sm:$0xff] %v5464_v14  ;;  %v5468_v10 = vld [vmem:[#allocation3 + $0x88] sm:$0xff]  ;;  %v9742_v63 = vld [vmem:[#allocation37_spill] sm:$0xff] }
 0x108   :  { %728 = vmatpush.msra.mxu0 %v5456_v35  ;;  %926 = vmatpush.msra.mxu1 %v9736_v5  ;;  %9741 = vst [vmem:[#allocation34_spill] sm:$0xff] %v5468_v10  ;;  %v5472_v35 = vld [vmem:[#allocation3 + $0x60] sm:$0xff]  ;;  %v9744_v5 = vld [vmem:[#allocation46_spill] sm:$0xff] }
 0x109   :  { %768 = vmatpush.msra.mxu2 %v5460_v17  ;;  %966 = vmatpush.msra.mxu3 %v9738_v0  ;;  %9743 = vst [vmem:[#allocation27_spill] sm:$0xff] %v5472_v35  ;;  %v5476_v17 = vld [vmem:[#allocation3 + $0x68] sm:$0xff]  ;;  %v9746_v0 = vld [vmem:[#allocation39_spill] sm:$0xff] }
 0x10a   :  { %729 = vmatpush.msra.mxu0 %v5464_v14  ;;  %927 = vmatpush.msra.mxu1 %v9740_v53  ;;  %9745 = vst [vmem:[#allocation36_spill] sm:$0xff] %v5476_v17  ;;  %v5480_v14 = vld [vmem:[#allocation3 + $0x40] sm:$0xff]  ;;  %v9748_v53 = vld [vmem:[#allocation48_spill] sm:$0xff] }
 0x10b   :  { %769 = vmatpush.msra.mxu2 %v5468_v10  ;;  %967 = vmatpush.msra.mxu3 %v9742_v63  ;;  %9747 = vst [vmem:[#allocation29_spill] sm:$0xff] %v5480_v14  ;;  %v5484_v10 = vld [vmem:[#allocation3 + $0x48] sm:$0xff]  ;;  %v9750_v63 = vld [vmem:[#allocation41_spill] sm:$0xff] }
 0x10c   :  { %730 = vmatpush.msra.mxu0 %v5472_v35  ;;  %928 = vmatpush.msra.mxu1 %v9744_v5  ;;  %9749 = vst [vmem:[#allocation38_spill] sm:$0xff] %v5484_v10  ;;  %v5488_v35 = vld [vmem:[#allocation3 + $0x20] sm:$0xff] }
 0x10d   :  { %770 = vmatpush.msra.mxu2 %v5476_v17  ;;  %968 = vmatpush.msra.mxu3 %v9746_v0  ;;  %9751 = vst [vmem:[#allocation31_spill] sm:$0xff] %v5488_v35  ;;  %v5494_v5 = vld [vmem:[%s8890_s0 + $0x1] sm:$0x1]  ;;  %v9752_v0 = vld [vmem:[#allocation50_spill] sm:$0xff]  ;;  %v9764_v17 = vld [vmem:[#allocation47_spill] sm:$0xff] }
 0x10e   :  { %731 = vmatpush.msra.mxu0 %v5480_v14  ;;  %929 = vmatpush.msra.mxu1 %v9748_v53  ;;  %v5497_v14 = vld [vmem:[#allocation3 + $0x28] sm:$0xff]  ;;  %v9754_v53 = vld [vmem:[#allocation43_spill] sm:$0xff]  ;;  %9765 = vst [vmem:[#allocation39_spill] sm:$0xff] %v5525_v62 }
 0x10f   :  { %771 = vmatpush.msra.mxu2 %v5484_v10  ;;  %969 = vmatpush.msra.mxu3 %v9750_v63  ;;  %9753 = vst [vmem:[#allocation40_spill] sm:$0xff] %v5497_v14  ;;  %v5501_v10 = vld [vmem:[#allocation3] sm:$0xff]  ;;  %v9756_v63 = vld [vmem:[#allocation51_spill] sm:$0xff] }
 0x110   :  { %732 = vmatpush.msra.mxu0 %v5488_v35  ;;  %930 = vmatpush.msra.mxu1 %v9752_v0  ;;  %9755 = vst [vmem:[#allocation33_spill] sm:$0xff] %v5501_v10  ;;  %v5505_v35 = vld [vmem:[#allocation3 + $0x8] sm:$0xff]  ;;  %v5510_v0 = vld [vmem:[#allocation3 + $0x1f0] sm:$0xff] }
 0x111   :  { %772 = vmatpush.msra.mxu2 %v5497_v14  ;;  %970 = vmatpush.msra.mxu3 %v9754_v53  ;;  %9757 = vst [vmem:[#allocation42_spill] sm:$0xff] %v5505_v35  ;;  %v5513_v14 = vld [vmem:[#allocation3 + $0x1f8] sm:$0xff]  ;;  %v9760_v53 = vld [vmem:[#allocation45_spill] sm:$0xff] }
 0x112   :  { %733 = vmatpush.msra.mxu0 %v5501_v10  ;;  %931 = vmatpush.msra.mxu1 %v9756_v63  ;;  %9758 = vst [vmem:[#allocation35_spill] sm:$0xff] %v5510_v0  ;;  %v5517_v10 = vld [vmem:[#allocation3 + $0x1d0] sm:$0xff]  ;;  %v9762_v63 = vld [vmem:[#allocation56_spill] sm:$0xff] }
 0x113   :  { %773 = vmatpush.msra.mxu2 %v5505_v35  ;;  %734 = vmatmul.f32.vlgmr.msra.gmra.mxu0 %v5494_v5  ;;  %9759 = vst [vmem:[#allocation44_spill] sm:$0xff] %v5513_v14  ;;  %v5521_v35 = vld [vmem:[#allocation3 + $0x1d8] sm:$0xff] }
 0x114   :  { %774 = vmatmul.f32.vlgmr.msra.gmra.mxu2 %v5494_v5  ;;  %798 = vmatpush.msrb.mxu0 %v5510_v0  ;;  %9761 = vst [vmem:[#allocation37_spill] sm:$0xff] %v5517_v10  ;;  %v9766_v0 = vld [vmem:[#allocation60_spill] sm:$0xff] }
 0x115   :  { %838 = vmatpush.msrb.mxu2 %v5513_v14  ;;  %971 = vmatpush.msra.mxu3 %v9760_v53  ;;  %9763 = vst [vmem:[#allocation46_spill] sm:$0xff] %v5521_v35  ;;  %v5529_v14 = vld [vmem:[#allocation3 + $0x1b8] sm:$0xff]  ;;  %v9768_v53 = vld [vmem:[#allocation49_spill] sm:$0xff] }
 0x116   :  { %799 = vmatpush.msrb.mxu0 %v5517_v10  ;;  %932 = vmatpush.msra.mxu1 %v9762_v63  ;;  %9767 = vst [vmem:[#allocation48_spill] sm:$0xff] %v5529_v14  ;;  %v5533_v10 = vld [vmem:[#allocation3 + $0x190] sm:$0xff]  ;;  %v9770_v63 = vld [vmem:[#allocation64_spill] sm:$0xff] }
 0x117   :  { %839 = vmatpush.msrb.mxu2 %v5521_v35  ;;  %972 = vmatpush.msra.mxu3 %v9764_v17  ;;  %9769 = vst [vmem:[#allocation41_spill] sm:$0xff] %v5533_v10  ;;  %v5537_v35 = vld [vmem:[#allocation3 + $0x198] sm:$0xff] }
 0x118   :  { %800 = vmatpush.msrb.mxu0 %v5525_v62  ;;  %933 = vmatpush.msra.mxu1 %v9766_v0  ;;  %9771 = vst [vmem:[#allocation50_spill] sm:$0xff] %v5537_v35  ;;  %v9772_v17 = vld [vmem:[#allocation52_spill] sm:$0xff]  ;;  %v5541_v62 = vld [vmem:[#allocation3 + $0x170] sm:$0xff] }
 0x119   :  { %840 = vmatpush.msrb.mxu2 %v5529_v14  ;;  %973 = vmatpush.msra.mxu3 %v9768_v53  ;;  %9773 = vst [vmem:[#allocation43_spill] sm:$0xff] %v5541_v62  ;;  %v9774_v0 = vld [vmem:[#allocation68_spill] sm:$0xff]  ;;  %v9776_v53 = vld [vmem:[#allocation53_spill] sm:$0xff] }
 0x11a   :  { %801 = vmatpush.msrb.mxu0 %v5533_v10  ;;  %934 = vmatpush.msra.mxu1 %v9770_v63  ;;  %v5545_v14 = vld [vmem:[#allocation3 + $0x178] sm:$0xff]  ;;  %v5549_v10 = vld [vmem:[#allocation3 + $0x150] sm:$0xff] }
 0x11b   :  { %841 = vmatpush.msrb.mxu2 %v5537_v35  ;;  %974 = vmatpush.msra.mxu3 %v9772_v17  ;;  %9775 = vst [vmem:[#allocation51_spill] sm:$0xff] %v5545_v14  ;;  %v9778_v63 = vld [vmem:[#allocation71_spill] sm:$0xff]  ;;  %v5553_v35 = vld [vmem:[#allocation3 + $0x158] sm:$0xff]  ;;  %v9780_v17 = vld [vmem:[#allocation57_spill] sm:$0xff] }
 0x11c   :  { %802 = vmatpush.msrb.mxu0 %v5541_v62  ;;  %999 = vmatpush.msrb.mxu1 %v9774_v0  ;;  %9777 = vst [vmem:[#allocation45_spill] sm:$0xff] %v5549_v10  ;;  %v5557_v62 = vld [vmem:[#allocation3 + $0x130] sm:$0xff] }
 0x11d   :  { %842 = vmatpush.msrb.mxu2 %v5545_v14  ;;  %1039 = vmatpush.msrb.mxu3 %v9776_v53  ;;  %9779 = vst [vmem:[#allocation56_spill] sm:$0xff] %v5553_v35  ;;  %v9782_v0 = vld [vmem:[#allocation75_spill] sm:$0xff]  ;;  %v5561_v14 = vld [vmem:[#allocation3 + $0x138] sm:$0xff]  ;;  %v9784_v53 = vld [vmem:[#allocation61_spill] sm:$0xff] }
 0x11e   :  { %803 = vmatpush.msrb.mxu0 %v5549_v10  ;;  %1000 = vmatpush.msrb.mxu1 %v9778_v63  ;;  %9781 = vst [vmem:[#allocation47_spill] sm:$0xff] %v5557_v62  ;;  %v5565_v10 = vld [vmem:[#allocation3 + $0x110] sm:$0xff]  ;;  %v9786_v63 = vld [vmem:[#allocation78_spill] sm:$0xff] }
 0x11f   :  { %843 = vmatpush.msrb.mxu2 %v5553_v35  ;;  %1040 = vmatpush.msrb.mxu3 %v9780_v17  ;;  %9783 = vst [vmem:[#allocation60_spill] sm:$0xff] %v5561_v14  ;;  %v5569_v35 = vld [vmem:[#allocation3 + $0x118] sm:$0xff]  ;;  %v9788_v17 = vld [vmem:[#allocation65_spill] sm:$0xff] }
 0x120   :  { %804 = vmatpush.msrb.mxu0 %v5557_v62  ;;  %1001 = vmatpush.msrb.mxu1 %v9782_v0  ;;  %9785 = vst [vmem:[#allocation49_spill] sm:$0xff] %v5565_v10  ;;  %v5573_v62 = vld [vmem:[#allocation3 + $0xf0] sm:$0xff]  ;;  %v9790_v0 = vld [vmem:[#allocation82_spill] sm:$0xff] }
 0x121   :  { %844 = vmatpush.msrb.mxu2 %v5561_v14  ;;  %1041 = vmatpush.msrb.mxu3 %v9784_v53  ;;  %9787 = vst [vmem:[#allocation64_spill] sm:$0xff] %v5569_v35  ;;  %v5577_v14 = vld [vmem:[#allocation3 + $0xf8] sm:$0xff]  ;;  %v9792_v53 = vld [vmem:[#allocation69_spill] sm:$0xff] }
 0x122   :  { %805 = vmatpush.msrb.mxu0 %v5565_v10  ;;  %1002 = vmatpush.msrb.mxu1 %v9786_v63  ;;  %9789 = vst [vmem:[#allocation52_spill] sm:$0xff] %v5573_v62  ;;  %v5581_v10 = vld [vmem:[#allocation3 + $0xd0] sm:$0xff]  ;;  %v9794_v63 = vld [vmem:[#allocation86_spill] sm:$0xff] }
 0x123   :  { %845 = vmatpush.msrb.mxu2 %v5569_v35  ;;  %1042 = vmatpush.msrb.mxu3 %v9788_v17  ;;  %9791 = vst [vmem:[#allocation68_spill] sm:$0xff] %v5577_v14  ;;  %v5585_v35 = vld [vmem:[#allocation3 + $0xd8] sm:$0xff]  ;;  %v9795_v17 = vld [vmem:[#allocation73_spill] sm:$0xff] }
 0x124   :  { %806 = vmatpush.msrb.mxu0 %v5573_v62  ;;  %1003 = vmatpush.msrb.mxu1 %v9790_v0  ;;  %9793 = vst [vmem:[#allocation53_spill] sm:$0xff] %v5581_v10  ;;  %v5589_v62 = vld [vmem:[#allocation3 + $0xb0] sm:$0xff]  ;;  %v9797_v0 = vld [vmem:[#allocation90_spill] sm:$0xff] }
 0x125   :  { %846 = vmatpush.msrb.mxu2 %v5577_v14  ;;  %1043 = vmatpush.msrb.mxu3 %v9792_v53  ;;  %9796 = vst [vmem:[#allocation71_spill] sm:$0xff] %v5589_v62  ;;  %v5593_v14 = vld [vmem:[#allocation3 + $0xb8] sm:$0xff] }
 0x126   :  { %807 = vmatpush.msrb.mxu0 %v5581_v10  ;;  %1004 = vmatpush.msrb.mxu1 %v9794_v63  ;;  %v9798_v53 = vld [vmem:[#allocation76_spill] sm:$0xff]  ;;  %v5597_v10 = vld [vmem:[#allocation3 + $0x90] sm:$0xff] }
 0x127   :  { %847 = vmatpush.msrb.mxu2 %v5585_v35  ;;  %1044 = vmatpush.msrb.mxu3 %v9795_v17  ;;  %9799 = vst [vmem:[#allocation57_spill] sm:$0xff] %v5597_v10  ;;  %v5601_v63 = vld [vmem:[#allocation3 + $0x98] sm:$0xff] }
 0x128   :  { %808 = vmatpush.msrb.mxu0 %v5589_v62  ;;  %1005 = vmatpush.msrb.mxu1 %v9797_v0  ;;  %v9800_v17 = vld [vmem:[#allocation80_spill] sm:$0xff]  ;;  %v5605_v62 = vld [vmem:[#allocation3 + $0x70] sm:$0xff] }
 0x129   :  { %848 = vmatpush.msrb.mxu2 %v5593_v14  ;;  %1045 = vmatpush.msrb.mxu3 %v9798_v53  ;;  %9801 = vst [vmem:[#allocation75_spill] sm:$0xff] %v5605_v62  ;;  %v5609_v0 = vld [vmem:[#allocation3 + $0x78] sm:$0xff] }
 0x12a   :  { %809 = vmatpush.msrb.mxu0 %v5597_v10  ;;  %1006 = vmatpush.msrb.mxu1 %v5112_v29  ;;  %9802 = vst [vmem:[#allocation61_spill] sm:$0xff] %v5609_v0  ;;  %v9803_v53 = vld [vmem:[#allocation84_spill] sm:$0xff]  ;;  %v5613_v10 = vld [vmem:[#allocation3 + $0x50] sm:$0xff] }
 0x12b   :  { %849 = vmatpush.msrb.mxu2 %v5601_v63  ;;  %1046 = vmatpush.msrb.mxu3 %v9800_v17  ;;  %v5617_v29 = vld [vmem:[#allocation3 + $0x58] sm:$0xff] }
 0x12c   :  { %810 = vmatpush.msrb.mxu0 %v5605_v62  ;;  %1007 = vmatpush.msrb.mxu1 %v5124_v55  ;;  %v9804_v17 = vld [vmem:[#allocation88_spill] sm:$0xff] }
 0x12d   :  { %850 = vmatpush.msrb.mxu2 %v5609_v0  ;;  %1047 = vmatpush.msrb.mxu3 %v9803_v53  ;;  %v9805_v62 = vld [vmem:[#allocation20_spill] sm:$0xff]  ;;  %v9808_v0 = vld [vmem:[#allocation23_spill] sm:$0xff] }
 0x12e   :  { %811 = vmatpush.msrb.mxu0 %v5613_v10  ;;  %1008 = vmatpush.msrb.mxu1 %v5136_v21  ;;  %v5623_v55 = vld [vmem:[#allocation3 + $0x38] sm:$0xff] }
 0x12f   :  { %851 = vmatpush.msrb.mxu2 %v5617_v29  ;;  %1048 = vmatpush.msrb.mxu3 %v9804_v17  ;;  %9806 = vst [vmem:[#allocation78_spill] sm:$0xff] %v5623_v55  ;;  %v9807_v53 = vld [vmem:[#allocation92_spill] sm:$0xff]  ;;  %v9811_v17 = vld [vmem:[#allocation95_spill] sm:$0xff] }
 0x130   :  { %812 = vmatpush.msrb.mxu0 %v9805_v62  ;;  %1009 = vmatpush.msrb.mxu1 %v5144_v12  ;;  %v5629_v21 = vld [vmem:[#allocation3 + $0x18] sm:$0xff]  ;;  %v9809_v62 = vld [vmem:[#allocation54_spill] sm:$0xff]  ;;  %v9810_v12 = vld [vmem:[#allocation55_spill] sm:$0xff] }
 0x131   :  { %852 = vmatpush.msrb.mxu2 %v5623_v55  ;;  %1049 = vmatpush.msrb.mxu3 %v9807_v53  ;;  %v9812_v55 = vld [vmem:[#allocation58_spill] sm:$0xff]  ;;  %v9815_v53 = vld [vmem:[#allocation63_spill] sm:$0xff] }
 0x132   :  { %813 = vmatpush.msrb.mxu0 %v9808_v0  ;;  %1010 = vmatpush.msrb.mxu1 %v5151_v1  ;;  %v9813_v0 = vld [vmem:[#allocation59_spill] sm:$0xff]  ;;  %v9814_v1 = vld [vmem:[#allocation62_spill] sm:$0xff] }
 0x133   :  { %853 = vmatpush.msrb.mxu2 %v5629_v21  ;;  %814 = vmatmul.f32.vlgmr.msrb.gmra.mxu0 %v5494_v5 }
 0x134   :  { %854 = vmatmul.f32.vlgmr.msrb.gmra.mxu2 %v5494_v5  ;;  %899 = vmatpush.msra.mxu0 %v9809_v62  ;;  %v9816_v5 = vld [vmem:[#allocation99_spill] sm:$0xff]  ;;  %v9817_v62 = vld [vmem:[#allocation66_spill] sm:$0xff] }
 0x135   :  { %939 = vmatpush.msra.mxu2 %v9810_v12  ;;  %1050 = vmatpush.msrb.mxu3 %v9811_v17  ;;  %v9818_v12 = vld [vmem:[#allocation67_spill] sm:$0xff] }
 0x136   :  { %900 = vmatpush.msra.mxu0 %v9812_v55  ;;  %1011 = vmatpush.msrb.mxu1 %v5157_v41  ;;  %v9819_v41 = vld [vmem:[#allocation70_spill] sm:$0xff]  ;;  %v9822_v55 = vld [vmem:[#allocation77_spill] sm:$0xff]  ;;  %v9823_v17 = vld [vmem:[#allocation79_spill] sm:$0xff] }
 0x137   :  { %940 = vmatpush.msra.mxu2 %v9813_v0  ;;  %1051 = vmatpush.msrb.mxu3 %v5131_v47  ;;  %v9820_v47 = vld [vmem:[#allocation72_spill] sm:$0xff]  ;;  %v9824_v0 = vld [vmem:[#allocation81_spill] sm:$0xff] }
 0x138   :  { %901 = vmatpush.msra.mxu0 %v9814_v1  ;;  %1012 = vmatpush.msrb.mxu1 %v5161_v8  ;;  %v9821_v8 = vld [vmem:[#allocation74_spill] sm:$0xff]  ;;  %v9826_v1 = vld [vmem:[#allocation85_spill] sm:$0xff] }
 0x139   :  { %941 = vmatpush.msra.mxu2 %v9815_v53  ;;  %1052 = vmatpush.msrb.mxu3 %v9816_v5  ;;  %v9828_v53 = vld [vmem:[#allocation89_spill] sm:$0xff] }
 0x13a   :  { %902 = vmatpush.msra.mxu0 %v9817_v62  ;;  %1013 = vmatpush.msrb.mxu1 %v5166_v61  ;;  %v9825_v61 = vld [vmem:[#allocation83_spill] sm:$0xff]  ;;  %v9830_v5 = vld [vmem:[#allocation93_spill] sm:$0xff]  ;;  %v9832_v62 = vld [vmem:[#allocation96_spill] sm:$0xff] }
 0x13b   :  { %942 = vmatpush.msra.mxu2 %v9818_v12  ;;  %1053 = vmatpush.msrb.mxu3 %v5149_v45  ;;  %v9827_v45 = vld [vmem:[#allocation87_spill] sm:$0xff]  ;;  %v9833_v12 = vld [vmem:[#allocation97_spill] sm:$0xff] }
 0x13c   :  { %903 = vmatpush.msra.mxu0 %v9819_v41  ;;  %1014 = vmatpush.msrb.mxu1 %v5171_v33  ;;  %v9829_v33 = vld [vmem:[#allocation91_spill] sm:$0xff]  ;;  %v9834_v41 = vld [vmem:[#allocation98_spill] sm:$0xff] }
 0x13d   :  { %943 = vmatpush.msra.mxu2 %v9820_v47  ;;  %1054 = vmatpush.msrb.mxu3 %v5155_v59  ;;  %v9831_v59 = vld [vmem:[#allocation94_spill] sm:$0xff] }
 0x13e   :  { %904 = vmatpush.msra.mxu0 %v9821_v8 }
 0x13f   :  { %944 = vmatpush.msra.mxu2 %v9822_v55 }
 0x140   :  { %905 = vmatpush.msra.mxu0 %v9823_v17 }
 0x141   :  { %945 = vmatpush.msra.mxu2 %v9824_v0 }
 0x142   :  { %906 = vmatpush.msra.mxu0 %v9825_v61 }
 0x143   :  { %946 = vmatpush.msra.mxu2 %v9826_v1 }
 0x144   :  { %907 = vmatpush.msra.mxu0 %v9827_v45 }
 0x145   :  { %947 = vmatpush.msra.mxu2 %v9828_v53 }
 0x146   :  { %908 = vmatpush.msra.mxu0 %v9829_v33 }
 0x147   :  { %948 = vmatpush.msra.mxu2 %v9830_v5 }
 0x148   :  { %909 = vmatpush.msra.mxu0 %v9831_v59 }
 0x149   :  { %949 = vmatpush.msra.mxu2 %v9832_v62 }
 0x14a   :  { %910 = vmatpush.msra.mxu0 %v9833_v12 }
 0x14b   :  { %950 = vmatpush.msra.mxu2 %v9834_v41 }
 0x14c   :  { %911 = vmatpush.msra.mxu0 %v5191_v3  ;;  %v335_v3 = vld [vmem:[%s8894_s4] sm:$0xf] }
 0x14d   :  { %951 = vmatpush.msra.mxu2 %v5193_v4  ;;  %v9835_v4 = vld [vmem:[#allocation102_spill] sm:$0xff] }
 0x14e   :  { %912 = vmatpush.msra.mxu0 %v5201_v6  ;;  %v9836_v6 = vld [vmem:[#allocation103_spill] sm:$0xff] }
 0x14f   :  { %952 = vmatpush.msra.mxu2 %v5203_v9  ;;  %v5704_v9 = vperm.slane %v335_v3, 0 }
 0x150   :  { %913 = vmatpush.msra.mxu0 %v5208_v11  ;;  %v9838_v11 = vld [vmem:[#allocation104_spill] sm:$0xff] }
 0x151   :  { %953 = vmatpush.msra.mxu2 %v5210_v13  ;;  %9837 = vst [vmem:[#allocation65_spill] sm:$0xff] %v5704_v9  ;;  %v9839_v13 = vld [vmem:[#allocation105_spill] sm:$0xff] }
 0x152   :  { %914 = vmatpush.msra.mxu0 %v5216_v15  ;;  %v9840_v15 = vld [vmem:[#allocation9_spill] sm:$0xff] }
 0x153   :  { %954 = vmatpush.msra.mxu2 %v5218_v16 }
 0x154   :  { %979 = vmatpush.msrb.mxu0 %v5223_v18  ;;  %v9841_v18 = vld [vmem:[#allocation12_spill] sm:$0xff] }
 0x155   :  { %1019 = vmatpush.msrb.mxu2 %v5225_v20 }
 0x156   :  { %980 = vmatpush.msrb.mxu0 %v5230_v22  ;;  %v9842_v22 = vld [vmem:[#allocation10_spill] sm:$0xff] }
 0x157   :  { %1020 = vmatpush.msrb.mxu2 %v5232_v24  ;;  %v573_v24 = vpop.f32.mrf.mxu1 }
 0x158   :  { %981 = vmatpush.msrb.mxu0 %v5238_v26  ;;  %v9843_v26 = vld [vmem:[#allocation14_spill] sm:$0xff] }
 0x159   :  { %1021 = vmatpush.msrb.mxu2 %v5240_v28 }
 0x15a   :  { %982 = vmatpush.msrb.mxu0 %v5246_v30  ;;  %v5713_v30 = vperm.slane %v335_v3, 1 }
 0x15b   :  { %1022 = vmatpush.msrb.mxu2 %v5248_v32 }
 0x15c   :  { %983 = vmatpush.msrb.mxu0 %v5256_v34 }
 0x15d   :  { %1023 = vmatpush.msrb.mxu2 %v5258_v36  ;;  %v613_v36 = vpop.f32.mrf.mxu3 }
 0x15e   :  { %984 = vmatpush.msrb.mxu0 %v5263_v38 }
 0x15f   :  { %1024 = vmatpush.msrb.mxu2 %v5265_v40 }
 0x160   :  { %985 = vmatpush.msrb.mxu0 %v5271_v42 }
 0x161   :  { %1025 = vmatpush.msrb.mxu2 %v5273_v44 }
 0x162   :  { %986 = vmatpush.msrb.mxu0 %v5284_v48  ;;  %v5716_v48 = vperm.slane %v335_v3, 2 }
 0x163   :  { %1026 = vmatpush.msrb.mxu2 %v5286_v50 }
 0x164   :  { %987 = vmatpush.msrb.mxu0 %v5292_v52  ;;  %v5718_v52 = vperm.slane %v335_v3, 3 }
 0x165   :  { %1027 = vmatpush.msrb.mxu2 %v5294_v54 }
 0x166   :  { %988 = vmatpush.msrb.mxu0 %v5303_v58  ;;  %9844 = vst [vmem:[#allocation82_spill] sm:$0xff] %v5718_v52 }
 0x167   :  { %1028 = vmatpush.msrb.mxu2 %v5305_v60 }
 0x168   :  { %989 = vmatpush.msrb.mxu0 %v5314_v2 }
 0x169   :  { %1029 = vmatpush.msrb.mxu2 %v5316_v7 }
 0x16a   :  { %990 = vmatpush.msrb.mxu0 %v5323_v19  ;;  %v693_v19 = vpop.f32.mrf.mxu3 }
 0x16b   :  { %1030 = vmatpush.msrb.mxu2 %v5325_v23  ;;  %v653_v23 = vpop.f32.mrf.mxu1 }
 0x16c   :  { %991 = vmatpush.msrb.mxu0 %v9835_v4 }
 0x16d   :  { %1031 = vmatpush.msrb.mxu2 %v9836_v6 }
 0x16e   :  { %992 = vmatpush.msrb.mxu0 %v9838_v11 }
 0x16f   :  { %1032 = vmatpush.msrb.mxu2 %v9839_v13 }
 0x170   :  { %993 = vmatpush.msrb.mxu0 %v9840_v15  ;;  %v553_v16 = vpop.f32.mrf.mxu0  ;;  %v9846_v15 = vld [vmem:[#allocation101_spill] sm:$0xff] }
 0x171   :  { %1033 = vmatpush.msrb.mxu2 %v9841_v18  ;;  %v554_v20 = vadd.f32 %v553_v16, %v5704_v9  ;;  %v9847_v18 = vld [vmem:[#allocation100_spill] sm:$0xff] }
 0x172   :  { %994 = vmatpush.msrb.mxu0 %v9842_v22  ;;  %v5731_v22 = vld [vmem:[#allocation3 + $0x3e0] sm:$0xff] }
 0x173   :  { %1034 = vmatpush.msrb.mxu2 %v9843_v26  ;;  %v574_v28 = vadd.f32 %v573_v24, %v554_v20  ;;  %v5734_v24 = vld [vmem:[#allocation3 + $0x3e8] sm:$0xff]  ;;  %v755_v26 = vpop.f32.mrf.mxu1 }
 0x175   :  { %v696_v32 = vsub.f32 0.0, %v574_v28  ;;  %v5737_v28 = vld [vmem:[#allocation3 + $0x3c0] sm:$0xff] }
 0x176   :  { %v593_v34 = vpop.f32.mrf.mxu2 }
 0x177   :  { %v697_v38 = vmul.f32 1.442695, %v696_v32  ;;  %v594_v40 = vadd.f32 %v593_v34, %v5713_v30  ;;  %v5740_v32 = vld [vmem:[#allocation3 + $0x3c8] sm:$0xff] }
 0x178   :  { %v633_v50 = vpop.f32.mrf.mxu0  ;;  %v795_v34 = vpop.f32.mrf.mxu3 }
 0x179   :  { %3484 = vpow2.f32 %v697_v38  ;;  %v614_v42 = vadd.f32 %v613_v36, %v594_v40  ;;  %v634_v60 = vadd.f32 %v633_v50, %v5716_v48  ;;  %v5743_v40 = vld [vmem:[#allocation3 + $0x3a0] sm:$0xff]  ;;  %v5752_v50 = vld [vmem:[#allocation3 + $0x388] sm:$0xff] }
 0x17b   :  { %v701_v44 = vsub.f32 0.0, %v614_v42  ;;  %v654_v55 = vadd.f32 %v653_v23, %v634_v60  ;;  %v5746_v42 = vld [vmem:[#allocation3 + $0x3a8] sm:$0xff]  ;;  %v5757_v60 = vld [vmem:[#allocation3 + $0x360] sm:$0xff] }
 0x17d   :  { %v702_v54 = vmul.f32 1.442695, %v701_v44  ;;  %v5749_v44 = vld [vmem:[#allocation3 + $0x380] sm:$0xff] }
 0x17f   :  { %v3485_v58 = vpop.eup %3484  ;;  %3486 = vpow2.f32 %v702_v54  ;;  %v673_v2 = vpop.f32.mrf.mxu2 }
 0x180   :  { %v674_v7 = vadd.f32 %v673_v2, %v5718_v52  ;;  %v699_v47 = vadd.f32 1.0, %v3485_v58  ;;  %v5760_v2 = vld [vmem:[#allocation3 + $0x368] sm:$0xff] }
 0x182   :  { %v694_v8 = vadd.f32 %v693_v19, %v674_v7  ;;  %3488 = vrcp.f32 %v699_v47  ;;  %v5763_v7 = vld [vmem:[#allocation3 + $0x340] sm:$0xff]  ;;  %v5766_v19 = vld [vmem:[#allocation3 + $0x348] sm:$0xff] }
 0x183   :  { %3490 = vtanh.f32 %v654_v55  ;;  %v5772_v55 = vld [vmem:[#allocation3 + $0x328] sm:$0xff] }
 0x184   :  { %v707_v17 = vsub.f32 0.0, %v694_v8  ;;  %v5769_v8 = vld [vmem:[#allocation3 + $0x320] sm:$0xff] }
 0x185   :  { %v3487_v0 = vpop.eup %3486 }
 0x186   :  { %v704_v61 = vadd.f32 1.0, %v3487_v0  ;;  %v708_v1 = vmul.f32 1.442695, %v707_v17  ;;  %v5775_v17 = vld [vmem:[#allocation3 + $0x300] sm:$0xff]  ;;  %v5778_v0 = vld [vmem:[#allocation3 + $0x308] sm:$0xff] }
 0x188   :  { %3492 = vrcp.f32 %v704_v61  ;;  %v3489_v45 = vpop.eup %3488  ;;  %v5781_v61 = vld [vmem:[#allocation3 + $0x2e0] sm:$0xff] }
 0x189   :  { %3494 = vpow2.f32 %v708_v1  ;;  %v3491_v53 = vpop.eup %3490  ;;  %v5784_v1 = vld [vmem:[#allocation3 + $0x2e8] sm:$0xff] }
 0x18a   :  { %v713_v62 = vmul.f32 %v3491_v53, %v3489_v45  ;;  %v5787_v45 = vld [vmem:[#allocation3 + $0x2c0] sm:$0xff]  ;;  %v5790_v53 = vld [vmem:[#allocation3 + $0x2c8] sm:$0xff] }
 0x18e   :  { %v3493_v33 = vpop.eup %3492 }
 0x18f   :  { %v3495_v5 = vpop.eup %3494  ;;  %v712_v59 = vmul.f32 0.0, %v3493_v33 }
 0x190   :  { %v710_v12 = vadd.f32 1.0, %v3495_v5  ;;  %v735_v6 = vpop.f32.mrf.mxu0  ;;  %v9848_v5 = vld [vmem:[#allocation16_spill] sm:$0xff] }
 0x191   :  { %v5722_v41 = vadd.f32 %v713_v62, %v712_v59  ;;  %v736_v16 = vadd.f32 %v735_v6, %v9846_v15  ;;  %v5794_v62 = vld [vmem:[#allocation3 + $0x2a0] sm:$0xff]  ;;  %v835_v6 = vpop.f32.mrf.mxu1 }
 0x192   :  { %3496 = vrcp.f32 %v710_v12  ;;  %v5797_v12 = vld [vmem:[#allocation3 + $0x2a8] sm:$0xff] }
 0x193   :  { %3498 = vtanh.f32 %v5722_v41  ;;  %v756_v36 = vadd.f32 %v755_v26, %v736_v16  ;;  %v5803_v16 = vld [vmem:[#allocation3 + $0x288] sm:$0xff] }
 0x195   :  { %v878_v54 = vsub.f32 0.0, %v756_v36  ;;  %v5809_v36 = vld [vmem:[#allocation3 + $0x268] sm:$0xff] }
 0x197   :  { %v775_v11 = vpop.f32.mrf.mxu2  ;;  %v879_v23 = vmul.f32 1.442695, %v878_v54 }
 0x198   :  { %v3497_v3 = vpop.eup %3496  ;;  %v776_v20 = vadd.f32 %v775_v11, %v9847_v18  ;;  %v5800_v11 = vld [vmem:[#allocation3 + $0x280] sm:$0xff] }
 0x199   :  { %v3499_v4 = vpop.eup %3498  ;;  %3500 = vpow2.f32 %v879_v23  ;;  %v5815_v23 = vld [vmem:[#allocation3 + $0x248] sm:$0xff] }
 0x19a   :  { %v5725_v13 = vmul.f32 %v3499_v4, %v3497_v3  ;;  %v796_v38 = vadd.f32 %v795_v34, %v776_v20  ;;  %v5806_v34 = vld [vmem:[#allocation3 + $0x260] sm:$0xff]  ;;  %9849 = vst [vmem:[#allocation86_spill] sm:$0xff] %v5815_v23 }
 0x19c   :  { %9845 = vst [vmem:[#allocation69_spill] sm:$0xff] %v5725_v13  ;;  %935 = vmatmul.f32.vlgmr.msra.gmra.mxu1 %v5725_v13  ;;  %975 = vmatmul.f32.vlgmr.msra.gmra.mxu3 %v5725_v13  ;;  %v883_v58 = vsub.f32 0.0, %v796_v38 }
 0x19d   :  { %1101 = vmatpush.msra.mxu1 %v5731_v22  ;;  %1141 = vmatpush.msra.mxu3 %v5734_v24 }
 0x19e   :  { %v884_v47 = vmul.f32 1.442695, %v883_v58  ;;  %v5812_v58 = vld [vmem:[#allocation3 + $0x240] sm:$0xff] }
 0x19f   :  { %1102 = vmatpush.msra.mxu1 %v5737_v28  ;;  %1142 = vmatpush.msra.mxu3 %v5740_v32  ;;  %v3501_v3 = vpop.eup %3500 }
 0x1a0   :  { %3502 = vpow2.f32 %v884_v47  ;;  %v881_v26 = vadd.f32 1.0, %v3501_v3  ;;  %v9850_v47 = vld [vmem:[#allocation11_spill] sm:$0xff]  ;;  %v5819_v3 = vld [vmem:[#allocation3 + $0x220] sm:$0xff] }
 0x1a1   :  { %1103 = vmatpush.msra.mxu1 %v5743_v40  ;;  %1143 = vmatpush.msra.mxu3 %v5746_v42  ;;  %9851 = vst [vmem:[#allocation73_spill] sm:$0xff] %v5819_v3 }
 0x1a3   :  { %1104 = vmatpush.msra.mxu1 %v5749_v44  ;;  %1144 = vmatpush.msra.mxu3 %v5752_v50 }
 0x1a4   :  { %1015 = vmatmul.f32.vlgmr.msrb.gmra.mxu1 %v5725_v13  ;;  %1055 = vmatmul.f32.vlgmr.msrb.gmra.mxu3 %v5725_v13  ;;  %v5825_v13 = vld [vmem:[#allocation3 + $0x200] sm:$0xff] }
 0x1a5   :  { %1105 = vmatpush.msra.mxu1 %v5757_v60  ;;  %1145 = vmatpush.msra.mxu3 %v5760_v2  ;;  %9853 = vst [vmem:[#allocation76_spill] sm:$0xff] %v5825_v13 }
 0x1a6   :  { %v3503_v4 = vpop.eup %3502 }
 0x1a7   :  { %1106 = vmatpush.msra.mxu1 %v5763_v7  ;;  %1146 = vmatpush.msra.mxu3 %v5766_v19  ;;  %v886_v38 = vadd.f32 1.0, %v3503_v4 }
 0x1a9   :  { %1107 = vmatpush.msra.mxu1 %v5769_v8  ;;  %1147 = vmatpush.msra.mxu3 %v5772_v55 }
 0x1ab   :  { %1108 = vmatpush.msra.mxu1 %v5775_v17  ;;  %1148 = vmatpush.msra.mxu3 %v5778_v0 }
 0x1ad   :  { %1109 = vmatpush.msra.mxu1 %v5781_v61  ;;  %1149 = vmatpush.msra.mxu3 %v5784_v1 }
 0x1af   :  { %1110 = vmatpush.msra.mxu1 %v5787_v45  ;;  %1150 = vmatpush.msra.mxu3 %v5790_v53 }
 0x1b0   :  { %v815_v33 = vpop.f32.mrf.mxu0 }
 0x1b1   :  { %v816_v59 = vadd.f32 %v815_v33, %v9848_v5  ;;  %1111 = vmatpush.msra.mxu1 %v5794_v62  ;;  %1151 = vmatpush.msra.mxu3 %v5797_v12 }
 0x1b3   :  { %1112 = vmatpush.msra.mxu1 %v5800_v11  ;;  %1152 = vmatpush.msra.mxu3 %v5803_v16  ;;  %v836_v20 = vadd.f32 %v835_v6, %v816_v59  ;;  %v875_v59 = vpop.f32.mrf.mxu3  ;;  %v5822_v6 = vld [vmem:[#allocation3 + $0x228] sm:$0xff] }
 0x1b4   :  { %9852 = vst [vmem:[#allocation90_spill] sm:$0xff] %v5822_v6 }
 0x1b5   :  { %1113 = vmatpush.msra.mxu1 %v5806_v34  ;;  %1153 = vmatpush.msra.mxu3 %v5809_v36  ;;  %3504 = vtanh.f32 %v836_v20 }
 0x1b6   :  { %3506 = vrcp.f32 %v881_v26  ;;  %v5831_v26 = vld [vmem:[#allocation3 + $0x3f0] sm:$0xff] }
 0x1b7   :  { %v855_v54 = vpop.f32.mrf.mxu2  ;;  %1114 = vmatpush.msra.mxu1 %v5812_v58  ;;  %1154 = vmatpush.msra.mxu3 %v5815_v23  ;;  %3508 = vrcp.f32 %v886_v38  ;;  %v5828_v23 = vld [vmem:[#allocation3 + $0x208] sm:$0xff]  ;;  %9855 = vst [vmem:[#allocation84_spill] sm:$0xff] %v5831_v26 }
 0x1b8   :  { %v856_v33 = vadd.f32 %v855_v54, %v9850_v47  ;;  %9854 = vst [vmem:[#allocation80_spill] sm:$0xff] %v5828_v23  ;;  %v5834_v54 = vld [vmem:[#allocation3 + $0x3f8] sm:$0xff] }
 0x1b9   :  { %1115 = vmatpush.msra.mxu1 %v5819_v3  ;;  %1155 = vmatpush.msra.mxu3 %v5822_v6  ;;  %9856 = vst [vmem:[#allocation88_spill] sm:$0xff] %v5834_v54  ;;  %v5856_v3 = vld [vmem:[#allocation3 + $0x370] sm:$0xff] }
 0x1ba   :  { %v876_v4 = vadd.f32 %v875_v59, %v856_v33  ;;  %v5837_v33 = vld [vmem:[#allocation3 + $0x3d0] sm:$0xff]  ;;  %v5840_v59 = vld [vmem:[#allocation3 + $0x3d8] sm:$0xff]  ;;  %9861 = vst [vmem:[#allocation55_spill] sm:$0xff] %v5856_v3 }
 0x1bb   :  { %1116 = vmatpush.msra.mxu1 %v5825_v13  ;;  %1156 = vmatpush.msra.mxu3 %v5828_v23  ;;  %v3505_v6 = vpop.eup %3504  ;;  %9857 = vst [vmem:[#allocation20_spill] sm:$0xff] %v5837_v33  ;;  %v5843_v13 = vld [vmem:[#allocation3 + $0x3b0] sm:$0xff] }
 0x1bc   :  { %v889_v20 = vsub.f32 0.0, %v876_v4  ;;  %9858 = vst [vmem:[#allocation92_spill] sm:$0xff] %v5840_v59  ;;  %v3507_v23 = vpop.eup %3506 }
 0x1bd   :  { %1181 = vmatpush.msrb.mxu1 %v5831_v26  ;;  %1221 = vmatpush.msrb.mxu3 %v5834_v54  ;;  %v3509_v4 = vpop.eup %3508  ;;  %9859 = vst [vmem:[#allocation23_spill] sm:$0xff] %v5843_v13  ;;  %v5846_v26 = vld [vmem:[#allocation3 + $0x3b8] sm:$0xff]  ;;  %v895_v54 = vmul.f32 %v3507_v23, %v3505_v6  ;;  %v5864_v6 = vld [vmem:[#allocation3 + $0x350] sm:$0xff] }
 0x1be   :  { %v890_v38 = vmul.f32 1.442695, %v889_v20  ;;  %v5849_v20 = vld [vmem:[#allocation3 + $0x390] sm:$0xff]  ;;  %9862 = vst [vmem:[#allocation95_spill] sm:$0xff] %v5864_v6 }
 0x1bf   :  { %1182 = vmatpush.msrb.mxu1 %v5837_v33  ;;  %1222 = vmatpush.msrb.mxu3 %v5840_v59  ;;  %v5852_v33 = vld [vmem:[#allocation3 + $0x398] sm:$0xff]  ;;  %v894_v59 = vmul.f32 %v3509_v4, %v5379_v46  ;;  %v5870_v4 = vld [vmem:[#allocation3 + $0x330] sm:$0xff] }
 0x1c0   :  { %3510 = vpow2.f32 %v890_v38  ;;  %9860 = vst [vmem:[#allocation54_spill] sm:$0xff] %v5852_v33  ;;  %v5867_v38 = vld [vmem:[#allocation3 + $0x358] sm:$0xff] }
 0x1c1   :  { %1183 = vmatpush.msrb.mxu1 %v5843_v13  ;;  %1223 = vmatpush.msrb.mxu3 %v5846_v26  ;;  %v5859_v13 = vld [vmem:[#allocation3 + $0x378] sm:$0xff]  ;;  %v5862_v23 = vadd.f32 %v895_v54, %v894_v59  ;;  %9863 = vst [vmem:[#allocation58_spill] sm:$0xff] %v5867_v38  ;;  %v5877_v54 = vld [vmem:[#allocation3 + $0x310] sm:$0xff] }
 0x1c2   :  { %9864 = vst [vmem:[#allocation59_spill] sm:$0xff] %v5870_v4  ;;  %v5880_v59 = vld [vmem:[#allocation3 + $0x318] sm:$0xff] }
 0x1c3   :  { %1184 = vmatpush.msrb.mxu1 %v5849_v20  ;;  %1224 = vmatpush.msrb.mxu3 %v5852_v33  ;;  %3512 = vtanh.f32 %v5862_v23  ;;  %9866 = vst [vmem:[#allocation63_spill] sm:$0xff] %v5877_v54 }
 0x1c4   :  { %9867 = vst [vmem:[#allocation99_spill] sm:$0xff] %v5880_v59 }
 0x1c5   :  { %1185 = vmatpush.msrb.mxu1 %v5856_v3  ;;  %1225 = vmatpush.msrb.mxu3 %v5859_v13  ;;  %v5873_v3 = vld [vmem:[#allocation3 + $0x338] sm:$0xff] }
 0x1c6   :  { %v3511_v33 = vpop.eup %3510  ;;  %9865 = vst [vmem:[#allocation62_spill] sm:$0xff] %v5873_v3 }
 0x1c7   :  { %1186 = vmatpush.msrb.mxu1 %v5864_v6  ;;  %1226 = vmatpush.msrb.mxu3 %v5867_v38  ;;  %v892_v46 = vadd.f32 1.0, %v3511_v33  ;;  %v5883_v33 = vld [vmem:[#allocation3 + $0x2f0] sm:$0xff] }
 0x1c8   :  { %9868 = vst [vmem:[#allocation66_spill] sm:$0xff] %v5883_v33  ;;  %v5895_v6 = vld [vmem:[#allocation3 + $0x2b0] sm:$0xff] }
 0x1c9   :  { %1187 = vmatpush.msrb.mxu1 %v5870_v4  ;;  %1227 = vmatpush.msrb.mxu3 %v5873_v3  ;;  %3514 = vrcp.f32 %v892_v46  ;;  %v5886_v4 = vld [vmem:[#allocation3 + $0x2f8] sm:$0xff]  ;;  %v5889_v3 = vld [vmem:[#allocation3 + $0x2d0] sm:$0xff] }
 0x1ca   :  { %9869 = vst [vmem:[#allocation67_spill] sm:$0xff] %v5886_v4  ;;  %v5892_v46 = vld [vmem:[#allocation3 + $0x2d8] sm:$0xff] }
 0x1cb   :  { %1188 = vmatpush.msrb.mxu1 %v5877_v54  ;;  %1228 = vmatpush.msrb.mxu3 %v5880_v59  ;;  %9870 = vst [vmem:[#allocation70_spill] sm:$0xff] %v5889_v3  ;;  %v3513_v54 = vpop.eup %3512  ;;  %v5898_v59 = vld [vmem:[#allocation3 + $0x2b8] sm:$0xff] }
 0x1cc   :  { %9871 = vst [vmem:[#allocation72_spill] sm:$0xff] %v5898_v59 }
 0x1cd   :  { %1189 = vmatpush.msrb.mxu1 %v5883_v33  ;;  %1229 = vmatpush.msrb.mxu3 %v5886_v4  ;;  %v5901_v4 = vld [vmem:[#allocation3 + $0x290] sm:$0xff] }
 0x1cf   :  { %1190 = vmatpush.msrb.mxu1 %v5889_v3  ;;  %1230 = vmatpush.msrb.mxu3 %v5892_v46  ;;  %v3515_v38 = vpop.eup %3514  ;;  %v5904_v3 = vld [vmem:[#allocation3 + $0x298] sm:$0xff] }
 0x1d0   :  { %v898_v33 = vmul.f32 %v3515_v38, %v3513_v54  ;;  %v5914_v38 = vld [vmem:[#allocation3 + $0x278] sm:$0xff]  ;;  %v5918_v54 = vld [vmem:[#allocation3 + $0x250] sm:$0xff] }
 0x1d1   :  { %1191 = vmatpush.msrb.mxu1 %v5895_v6  ;;  %1231 = vmatpush.msrb.mxu3 %v5898_v59  ;;  %v5910_v59 = vld [vmem:[#allocation3 + $0x270] sm:$0xff]  ;;  %9872 = vst [vmem:[#allocation74_spill] sm:$0xff] %v5918_v54 }
 0x1d2   :  { %915 = vmatmul.f32.vlgmr.msra.gmra.mxu0 %v898_v33  ;;  %955 = vmatmul.f32.vlgmr.msra.gmra.mxu2 %v898_v33 }
 0x1d3   :  { %1192 = vmatpush.msrb.mxu1 %v5901_v4  ;;  %1232 = vmatpush.msrb.mxu3 %v5904_v3 }
 0x1d4   :  { %1081 = vmatpush.msra.mxu0 %v5382_v43  ;;  %1117 = vmatmul.f32.vlgmr.msra.gmra.mxu1 %v898_v33  ;;  %v5922_v43 = vld [vmem:[#allocation3 + $0x258] sm:$0xff] }
 0x1d5   :  { %1121 = vmatpush.msra.mxu2 %v5385_v57  ;;  %1157 = vmatmul.f32.vlgmr.msra.gmra.mxu3 %v898_v33  ;;  %9873 = vst [vmem:[#allocation77_spill] sm:$0xff] %v5922_v43  ;;  %v5926_v57 = vld [vmem:[#allocation3 + $0x230] sm:$0xff] }
 0x1d6   :  { %1082 = vmatpush.msra.mxu0 %v5388_v39  ;;  %1193 = vmatpush.msrb.mxu1 %v5910_v59  ;;  %9874 = vst [vmem:[#allocation79_spill] sm:$0xff] %v5926_v57  ;;  %v5932_v39 = vld [vmem:[#allocation3 + $0x238] sm:$0xff] }
 0x1d7   :  { %1122 = vmatpush.msra.mxu2 %v5392_v49  ;;  %1233 = vmatpush.msrb.mxu3 %v5914_v38  ;;  %9875 = vst [vmem:[#allocation81_spill] sm:$0xff] %v5932_v39  ;;  %v9876_v49 = vld [vmem:[#allocation13_spill] sm:$0xff] }
 0x1d8   :  { %1083 = vmatpush.msra.mxu0 %v5396_v25  ;;  %1194 = vmatpush.msrb.mxu1 %v5918_v54  ;;  %v5936_v25 = vld [vmem:[#allocation3 + $0x210] sm:$0xff] }
 0x1d9   :  { %1123 = vmatpush.msra.mxu2 %v5400_v37  ;;  %1234 = vmatpush.msrb.mxu3 %v5922_v43  ;;  %9877 = vst [vmem:[#allocation83_spill] sm:$0xff] %v5936_v25  ;;  %v9878_v37 = vld [vmem:[#allocation18_spill] sm:$0xff] }
 0x1da   :  { %1084 = vmatpush.msra.mxu0 %v5404_v31  ;;  %1195 = vmatpush.msrb.mxu1 %v5926_v57  ;;  %v5940_v31 = vld [vmem:[#allocation3 + $0x218] sm:$0xff] }
 0x1db   :  { %1124 = vmatpush.msra.mxu2 %v5408_v56  ;;  %995 = vmatmul.f32.vlgmr.msrb.gmra.mxu0 %v898_v33  ;;  %9879 = vst [vmem:[#allocation85_spill] sm:$0xff] %v5940_v31  ;;  %v9880_v56 = vld [vmem:[#allocation15_spill] sm:$0xff] }
 0x1dc   :  { %1035 = vmatmul.f32.vlgmr.msrb.gmra.mxu2 %v898_v33  ;;  %1085 = vmatpush.msra.mxu0 %v5411_v51  ;;  %v9881_v51 = vld [vmem:[#allocation21_spill] sm:$0xff] }
 0x1dd   :  { %1125 = vmatpush.msra.mxu2 %v5414_v27  ;;  %1235 = vmatpush.msrb.mxu3 %v5932_v39  ;;  %v5945_v27 = vld [vmem:[#allocation5 + $0x3e0] sm:$0xff] }
 0x1de   :  { %1086 = vmatpush.msra.mxu0 %v9876_v49  ;;  %1196 = vmatpush.msrb.mxu1 %v5936_v25  ;;  %9882 = vst [vmem:[#allocation87_spill] sm:$0xff] %v5945_v27  ;;  %v5948_v49 = vld [vmem:[#allocation5 + $0x3e8] sm:$0xff]  ;;  %v9884_v25 = vld [vmem:[#allocation17_spill] sm:$0xff] }
 0x1df   :  { %1126 = vmatpush.msra.mxu2 %v9878_v37  ;;  %1236 = vmatpush.msrb.mxu3 %v5940_v31  ;;  %9883 = vst [vmem:[#allocation89_spill] sm:$0xff] %v5948_v49  ;;  %v9885_v37 = vld [vmem:[#allocation24_spill] sm:$0xff]  ;;  %v5953_v39 = vld [vmem:[#allocation5 + $0x3c0] sm:$0xff]  ;;  %v6037_v31 = vld [vmem:[#allocation5 + $0x2a8] sm:$0xff] }
 0x1e0   :  { %1197 = vmatmul.f32.vlgmr.msrb.gmra.mxu1 %v898_v33  ;;  %1237 = vmatmul.f32.vlgmr.msrb.gmra.mxu3 %v898_v33  ;;  %9886 = vst [vmem:[#allocation91_spill] sm:$0xff] %v5953_v39  ;;  %v5956_v33 = vld [vmem:[#allocation5 + $0x3c8] sm:$0xff] }
 0x1e1   :  { %1087 = vmatpush.msra.mxu0 %v9880_v56  ;;  %1127 = vmatpush.msra.mxu2 %v9881_v51  ;;  %9887 = vst [vmem:[#allocation93_spill] sm:$0xff] %v5956_v33  ;;  %v9888_v56 = vld [vmem:[#allocation26_spill] sm:$0xff]  ;;  %v9889_v51 = vld [vmem:[#allocation28_spill] sm:$0xff] }
 0x1e2   :  { %1282 = vmatpush.msra.mxu1 %v5945_v27  ;;  %1322 = vmatpush.msra.mxu3 %v5948_v49  ;;  %v5961_v27 = vld [vmem:[#allocation5 + $0x3a0] sm:$0xff]  ;;  %v5964_v49 = vld [vmem:[#allocation5 + $0x3a8] sm:$0xff]  ;;  %9925 = vst [vmem:[#allocation21_spill] sm:$0xff] %v6037_v31 }
 0x1e3   :  { %1088 = vmatpush.msra.mxu0 %v9884_v25  ;;  %1128 = vmatpush.msra.mxu2 %v9885_v37  ;;  %9890 = vst [vmem:[#allocation94_spill] sm:$0xff] %v5961_v27  ;;  %v9892_v25 = vld [vmem:[#allocation19_spill] sm:$0xff]  ;;  %v9893_v37 = vld [vmem:[#allocation30_spill] sm:$0xff] }
 0x1e4   :  { %1283 = vmatpush.msra.mxu1 %v5953_v39  ;;  %1323 = vmatpush.msra.mxu3 %v5956_v33  ;;  %9891 = vst [vmem:[#allocation96_spill] sm:$0xff] %v5964_v49  ;;  %v5969_v39 = vld [vmem:[#allocation5 + $0x380] sm:$0xff]  ;;  %v5972_v33 = vld [vmem:[#allocation5 + $0x388] sm:$0xff] }
 0x1e5   :  { %1089 = vmatpush.msra.mxu0 %v9888_v56  ;;  %1129 = vmatpush.msra.mxu2 %v9889_v51  ;;  %9894 = vst [vmem:[#allocation97_spill] sm:$0xff] %v5969_v39  ;;  %v9896_v56 = vld [vmem:[#allocation22_spill] sm:$0xff]  ;;  %v9897_v51 = vld [vmem:[#allocation32_spill] sm:$0xff] }
 0x1e6   :  { %1284 = vmatpush.msra.mxu1 %v5961_v27  ;;  %1324 = vmatpush.msra.mxu3 %v5964_v49  ;;  %9895 = vst [vmem:[#allocation98_spill] sm:$0xff] %v5972_v33  ;;  %v5977_v27 = vld [vmem:[#allocation5 + $0x360] sm:$0xff]  ;;  %v5980_v49 = vld [vmem:[#allocation5 + $0x368] sm:$0xff] }
 0x1e7   :  { %1090 = vmatpush.msra.mxu0 %v9892_v25  ;;  %1130 = vmatpush.msra.mxu2 %v9893_v37  ;;  %9898 = vst [vmem:[#allocation102_spill] sm:$0xff] %v5977_v27  ;;  %v9900_v25 = vld [vmem:[#allocation25_spill] sm:$0xff]  ;;  %v9901_v37 = vld [vmem:[#allocation34_spill] sm:$0xff] }
 0x1e8   :  { %1285 = vmatpush.msra.mxu1 %v5969_v39  ;;  %1325 = vmatpush.msra.mxu3 %v5972_v33  ;;  %9899 = vst [vmem:[#allocation103_spill] sm:$0xff] %v5980_v49  ;;  %v5985_v39 = vld [vmem:[#allocation5 + $0x340] sm:$0xff]  ;;  %v5988_v33 = vld [vmem:[#allocation5 + $0x348] sm:$0xff] }
 0x1e9   :  { %1091 = vmatpush.msra.mxu0 %v9896_v56  ;;  %1131 = vmatpush.msra.mxu2 %v9897_v51  ;;  %9902 = vst [vmem:[#allocation104_spill] sm:$0xff] %v5985_v39  ;;  %v9904_v56 = vld [vmem:[#allocation27_spill] sm:$0xff]  ;;  %v9905_v51 = vld [vmem:[#allocation36_spill] sm:$0xff] }
 0x1ea   :  { %1286 = vmatpush.msra.mxu1 %v5977_v27  ;;  %1326 = vmatpush.msra.mxu3 %v5980_v49  ;;  %9903 = vst [vmem:[#allocation105_spill] sm:$0xff] %v5988_v33  ;;  %v5993_v27 = vld [vmem:[#allocation5 + $0x320] sm:$0xff]  ;;  %v5996_v49 = vld [vmem:[#allocation5 + $0x328] sm:$0xff] }
 0x1eb   :  { %1092 = vmatpush.msra.mxu0 %v9900_v25  ;;  %1132 = vmatpush.msra.mxu2 %v9901_v37  ;;  %9906 = vst [vmem:[#allocation9_spill] sm:$0xff] %v5993_v27  ;;  %v9908_v25 = vld [vmem:[#allocation29_spill] sm:$0xff]  ;;  %v9909_v37 = vld [vmem:[#allocation38_spill] sm:$0xff] }
 0x1ec   :  { %1287 = vmatpush.msra.mxu1 %v5985_v39  ;;  %1327 = vmatpush.msra.mxu3 %v5988_v33  ;;  %9907 = vst [vmem:[#allocation12_spill] sm:$0xff] %v5996_v49  ;;  %v6001_v39 = vld [vmem:[#allocation5 + $0x300] sm:$0xff]  ;;  %v6004_v33 = vld [vmem:[#allocation5 + $0x308] sm:$0xff] }
 0x1ed   :  { %1093 = vmatpush.msra.mxu0 %v9904_v56  ;;  %1133 = vmatpush.msra.mxu2 %v9905_v51  ;;  %9910 = vst [vmem:[#allocation10_spill] sm:$0xff] %v6001_v39  ;;  %v9912_v56 = vld [vmem:[#allocation31_spill] sm:$0xff]  ;;  %v9913_v51 = vld [vmem:[#allocation40_spill] sm:$0xff] }
 0x1ee   :  { %1288 = vmatpush.msra.mxu1 %v5993_v27  ;;  %1328 = vmatpush.msra.mxu3 %v5996_v49  ;;  %9911 = vst [vmem:[#allocation14_spill] sm:$0xff] %v6004_v33  ;;  %v6012_v49 = vld [vmem:[%s8890_s0 + $0x2] sm:$0x1] }
 0x1ef   :  { %1094 = vmatpush.msra.mxu0 %v9908_v25  ;;  %1134 = vmatpush.msra.mxu2 %v9909_v37  ;;  %v6014_v25 = vld [vmem:[#allocation5 + $0x2e0] sm:$0xff]  ;;  %v6017_v37 = vld [vmem:[#allocation5 + $0x2e8] sm:$0xff] }
 0x1f0   :  { %1289 = vmatpush.msra.mxu1 %v6001_v39  ;;  %1329 = vmatpush.msra.mxu3 %v6004_v33  ;;  %9914 = vst [vmem:[#allocation101_spill] sm:$0xff] %v6014_v25  ;;  %v9916_v39 = vld [vmem:[#allocation33_spill] sm:$0xff]  ;;  %v9917_v33 = vld [vmem:[#allocation42_spill] sm:$0xff] }
 0x1f1   :  { %1095 = vmatpush.msra.mxu0 %v9912_v56  ;;  %1135 = vmatpush.msra.mxu2 %v9913_v51  ;;  %9915 = vst [vmem:[#allocation100_spill] sm:$0xff] %v6017_v37  ;;  %v9918_v56 = vld [vmem:[#allocation35_spill] sm:$0xff]  ;;  %v9919_v51 = vld [vmem:[#allocation44_spill] sm:$0xff]  ;;  %v6026_v27 = vld [vmem:[#allocation5 + $0x2c0] sm:$0xff] }
 0x1f2   :  { %1290 = vmatpush.msra.mxu1 %v6014_v25  ;;  %1330 = vmatpush.msra.mxu3 %v6017_v37  ;;  %9920 = vst [vmem:[#allocation13_spill] sm:$0xff] %v6026_v27  ;;  %v6029_v25 = vld [vmem:[#allocation5 + $0x2c8] sm:$0xff]  ;;  %v9922_v37 = vld [vmem:[#allocation37_spill] sm:$0xff] }
 0x1f3   :  { %1096 = vmatpush.msra.mxu0 %v9916_v39  ;;  %1136 = vmatpush.msra.mxu2 %v9917_v33  ;;  %9921 = vst [vmem:[#allocation18_spill] sm:$0xff] %v6029_v25  ;;  %v9923_v39 = vld [vmem:[#allocation46_spill] sm:$0xff]  ;;  %v6034_v33 = vld [vmem:[#allocation5 + $0x2a0] sm:$0xff] }
 0x1f4   :  { %1097 = vmatmul.f32.vlgmr.msra.gmra.mxu0 %v6012_v49  ;;  %1137 = vmatmul.f32.vlgmr.msra.gmra.mxu2 %v6012_v49  ;;  %9924 = vst [vmem:[#allocation15_spill] sm:$0xff] %v6034_v33 }
 0x1f5   :  { %1161 = vmatpush.msrb.mxu0 %v9918_v56  ;;  %1201 = vmatpush.msrb.mxu2 %v9919_v51  ;;  %v9926_v56 = vld [vmem:[#allocation39_spill] sm:$0xff]  ;;  %v9927_v51 = vld [vmem:[#allocation48_spill] sm:$0xff] }
 0x1f6   :  { %1291 = vmatpush.msra.mxu1 %v6026_v27  ;;  %1331 = vmatpush.msra.mxu3 %v6029_v25  ;;  %v6042_v27 = vld [vmem:[#allocation5 + $0x280] sm:$0xff]  ;;  %v6045_v25 = vld [vmem:[#allocation5 + $0x288] sm:$0xff] }
 0x1f7   :  { %1162 = vmatpush.msrb.mxu0 %v9922_v37  ;;  %1202 = vmatpush.msrb.mxu2 %v9923_v39  ;;  %9928 = vst [vmem:[#allocation17_spill] sm:$0xff] %v6042_v27  ;;  %v9930_v37 = vld [vmem:[#allocation41_spill] sm:$0xff]  ;;  %v9931_v39 = vld [vmem:[#allocation50_spill] sm:$0xff] }
 0x1f8   :  { %1292 = vmatpush.msra.mxu1 %v6034_v33  ;;  %1332 = vmatpush.msra.mxu3 %v6037_v31  ;;  %9929 = vst [vmem:[#allocation24_spill] sm:$0xff] %v6045_v25  ;;  %v6050_v33 = vld [vmem:[#allocation5 + $0x260] sm:$0xff]  ;;  %v6053_v31 = vld [vmem:[#allocation5 + $0x268] sm:$0xff] }
 0x1f9   :  { %1163 = vmatpush.msrb.mxu0 %v9926_v56  ;;  %1203 = vmatpush.msrb.mxu2 %v9927_v51  ;;  %9932 = vst [vmem:[#allocation26_spill] sm:$0xff] %v6050_v33  ;;  %v9934_v56 = vld [vmem:[#allocation43_spill] sm:$0xff] }
 0x1fa   :  { %1293 = vmatpush.msra.mxu1 %v6042_v27  ;;  %1333 = vmatpush.msra.mxu3 %v6045_v25  ;;  %9933 = vst [vmem:[#allocation28_spill] sm:$0xff] %v6053_v31  ;;  %v9935_v51 = vld [vmem:[#allocation51_spill] sm:$0xff]  ;;  %v6058_v27 = vld [vmem:[#allocation5 + $0x240] sm:$0xff]  ;;  %v6061_v25 = vld [vmem:[#allocation5 + $0x248] sm:$0xff] }
 0x1fb   :  { %1164 = vmatpush.msrb.mxu0 %v9930_v37  ;;  %1204 = vmatpush.msrb.mxu2 %v9931_v39  ;;  %9936 = vst [vmem:[#allocation19_spill] sm:$0xff] %v6058_v27  ;;  %v9938_v37 = vld [vmem:[#allocation45_spill] sm:$0xff]  ;;  %v9939_v39 = vld [vmem:[#allocation56_spill] sm:$0xff] }
 0x1fc   :  { %1294 = vmatpush.msra.mxu1 %v6050_v33  ;;  %1334 = vmatpush.msra.mxu3 %v6053_v31  ;;  %9937 = vst [vmem:[#allocation30_spill] sm:$0xff] %v6061_v25  ;;  %v6066_v33 = vld [vmem:[#allocation5 + $0x220] sm:$0xff]  ;;  %v6069_v31 = vld [vmem:[#allocation5 + $0x228] sm:$0xff] }
 0x1fd   :  { %1165 = vmatpush.msrb.mxu0 %v9934_v56  ;;  %1205 = vmatpush.msrb.mxu2 %v9935_v51  ;;  %9940 = vst [vmem:[#allocation22_spill] sm:$0xff] %v6066_v33  ;;  %v9942_v56 = vld [vmem:[#allocation47_spill] sm:$0xff]  ;;  %v9943_v51 = vld [vmem:[#allocation60_spill] sm:$0xff] }
 0x1fe   :  { %1295 = vmatpush.msra.mxu1 %v6058_v27  ;;  %1335 = vmatpush.msra.mxu3 %v6061_v25  ;;  %9941 = vst [vmem:[#allocation32_spill] sm:$0xff] %v6069_v31  ;;  %v6074_v27 = vld [vmem:[#allocation5 + $0x200] sm:$0xff]  ;;  %v6077_v25 = vld [vmem:[#allocation5 + $0x208] sm:$0xff] }
 0x1ff   :  { %1166 = vmatpush.msrb.mxu0 %v9938_v37  ;;  %1206 = vmatpush.msrb.mxu2 %v9939_v39  ;;  %9944 = vst [vmem:[#allocation25_spill] sm:$0xff] %v6074_v27  ;;  %v9946_v37 = vld [vmem:[#allocation49_spill] sm:$0xff]  ;;  %v9947_v39 = vld [vmem:[#allocation64_spill] sm:$0xff] }
 0x200   :  { %1296 = vmatpush.msra.mxu1 %v6066_v33  ;;  %1336 = vmatpush.msra.mxu3 %v6069_v31  ;;  %9945 = vst [vmem:[#allocation34_spill] sm:$0xff] %v6077_v25  ;;  %v6082_v33 = vld [vmem:[#allocation5 + $0x3f0] sm:$0xff]  ;;  %v6085_v31 = vld [vmem:[#allocation5 + $0x3f8] sm:$0xff] }
 0x201   :  { %1167 = vmatpush.msrb.mxu0 %v9942_v56  ;;  %1207 = vmatpush.msrb.mxu2 %v9943_v51  ;;  %9948 = vst [vmem:[#allocation27_spill] sm:$0xff] %v6082_v33  ;;  %v9950_v56 = vld [vmem:[#allocation52_spill] sm:$0xff] }
 0x202   :  { %1297 = vmatpush.msra.mxu1 %v6074_v27  ;;  %1337 = vmatpush.msra.mxu3 %v6077_v25  ;;  %9949 = vst [vmem:[#allocation36_spill] sm:$0xff] %v6085_v31  ;;  %v9951_v51 = vld [vmem:[#allocation68_spill] sm:$0xff]  ;;  %v6090_v27 = vld [vmem:[#allocation5 + $0x3d0] sm:$0xff] }
 0x203   :  { %1168 = vmatpush.msrb.mxu0 %v9946_v37  ;;  %1208 = vmatpush.msrb.mxu2 %v9947_v39  ;;  %9952 = vst [vmem:[#allocation29_spill] sm:$0xff] %v6090_v27  ;;  %v6093_v25 = vld [vmem:[#allocation5 + $0x3d8] sm:$0xff]  ;;  %v9954_v37 = vld [vmem:[#allocation53_spill] sm:$0xff]  ;;  %v6098_v39 = vld [vmem:[#allocation5 + $0x3b0] sm:$0xff] }
 0x204   :  { %1362 = vmatpush.msrb.mxu1 %v6082_v33  ;;  %1402 = vmatpush.msrb.mxu3 %v6085_v31  ;;  %9953 = vst [vmem:[#allocation38_spill] sm:$0xff] %v6093_v25  ;;  %v6101_v31 = vld [vmem:[#allocation5 + $0x3b8] sm:$0xff] }
 0x205   :  { %1169 = vmatpush.msrb.mxu0 %v9950_v56  ;;  %1209 = vmatpush.msrb.mxu2 %v9951_v51  ;;  %9955 = vst [vmem:[#allocation31_spill] sm:$0xff] %v6098_v39  ;;  %v9957_v56 = vld [vmem:[#allocation71_spill] sm:$0xff] }
 0x206   :  { %1363 = vmatpush.msrb.mxu1 %v6090_v27  ;;  %1403 = vmatpush.msrb.mxu3 %v6093_v25  ;;  %9956 = vst [vmem:[#allocation40_spill] sm:$0xff] %v6101_v31  ;;  %v6106_v51 = vld [vmem:[#allocation5 + $0x390] sm:$0xff]  ;;  %v6109_v25 = vld [vmem:[#allocation5 + $0x398] sm:$0xff] }
 0x207   :  { %1170 = vmatpush.msrb.mxu0 %v9954_v37  ;;  %1210 = vmatpush.msrb.mxu2 %v5585_v35  ;;  %9958 = vst [vmem:[#allocation33_spill] sm:$0xff] %v6106_v51  ;;  %v9960_v35 = vld [vmem:[#allocation57_spill] sm:$0xff]  ;;  %v6114_v37 = vld [vmem:[#allocation5 + $0x370] sm:$0xff] }
 0x208   :  { %1364 = vmatpush.msrb.mxu1 %v6098_v39  ;;  %1404 = vmatpush.msrb.mxu3 %v6101_v31  ;;  %9959 = vst [vmem:[#allocation42_spill] sm:$0xff] %v6109_v25  ;;  %v6117_v31 = vld [vmem:[#allocation5 + $0x378] sm:$0xff] }
 0x209   :  { %1171 = vmatpush.msrb.mxu0 %v9957_v56  ;;  %1211 = vmatpush.msrb.mxu2 %v5593_v14  ;;  %9961 = vst [vmem:[#allocation35_spill] sm:$0xff] %v6114_v37  ;;  %v9963_v14 = vld [vmem:[#allocation75_spill] sm:$0xff]  ;;  %v9964_v56 = vld [vmem:[#allocation61_spill] sm:$0xff] }
 0x20a   :  { %1365 = vmatpush.msrb.mxu1 %v6106_v51  ;;  %1405 = vmatpush.msrb.mxu3 %v6109_v25  ;;  %9962 = vst [vmem:[#allocation44_spill] sm:$0xff] %v6117_v31  ;;  %v6122_v51 = vld [vmem:[#allocation5 + $0x350] sm:$0xff]  ;;  %v6125_v25 = vld [vmem:[#allocation5 + $0x358] sm:$0xff] }
 0x20b   :  { %1172 = vmatpush.msrb.mxu0 %v9960_v35  ;;  %1212 = vmatpush.msrb.mxu2 %v5601_v63  ;;  %9965 = vst [vmem:[#allocation37_spill] sm:$0xff] %v6122_v51  ;;  %v6130_v63 = vld [vmem:[#allocation5 + $0x330] sm:$0xff]  ;;  %v6133_v35 = vld [vmem:[#allocation5 + $0x338] sm:$0xff] }
 0x20c   :  { %1366 = vmatpush.msrb.mxu1 %v6114_v37  ;;  %1406 = vmatpush.msrb.mxu3 %v6117_v31  ;;  %9966 = vst [vmem:[#allocation46_spill] sm:$0xff] %v6125_v25 }
 0x20d   :  { %1173 = vmatpush.msrb.mxu0 %v9963_v14  ;;  %1213 = vmatpush.msrb.mxu2 %v9964_v56  ;;  %9967 = vst [vmem:[#allocation39_spill] sm:$0xff] %v6130_v63  ;;  %v6136_v14 = vld [vmem:[#allocation3 + $0x30] sm:$0xff]  ;;  %v9970_v56 = vld [vmem:[#allocation78_spill] sm:$0xff] }
 0x20e   :  { %1367 = vmatpush.msrb.mxu1 %v6122_v51  ;;  %1407 = vmatpush.msrb.mxu3 %v6125_v25  ;;  %9968 = vst [vmem:[#allocation48_spill] sm:$0xff] %v6133_v35  ;;  %v6140_v51 = vld [vmem:[#allocation5 + $0x310] sm:$0xff] }
 0x20f   :  { %1174 = vmatpush.msrb.mxu0 %v5613_v10  ;;  %1214 = vmatpush.msrb.mxu2 %v5617_v29  ;;  %9969 = vst [vmem:[#allocation41_spill] sm:$0xff] %v6136_v14  ;;  %v6143_v10 = vld [vmem:[#allocation5 + $0x318] sm:$0xff]  ;;  %v6146_v29 = vld [vmem:[#allocation3 + $0x10] sm:$0xff] }
 0x210   :  { %1368 = vmatpush.msrb.mxu1 %v6130_v63  ;;  %1408 = vmatpush.msrb.mxu3 %v6133_v35  ;;  %9971 = vst [vmem:[#allocation50_spill] sm:$0xff] %v6140_v51  ;;  %v6387_v63 = vld [vmem:[#allocation5 + $0x10] sm:$0xff] }
 0x211   :  { %1175 = vmatpush.msrb.mxu0 %v6136_v14  ;;  %1215 = vmatpush.msrb.mxu2 %v9970_v56  ;;  %9972 = vst [vmem:[#allocation43_spill] sm:$0xff] %v6143_v10  ;;  %v6152_v14 = vld [vmem:[#allocation5 + $0x2f0] sm:$0xff]  ;;  %v6155_v56 = vld [vmem:[#allocation5 + $0x2f8] sm:$0xff] }
 0x212   :  { %1369 = vmatpush.msrb.mxu1 %v6140_v51  ;;  %1409 = vmatpush.msrb.mxu3 %v6143_v10  ;;  %9973 = vst [vmem:[#allocation51_spill] sm:$0xff] %v6146_v29  ;;  %v6158_v51 = vld [vmem:[#allocation5 + $0x1e0] sm:$0xff]  ;;  %v6161_v10 = vld [vmem:[#allocation5 + $0x1e8] sm:$0xff] }
 0x213   :  { %1176 = vmatpush.msrb.mxu0 %v6146_v29  ;;  %1216 = vmatpush.msrb.mxu2 %v5629_v21  ;;  %9974 = vst [vmem:[#allocation45_spill] sm:$0xff] %v6152_v14  ;;  %v6164_v21 = vld [vmem:[#allocation5 + $0x2d0] sm:$0xff] }
 0x214   :  { %1177 = vmatmul.f32.vlgmr.msrb.gmra.mxu0 %v6012_v49  ;;  %1217 = vmatmul.f32.vlgmr.msrb.gmra.mxu2 %v6012_v49  ;;  %9975 = vst [vmem:[#allocation56_spill] sm:$0xff] %v6155_v56  ;;  %v6167_v49 = vld [vmem:[#allocation5 + $0x2d8] sm:$0xff] }
 0x215   :  { %1370 = vmatpush.msrb.mxu1 %v6152_v14  ;;  %1410 = vmatpush.msrb.mxu3 %v6155_v56  ;;  %9976 = vst [vmem:[#allocation47_spill] sm:$0xff] %v6158_v51  ;;  %v6170_v14 = vld [vmem:[#allocation5 + $0x1c0] sm:$0xff]  ;;  %v6173_v56 = vld [vmem:[#allocation5 + $0x1c8] sm:$0xff] }
 0x216   :  { %1262 = vmatpush.msra.mxu0 %v6158_v51  ;;  %9977 = vst [vmem:[#allocation60_spill] sm:$0xff] %v6161_v10  ;;  %1302 = vmatpush.msra.mxu2 %v6161_v10  ;;  %v6176_v51 = vld [vmem:[#allocation5 + $0x2b0] sm:$0xff]  ;;  %v6179_v10 = vld [vmem:[#allocation5 + $0x2b8] sm:$0xff] }
 0x217   :  { %9978 = vst [vmem:[#allocation49_spill] sm:$0xff] %v6164_v21  ;;  %1371 = vmatpush.msrb.mxu1 %v6164_v21  ;;  %1411 = vmatpush.msrb.mxu3 %v6167_v49  ;;  %v6182_v21 = vld [vmem:[#allocation5 + $0x1a0] sm:$0xff] }
 0x218   :  { %9979 = vst [vmem:[#allocation64_spill] sm:$0xff] %v6167_v49  ;;  %1263 = vmatpush.msra.mxu0 %v6170_v14  ;;  %1303 = vmatpush.msra.mxu2 %v6173_v56  ;;  %v6185_v49 = vld [vmem:[#allocation5 + $0x1a8] sm:$0xff] }
 0x219   :  { %9980 = vst [vmem:[#allocation52_spill] sm:$0xff] %v6170_v14  ;;  %1372 = vmatpush.msrb.mxu1 %v6176_v51  ;;  %1412 = vmatpush.msrb.mxu3 %v6179_v10  ;;  %v6188_v14 = vld [vmem:[#allocation5 + $0x290] sm:$0xff] }
 0x21a   :  { %9981 = vst [vmem:[#allocation68_spill] sm:$0xff] %v6173_v56  ;;  %1264 = vmatpush.msra.mxu0 %v6182_v21  ;;  %1304 = vmatpush.msra.mxu2 %v6185_v49  ;;  %v6191_v56 = vld [vmem:[#allocation5 + $0x298] sm:$0xff] }
 0x21b   :  { %9982 = vst [vmem:[#allocation53_spill] sm:$0xff] %v6176_v51  ;;  %1373 = vmatpush.msrb.mxu1 %v6188_v14  ;;  %1413 = vmatpush.msrb.mxu3 %v6191_v56  ;;  %v6194_v51 = vld [vmem:[#allocation5 + $0x180] sm:$0xff] }
 0x21c   :  { %9983 = vst [vmem:[#allocation71_spill] sm:$0xff] %v6179_v10  ;;  %1265 = vmatpush.msra.mxu0 %v6194_v51  ;;  %v6197_v10 = vld [vmem:[#allocation5 + $0x188] sm:$0xff] }
 0x21d   :  { %9984 = vst [vmem:[#allocation57_spill] sm:$0xff] %v6182_v21  ;;  %1305 = vmatpush.msra.mxu2 %v6197_v10  ;;  %v6200_v21 = vld [vmem:[#allocation5 + $0x270] sm:$0xff] }
 0x21e   :  { %9985 = vst [vmem:[#allocation75_spill] sm:$0xff] %v6185_v49  ;;  %1374 = vmatpush.msrb.mxu1 %v6200_v21  ;;  %v6203_v49 = vld [vmem:[#allocation5 + $0x278] sm:$0xff] }
 0x21f   :  { %9986 = vst [vmem:[#allocation61_spill] sm:$0xff] %v6188_v14  ;;  %1414 = vmatpush.msrb.mxu3 %v6203_v49  ;;  %v6206_v14 = vld [vmem:[#allocation5 + $0x160] sm:$0xff] }
 0x220   :  { %9987 = vst [vmem:[#allocation78_spill] sm:$0xff] %v6191_v56  ;;  %1266 = vmatpush.msra.mxu0 %v6206_v14  ;;  %v6209_v56 = vld [vmem:[#allocation5 + $0x168] sm:$0xff] }
 0x221   :  { %9988 = vst [vmem:[#allocation106_spill] sm:$0xff] %v6194_v51  ;;  %1306 = vmatpush.msra.mxu2 %v6209_v56  ;;  %v6212_v51 = vld [vmem:[#allocation5 + $0x250] sm:$0xff] }
 0x222   :  { %9989 = vst [vmem:[#allocation107_spill] sm:$0xff] %v6197_v10  ;;  %1375 = vmatpush.msrb.mxu1 %v6212_v51  ;;  %v6215_v10 = vld [vmem:[#allocation5 + $0x258] sm:$0xff] }
 0x223   :  { %9990 = vst [vmem:[#allocation108_spill] sm:$0xff] %v6200_v21  ;;  %1415 = vmatpush.msrb.mxu3 %v6215_v10  ;;  %v6218_v21 = vld [vmem:[#allocation5 + $0x140] sm:$0xff] }
 0x224   :  { %9991 = vst [vmem:[#allocation109_spill] sm:$0xff] %v6203_v49  ;;  %1267 = vmatpush.msra.mxu0 %v6218_v21  ;;  %v6221_v49 = vld [vmem:[#allocation5 + $0x148] sm:$0xff] }
 0x225   :  { %9992 = vst [vmem:[#allocation110_spill] sm:$0xff] %v6206_v14  ;;  %1307 = vmatpush.msra.mxu2 %v6221_v49  ;;  %v6224_v14 = vld [vmem:[#allocation5 + $0x230] sm:$0xff] }
 0x226   :  { %9993 = vst [vmem:[#allocation111_spill] sm:$0xff] %v6209_v56  ;;  %1376 = vmatpush.msrb.mxu1 %v6224_v14  ;;  %v6227_v56 = vld [vmem:[#allocation5 + $0x238] sm:$0xff] }
 0x227   :  { %9994 = vst [vmem:[#allocation112_spill] sm:$0xff] %v6212_v51  ;;  %1416 = vmatpush.msrb.mxu3 %v6227_v56  ;;  %v6230_v51 = vld [vmem:[#allocation5 + $0x120] sm:$0xff] }
 0x228   :  { %9995 = vst [vmem:[#allocation113_spill] sm:$0xff] %v6215_v10  ;;  %1268 = vmatpush.msra.mxu0 %v6230_v51  ;;  %v6233_v10 = vld [vmem:[#allocation5 + $0x128] sm:$0xff] }
 0x229   :  { %9996 = vst [vmem:[#allocation114_spill] sm:$0xff] %v6218_v21  ;;  %1308 = vmatpush.msra.mxu2 %v6233_v10  ;;  %v6236_v21 = vld [vmem:[#allocation5 + $0x210] sm:$0xff] }
 0x22a   :  { %9997 = vst [vmem:[#allocation115_spill] sm:$0xff] %v6221_v49  ;;  %1377 = vmatpush.msrb.mxu1 %v6236_v21  ;;  %v6239_v49 = vld [vmem:[#allocation5 + $0x218] sm:$0xff] }
 0x22b   :  { %9998 = vst [vmem:[#allocation116_spill] sm:$0xff] %v6224_v14  ;;  %1417 = vmatpush.msrb.mxu3 %v6239_v49  ;;  %v6242_v14 = vld [vmem:[#allocation5 + $0x100] sm:$0xff] }
 0x22c   :  { %9999 = vst [vmem:[#allocation117_spill] sm:$0xff] %v6227_v56  ;;  %1269 = vmatpush.msra.mxu0 %v6242_v14  ;;  %v6245_v56 = vld [vmem:[#allocation5 + $0x108] sm:$0xff] }
 0x22d   :  { %10000 = vst [vmem:[#allocation118_spill] sm:$0xff] %v6230_v51  ;;  %1309 = vmatpush.msra.mxu2 %v6245_v56  ;;  %v6248_v51 = vld [vmem:[#allocation5 + $0xe0] sm:$0xff] }
 0x22e   :  { %10001 = vst [vmem:[#allocation119_spill] sm:$0xff] %v6233_v10  ;;  %1270 = vmatpush.msra.mxu0 %v6248_v51  ;;  %v6251_v10 = vld [vmem:[#allocation5 + $0xe8] sm:$0xff] }
 0x22f   :  { %10002 = vst [vmem:[#allocation120_spill] sm:$0xff] %v6236_v21  ;;  %1310 = vmatpush.msra.mxu2 %v6251_v10  ;;  %v6254_v21 = vld [vmem:[#allocation5 + $0xc0] sm:$0xff] }
 0x230   :  { %10003 = vst [vmem:[#allocation121_spill] sm:$0xff] %v6239_v49  ;;  %1271 = vmatpush.msra.mxu0 %v6254_v21  ;;  %v6257_v49 = vld [vmem:[#allocation5 + $0xc8] sm:$0xff] }
 0x231   :  { %10004 = vst [vmem:[#allocation122_spill] sm:$0xff] %v6242_v14  ;;  %1311 = vmatpush.msra.mxu2 %v6257_v49  ;;  %v6260_v14 = vld [vmem:[#allocation5 + $0xa0] sm:$0xff] }
 0x232   :  { %10005 = vst [vmem:[#allocation123_spill] sm:$0xff] %v6245_v56  ;;  %1272 = vmatpush.msra.mxu0 %v6260_v14  ;;  %v6263_v56 = vld [vmem:[#allocation5 + $0xa8] sm:$0xff] }
 0x233   :  { %10006 = vst [vmem:[#allocation124_spill] sm:$0xff] %v6248_v51  ;;  %1312 = vmatpush.msra.mxu2 %v6263_v56  ;;  %v6266_v51 = vld [vmem:[#allocation5 + $0x80] sm:$0xff] }
 0x234   :  { %10007 = vst [vmem:[#allocation125_spill] sm:$0xff] %v6251_v10  ;;  %1273 = vmatpush.msra.mxu0 %v6266_v51  ;;  %v6269_v10 = vld [vmem:[#allocation5 + $0x88] sm:$0xff] }
 0x235   :  { %10008 = vst [vmem:[#allocation126_spill] sm:$0xff] %v6254_v21  ;;  %1313 = vmatpush.msra.mxu2 %v6269_v10  ;;  %v6272_v21 = vld [vmem:[#allocation5 + $0x60] sm:$0xff] }
 0x236   :  { %10009 = vst [vmem:[#allocation127_spill] sm:$0xff] %v6257_v49  ;;  %1274 = vmatpush.msra.mxu0 %v6272_v21  ;;  %v6275_v49 = vld [vmem:[#allocation5 + $0x68] sm:$0xff] }
 0x237   :  { %10010 = vst [vmem:[#allocation128_spill] sm:$0xff] %v6260_v14  ;;  %1314 = vmatpush.msra.mxu2 %v6275_v49  ;;  %v6278_v14 = vld [vmem:[#allocation5 + $0x40] sm:$0xff] }
 0x238   :  { %10011 = vst [vmem:[#allocation129_spill] sm:$0xff] %v6263_v56  ;;  %1275 = vmatpush.msra.mxu0 %v6278_v14  ;;  %v6281_v56 = vld [vmem:[#allocation5 + $0x48] sm:$0xff] }
 0x239   :  { %10012 = vst [vmem:[#allocation130_spill] sm:$0xff] %v6266_v51  ;;  %1315 = vmatpush.msra.mxu2 %v6281_v56  ;;  %v6284_v51 = vld [vmem:[#allocation5 + $0x20] sm:$0xff] }
 0x23a   :  { %10013 = vst [vmem:[#allocation131_spill] sm:$0xff] %v6269_v10  ;;  %1276 = vmatpush.msra.mxu0 %v6284_v51  ;;  %v6287_v10 = vld [vmem:[#allocation5 + $0x28] sm:$0xff] }
 0x23b   :  { %10014 = vst [vmem:[#allocation132_spill] sm:$0xff] %v6272_v21  ;;  %1316 = vmatpush.msra.mxu2 %v6287_v10  ;;  %v6290_v21 = vld [vmem:[#allocation5] sm:$0xff] }
 0x23c   :  { %10015 = vst [vmem:[#allocation133_spill] sm:$0xff] %v6275_v49  ;;  %1277 = vmatpush.msra.mxu0 %v6290_v21  ;;  %v6293_v49 = vld [vmem:[#allocation5 + $0x8] sm:$0xff] }
 0x23d   :  { %10016 = vst [vmem:[#allocation134_spill] sm:$0xff] %v6278_v14  ;;  %1317 = vmatpush.msra.mxu2 %v6293_v49  ;;  %v6296_v14 = vld [vmem:[#allocation5 + $0x1f0] sm:$0xff] }
 0x23e   :  { %10017 = vst [vmem:[#allocation135_spill] sm:$0xff] %v6281_v56  ;;  %1342 = vmatpush.msrb.mxu0 %v6296_v14  ;;  %v6299_v56 = vld [vmem:[#allocation5 + $0x1f8] sm:$0xff] }
 0x23f   :  { %10018 = vst [vmem:[#allocation136_spill] sm:$0xff] %v6284_v51  ;;  %1382 = vmatpush.msrb.mxu2 %v6299_v56  ;;  %v6302_v51 = vld [vmem:[#allocation5 + $0x1d0] sm:$0xff] }
 0x240   :  { %10019 = vst [vmem:[#allocation137_spill] sm:$0xff] %v6287_v10  ;;  %1343 = vmatpush.msrb.mxu0 %v6302_v51  ;;  %v6305_v10 = vld [vmem:[#allocation5 + $0x1d8] sm:$0xff] }
 0x241   :  { %10020 = vst [vmem:[#allocation138_spill] sm:$0xff] %v6290_v21  ;;  %1383 = vmatpush.msrb.mxu2 %v6305_v10  ;;  %v6308_v21 = vld [vmem:[#allocation5 + $0x1b0] sm:$0xff] }
 0x242   :  { %10021 = vst [vmem:[#allocation139_spill] sm:$0xff] %v6293_v49  ;;  %1344 = vmatpush.msrb.mxu0 %v6308_v21  ;;  %v6311_v49 = vld [vmem:[#allocation5 + $0x1b8] sm:$0xff] }
 0x243   :  { %10022 = vst [vmem:[#allocation140_spill] sm:$0xff] %v6296_v14  ;;  %1384 = vmatpush.msrb.mxu2 %v6311_v49  ;;  %v6314_v14 = vld [vmem:[#allocation5 + $0x190] sm:$0xff] }
 0x244   :  { %10023 = vst [vmem:[#allocation141_spill] sm:$0xff] %v6299_v56  ;;  %1345 = vmatpush.msrb.mxu0 %v6314_v14  ;;  %v6317_v56 = vld [vmem:[#allocation5 + $0x198] sm:$0xff] }
 0x245   :  { %10024 = vst [vmem:[#allocation142_spill] sm:$0xff] %v6302_v51  ;;  %1385 = vmatpush.msrb.mxu2 %v6317_v56  ;;  %v6320_v51 = vld [vmem:[#allocation5 + $0x170] sm:$0xff] }
 0x246   :  { %10025 = vst [vmem:[#allocation143_spill] sm:$0xff] %v6305_v10  ;;  %1346 = vmatpush.msrb.mxu0 %v6320_v51  ;;  %v6323_v10 = vld [vmem:[#allocation5 + $0x178] sm:$0xff] }
 0x247   :  { %10026 = vst [vmem:[#allocation144_spill] sm:$0xff] %v6308_v21  ;;  %1386 = vmatpush.msrb.mxu2 %v6323_v10  ;;  %v6326_v21 = vld [vmem:[#allocation5 + $0x150] sm:$0xff] }
 0x248   :  { %10027 = vst [vmem:[#allocation145_spill] sm:$0xff] %v6311_v49  ;;  %1347 = vmatpush.msrb.mxu0 %v6326_v21  ;;  %v6329_v49 = vld [vmem:[#allocation5 + $0x158] sm:$0xff] }
 0x249   :  { %10028 = vst [vmem:[#allocation146_spill] sm:$0xff] %v6314_v14  ;;  %1387 = vmatpush.msrb.mxu2 %v6329_v49  ;;  %v6332_v14 = vld [vmem:[#allocation5 + $0x130] sm:$0xff] }
 0x24a   :  { %10029 = vst [vmem:[#allocation147_spill] sm:$0xff] %v6317_v56  ;;  %1348 = vmatpush.msrb.mxu0 %v6332_v14  ;;  %v6335_v56 = vld [vmem:[#allocation5 + $0x138] sm:$0xff] }
 0x24b   :  { %10030 = vst [vmem:[#allocation148_spill] sm:$0xff] %v6320_v51  ;;  %1388 = vmatpush.msrb.mxu2 %v6335_v56  ;;  %v6338_v51 = vld [vmem:[#allocation5 + $0x110] sm:$0xff] }
 0x24c   :  { %10031 = vst [vmem:[#allocation149_spill] sm:$0xff] %v6323_v10  ;;  %1349 = vmatpush.msrb.mxu0 %v6338_v51  ;;  %v6341_v10 = vld [vmem:[#allocation5 + $0x118] sm:$0xff] }
 0x24d   :  { %10032 = vst [vmem:[#allocation150_spill] sm:$0xff] %v6326_v21  ;;  %1389 = vmatpush.msrb.mxu2 %v6341_v10  ;;  %v6344_v21 = vld [vmem:[#allocation5 + $0xf0] sm:$0xff] }
 0x24e   :  { %10033 = vst [vmem:[#allocation151_spill] sm:$0xff] %v6329_v49  ;;  %1350 = vmatpush.msrb.mxu0 %v6344_v21  ;;  %v6347_v49 = vld [vmem:[#allocation5 + $0xf8] sm:$0xff] }
 0x24f   :  { %10034 = vst [vmem:[#allocation152_spill] sm:$0xff] %v6332_v14  ;;  %1390 = vmatpush.msrb.mxu2 %v6347_v49  ;;  %v6350_v14 = vld [vmem:[#allocation5 + $0xd0] sm:$0xff] }
 0x250   :  { %10035 = vst [vmem:[#allocation153_spill] sm:$0xff] %v6335_v56  ;;  %1351 = vmatpush.msrb.mxu0 %v6350_v14  ;;  %v6353_v56 = vld [vmem:[#allocation5 + $0xd8] sm:$0xff] }
 0x251   :  { %10036 = vst [vmem:[#allocation154_spill] sm:$0xff] %v6338_v51  ;;  %1391 = vmatpush.msrb.mxu2 %v6353_v56  ;;  %v6356_v51 = vld [vmem:[#allocation5 + $0xb0] sm:$0xff] }
 0x252   :  { %10037 = vst [vmem:[#allocation155_spill] sm:$0xff] %v6341_v10  ;;  %1352 = vmatpush.msrb.mxu0 %v6356_v51  ;;  %v6359_v10 = vld [vmem:[#allocation5 + $0xb8] sm:$0xff] }
 0x253   :  { %10038 = vst [vmem:[#allocation156_spill] sm:$0xff] %v6344_v21  ;;  %1392 = vmatpush.msrb.mxu2 %v6359_v10  ;;  %v6362_v21 = vld [vmem:[#allocation5 + $0x90] sm:$0xff] }
 0x254   :  { %10039 = vst [vmem:[#allocation157_spill] sm:$0xff] %v6347_v49  ;;  %1353 = vmatpush.msrb.mxu0 %v6362_v21  ;;  %v6365_v49 = vld [vmem:[#allocation5 + $0x98] sm:$0xff] }
 0x255   :  { %10040 = vst [vmem:[#allocation158_spill] sm:$0xff] %v6350_v14  ;;  %1393 = vmatpush.msrb.mxu2 %v6365_v49  ;;  %v6368_v14 = vld [vmem:[#allocation5 + $0x70] sm:$0xff] }
 0x256   :  { %10041 = vst [vmem:[#allocation159_spill] sm:$0xff] %v6353_v56  ;;  %1354 = vmatpush.msrb.mxu0 %v6368_v14  ;;  %v6371_v56 = vld [vmem:[#allocation5 + $0x78] sm:$0xff] }
 0x257   :  { %10042 = vst [vmem:[#allocation160_spill] sm:$0xff] %v6356_v51  ;;  %1394 = vmatpush.msrb.mxu2 %v6371_v56  ;;  %v6374_v51 = vld [vmem:[#allocation5 + $0x50] sm:$0xff] }
 0x258   :  { %10043 = vst [vmem:[#allocation161_spill] sm:$0xff] %v6359_v10  ;;  %1355 = vmatpush.msrb.mxu0 %v6374_v51  ;;  %v6377_v10 = vld [vmem:[#allocation5 + $0x58] sm:$0xff] }
 0x259   :  { %10044 = vst [vmem:[#allocation162_spill] sm:$0xff] %v6362_v21  ;;  %1395 = vmatpush.msrb.mxu2 %v6377_v10  ;;  %v916_v21 = vpop.f32.mrf.mxu0 }
 0x25a   :  { %10045 = vst [vmem:[#allocation163_spill] sm:$0xff] %v6365_v49  ;;  %v917_v29 = vadd.f32 %v916_v21, %v5704_v9  ;;  %v6381_v49 = vld [vmem:[#allocation5 + $0x30] sm:$0xff]  ;;  %v956_v21 = vpop.f32.mrf.mxu2  ;;  %v976_v9 = vpop.f32.mrf.mxu3 }
 0x25b   :  { %10046 = vst [vmem:[#allocation164_spill] sm:$0xff] %v6368_v14  ;;  %1356 = vmatpush.msrb.mxu0 %v6381_v49  ;;  %v6384_v14 = vld [vmem:[#allocation5 + $0x38] sm:$0xff] }
 0x25c   :  { %10047 = vst [vmem:[#allocation165_spill] sm:$0xff] %v6371_v56  ;;  %1396 = vmatpush.msrb.mxu2 %v6384_v14  ;;  %v936_v56 = vpop.f32.mrf.mxu1 }
 0x25d   :  { %10048 = vst [vmem:[#allocation166_spill] sm:$0xff] %v6374_v51  ;;  %v937_v35 = vadd.f32 %v936_v56, %v917_v29  ;;  %1357 = vmatpush.msrb.mxu0 %v6387_v63  ;;  %v6390_v51 = vld [vmem:[#allocation5 + $0x18] sm:$0xff] }
 0x25e   :  { %10049 = vst [vmem:[#allocation167_spill] sm:$0xff] %v6377_v10  ;;  %1397 = vmatpush.msrb.mxu2 %v6390_v51 }
 0x25f   :  { %10050 = vst [vmem:[#allocation168_spill] sm:$0xff] %v6381_v49  ;;  %v1059_v10 = vsub.f32 0.0, %v937_v35  ;;  %v957_v49 = vadd.f32 %v956_v21, %v5713_v30 }
 0x260   :  { %10051 = vst [vmem:[#allocation169_spill] sm:$0xff] %v6384_v14 }
 0x261   :  { %10052 = vst [vmem:[#allocation170_spill] sm:$0xff] %v6387_v63  ;;  %v1060_v25 = vmul.f32 1.442695, %v1059_v10  ;;  %v977_v31 = vadd.f32 %v976_v9, %v957_v49  ;;  %v996_v14 = vpop.f32.mrf.mxu0 }
 0x262   :  { %10053 = vst [vmem:[#allocation171_spill] sm:$0xff] %v6390_v51  ;;  %v997_v56 = vadd.f32 %v996_v14, %v5716_v48  ;;  %v1036_v63 = vpop.f32.mrf.mxu2  ;;  %v1056_v33 = vpop.f32.mrf.mxu3 }
 0x263   :  { %3516 = vpow2.f32 %v1060_v25  ;;  %v1064_v37 = vsub.f32 0.0, %v977_v31  ;;  %v1037_v27 = vadd.f32 %v1036_v63, %v5718_v52 }
 0x264   :  { %v1016_v51 = vpop.f32.mrf.mxu1 }
 0x265   :  { %v1065_v39 = vmul.f32 1.442695, %v1064_v37  ;;  %v1057_v57 = vadd.f32 %v1056_v33, %v1037_v27  ;;  %v1017_v43 = vadd.f32 %v1016_v51, %v997_v56 }
 0x267   :  { %3518 = vpow2.f32 %v1065_v39  ;;  %v1070_v10 = vsub.f32 0.0, %v1057_v57 }
 0x269   :  { %v3517_v29 = vpop.eup %3516  ;;  %v1071_v9 = vmul.f32 1.442695, %v1070_v10 }
 0x26a   :  { %v1062_v35 = vadd.f32 1.0, %v3517_v29  ;;  %v1158_v56 = vpop.f32.mrf.mxu3 }
 0x26c   :  { %3520 = vrcp.f32 %v1062_v35 }
 0x26d   :  { %v3519_v54 = vpop.eup %3518  ;;  %3522 = vtanh.f32 %v1017_v43 }
 0x26e   :  { %v1067_v25 = vadd.f32 1.0, %v3519_v54 }
 0x270   :  { %3524 = vrcp.f32 %v1067_v25 }
 0x271   :  { %3526 = vpow2.f32 %v1071_v9  ;;  %v1098_v27 = vpop.f32.mrf.mxu0  ;;  %v10062_v9 = vld [vmem:[#allocation92_spill] sm:$0xff] }
 0x272   :  { %v3521_v31 = vpop.eup %3520  ;;  %v1099_v51 = vadd.f32 %v1098_v27, %v9846_v15  ;;  %v10066_v27 = vld [vmem:[#allocation95_spill] sm:$0xff] }
 0x273   :  { %v3523_v39 = vpop.eup %3522 }
 0x274   :  { %v1076_v63 = vmul.f32 %v3523_v39, %v3521_v31 }
 0x276   :  { %v3525_v37 = vpop.eup %3524 }
 0x277   :  { %v3527_v14 = vpop.eup %3526  ;;  %v1075_v49 = vmul.f32 %v3525_v37, %v5722_v41  ;;  %v1138_v33 = vpop.f32.mrf.mxu2  ;;  %v10063_v37 = vld [vmem:[#allocation23_spill] sm:$0xff] }
 0x278   :  { %v1073_v21 = vadd.f32 1.0, %v3527_v14  ;;  %v1139_v29 = vadd.f32 %v1138_v33, %v9847_v18  ;;  %v1118_v41 = vpop.f32.mrf.mxu1 }
 0x279   :  { %v6397_v52 = vadd.f32 %v1076_v63, %v1075_v49  ;;  %v1119_v35 = vadd.f32 %v1118_v41, %v1099_v51  ;;  %v10064_v49 = vld [vmem:[#allocation54_spill] sm:$0xff]  ;;  %v10071_v51 = vld [vmem:[#allocation99_spill] sm:$0xff] }
 0x27a   :  { %3528 = vrcp.f32 %v1073_v21  ;;  %v1159_v10 = vadd.f32 %v1158_v56, %v1139_v29  ;;  %v10065_v21 = vld [vmem:[#allocation55_spill] sm:$0xff]  ;;  %v10072_v29 = vld [vmem:[#allocation66_spill] sm:$0xff] }
 0x27b   :  { %3530 = vtanh.f32 %v6397_v52  ;;  %v1241_v25 = vsub.f32 0.0, %v1119_v35  ;;  %v10074_v56 = vld [vmem:[#allocation70_spill] sm:$0xff] }
 0x280   :  { %v3529_v57 = vpop.eup %3528 }
 0x281   :  { %v3531_v54 = vpop.eup %3530 }
 0x282   :  { %v6400_v43 = vmul.f32 %v3531_v54, %v3529_v57  ;;  %v10067_v54 = vld [vmem:[#allocation58_spill] sm:$0xff] }
 0x284   :  { %1298 = vmatmul.f32.vlgmr.msra.gmra.mxu1 %v6400_v43  ;;  %1338 = vmatmul.f32.vlgmr.msra.gmra.mxu3 %v6400_v43 }
 0x285   :  { %1464 = vmatpush.msra.mxu1 %v5731_v22  ;;  %1504 = vmatpush.msra.mxu3 %v5734_v24  ;;  %v1246_v22 = vsub.f32 0.0, %v1159_v10  ;;  %v1242_v24 = vmul.f32 1.442695, %v1241_v25  ;;  %v10075_v25 = vld [vmem:[#allocation72_spill] sm:$0xff] }
 0x287   :  { %1465 = vmatpush.msra.mxu1 %v5737_v28  ;;  %1505 = vmatpush.msra.mxu3 %v5740_v32  ;;  %v1247_v28 = vmul.f32 1.442695, %v1246_v22  ;;  %3532 = vpow2.f32 %v1242_v24  ;;  %v6468_v22 = vld [vmem:[#allocation3 + $0x1e0] sm:$0xff]  ;;  %v6471_v24 = vld [vmem:[#allocation3 + $0x1e8] sm:$0xff] }
 0x289   :  { %1466 = vmatpush.msra.mxu1 %v5743_v40  ;;  %1506 = vmatpush.msra.mxu3 %v5746_v42  ;;  %3534 = vpow2.f32 %v1247_v28  ;;  %v6474_v28 = vld [vmem:[#allocation3 + $0x1c0] sm:$0xff] }
 0x28b   :  { %1467 = vmatpush.msra.mxu1 %v5749_v44  ;;  %1507 = vmatpush.msra.mxu3 %v5752_v50  ;;  %v1198_v50 = vpop.f32.mrf.mxu1 }
 0x28c   :  { %1378 = vmatmul.f32.vlgmr.msrb.gmra.mxu1 %v6400_v43  ;;  %1418 = vmatmul.f32.vlgmr.msrb.gmra.mxu3 %v6400_v43 }
 0x28d   :  { %1468 = vmatpush.msra.mxu1 %v5757_v60  ;;  %1508 = vmatpush.msra.mxu3 %v5760_v2  ;;  %v3533_v32 = vpop.eup %3532 }
 0x28e   :  { %v1244_v60 = vadd.f32 1.0, %v3533_v32  ;;  %v6486_v32 = vld [vmem:[#allocation3 + $0x1a8] sm:$0xff] }
 0x28f   :  { %1469 = vmatpush.msra.mxu1 %v5763_v7  ;;  %1509 = vmatpush.msra.mxu3 %v5766_v19  ;;  %v3535_v42 = vpop.eup %3534 }
 0x290   :  { %v1249_v7 = vadd.f32 1.0, %v3535_v42  ;;  %v6494_v42 = vld [vmem:[#allocation3 + $0x188] sm:$0xff] }
 0x291   :  { %1470 = vmatpush.msra.mxu1 %v5769_v8  ;;  %1510 = vmatpush.msra.mxu3 %v5772_v55  ;;  %v1178_v40 = vpop.f32.mrf.mxu0  ;;  %v10054_v8 = vld [vmem:[#allocation86_spill] sm:$0xff] }
 0x292   :  { %v1179_v44 = vadd.f32 %v1178_v40, %v9848_v5  ;;  %v6490_v40 = vld [vmem:[#allocation3 + $0x180] sm:$0xff] }
 0x293   :  { %1471 = vmatpush.msra.mxu1 %v5775_v17  ;;  %1511 = vmatpush.msra.mxu3 %v5778_v0  ;;  %v1238_v17 = vpop.f32.mrf.mxu3  ;;  %v10055_v0 = vld [vmem:[#allocation73_spill] sm:$0xff] }
 0x294   :  { %v1199_v2 = vadd.f32 %v1198_v50, %v1179_v44  ;;  %v6501_v44 = vld [vmem:[#allocation3 + $0x168] sm:$0xff]  ;;  %v10079_v50 = vld [vmem:[#allocation81_spill] sm:$0xff] }
 0x295   :  { %1472 = vmatpush.msra.mxu1 %v5781_v61  ;;  %1512 = vmatpush.msra.mxu3 %v5784_v1  ;;  %v10056_v61 = vld [vmem:[#allocation90_spill] sm:$0xff] }
 0x296   :  { %3536 = vtanh.f32 %v1199_v2  ;;  %v6509_v2 = vld [vmem:[#allocation3 + $0x148] sm:$0xff] }
 0x297   :  { %1473 = vmatpush.msra.mxu1 %v5787_v45  ;;  %1513 = vmatpush.msra.mxu3 %v5790_v53  ;;  %v1218_v19 = vpop.f32.mrf.mxu2  ;;  %3538 = vrcp.f32 %v1244_v60  ;;  %v10057_v45 = vld [vmem:[#allocation76_spill] sm:$0xff]  ;;  %v6506_v60 = vld [vmem:[#allocation3 + $0x140] sm:$0xff] }
 0x298   :  { %v1219_v55 = vadd.f32 %v1218_v19, %v9850_v47  ;;  %3540 = vrcp.f32 %v1249_v7  ;;  %v10058_v53 = vld [vmem:[#allocation80_spill] sm:$0xff]  ;;  %v10080_v7 = vld [vmem:[#allocation83_spill] sm:$0xff]  ;;  %v10081_v19 = vld [vmem:[#allocation85_spill] sm:$0xff] }
 0x299   :  { %1474 = vmatpush.msra.mxu1 %v5794_v62  ;;  %1514 = vmatpush.msra.mxu3 %v5797_v12  ;;  %v10059_v12 = vld [vmem:[#allocation84_spill] sm:$0xff] }
 0x29a   :  { %v1239_v1 = vadd.f32 %v1238_v17, %v1219_v55  ;;  %v6517_v55 = vld [vmem:[#allocation3 + $0x128] sm:$0xff]  ;;  %v10082_v17 = vld [vmem:[#allocation87_spill] sm:$0xff] }
 0x29b   :  { %1475 = vmatpush.msra.mxu1 %v5800_v11  ;;  %1515 = vmatpush.msra.mxu3 %v5803_v16  ;;  %v10060_v11 = vld [vmem:[#allocation88_spill] sm:$0xff] }
 0x29c   :  { %v1252_v62 = vsub.f32 0.0, %v1239_v1  ;;  %v3537_v16 = vpop.eup %3536  ;;  %v6525_v1 = vld [vmem:[#allocation3 + $0x108] sm:$0xff] }
 0x29d   :  { %1476 = vmatpush.msra.mxu1 %v5806_v34  ;;  %1516 = vmatpush.msra.mxu3 %v5809_v36  ;;  %v3539_v34 = vpop.eup %3538 }
 0x29e   :  { %v1253_v36 = vmul.f32 1.442695, %v1252_v62  ;;  %v3541_v31 = vpop.eup %3540  ;;  %v1258_v39 = vmul.f32 %v3539_v34, %v3537_v16  ;;  %v6530_v62 = vld [vmem:[#allocation3 + $0xe0] sm:$0xff]  ;;  %v10087_v16 = vld [vmem:[#allocation96_spill] sm:$0xff] }
 0x29f   :  { %1477 = vmatpush.msra.mxu1 %v5812_v58  ;;  %1517 = vmatpush.msra.mxu3 %v10054_v8  ;;  %v10061_v58 = vld [vmem:[#allocation20_spill] sm:$0xff]  ;;  %v1257_v14 = vmul.f32 %v3541_v31, %v5862_v23  ;;  %v10069_v23 = vld [vmem:[#allocation62_spill] sm:$0xff]  ;;  %v6514_v8 = vld [vmem:[#allocation3 + $0x120] sm:$0xff] }
 0x2a0   :  { %3542 = vpow2.f32 %v1253_v36  ;;  %v6538_v34 = vld [vmem:[#allocation3 + $0xc0] sm:$0xff]  ;;  %v6541_v36 = vld [vmem:[#allocation3 + $0xc8] sm:$0xff] }
 0x2a1   :  { %1478 = vmatpush.msra.mxu1 %v10055_v0  ;;  %1518 = vmatpush.msra.mxu3 %v10056_v61  ;;  %v6451_v63 = vadd.f32 %v1258_v39, %v1257_v14  ;;  %v10083_v0 = vld [vmem:[#allocation89_spill] sm:$0xff]  ;;  %v6549_v39 = vld [vmem:[#allocation3 + $0xa8] sm:$0xff]  ;;  %v10091_v14 = vld [vmem:[#allocation103_spill] sm:$0xff] }
 0x2a2   :  { %v6522_v61 = vld [vmem:[#allocation3 + $0x100] sm:$0xff] }
 0x2a3   :  { %1479 = vmatpush.msra.mxu1 %v10057_v45  ;;  %1519 = vmatpush.msra.mxu3 %v10058_v53  ;;  %3544 = vtanh.f32 %v6451_v63  ;;  %v10084_v45 = vld [vmem:[#allocation91_spill] sm:$0xff]  ;;  %v10085_v53 = vld [vmem:[#allocation93_spill] sm:$0xff] }
 0x2a4   :  { %v6546_v31 = vld [vmem:[#allocation3 + $0xa0] sm:$0xff] }
 0x2a5   :  { %1544 = vmatpush.msrb.mxu1 %v10059_v12  ;;  %1584 = vmatpush.msrb.mxu3 %v10060_v11  ;;  %v6533_v12 = vld [vmem:[#allocation3 + $0xe8] sm:$0xff] }
 0x2a6   :  { %v3543_v57 = vpop.eup %3542  ;;  %v10086_v11 = vld [vmem:[#allocation94_spill] sm:$0xff] }
 0x2a7   :  { %1545 = vmatpush.msrb.mxu1 %v10061_v58  ;;  %1585 = vmatpush.msrb.mxu3 %v10062_v9  ;;  %v1255_v33 = vadd.f32 1.0, %v3543_v57  ;;  %v10088_v58 = vld [vmem:[#allocation97_spill] sm:$0xff]  ;;  %v10089_v9 = vld [vmem:[#allocation98_spill] sm:$0xff]  ;;  %v10092_v57 = vld [vmem:[#allocation104_spill] sm:$0xff] }
 0x2a9   :  { %1546 = vmatpush.msrb.mxu1 %v10063_v37  ;;  %1586 = vmatpush.msrb.mxu3 %v5846_v26  ;;  %v10068_v26 = vld [vmem:[#allocation59_spill] sm:$0xff]  ;;  %3546 = vrcp.f32 %v1255_v33  ;;  %v3545_v41 = vpop.eup %3544  ;;  %v10090_v37 = vld [vmem:[#allocation102_spill] sm:$0xff] }
 0x2aa   :  { %v6565_v33 = vld [vmem:[#allocation3 + $0x68] sm:$0xff] }
 0x2ab   :  { %1547 = vmatpush.msrb.mxu1 %v5849_v20  ;;  %1587 = vmatpush.msrb.mxu3 %v10064_v49  ;;  %v10070_v20 = vld [vmem:[#allocation63_spill] sm:$0xff]  ;;  %v6554_v49 = vld [vmem:[#allocation3 + $0x80] sm:$0xff] }
 0x2ad   :  { %1548 = vmatpush.msrb.mxu1 %v10065_v21  ;;  %1588 = vmatpush.msrb.mxu3 %v5859_v13  ;;  %v10073_v13 = vld [vmem:[#allocation67_spill] sm:$0xff]  ;;  %v6557_v21 = vld [vmem:[#allocation3 + $0x88] sm:$0xff] }
 0x2af   :  { %1549 = vmatpush.msrb.mxu1 %v10066_v27  ;;  %1589 = vmatpush.msrb.mxu3 %v10067_v54  ;;  %v3547_v35 = vpop.eup %3546  ;;  %v10093_v27 = vld [vmem:[#allocation105_spill] sm:$0xff] }
 0x2b0   :  { %v1261_v10 = vmul.f32 %v3547_v35, %v3545_v41  ;;  %v6562_v54 = vld [vmem:[#allocation3 + $0x60] sm:$0xff] }
 0x2b1   :  { %1550 = vmatpush.msrb.mxu1 %v10068_v26  ;;  %1590 = vmatpush.msrb.mxu3 %v10069_v23  ;;  %v10094_v26 = vld [vmem:[#allocation9_spill] sm:$0xff]  ;;  %v10095_v23 = vld [vmem:[#allocation12_spill] sm:$0xff] }
 0x2b2   :  { %1278 = vmatmul.f32.vlgmr.msra.gmra.mxu0 %v1261_v10  ;;  %1318 = vmatmul.f32.vlgmr.msra.gmra.mxu2 %v1261_v10  ;;  %v6578_v41 = vld [vmem:[#allocation3 + $0x20] sm:$0xff] }
 0x2b3   :  { %1551 = vmatpush.msrb.mxu1 %v10070_v20  ;;  %1591 = vmatpush.msrb.mxu3 %v10071_v51  ;;  %v6570_v20 = vld [vmem:[#allocation3 + $0x40] sm:$0xff]  ;;  %v6573_v51 = vld [vmem:[#allocation3 + $0x48] sm:$0xff] }
 0x2b4   :  { %1444 = vmatpush.msra.mxu0 %v6468_v22  ;;  %1480 = vmatmul.f32.vlgmr.msra.gmra.mxu1 %v1261_v10  ;;  %v6587_v35 = vld [vmem:[%s8890_s0 + $0x3] sm:$0x1] }
 0x2b5   :  { %1552 = vmatpush.msrb.mxu1 %v10072_v29  ;;  %1592 = vmatpush.msrb.mxu3 %v10073_v13  ;;  %v10096_v29 = vld [vmem:[#allocation10_spill] sm:$0xff] }
 0x2b6   :  { %1484 = vmatpush.msra.mxu2 %v6471_v24  ;;  %1520 = vmatmul.f32.vlgmr.msra.gmra.mxu3 %v1261_v10  ;;  %v10097_v13 = vld [vmem:[#allocation14_spill] sm:$0xff] }
 0x2b7   :  { %1553 = vmatpush.msrb.mxu1 %v10074_v56  ;;  %1593 = vmatpush.msrb.mxu3 %v5892_v46  ;;  %v6482_v46 = vld [vmem:[#allocation3 + $0x1a0] sm:$0xff]  ;;  %v6581_v56 = vld [vmem:[#allocation3 + $0x28] sm:$0xff] }
 0x2b8   :  { %1445 = vmatpush.msra.mxu0 %v6474_v28 }
 0x2b9   :  { %1554 = vmatpush.msrb.mxu1 %v5895_v6  ;;  %1594 = vmatpush.msrb.mxu3 %v10075_v25  ;;  %v6478_v6 = vld [vmem:[#allocation3 + $0x1c8] sm:$0xff]  ;;  %v10099_v25 = vld [vmem:[#allocation100_spill] sm:$0xff] }
 0x2ba   :  { %1485 = vmatpush.msra.mxu2 %v6478_v6  ;;  %1446 = vmatpush.msra.mxu0 %v6482_v46 }
 0x2bb   :  { %1555 = vmatpush.msrb.mxu1 %v5901_v4  ;;  %1595 = vmatpush.msrb.mxu3 %v5904_v3  ;;  %v10076_v4 = vld [vmem:[#allocation74_spill] sm:$0xff]  ;;  %v10077_v3 = vld [vmem:[#allocation77_spill] sm:$0xff] }
 0x2bc   :  { %1486 = vmatpush.msra.mxu2 %v6486_v32  ;;  %1447 = vmatpush.msra.mxu0 %v6490_v40 }
 0x2bd   :  { %1556 = vmatpush.msrb.mxu1 %v5910_v59  ;;  %1596 = vmatpush.msrb.mxu3 %v5914_v38  ;;  %v6498_v59 = vld [vmem:[#allocation3 + $0x160] sm:$0xff]  ;;  %v10078_v38 = vld [vmem:[#allocation79_spill] sm:$0xff] }
 0x2be   :  { %1487 = vmatpush.msra.mxu2 %v6494_v42  ;;  %1358 = vmatmul.f32.vlgmr.msrb.gmra.mxu0 %v1261_v10 }
 0x2bf   :  { %1557 = vmatpush.msrb.mxu1 %v10076_v4  ;;  %1597 = vmatpush.msrb.mxu3 %v10077_v3  ;;  %v6591_v4 = vld [vmem:[#allocation3] sm:$0xff]  ;;  %v6594_v3 = vld [vmem:[#allocation3 + $0x8] sm:$0xff] }
 0x2c0   :  { %1398 = vmatmul.f32.vlgmr.msrb.gmra.mxu2 %v1261_v10  ;;  %1448 = vmatpush.msra.mxu0 %v6498_v59 }
 0x2c1   :  { %1488 = vmatpush.msra.mxu2 %v6501_v44  ;;  %1558 = vmatpush.msrb.mxu1 %v10078_v38  ;;  %v6599_v38 = vld [vmem:[#allocation3 + $0x1f0] sm:$0xff] }
 0x2c2   :  { %1598 = vmatpush.msrb.mxu3 %v10079_v50  ;;  %1449 = vmatpush.msra.mxu0 %v6506_v60  ;;  %v6602_v50 = vld [vmem:[#allocation3 + $0x1f8] sm:$0xff] }
 0x2c3   :  { %1489 = vmatpush.msra.mxu2 %v6509_v2  ;;  %1559 = vmatpush.msrb.mxu1 %v10080_v7  ;;  %v10100_v7 = vld [vmem:[#allocation13_spill] sm:$0xff] }
 0x2c4   :  { %1599 = vmatpush.msrb.mxu3 %v10081_v19  ;;  %1560 = vmatmul.f32.vlgmr.msrb.gmra.mxu1 %v1261_v10  ;;  %v10101_v19 = vld [vmem:[#allocation18_spill] sm:$0xff] }
 0x2c5   :  { %1600 = vmatmul.f32.vlgmr.msrb.gmra.mxu3 %v1261_v10  ;;  %1450 = vmatpush.msra.mxu0 %v6514_v8  ;;  %v10098_v10 = vld [vmem:[#allocation101_spill] sm:$0xff] }
 0x2c6   :  { %1490 = vmatpush.msra.mxu2 %v6517_v55  ;;  %1645 = vmatpush.msra.mxu1 %v10082_v17  ;;  %v6607_v17 = vld [vmem:[#allocation3 + $0x1d0] sm:$0xff] }
 0x2c7   :  { %1685 = vmatpush.msra.mxu3 %v10083_v0  ;;  %1451 = vmatpush.msra.mxu0 %v6522_v61  ;;  %v6610_v0 = vld [vmem:[#allocation3 + $0x1d8] sm:$0xff] }
 0x2c8   :  { %1491 = vmatpush.msra.mxu2 %v6525_v1  ;;  %1646 = vmatpush.msra.mxu1 %v10084_v45  ;;  %10102 = vst [vmem:[#allocation86_spill] sm:$0xff] %v6610_v0  ;;  %v10103_v45 = vld [vmem:[#allocation15_spill] sm:$0xff] }
 0x2c9   :  { %1686 = vmatpush.msra.mxu3 %v10085_v53  ;;  %1452 = vmatpush.msra.mxu0 %v6530_v62  ;;  %v10104_v53 = vld [vmem:[#allocation21_spill] sm:$0xff] }
 0x2ca   :  { %1492 = vmatpush.msra.mxu2 %v6533_v12  ;;  %1647 = vmatpush.msra.mxu1 %v10086_v11  ;;  %v6615_v11 = vld [vmem:[#allocation3 + $0x1b0] sm:$0xff] }
 0x2cb   :  { %1687 = vmatpush.msra.mxu3 %v10087_v16  ;;  %1453 = vmatpush.msra.mxu0 %v6538_v34  ;;  %10105 = vst [vmem:[#allocation73_spill] sm:$0xff] %v6615_v11  ;;  %v6618_v16 = vld [vmem:[#allocation3 + $0x1b8] sm:$0xff] }
 0x2cc   :  { %1493 = vmatpush.msra.mxu2 %v6541_v36  ;;  %1648 = vmatpush.msra.mxu1 %v10088_v58  ;;  %10106 = vst [vmem:[#allocation90_spill] sm:$0xff] %v6618_v16  ;;  %v10107_v58 = vld [vmem:[#allocation17_spill] sm:$0xff] }
 0x2cd   :  { %1688 = vmatpush.msra.mxu3 %v10089_v9  ;;  %1454 = vmatpush.msra.mxu0 %v6546_v31  ;;  %v10108_v9 = vld [vmem:[#allocation24_spill] sm:$0xff] }
 0x2ce   :  { %1494 = vmatpush.msra.mxu2 %v6549_v39  ;;  %1649 = vmatpush.msra.mxu1 %v10090_v37  ;;  %v6623_v37 = vld [vmem:[#allocation3 + $0x190] sm:$0xff] }
 0x2cf   :  { %1689 = vmatpush.msra.mxu3 %v10091_v14  ;;  %1455 = vmatpush.msra.mxu0 %v6554_v49  ;;  %10109 = vst [vmem:[#allocation76_spill] sm:$0xff] %v6623_v37  ;;  %v6626_v14 = vld [vmem:[#allocation3 + $0x198] sm:$0xff] }
 0x2d0   :  { %1495 = vmatpush.msra.mxu2 %v6557_v21  ;;  %1650 = vmatpush.msra.mxu1 %v10092_v57  ;;  %10110 = vst [vmem:[#allocation80_spill] sm:$0xff] %v6626_v14  ;;  %v10111_v57 = vld [vmem:[#allocation26_spill] sm:$0xff] }
 0x2d1   :  { %1690 = vmatpush.msra.mxu3 %v10093_v27  ;;  %1456 = vmatpush.msra.mxu0 %v6562_v54  ;;  %v10112_v27 = vld [vmem:[#allocation28_spill] sm:$0xff] }
 0x2d2   :  { %1496 = vmatpush.msra.mxu2 %v6565_v33  ;;  %1651 = vmatpush.msra.mxu1 %v10094_v26  ;;  %v6631_v26 = vld [vmem:[#allocation3 + $0x170] sm:$0xff] }
 0x2d3   :  { %1691 = vmatpush.msra.mxu3 %v10095_v23  ;;  %1457 = vmatpush.msra.mxu0 %v6570_v20  ;;  %10113 = vst [vmem:[#allocation84_spill] sm:$0xff] %v6631_v26  ;;  %v6634_v23 = vld [vmem:[#allocation3 + $0x178] sm:$0xff] }
 0x2d4   :  { %1497 = vmatpush.msra.mxu2 %v6573_v51  ;;  %1652 = vmatpush.msra.mxu1 %v10096_v29  ;;  %10114 = vst [vmem:[#allocation88_spill] sm:$0xff] %v6634_v23  ;;  %v10115_v29 = vld [vmem:[#allocation19_spill] sm:$0xff] }
 0x2d5   :  { %1692 = vmatpush.msra.mxu3 %v10097_v13  ;;  %1458 = vmatpush.msra.mxu0 %v6578_v41  ;;  %v10116_v13 = vld [vmem:[#allocation30_spill] sm:$0xff] }
 0x2d6   :  { %1498 = vmatpush.msra.mxu2 %v6581_v56  ;;  %1653 = vmatpush.msra.mxu1 %v10098_v10  ;;  %v6639_v10 = vld [vmem:[#allocation3 + $0x150] sm:$0xff] }
 0x2d7   :  { %1693 = vmatpush.msra.mxu3 %v10099_v25  ;;  %1459 = vmatpush.msra.mxu0 %v6591_v4  ;;  %10117 = vst [vmem:[#allocation20_spill] sm:$0xff] %v6639_v10  ;;  %v6642_v25 = vld [vmem:[#allocation3 + $0x158] sm:$0xff] }
 0x2d8   :  { %1499 = vmatpush.msra.mxu2 %v6594_v3  ;;  %1460 = vmatmul.f32.vlgmr.msra.gmra.mxu0 %v6587_v35  ;;  %10118 = vst [vmem:[#allocation92_spill] sm:$0xff] %v6642_v25 }
 0x2d9   :  { %1500 = vmatmul.f32.vlgmr.msra.gmra.mxu2 %v6587_v35  ;;  %1524 = vmatpush.msrb.mxu0 %v6599_v38 }
 0x2da   :  { %1564 = vmatpush.msrb.mxu2 %v6602_v50  ;;  %1654 = vmatpush.msra.mxu1 %v10100_v7  ;;  %v10119_v7 = vld [vmem:[#allocation22_spill] sm:$0xff] }
 0x2db   :  { %1694 = vmatpush.msra.mxu3 %v10101_v19  ;;  %1525 = vmatpush.msrb.mxu0 %v6607_v17  ;;  %v10120_v19 = vld [vmem:[#allocation32_spill] sm:$0xff] }
 0x2dc   :  { %1565 = vmatpush.msrb.mxu2 %v6610_v0  ;;  %1655 = vmatpush.msra.mxu1 %v10103_v45  ;;  %v6647_v45 = vld [vmem:[#allocation3 + $0x130] sm:$0xff] }
 0x2dd   :  { %1695 = vmatpush.msra.mxu3 %v10104_v53  ;;  %1526 = vmatpush.msrb.mxu0 %v6615_v11  ;;  %10121 = vst [vmem:[#allocation23_spill] sm:$0xff] %v6647_v45  ;;  %v6650_v53 = vld [vmem:[#allocation3 + $0x138] sm:$0xff] }
 0x2de   :  { %1566 = vmatpush.msrb.mxu2 %v6618_v16  ;;  %1656 = vmatpush.msra.mxu1 %v10107_v58  ;;  %10122 = vst [vmem:[#allocation54_spill] sm:$0xff] %v6650_v53  ;;  %v10123_v58 = vld [vmem:[#allocation25_spill] sm:$0xff] }
 0x2df   :  { %1696 = vmatpush.msra.mxu3 %v10108_v9  ;;  %1527 = vmatpush.msrb.mxu0 %v6623_v37  ;;  %v10124_v9 = vld [vmem:[#allocation34_spill] sm:$0xff] }
 0x2e0   :  { %1567 = vmatpush.msrb.mxu2 %v6626_v14  ;;  %1657 = vmatpush.msra.mxu1 %v10111_v57  ;;  %v6655_v57 = vld [vmem:[#allocation3 + $0x110] sm:$0xff] }
 0x2e1   :  { %1697 = vmatpush.msra.mxu3 %v10112_v27  ;;  %1528 = vmatpush.msrb.mxu0 %v6631_v26  ;;  %10125 = vst [vmem:[#allocation55_spill] sm:$0xff] %v6655_v57  ;;  %v6658_v27 = vld [vmem:[#allocation3 + $0x118] sm:$0xff] }
 0x2e2   :  { %1568 = vmatpush.msrb.mxu2 %v6634_v23  ;;  %1658 = vmatpush.msra.mxu1 %v10115_v29  ;;  %10126 = vst [vmem:[#allocation95_spill] sm:$0xff] %v6658_v27  ;;  %v10127_v29 = vld [vmem:[#allocation27_spill] sm:$0xff] }
 0x2e3   :  { %1698 = vmatpush.msra.mxu3 %v10116_v13  ;;  %1529 = vmatpush.msrb.mxu0 %v6639_v10  ;;  %v10128_v13 = vld [vmem:[#allocation36_spill] sm:$0xff] }
 0x2e4   :  { %1569 = vmatpush.msrb.mxu2 %v6642_v25  ;;  %1659 = vmatpush.msra.mxu1 %v10119_v7  ;;  %v6663_v7 = vld [vmem:[#allocation3 + $0xf0] sm:$0xff]  ;;  %v10236_v10 = vld [vmem:[#allocation168_spill] sm:$0xff] }
 0x2e5   :  { %1699 = vmatpush.msra.mxu3 %v10120_v19  ;;  %1530 = vmatpush.msrb.mxu0 %v6647_v45  ;;  %10129 = vst [vmem:[#allocation58_spill] sm:$0xff] %v6663_v7  ;;  %v6666_v19 = vld [vmem:[#allocation3 + $0xf8] sm:$0xff]  ;;  %v10168_v45 = vld [vmem:[#allocation71_spill] sm:$0xff] }
 0x2e6   :  { %1570 = vmatpush.msrb.mxu2 %v6650_v53  ;;  %1660 = vmatpush.msra.mxu1 %v10123_v58  ;;  %10130 = vst [vmem:[#allocation59_spill] sm:$0xff] %v6666_v19  ;;  %v10131_v58 = vld [vmem:[#allocation29_spill] sm:$0xff]  ;;  %v6712_v53 = vld [vmem:[#allocation3 + $0x38] sm:$0xff] }
 0x2e7   :  { %1700 = vmatpush.msra.mxu3 %v10124_v9  ;;  %1531 = vmatpush.msrb.mxu0 %v6655_v57  ;;  %v10132_v9 = vld [vmem:[#allocation38_spill] sm:$0xff]  ;;  %v6671_v57 = vld [vmem:[#allocation3 + $0xd0] sm:$0xff]  ;;  %10154 = vst [vmem:[#allocation81_spill] sm:$0xff] %v6712_v53 }
 0x2e8   :  { %1571 = vmatpush.msrb.mxu2 %v6658_v27  ;;  %1725 = vmatpush.msrb.mxu1 %v10127_v29  ;;  %10133 = vst [vmem:[#allocation62_spill] sm:$0xff] %v6671_v57  ;;  %v6674_v27 = vld [vmem:[#allocation3 + $0xd8] sm:$0xff]  ;;  %v10135_v29 = vld [vmem:[#allocation31_spill] sm:$0xff] }
 0x2e9   :  { %1765 = vmatpush.msrb.mxu3 %v10128_v13  ;;  %1532 = vmatpush.msrb.mxu0 %v6663_v7  ;;  %10134 = vst [vmem:[#allocation63_spill] sm:$0xff] %v6674_v27  ;;  %v10136_v13 = vld [vmem:[#allocation40_spill] sm:$0xff]  ;;  %v6679_v7 = vld [vmem:[#allocation3 + $0xb0] sm:$0xff] }
 0x2ea   :  { %1572 = vmatpush.msrb.mxu2 %v6666_v19  ;;  %1726 = vmatpush.msrb.mxu1 %v10131_v58  ;;  %10137 = vst [vmem:[#allocation99_spill] sm:$0xff] %v6679_v7  ;;  %v6682_v19 = vld [vmem:[#allocation3 + $0xb8] sm:$0xff]  ;;  %v10139_v58 = vld [vmem:[#allocation33_spill] sm:$0xff] }
 0x2eb   :  { %1766 = vmatpush.msrb.mxu3 %v10132_v9  ;;  %1533 = vmatpush.msrb.mxu0 %v6671_v57  ;;  %10138 = vst [vmem:[#allocation66_spill] sm:$0xff] %v6682_v19  ;;  %v10140_v9 = vld [vmem:[#allocation42_spill] sm:$0xff]  ;;  %v6687_v57 = vld [vmem:[#allocation3 + $0x90] sm:$0xff] }
 0x2ec   :  { %1573 = vmatpush.msrb.mxu2 %v6674_v27  ;;  %1727 = vmatpush.msrb.mxu1 %v10135_v29  ;;  %10141 = vst [vmem:[#allocation67_spill] sm:$0xff] %v6687_v57  ;;  %v6690_v27 = vld [vmem:[#allocation3 + $0x98] sm:$0xff]  ;;  %v10143_v29 = vld [vmem:[#allocation35_spill] sm:$0xff] }
 0x2ed   :  { %1767 = vmatpush.msrb.mxu3 %v10136_v13  ;;  %1534 = vmatpush.msrb.mxu0 %v6679_v7  ;;  %10142 = vst [vmem:[#allocation70_spill] sm:$0xff] %v6690_v27  ;;  %v10144_v13 = vld [vmem:[#allocation44_spill] sm:$0xff]  ;;  %v6695_v7 = vld [vmem:[#allocation3 + $0x70] sm:$0xff] }
 0x2ee   :  { %1574 = vmatpush.msrb.mxu2 %v6682_v19  ;;  %1728 = vmatpush.msrb.mxu1 %v10139_v58  ;;  %10145 = vst [vmem:[#allocation72_spill] sm:$0xff] %v6695_v7  ;;  %v6698_v19 = vld [vmem:[#allocation3 + $0x78] sm:$0xff]  ;;  %v10147_v58 = vld [vmem:[#allocation37_spill] sm:$0xff] }
 0x2ef   :  { %1768 = vmatpush.msrb.mxu3 %v10140_v9  ;;  %1535 = vmatpush.msrb.mxu0 %v6687_v57  ;;  %10146 = vst [vmem:[#allocation74_spill] sm:$0xff] %v6698_v19  ;;  %v10148_v9 = vld [vmem:[#allocation46_spill] sm:$0xff]  ;;  %v6703_v57 = vld [vmem:[#allocation3 + $0x50] sm:$0xff] }
 0x2f0   :  { %1575 = vmatpush.msrb.mxu2 %v6690_v27  ;;  %1729 = vmatpush.msrb.mxu1 %v10143_v29  ;;  %10149 = vst [vmem:[#allocation77_spill] sm:$0xff] %v6703_v57  ;;  %v6706_v27 = vld [vmem:[#allocation3 + $0x58] sm:$0xff]  ;;  %v10151_v29 = vld [vmem:[#allocation39_spill] sm:$0xff] }
 0x2f1   :  { %1769 = vmatpush.msrb.mxu3 %v10144_v13  ;;  %1536 = vmatpush.msrb.mxu0 %v6695_v7  ;;  %10150 = vst [vmem:[#allocation79_spill] sm:$0xff] %v6706_v27  ;;  %v10152_v13 = vld [vmem:[#allocation48_spill] sm:$0xff]  ;;  %v10153_v7 = vld [vmem:[#allocation41_spill] sm:$0xff] }
 0x2f2   :  { %1576 = vmatpush.msrb.mxu2 %v6698_v19  ;;  %1730 = vmatpush.msrb.mxu1 %v10147_v58  ;;  %v10155_v58 = vld [vmem:[#allocation50_spill] sm:$0xff]  ;;  %v10157_v19 = vld [vmem:[#allocation51_spill] sm:$0xff] }
 0x2f3   :  { %1770 = vmatpush.msrb.mxu3 %v10148_v9  ;;  %1537 = vmatpush.msrb.mxu0 %v6703_v57  ;;  %v10156_v9 = vld [vmem:[#allocation43_spill] sm:$0xff]  ;;  %v6718_v57 = vld [vmem:[#allocation3 + $0x18] sm:$0xff] }
 0x2f4   :  { %1577 = vmatpush.msrb.mxu2 %v6706_v27  ;;  %1731 = vmatpush.msrb.mxu1 %v10151_v29  ;;  %10158 = vst [vmem:[#allocation83_spill] sm:$0xff] %v6718_v57  ;;  %v10159_v29 = vld [vmem:[#allocation45_spill] sm:$0xff]  ;;  %v10166_v27 = vld [vmem:[#allocation68_spill] sm:$0xff] }
 0x2f5   :  { %1771 = vmatpush.msrb.mxu3 %v10152_v13  ;;  %1538 = vmatpush.msrb.mxu0 %v10153_v7  ;;  %v10160_v7 = vld [vmem:[#allocation56_spill] sm:$0xff]  ;;  %v10161_v13 = vld [vmem:[#allocation47_spill] sm:$0xff] }
 0x2f6   :  { %1578 = vmatpush.msrb.mxu2 %v6712_v53  ;;  %1732 = vmatpush.msrb.mxu1 %v10155_v58  ;;  %v10162_v53 = vld [vmem:[#allocation60_spill] sm:$0xff]  ;;  %v10163_v58 = vld [vmem:[#allocation49_spill] sm:$0xff] }
 0x2f7   :  { %1772 = vmatpush.msrb.mxu3 %v10156_v9  ;;  %1539 = vmatpush.msrb.mxu0 %v10157_v19  ;;  %v10164_v9 = vld [vmem:[#allocation64_spill] sm:$0xff] }
 0x2f8   :  { %1579 = vmatpush.msrb.mxu2 %v6718_v57  ;;  %1540 = vmatmul.f32.vlgmr.msrb.gmra.mxu0 %v6587_v35  ;;  %v10165_v19 = vld [vmem:[#allocation52_spill] sm:$0xff]  ;;  %v10167_v57 = vld [vmem:[#allocation53_spill] sm:$0xff] }
 0x2f9   :  { %1580 = vmatmul.f32.vlgmr.msrb.gmra.mxu2 %v6587_v35  ;;  %1733 = vmatpush.msrb.mxu1 %v10159_v29  ;;  %v10169_v35 = vld [vmem:[#allocation57_spill] sm:$0xff]  ;;  %v10170_v29 = vld [vmem:[#allocation75_spill] sm:$0xff] }
 0x2fa   :  { %1773 = vmatpush.msrb.mxu3 %v10160_v7  ;;  %1625 = vmatpush.msra.mxu0 %v10161_v13  ;;  %v10171_v7 = vld [vmem:[#allocation61_spill] sm:$0xff]  ;;  %v10172_v13 = vld [vmem:[#allocation78_spill] sm:$0xff] }
 0x2fb   :  { %1665 = vmatpush.msra.mxu2 %v10162_v53  ;;  %1734 = vmatpush.msrb.mxu1 %v10163_v58  ;;  %v10173_v53 = vld [vmem:[#allocation106_spill] sm:$0xff]  ;;  %v10174_v58 = vld [vmem:[#allocation107_spill] sm:$0xff] }
 0x2fc   :  { %1774 = vmatpush.msrb.mxu3 %v10164_v9  ;;  %1626 = vmatpush.msra.mxu0 %v10165_v19  ;;  %v10175_v9 = vld [vmem:[#allocation108_spill] sm:$0xff]  ;;  %v10176_v19 = vld [vmem:[#allocation109_spill] sm:$0xff] }
 0x2fd   :  { %1666 = vmatpush.msra.mxu2 %v10166_v27  ;;  %1735 = vmatpush.msrb.mxu1 %v10167_v57  ;;  %v10177_v27 = vld [vmem:[#allocation110_spill] sm:$0xff]  ;;  %v10178_v57 = vld [vmem:[#allocation111_spill] sm:$0xff] }
 0x2fe   :  { %1775 = vmatpush.msrb.mxu3 %v10168_v45  ;;  %1627 = vmatpush.msra.mxu0 %v10169_v35  ;;  %v10179_v45 = vld [vmem:[#allocation112_spill] sm:$0xff]  ;;  %v10180_v35 = vld [vmem:[#allocation113_spill] sm:$0xff] }
 0x2ff   :  { %1667 = vmatpush.msra.mxu2 %v10170_v29  ;;  %1736 = vmatpush.msrb.mxu1 %v10171_v7  ;;  %v10181_v29 = vld [vmem:[#allocation114_spill] sm:$0xff]  ;;  %v10182_v7 = vld [vmem:[#allocation115_spill] sm:$0xff] }
 0x300   :  { %1776 = vmatpush.msrb.mxu3 %v10172_v13  ;;  %1628 = vmatpush.msra.mxu0 %v10173_v53  ;;  %v10183_v13 = vld [vmem:[#allocation116_spill] sm:$0xff]  ;;  %v10184_v53 = vld [vmem:[#allocation117_spill] sm:$0xff] }
 0x301   :  { %1668 = vmatpush.msra.mxu2 %v10174_v58  ;;  %1737 = vmatpush.msrb.mxu1 %v10175_v9  ;;  %v10185_v58 = vld [vmem:[#allocation118_spill] sm:$0xff]  ;;  %v10186_v9 = vld [vmem:[#allocation119_spill] sm:$0xff] }
 0x302   :  { %1777 = vmatpush.msrb.mxu3 %v10176_v19  ;;  %1629 = vmatpush.msra.mxu0 %v10177_v27  ;;  %v10187_v19 = vld [vmem:[#allocation120_spill] sm:$0xff]  ;;  %v10188_v27 = vld [vmem:[#allocation121_spill] sm:$0xff] }
 0x303   :  { %1669 = vmatpush.msra.mxu2 %v10178_v57  ;;  %1738 = vmatpush.msrb.mxu1 %v10179_v45  ;;  %v10189_v57 = vld [vmem:[#allocation122_spill] sm:$0xff]  ;;  %v10190_v45 = vld [vmem:[#allocation123_spill] sm:$0xff] }
 0x304   :  { %1778 = vmatpush.msrb.mxu3 %v10180_v35  ;;  %1630 = vmatpush.msra.mxu0 %v10181_v29  ;;  %v10191_v35 = vld [vmem:[#allocation124_spill] sm:$0xff]  ;;  %v10192_v29 = vld [vmem:[#allocation125_spill] sm:$0xff] }
 0x305   :  { %1670 = vmatpush.msra.mxu2 %v10182_v7  ;;  %1739 = vmatpush.msrb.mxu1 %v10183_v13  ;;  %v10193_v7 = vld [vmem:[#allocation126_spill] sm:$0xff]  ;;  %v10194_v13 = vld [vmem:[#allocation127_spill] sm:$0xff] }
 0x306   :  { %1779 = vmatpush.msrb.mxu3 %v10184_v53  ;;  %1631 = vmatpush.msra.mxu0 %v10185_v58  ;;  %v10195_v53 = vld [vmem:[#allocation128_spill] sm:$0xff]  ;;  %v10196_v58 = vld [vmem:[#allocation129_spill] sm:$0xff] }
 0x307   :  { %1671 = vmatpush.msra.mxu2 %v10186_v9  ;;  %1740 = vmatpush.msrb.mxu1 %v10187_v19  ;;  %v10197_v9 = vld [vmem:[#allocation130_spill] sm:$0xff]  ;;  %v10198_v19 = vld [vmem:[#allocation131_spill] sm:$0xff] }
 0x308   :  { %1780 = vmatpush.msrb.mxu3 %v10188_v27  ;;  %1632 = vmatpush.msra.mxu0 %v10189_v57  ;;  %v10199_v27 = vld [vmem:[#allocation132_spill] sm:$0xff]  ;;  %v10200_v57 = vld [vmem:[#allocation133_spill] sm:$0xff] }
 0x309   :  { %1672 = vmatpush.msra.mxu2 %v10190_v45  ;;  %v10201_v45 = vld [vmem:[#allocation134_spill] sm:$0xff] }
 0x30a   :  { %1633 = vmatpush.msra.mxu0 %v10191_v35  ;;  %v10202_v35 = vld [vmem:[#allocation135_spill] sm:$0xff] }
 0x30b   :  { %1673 = vmatpush.msra.mxu2 %v10192_v29  ;;  %v10203_v29 = vld [vmem:[#allocation136_spill] sm:$0xff] }
 0x30c   :  { %1634 = vmatpush.msra.mxu0 %v10193_v7  ;;  %v10204_v7 = vld [vmem:[#allocation137_spill] sm:$0xff] }
 0x30d   :  { %1674 = vmatpush.msra.mxu2 %v10194_v13  ;;  %v10205_v13 = vld [vmem:[#allocation138_spill] sm:$0xff] }
 0x30e   :  { %1635 = vmatpush.msra.mxu0 %v10195_v53  ;;  %v10206_v53 = vld [vmem:[#allocation139_spill] sm:$0xff] }
 0x30f   :  { %1675 = vmatpush.msra.mxu2 %v10196_v58  ;;  %v10207_v58 = vld [vmem:[#allocation140_spill] sm:$0xff] }
 0x310   :  { %1636 = vmatpush.msra.mxu0 %v10197_v9  ;;  %v10208_v9 = vld [vmem:[#allocation141_spill] sm:$0xff] }
 0x311   :  { %1676 = vmatpush.msra.mxu2 %v10198_v19  ;;  %v10209_v19 = vld [vmem:[#allocation142_spill] sm:$0xff] }
 0x312   :  { %1637 = vmatpush.msra.mxu0 %v10199_v27  ;;  %v10210_v27 = vld [vmem:[#allocation143_spill] sm:$0xff] }
 0x313   :  { %1677 = vmatpush.msra.mxu2 %v10200_v57  ;;  %v10211_v57 = vld [vmem:[#allocation144_spill] sm:$0xff] }
 0x314   :  { %1638 = vmatpush.msra.mxu0 %v10201_v45  ;;  %v10212_v45 = vld [vmem:[#allocation145_spill] sm:$0xff] }
 0x315   :  { %1678 = vmatpush.msra.mxu2 %v10202_v35  ;;  %v10213_v35 = vld [vmem:[#allocation146_spill] sm:$0xff] }
 0x316   :  { %1639 = vmatpush.msra.mxu0 %v10203_v29  ;;  %v10214_v29 = vld [vmem:[#allocation147_spill] sm:$0xff] }
 0x317   :  { %1679 = vmatpush.msra.mxu2 %v10204_v7  ;;  %v10215_v7 = vld [vmem:[#allocation148_spill] sm:$0xff] }
 0x318   :  { %1640 = vmatpush.msra.mxu0 %v10205_v13  ;;  %v10216_v13 = vld [vmem:[#allocation149_spill] sm:$0xff] }
 0x319   :  { %1680 = vmatpush.msra.mxu2 %v10206_v53  ;;  %v10217_v53 = vld [vmem:[#allocation150_spill] sm:$0xff] }
 0x31a   :  { %1705 = vmatpush.msrb.mxu0 %v10207_v58  ;;  %v10218_v58 = vld [vmem:[#allocation151_spill] sm:$0xff] }
 0x31b   :  { %1745 = vmatpush.msrb.mxu2 %v10208_v9  ;;  %v10219_v9 = vld [vmem:[#allocation152_spill] sm:$0xff] }
 0x31c   :  { %1706 = vmatpush.msrb.mxu0 %v10209_v19  ;;  %v10220_v19 = vld [vmem:[#allocation153_spill] sm:$0xff] }
 0x31d   :  { %1746 = vmatpush.msrb.mxu2 %v10210_v27  ;;  %v10221_v27 = vld [vmem:[#allocation154_spill] sm:$0xff] }
 0x31e   :  { %1707 = vmatpush.msrb.mxu0 %v10211_v57  ;;  %v10222_v57 = vld [vmem:[#allocation155_spill] sm:$0xff] }
 0x31f   :  { %1747 = vmatpush.msrb.mxu2 %v10212_v45  ;;  %v10223_v45 = vld [vmem:[#allocation156_spill] sm:$0xff] }
 0x320   :  { %1708 = vmatpush.msrb.mxu0 %v10213_v35  ;;  %v10224_v35 = vld [vmem:[#allocation157_spill] sm:$0xff] }
 0x321   :  { %1748 = vmatpush.msrb.mxu2 %v10214_v29  ;;  %v10225_v29 = vld [vmem:[#allocation158_spill] sm:$0xff] }
 0x322   :  { %1709 = vmatpush.msrb.mxu0 %v10215_v7  ;;  %v10226_v7 = vld [vmem:[#allocation159_spill] sm:$0xff] }
 0x323   :  { %1749 = vmatpush.msrb.mxu2 %v10216_v13  ;;  %v10227_v13 = vld [vmem:[#allocation160_spill] sm:$0xff] }
 0x324   :  { %1710 = vmatpush.msrb.mxu0 %v10217_v53  ;;  %v10228_v53 = vld [vmem:[#allocation161_spill] sm:$0xff] }
 0x325   :  { %1750 = vmatpush.msrb.mxu2 %v10218_v58  ;;  %v10229_v58 = vld [vmem:[#allocation162_spill] sm:$0xff] }
 0x326   :  { %1711 = vmatpush.msrb.mxu0 %v10219_v9  ;;  %v10230_v9 = vld [vmem:[#allocation163_spill] sm:$0xff] }
 0x327   :  { %1751 = vmatpush.msrb.mxu2 %v10220_v19  ;;  %v10231_v19 = vld [vmem:[#allocation164_spill] sm:$0xff] }
 0x328   :  { %1712 = vmatpush.msrb.mxu0 %v10221_v27  ;;  %v10232_v27 = vld [vmem:[#allocation165_spill] sm:$0xff] }
 0x329   :  { %1752 = vmatpush.msrb.mxu2 %v10222_v57 }
 0x32a   :  { %1713 = vmatpush.msrb.mxu0 %v10223_v45  ;;  %v10233_v45 = vld [vmem:[#allocation166_spill] sm:$0xff] }
 0x32b   :  { %1753 = vmatpush.msrb.mxu2 %v10224_v35  ;;  %v10234_v35 = vld [vmem:[#allocation167_spill] sm:$0xff] }
 0x32c   :  { %1714 = vmatpush.msrb.mxu0 %v10225_v29  ;;  %v10235_v29 = vld [vmem:[#allocation65_spill] sm:$0xff] }
 0x32d   :  { %1754 = vmatpush.msrb.mxu2 %v10226_v7  ;;  %v1299_v7 = vpop.f32.mrf.mxu1 }
 0x32e   :  { %1715 = vmatpush.msrb.mxu0 %v10227_v13  ;;  %v10237_v13 = vld [vmem:[#allocation169_spill] sm:$0xff] }
 0x32f   :  { %1755 = vmatpush.msrb.mxu2 %v10228_v53  ;;  %v1279_v57 = vpop.f32.mrf.mxu0 }
 0x330   :  { %1716 = vmatpush.msrb.mxu0 %v10229_v58  ;;  %v1280_v25 = vadd.f32 %v1279_v57, %v10235_v29  ;;  %v10238_v58 = vld [vmem:[#allocation170_spill] sm:$0xff] }
 0x331   :  { %1756 = vmatpush.msrb.mxu2 %v10230_v9  ;;  %v10239_v9 = vld [vmem:[#allocation171_spill] sm:$0xff] }
 0x332   :  { %1717 = vmatpush.msrb.mxu0 %v10231_v19  ;;  %v1300_v53 = vadd.f32 %v1299_v7, %v1280_v25  ;;  %v10240_v7 = vld [vmem:[#allocation82_spill] sm:$0xff] }
 0x333   :  { %1757 = vmatpush.msrb.mxu2 %v10232_v27  ;;  %v1339_v27 = vpop.f32.mrf.mxu3 }
 0x334   :  { %1718 = vmatpush.msrb.mxu0 %v10233_v45  ;;  %v1422_v19 = vsub.f32 0.0, %v1300_v53 }
 0x335   :  { %1758 = vmatpush.msrb.mxu2 %v10234_v35  ;;  %v1319_v23 = vpop.f32.mrf.mxu2 }
 0x336   :  { %1719 = vmatpush.msrb.mxu0 %v10236_v10  ;;  %v1423_v26 = vmul.f32 1.442695, %v1422_v19  ;;  %v1320_v45 = vadd.f32 %v1319_v23, %v5713_v30 }
 0x337   :  { %1759 = vmatpush.msrb.mxu2 %v10237_v13 }
 0x338   :  { %1720 = vmatpush.msrb.mxu0 %v10238_v58  ;;  %3548 = vpow2.f32 %v1423_v26  ;;  %v1340_v35 = vadd.f32 %v1339_v27, %v1320_v45 }
 0x339   :  { %1760 = vmatpush.msrb.mxu2 %v10239_v9  ;;  %v1379_v9 = vpop.f32.mrf.mxu1 }
 0x33a   :  { %v1427_v14 = vsub.f32 0.0, %v1340_v35 }
 0x33b   :  { %v1359_v57 = vpop.f32.mrf.mxu0  ;;  %v1419_v58 = vpop.f32.mrf.mxu3 }
 0x33c   :  { %v1428_v29 = vmul.f32 1.442695, %v1427_v14  ;;  %v1360_v10 = vadd.f32 %v1359_v57, %v5716_v48 }
 0x33e   :  { %v3549_v37 = vpop.eup %3548  ;;  %3550 = vpow2.f32 %v1428_v29  ;;  %v1380_v11 = vadd.f32 %v1379_v9, %v1360_v10 }
 0x33f   :  { %v1425_v53 = vadd.f32 1.0, %v3549_v37 }
 0x341   :  { %3552 = vrcp.f32 %v1425_v53  ;;  %v6814_v53 = vld [vmem:[#allocation3 + $0x3e0] sm:$0xff] }
 0x342   :  { %3554 = vtanh.f32 %v1380_v11  ;;  %v3259_v11 = vrot.slane %v6400_v43, 7  ;;  %v10241_v43 = vld [vmem:[#allocation69_spill] sm:$0xff] }
 0x343   :  { %v1399_v25 = vpop.f32.mrf.mxu2 }
 0x344   :  { %v1400_v13 = vadd.f32 %v1399_v25, %v10240_v7  ;;  %v3551_v0 = vpop.eup %3550 }
 0x345   :  { %v1430_v26 = vadd.f32 1.0, %v3551_v0 }
 0x346   :  { %v1420_v16 = vadd.f32 %v1419_v58, %v1400_v13 }
 0x347   :  { %3556 = vrcp.f32 %v1430_v26  ;;  %v3553_v14 = vpop.eup %3552  ;;  %v3280_v26 = vsel %vm3279_vm0, %v10241_v43, %v3259_v11  ;;  %v6850_v43 = vld [vmem:[#allocation3 + $0x348] sm:$0xff] }
 0x348   :  { %v1433_v19 = vsub.f32 0.0, %v1420_v16  ;;  %v3555_v29 = vpop.eup %3554  ;;  %10244 = vst [vmem:[#allocation89_spill] sm:$0xff] %v6850_v43 }
 0x349   :  { %v1439_v57 = vmul.f32 %v3555_v29, %v3553_v14  ;;  %v1481_v14 = vpop.f32.mrf.mxu1  ;;  %v6823_v29 = vld [vmem:[#allocation3 + $0x3c0] sm:$0xff] }
 0x34a   :  { %v1434_v23 = vmul.f32 1.442695, %v1433_v19  ;;  %v6817_v19 = vld [vmem:[#allocation3 + $0x3e8] sm:$0xff] }
 0x34c   :  { %3558 = vpow2.f32 %v1434_v23 }
 0x34d   :  { %v3557_v27 = vpop.eup %3556 }
 0x34e   :  { %v1438_v35 = vmul.f32 %v3557_v27, %v6397_v52  ;;  %v6826_v27 = vld [vmem:[#allocation3 + $0x3c8] sm:$0xff] }
 0x350   :  { %v6808_v7 = vadd.f32 %v1439_v57, %v1438_v35 }
 0x352   :  { %v3559_v45 = vpop.eup %3558 }
 0x353   :  { %v1436_v25 = vadd.f32 1.0, %v3559_v45  ;;  %v1521_v45 = vpop.f32.mrf.mxu3 }
 0x355   :  { %3560 = vrcp.f32 %v1436_v25  ;;  %v1461_v0 = vpop.f32.mrf.mxu0  ;;  %v6829_v25 = vld [vmem:[#allocation3 + $0x3a0] sm:$0xff] }
 0x356   :  { %3562 = vtanh.f32 %v6808_v7  ;;  %v1462_v58 = vadd.f32 %v1461_v0, %v9846_v15  ;;  %v6838_v0 = vld [vmem:[#allocation3 + $0x388] sm:$0xff] }
 0x358   :  { %v1482_v35 = vadd.f32 %v1481_v14, %v1462_v58  ;;  %v6841_v58 = vld [vmem:[#allocation3 + $0x360] sm:$0xff] }
 0x35a   :  { %v1604_v11 = vsub.f32 0.0, %v1482_v35  ;;  %v6859_v35 = vld [vmem:[#allocation3 + $0x300] sm:$0xff] }
 0x35b   :  { %v3561_v16 = vpop.eup %3560  ;;  %10247 = vst [vmem:[#allocation94_spill] sm:$0xff] %v6859_v35 }
 0x35c   :  { %v3563_v37 = vpop.eup %3562  ;;  %v1501_v10 = vpop.f32.mrf.mxu2 }
 0x35d   :  { %v1442_v13 = vmul.f32 %v3563_v37, %v3561_v16  ;;  %v1502_v9 = vadd.f32 %v1501_v10, %v9847_v18  ;;  %v6832_v16 = vld [vmem:[#allocation3 + $0x3a8] sm:$0xff]  ;;  %v6835_v37 = vld [vmem:[#allocation3 + $0x380] sm:$0xff] }
 0x35f   :  { %1661 = vmatmul.f32.vlgmr.msra.gmra.mxu1 %v1442_v13  ;;  %1701 = vmatmul.f32.vlgmr.msra.gmra.mxu3 %v1442_v13  ;;  %v3262_v52 = vrot.slane %v1442_v13, 6  ;;  %v1522_v57 = vadd.f32 %v1521_v45, %v1502_v9  ;;  %v6847_v9 = vld [vmem:[#allocation3 + $0x340] sm:$0xff]  ;;  %v6856_v45 = vld [vmem:[#allocation3 + $0x328] sm:$0xff] }
 0x360   :  { %1827 = vmatpush.msra.mxu1 %v6814_v53  ;;  %1867 = vmatpush.msra.mxu3 %v6817_v19  ;;  %10243 = vst [vmem:[#allocation87_spill] sm:$0xff] %v6847_v9 }
 0x361   :  { %v6821_v23 = vsel %vm3281_vm1, %v3280_v26, %v3262_v52  ;;  %v1609_v10 = vsub.f32 0.0, %v1522_v57  ;;  %v6844_v52 = vld [vmem:[#allocation3 + $0x368] sm:$0xff]  ;;  %v1605_v26 = vmul.f32 1.442695, %v1604_v11  ;;  %10246 = vst [vmem:[#allocation93_spill] sm:$0xff] %v6856_v45  ;;  %v6865_v11 = vld [vmem:[#allocation3 + $0x2e0] sm:$0xff] }
 0x362   :  { %1828 = vmatpush.msra.mxu1 %v6823_v29  ;;  %1868 = vmatpush.msra.mxu3 %v6826_v27  ;;  %10242 = vst [vmem:[#allocation85_spill] sm:$0xff] %v6844_v52  ;;  %v6862_v57 = vld [vmem:[#allocation3 + $0x308] sm:$0xff] }
 0x363   :  { %v1610_v14 = vmul.f32 1.442695, %v1609_v10  ;;  %10248 = vst [vmem:[#allocation96_spill] sm:$0xff] %v6862_v57  ;;  %3564 = vpow2.f32 %v1605_v26  ;;  %v6868_v10 = vld [vmem:[#allocation3 + $0x2e8] sm:$0xff] }
 0x364   :  { %1829 = vmatpush.msra.mxu1 %v6829_v25  ;;  %1869 = vmatpush.msra.mxu3 %v6832_v16  ;;  %10249 = vst [vmem:[#allocation97_spill] sm:$0xff] %v6865_v11  ;;  %v6880_v26 = vld [vmem:[#allocation3 + $0x2a8] sm:$0xff] }
 0x365   :  { %3566 = vpow2.f32 %v1610_v14  ;;  %10250 = vst [vmem:[#allocation98_spill] sm:$0xff] %v6868_v10 }
 0x366   :  { %1830 = vmatpush.msra.mxu1 %v6835_v37  ;;  %1870 = vmatpush.msra.mxu3 %v6838_v0  ;;  %10254 = vst [vmem:[#allocation105_spill] sm:$0xff] %v6880_v26 }
 0x367   :  { %1741 = vmatmul.f32.vlgmr.msrb.gmra.mxu1 %v1442_v13  ;;  %1781 = vmatmul.f32.vlgmr.msrb.gmra.mxu3 %v1442_v13  ;;  %v6853_v13 = vld [vmem:[#allocation3 + $0x320] sm:$0xff] }
 0x368   :  { %1831 = vmatpush.msra.mxu1 %v6841_v58  ;;  %1871 = vmatpush.msra.mxu3 %v6844_v52  ;;  %10245 = vst [vmem:[#allocation91_spill] sm:$0xff] %v6853_v13  ;;  %v6890_v52 = vld [vmem:[#allocation3 + $0x260] sm:$0xff] }
 0x369   :  { %v3565_v14 = vpop.eup %3564  ;;  %10256 = vst [vmem:[#allocation12_spill] sm:$0xff] %v6890_v52 }
 0x36a   :  { %1832 = vmatpush.msra.mxu1 %v6847_v9  ;;  %1872 = vmatpush.msra.mxu3 %v6850_v43  ;;  %v6884_v43 = vld [vmem:[#allocation3 + $0x280] sm:$0xff]  ;;  %v1607_v9 = vadd.f32 1.0, %v3565_v14 }
 0x36b   :  { %10255 = vst [vmem:[#allocation9_spill] sm:$0xff] %v6884_v43 }
 0x36c   :  { %1833 = vmatpush.msra.mxu1 %v6853_v13  ;;  %1873 = vmatpush.msra.mxu3 %v6856_v45  ;;  %v6871_v13 = vld [vmem:[#allocation3 + $0x2c0] sm:$0xff]  ;;  %v6874_v45 = vld [vmem:[#allocation3 + $0x2c8] sm:$0xff] }
 0x36d   :  { %10251 = vst [vmem:[#allocation102_spill] sm:$0xff] %v6871_v13 }
 0x36e   :  { %1834 = vmatpush.msra.mxu1 %v6859_v35  ;;  %1874 = vmatpush.msra.mxu3 %v6862_v57  ;;  %10252 = vst [vmem:[#allocation103_spill] sm:$0xff] %v6874_v45  ;;  %v6877_v35 = vld [vmem:[#allocation3 + $0x2a0] sm:$0xff]  ;;  %v3567_v57 = vpop.eup %3566 }
 0x36f   :  { %10253 = vst [vmem:[#allocation104_spill] sm:$0xff] %v6877_v35 }
 0x370   :  { %1835 = vmatpush.msra.mxu1 %v6865_v11  ;;  %1875 = vmatpush.msra.mxu3 %v6868_v10 }
 0x372   :  { %1836 = vmatpush.msra.mxu1 %v6871_v13  ;;  %1876 = vmatpush.msra.mxu3 %v6874_v45  ;;  %v6887_v13 = vld [vmem:[#allocation3 + $0x288] sm:$0xff]  ;;  %v1561_v45 = vpop.f32.mrf.mxu1 }
 0x374   :  { %1837 = vmatpush.msra.mxu1 %v6877_v35  ;;  %1877 = vmatpush.msra.mxu3 %v6880_v26  ;;  %v6893_v26 = vld [vmem:[#allocation3 + $0x268] sm:$0xff] }
 0x375   :  { %v1541_v11 = vpop.f32.mrf.mxu0  ;;  %10257 = vst [vmem:[#allocation10_spill] sm:$0xff] %v6893_v26 }
 0x376   :  { %v1542_v10 = vadd.f32 %v1541_v11, %v9848_v5  ;;  %1838 = vmatpush.msra.mxu1 %v6884_v43  ;;  %1878 = vmatpush.msra.mxu3 %v6887_v13  ;;  %v1612_v11 = vadd.f32 1.0, %v3567_v57  ;;  %v6896_v5 = vld [vmem:[#allocation3 + $0x240] sm:$0xff]  ;;  %v6899_v43 = vld [vmem:[#allocation3 + $0x248] sm:$0xff]  ;;  %v1601_v57 = vpop.f32.mrf.mxu3 }
 0x377   :  { %10258 = vst [vmem:[#allocation14_spill] sm:$0xff] %v6896_v5 }
 0x378   :  { %v1562_v35 = vadd.f32 %v1561_v45, %v1542_v10  ;;  %1839 = vmatpush.msra.mxu1 %v6890_v52  ;;  %1879 = vmatpush.msra.mxu3 %v6893_v26  ;;  %v6903_v10 = vld [vmem:[#allocation3 + $0x220] sm:$0xff]  ;;  %v6906_v52 = vld [vmem:[#allocation3 + $0x228] sm:$0xff] }
 0x379   :  { %10259 = vst [vmem:[#allocation101_spill] sm:$0xff] %v6903_v10  ;;  %v6909_v26 = vld [vmem:[#allocation3 + $0x200] sm:$0xff] }
 0x37a   :  { %1840 = vmatpush.msra.mxu1 %v6896_v5  ;;  %1880 = vmatpush.msra.mxu3 %v6899_v43  ;;  %3568 = vtanh.f32 %v1562_v35  ;;  %10260 = vst [vmem:[#allocation100_spill] sm:$0xff] %v6906_v52  ;;  %v6912_v35 = vld [vmem:[#allocation3 + $0x208] sm:$0xff] }
 0x37b   :  { %3570 = vrcp.f32 %v1607_v9  ;;  %10261 = vst [vmem:[#allocation13_spill] sm:$0xff] %v6909_v26  ;;  %v6915_v9 = vld [vmem:[#allocation3 + $0x3f0] sm:$0xff] }
 0x37c   :  { %v1581_v14 = vpop.f32.mrf.mxu2  ;;  %1841 = vmatpush.msra.mxu1 %v6903_v10  ;;  %1881 = vmatpush.msra.mxu3 %v6906_v52  ;;  %3572 = vrcp.f32 %v1612_v11  ;;  %10262 = vst [vmem:[#allocation18_spill] sm:$0xff] %v6912_v35  ;;  %v6921_v11 = vld [vmem:[#allocation3 + $0x3d0] sm:$0xff] }
 0x37d   :  { %v1582_v45 = vadd.f32 %v1581_v14, %v9850_v47  ;;  %10263 = vst [vmem:[#allocation15_spill] sm:$0xff] %v6915_v9  ;;  %v6918_v14 = vld [vmem:[#allocation3 + $0x3f8] sm:$0xff]  ;;  %v6927_v47 = vld [vmem:[#allocation3 + $0x3b0] sm:$0xff] }
 0x37e   :  { %1842 = vmatpush.msra.mxu1 %v6909_v26  ;;  %1882 = vmatpush.msra.mxu3 %v6912_v35  ;;  %10264 = vst [vmem:[#allocation21_spill] sm:$0xff] %v6918_v14 }
 0x37f   :  { %v1602_v5 = vadd.f32 %v1601_v57, %v1582_v45  ;;  %10265 = vst [vmem:[#allocation17_spill] sm:$0xff] %v6921_v11  ;;  %v6924_v45 = vld [vmem:[#allocation3 + $0x3d8] sm:$0xff] }
 0x380   :  { %1907 = vmatpush.msrb.mxu1 %v6915_v9  ;;  %1947 = vmatpush.msrb.mxu3 %v6918_v14  ;;  %v3569_v10 = vpop.eup %3568  ;;  %10266 = vst [vmem:[#allocation24_spill] sm:$0xff] %v6924_v45  ;;  %v6930_v9 = vld [vmem:[#allocation3 + $0x3b8] sm:$0xff]  ;;  %v6933_v14 = vld [vmem:[#allocation3 + $0x390] sm:$0xff] }
 0x381   :  { %v1615_v52 = vsub.f32 0.0, %v1602_v5  ;;  %v3571_v57 = vpop.eup %3570  ;;  %10267 = vst [vmem:[#allocation26_spill] sm:$0xff] %v6927_v47 }
 0x382   :  { %1908 = vmatpush.msrb.mxu1 %v6921_v11  ;;  %1948 = vmatpush.msrb.mxu3 %v6924_v45  ;;  %v3573_v26 = vpop.eup %3572  ;;  %v1621_v5 = vmul.f32 %v3571_v57, %v3569_v10  ;;  %v6936_v11 = vld [vmem:[#allocation3 + $0x398] sm:$0xff]  ;;  %v6940_v45 = vld [vmem:[#allocation3 + $0x370] sm:$0xff] }
 0x383   :  { %v1616_v35 = vmul.f32 1.442695, %v1615_v52  ;;  %10268 = vst [vmem:[#allocation28_spill] sm:$0xff] %v6936_v11  ;;  %v1620_v52 = vmul.f32 %v3573_v26, %v6451_v63  ;;  %v6951_v57 = vld [vmem:[#allocation3 + $0x358] sm:$0xff]  ;;  %v6954_v26 = vld [vmem:[#allocation3 + $0x330] sm:$0xff] }
 0x384   :  { %1909 = vmatpush.msrb.mxu1 %v6927_v47  ;;  %1949 = vmatpush.msrb.mxu3 %v6930_v9  ;;  %10269 = vst [vmem:[#allocation19_spill] sm:$0xff] %v6940_v45  ;;  %v6943_v47 = vld [vmem:[#allocation3 + $0x378] sm:$0xff] }
 0x385   :  { %3574 = vpow2.f32 %v1616_v35  ;;  %v6946_v10 = vadd.f32 %v1621_v5, %v1620_v52  ;;  %v6948_v35 = vld [vmem:[#allocation3 + $0x350] sm:$0xff]  ;;  %10271 = vst [vmem:[#allocation22_spill] sm:$0xff] %v6951_v57  ;;  %v6964_v52 = vld [vmem:[#allocation3 + $0x318] sm:$0xff] }
 0x386   :  { %1910 = vmatpush.msrb.mxu1 %v6933_v14  ;;  %1950 = vmatpush.msrb.mxu3 %v6936_v11  ;;  %10270 = vst [vmem:[#allocation30_spill] sm:$0xff] %v6948_v35  ;;  %v6961_v5 = vld [vmem:[#allocation3 + $0x310] sm:$0xff] }
 0x387   :  { %10272 = vst [vmem:[#allocation32_spill] sm:$0xff] %v6954_v26  ;;  %3576 = vtanh.f32 %v6946_v10 }
 0x388   :  { %1911 = vmatpush.msrb.mxu1 %v6940_v45  ;;  %1951 = vmatpush.msrb.mxu3 %v6943_v47  ;;  %v6957_v45 = vld [vmem:[#allocation3 + $0x338] sm:$0xff]  ;;  %10274 = vst [vmem:[#allocation34_spill] sm:$0xff] %v6961_v5 }
 0x389   :  { %10273 = vst [vmem:[#allocation25_spill] sm:$0xff] %v6957_v45 }
 0x38a   :  { %1912 = vmatpush.msrb.mxu1 %v6948_v35  ;;  %1952 = vmatpush.msrb.mxu3 %v6951_v57  ;;  %10275 = vst [vmem:[#allocation27_spill] sm:$0xff] %v6964_v52  ;;  %v6979_v35 = vld [vmem:[#allocation3 + $0x2b0] sm:$0xff] }
 0x38b   :  { %v3575_v11 = vpop.eup %3574 }
 0x38c   :  { %v1618_v63 = vadd.f32 1.0, %v3575_v11  ;;  %1913 = vmatpush.msrb.mxu1 %v6954_v26  ;;  %1953 = vmatpush.msrb.mxu3 %v6957_v45  ;;  %v6967_v11 = vld [vmem:[#allocation3 + $0x2f0] sm:$0xff]  ;;  %v6970_v26 = vld [vmem:[#allocation3 + $0x2f8] sm:$0xff] }
 0x38d   :  { %10276 = vst [vmem:[#allocation36_spill] sm:$0xff] %v6967_v11  ;;  %v6973_v45 = vld [vmem:[#allocation3 + $0x2d0] sm:$0xff] }
 0x38e   :  { %3578 = vrcp.f32 %v1618_v63  ;;  %1914 = vmatpush.msrb.mxu1 %v6961_v5  ;;  %1954 = vmatpush.msrb.mxu3 %v6964_v52  ;;  %10277 = vst [vmem:[#allocation29_spill] sm:$0xff] %v6970_v26  ;;  %v6976_v63 = vld [vmem:[#allocation3 + $0x2d8] sm:$0xff]  ;;  %v3577_v5 = vpop.eup %3576 }
 0x38f   :  { %10278 = vst [vmem:[#allocation38_spill] sm:$0xff] %v6973_v45  ;;  %v6982_v52 = vld [vmem:[#allocation3 + $0x2b8] sm:$0xff] }
 0x390   :  { %1915 = vmatpush.msrb.mxu1 %v6967_v11  ;;  %1955 = vmatpush.msrb.mxu3 %v6970_v26  ;;  %10279 = vst [vmem:[#allocation31_spill] sm:$0xff] %v6982_v52  ;;  %v6985_v26 = vld [vmem:[#allocation3 + $0x290] sm:$0xff] }
 0x392   :  { %1916 = vmatpush.msrb.mxu1 %v6973_v45  ;;  %1956 = vmatpush.msrb.mxu3 %v6976_v63  ;;  %v6988_v45 = vld [vmem:[#allocation3 + $0x298] sm:$0xff] }
 0x394   :  { %v3579_v57 = vpop.eup %3578  ;;  %1917 = vmatpush.msrb.mxu1 %v6979_v35  ;;  %1957 = vmatpush.msrb.mxu3 %v6982_v52  ;;  %v6994_v52 = vld [vmem:[#allocation3 + $0x270] sm:$0xff] }
 0x395   :  { %v1624_v11 = vmul.f32 %v3579_v57, %v3577_v5  ;;  %v6998_v57 = vld [vmem:[#allocation3 + $0x278] sm:$0xff]  ;;  %v7002_v5 = vld [vmem:[#allocation3 + $0x250] sm:$0xff] }
 0x396   :  { %1918 = vmatpush.msrb.mxu1 %v6985_v26  ;;  %1958 = vmatpush.msrb.mxu3 %v6988_v45 }
 0x397   :  { %1641 = vmatmul.f32.vlgmr.msra.gmra.mxu0 %v1624_v11  ;;  %1681 = vmatmul.f32.vlgmr.msra.gmra.mxu2 %v1624_v11 }
 0x398   :  { %1807 = vmatpush.msra.mxu0 %v6468_v22  ;;  %1843 = vmatmul.f32.vlgmr.msra.gmra.mxu1 %v1624_v11  ;;  %v7006_v22 = vld [vmem:[#allocation3 + $0x258] sm:$0xff] }
 0x399   :  { %1847 = vmatpush.msra.mxu2 %v6471_v24  ;;  %1883 = vmatmul.f32.vlgmr.msra.gmra.mxu3 %v1624_v11  ;;  %v7010_v24 = vld [vmem:[#allocation3 + $0x230] sm:$0xff] }
 0x39a   :  { %1808 = vmatpush.msra.mxu0 %v6474_v28  ;;  %1919 = vmatpush.msrb.mxu1 %v6994_v52  ;;  %v7016_v28 = vld [vmem:[#allocation3 + $0x238] sm:$0xff] }
 0x39b   :  { %1848 = vmatpush.msra.mxu2 %v6478_v6  ;;  %1959 = vmatpush.msrb.mxu3 %v6998_v57  ;;  %v7020_v6 = vld [vmem:[#allocation3 + $0x210] sm:$0xff] }
 0x39c   :  { %1809 = vmatpush.msra.mxu0 %v6482_v46  ;;  %1920 = vmatpush.msrb.mxu1 %v7002_v5  ;;  %v7024_v46 = vld [vmem:[#allocation3 + $0x218] sm:$0xff] }
 0x39d   :  { %1849 = vmatpush.msra.mxu2 %v6486_v32  ;;  %1960 = vmatpush.msrb.mxu3 %v7006_v22  ;;  %v7029_v32 = vld [vmem:[#allocation5 + $0x3e0] sm:$0xff] }
 0x39e   :  { %1810 = vmatpush.msra.mxu0 %v6490_v40  ;;  %1921 = vmatpush.msrb.mxu1 %v7010_v24  ;;  %v7032_v40 = vld [vmem:[#allocation5 + $0x3e8] sm:$0xff] }
 0x39f   :  { %1850 = vmatpush.msra.mxu2 %v6494_v42  ;;  %1721 = vmatmul.f32.vlgmr.msrb.gmra.mxu0 %v1624_v11  ;;  %v7037_v42 = vld [vmem:[#allocation5 + $0x3c0] sm:$0xff] }
 0x3a0   :  { %1761 = vmatmul.f32.vlgmr.msrb.gmra.mxu2 %v1624_v11  ;;  %1811 = vmatpush.msra.mxu0 %v6498_v59  ;;  %v7040_v59 = vld [vmem:[#allocation5 + $0x3c8] sm:$0xff] }
 0x3a1   :  { %1851 = vmatpush.msra.mxu2 %v6501_v44  ;;  %1961 = vmatpush.msrb.mxu3 %v7016_v28  ;;  %v7045_v44 = vld [vmem:[#allocation5 + $0x3a0] sm:$0xff] }
 0x3a2   :  { %1812 = vmatpush.msra.mxu0 %v6506_v60  ;;  %1922 = vmatpush.msrb.mxu1 %v7020_v6  ;;  %v7048_v60 = vld [vmem:[#allocation5 + $0x3a8] sm:$0xff] }
 0x3a3   :  { %1852 = vmatpush.msra.mxu2 %v6509_v2  ;;  %1962 = vmatpush.msrb.mxu3 %v7024_v46  ;;  %v7053_v2 = vld [vmem:[#allocation5 + $0x380] sm:$0xff] }
 0x3a4   :  { %1923 = vmatmul.f32.vlgmr.msrb.gmra.mxu1 %v1624_v11  ;;  %1963 = vmatmul.f32.vlgmr.msrb.gmra.mxu3 %v1624_v11  ;;  %v7134_v11 = vld [vmem:[#allocation5 + $0x260] sm:$0xff] }
 0x3a5   :  { %1813 = vmatpush.msra.mxu0 %v6514_v8  ;;  %1853 = vmatpush.msra.mxu2 %v6517_v55  ;;  %v7056_v8 = vld [vmem:[#allocation5 + $0x388] sm:$0xff]  ;;  %v7061_v55 = vld [vmem:[#allocation5 + $0x360] sm:$0xff]  ;;  %10298 = vst [vmem:[#allocation45_spill] sm:$0xff] %v7134_v11 }
 0x3a6   :  { %2008 = vmatpush.msra.mxu1 %v7029_v32  ;;  %2048 = vmatpush.msra.mxu3 %v7032_v40 }
 0x3a7   :  { %1814 = vmatpush.msra.mxu0 %v6522_v61  ;;  %1854 = vmatpush.msra.mxu2 %v6525_v1  ;;  %v7064_v61 = vld [vmem:[#allocation5 + $0x368] sm:$0xff]  ;;  %v7069_v1 = vld [vmem:[#allocation5 + $0x340] sm:$0xff] }
 0x3a8   :  { %2009 = vmatpush.msra.mxu1 %v7037_v42  ;;  %2049 = vmatpush.msra.mxu3 %v7040_v59 }
 0x3a9   :  { %1815 = vmatpush.msra.mxu0 %v6530_v62  ;;  %1855 = vmatpush.msra.mxu2 %v6533_v12  ;;  %v7072_v62 = vld [vmem:[#allocation5 + $0x348] sm:$0xff]  ;;  %v7077_v12 = vld [vmem:[#allocation5 + $0x320] sm:$0xff] }
 0x3aa   :  { %2010 = vmatpush.msra.mxu1 %v7045_v44  ;;  %2050 = vmatpush.msra.mxu3 %v7048_v60  ;;  %10280 = vst [vmem:[#allocation40_spill] sm:$0xff] %v7072_v62 }
 0x3ab   :  { %1816 = vmatpush.msra.mxu0 %v6538_v34  ;;  %1856 = vmatpush.msra.mxu2 %v6541_v36  ;;  %10281 = vst [vmem:[#allocation33_spill] sm:$0xff] %v7077_v12  ;;  %v7080_v34 = vld [vmem:[#allocation5 + $0x328] sm:$0xff]  ;;  %v7085_v36 = vld [vmem:[#allocation5 + $0x300] sm:$0xff] }
 0x3ac   :  { %2011 = vmatpush.msra.mxu1 %v7053_v2  ;;  %2051 = vmatpush.msra.mxu3 %v7056_v8  ;;  %10282 = vst [vmem:[#allocation42_spill] sm:$0xff] %v7080_v34 }
 0x3ad   :  { %1817 = vmatpush.msra.mxu0 %v6546_v31  ;;  %1857 = vmatpush.msra.mxu2 %v6549_v39  ;;  %10283 = vst [vmem:[#allocation35_spill] sm:$0xff] %v7085_v36  ;;  %v7088_v31 = vld [vmem:[#allocation5 + $0x308] sm:$0xff]  ;;  %v7096_v39 = vld [vmem:[%s8890_s0 + $0x4] sm:$0x1] }
 0x3ae   :  { %2012 = vmatpush.msra.mxu1 %v7061_v55  ;;  %2052 = vmatpush.msra.mxu3 %v7064_v61  ;;  %10284 = vst [vmem:[#allocation44_spill] sm:$0xff] %v7088_v31 }
 0x3af   :  { %1818 = vmatpush.msra.mxu0 %v6554_v49  ;;  %1858 = vmatpush.msra.mxu2 %v6557_v21  ;;  %v7098_v49 = vld [vmem:[#allocation5 + $0x2e0] sm:$0xff]  ;;  %v7101_v21 = vld [vmem:[#allocation5 + $0x2e8] sm:$0xff] }
 0x3b0   :  { %2013 = vmatpush.msra.mxu1 %v7069_v1  ;;  %2053 = vmatpush.msra.mxu3 %v7072_v62  ;;  %10285 = vst [vmem:[#allocation37_spill] sm:$0xff] %v7098_v49 }
 0x3b1   :  { %1819 = vmatpush.msra.mxu0 %v6562_v54  ;;  %1859 = vmatpush.msra.mxu2 %v6565_v33  ;;  %10286 = vst [vmem:[#allocation46_spill] sm:$0xff] %v7101_v21  ;;  %v7110_v54 = vld [vmem:[#allocation5 + $0x2c0] sm:$0xff]  ;;  %v7113_v33 = vld [vmem:[#allocation5 + $0x2c8] sm:$0xff] }
 0x3b2   :  { %2014 = vmatpush.msra.mxu1 %v7077_v12  ;;  %2054 = vmatpush.msra.mxu3 %v7080_v34  ;;  %10287 = vst [vmem:[#allocation39_spill] sm:$0xff] %v7110_v54 }
 0x3b3   :  { %1820 = vmatpush.msra.mxu0 %v6570_v20  ;;  %1860 = vmatpush.msra.mxu2 %v6573_v51  ;;  %10288 = vst [vmem:[#allocation48_spill] sm:$0xff] %v7113_v33  ;;  %v10289_v20 = vld [vmem:[#allocation86_spill] sm:$0xff]  ;;  %v7118_v51 = vld [vmem:[#allocation5 + $0x2a0] sm:$0xff] }
 0x3b4   :  { %2015 = vmatpush.msra.mxu1 %v7085_v36  ;;  %2055 = vmatpush.msra.mxu3 %v7088_v31  ;;  %10290 = vst [vmem:[#allocation41_spill] sm:$0xff] %v7118_v51 }
 0x3b5   :  { %1821 = vmatpush.msra.mxu0 %v6578_v41  ;;  %1861 = vmatpush.msra.mxu2 %v6581_v56  ;;  %v7121_v41 = vld [vmem:[#allocation5 + $0x2a8] sm:$0xff]  ;;  %v10292_v56 = vld [vmem:[#allocation73_spill] sm:$0xff] }
 0x3b6   :  { %2016 = vmatpush.msra.mxu1 %v7098_v49  ;;  %2056 = vmatpush.msra.mxu3 %v7101_v21  ;;  %10291 = vst [vmem:[#allocation50_spill] sm:$0xff] %v7121_v41  ;;  %v10427_v49 = vld [vmem:[#allocation82_spill] sm:$0xff] }
 0x3b7   :  { %1822 = vmatpush.msra.mxu0 %v6591_v4  ;;  %1862 = vmatpush.msra.mxu2 %v6594_v3  ;;  %v10293_v4 = vld [vmem:[#allocation90_spill] sm:$0xff]  ;;  %v7126_v3 = vld [vmem:[#allocation5 + $0x280] sm:$0xff] }
 0x3b8   :  { %1823 = vmatmul.f32.vlgmr.msra.gmra.mxu0 %v7096_v39  ;;  %1863 = vmatmul.f32.vlgmr.msra.gmra.mxu2 %v7096_v39  ;;  %10294 = vst [vmem:[#allocation43_spill] sm:$0xff] %v7126_v3 }
 0x3b9   :  { %1887 = vmatpush.msrb.mxu0 %v6599_v38  ;;  %1927 = vmatpush.msrb.mxu2 %v6602_v50  ;;  %v7129_v38 = vld [vmem:[#allocation5 + $0x288] sm:$0xff]  ;;  %v10296_v50 = vld [vmem:[#allocation76_spill] sm:$0xff] }
 0x3ba   :  { %2017 = vmatpush.msra.mxu1 %v7110_v54  ;;  %2057 = vmatpush.msra.mxu3 %v7113_v33  ;;  %10295 = vst [vmem:[#allocation51_spill] sm:$0xff] %v7129_v38 }
 0x3bb   :  { %1888 = vmatpush.msrb.mxu0 %v6607_v17  ;;  %1928 = vmatpush.msrb.mxu2 %v10289_v20  ;;  %v10297_v17 = vld [vmem:[#allocation80_spill] sm:$0xff]  ;;  %v7137_v20 = vld [vmem:[#allocation5 + $0x268] sm:$0xff] }
 0x3bc   :  { %2018 = vmatpush.msra.mxu1 %v7118_v51  ;;  %2058 = vmatpush.msra.mxu3 %v7121_v41  ;;  %10299 = vst [vmem:[#allocation56_spill] sm:$0xff] %v7137_v20  ;;  %v7471_v41 = vld [vmem:[#allocation5 + $0x10] sm:$0xff] }
 0x3bd   :  { %1889 = vmatpush.msrb.mxu0 %v10292_v56  ;;  %1929 = vmatpush.msrb.mxu2 %v10293_v4  ;;  %v10300_v56 = vld [vmem:[#allocation84_spill] sm:$0xff] }
 0x3be   :  { %2019 = vmatpush.msra.mxu1 %v7126_v3  ;;  %2059 = vmatpush.msra.mxu3 %v7129_v38  ;;  %v10301_v4 = vld [vmem:[#allocation88_spill] sm:$0xff]  ;;  %v7142_v3 = vld [vmem:[#allocation5 + $0x240] sm:$0xff]  ;;  %v7145_v38 = vld [vmem:[#allocation5 + $0x248] sm:$0xff] }
 0x3bf   :  { %1890 = vmatpush.msrb.mxu0 %v10296_v50  ;;  %1930 = vmatpush.msrb.mxu2 %v10297_v17  ;;  %10302 = vst [vmem:[#allocation47_spill] sm:$0xff] %v7142_v3  ;;  %v10304_v50 = vld [vmem:[#allocation20_spill] sm:$0xff] }
 0x3c0   :  { %2020 = vmatpush.msra.mxu1 %v7134_v11  ;;  %2060 = vmatpush.msra.mxu3 %v7137_v20  ;;  %10303 = vst [vmem:[#allocation60_spill] sm:$0xff] %v7145_v38  ;;  %v10305_v17 = vld [vmem:[#allocation92_spill] sm:$0xff]  ;;  %v7150_v11 = vld [vmem:[#allocation5 + $0x220] sm:$0xff]  ;;  %v7153_v20 = vld [vmem:[#allocation5 + $0x228] sm:$0xff] }
 0x3c1   :  { %1891 = vmatpush.msrb.mxu0 %v10300_v56  ;;  %1931 = vmatpush.msrb.mxu2 %v10301_v4  ;;  %10306 = vst [vmem:[#allocation49_spill] sm:$0xff] %v7150_v11  ;;  %v10308_v56 = vld [vmem:[#allocation23_spill] sm:$0xff]  ;;  %v10309_v4 = vld [vmem:[#allocation54_spill] sm:$0xff] }
 0x3c2   :  { %2021 = vmatpush.msra.mxu1 %v7142_v3  ;;  %2061 = vmatpush.msra.mxu3 %v7145_v38  ;;  %10307 = vst [vmem:[#allocation64_spill] sm:$0xff] %v7153_v20  ;;  %v7158_v3 = vld [vmem:[#allocation5 + $0x200] sm:$0xff]  ;;  %v7161_v38 = vld [vmem:[#allocation5 + $0x208] sm:$0xff] }
 0x3c3   :  { %1892 = vmatpush.msrb.mxu0 %v10304_v50  ;;  %1932 = vmatpush.msrb.mxu2 %v10305_v17  ;;  %10310 = vst [vmem:[#allocation52_spill] sm:$0xff] %v7158_v3  ;;  %v10312_v50 = vld [vmem:[#allocation55_spill] sm:$0xff] }
 0x3c4   :  { %2022 = vmatpush.msra.mxu1 %v7150_v11  ;;  %2062 = vmatpush.msra.mxu3 %v7153_v20  ;;  %10311 = vst [vmem:[#allocation68_spill] sm:$0xff] %v7161_v38  ;;  %v10313_v17 = vld [vmem:[#allocation95_spill] sm:$0xff]  ;;  %v7169_v20 = vld [vmem:[#allocation5 + $0x3f8] sm:$0xff] }
 0x3c5   :  { %1893 = vmatpush.msrb.mxu0 %v10308_v56  ;;  %1933 = vmatpush.msrb.mxu2 %v10309_v4  ;;  %v7166_v11 = vld [vmem:[#allocation5 + $0x3f0] sm:$0xff]  ;;  %10315 = vst [vmem:[#allocation71_spill] sm:$0xff] %v7169_v20  ;;  %v10316_v56 = vld [vmem:[#allocation58_spill] sm:$0xff] }
 0x3c6   :  { %2023 = vmatpush.msra.mxu1 %v7158_v3  ;;  %2063 = vmatpush.msra.mxu3 %v7161_v38  ;;  %10314 = vst [vmem:[#allocation53_spill] sm:$0xff] %v7166_v11  ;;  %v10317_v4 = vld [vmem:[#allocation59_spill] sm:$0xff]  ;;  %v7177_v38 = vld [vmem:[#allocation5 + $0x3d8] sm:$0xff] }
 0x3c7   :  { %1894 = vmatpush.msrb.mxu0 %v10312_v50  ;;  %1934 = vmatpush.msrb.mxu2 %v10313_v17  ;;  %v7174_v3 = vld [vmem:[#allocation5 + $0x3d0] sm:$0xff]  ;;  %10319 = vst [vmem:[#allocation75_spill] sm:$0xff] %v7177_v38  ;;  %v10320_v50 = vld [vmem:[#allocation62_spill] sm:$0xff] }
 0x3c8   :  { %2088 = vmatpush.msrb.mxu1 %v7166_v11  ;;  %2128 = vmatpush.msrb.mxu3 %v7169_v20  ;;  %10318 = vst [vmem:[#allocation57_spill] sm:$0xff] %v7174_v3  ;;  %v10321_v17 = vld [vmem:[#allocation63_spill] sm:$0xff]  ;;  %v7185_v20 = vld [vmem:[#allocation5 + $0x3b8] sm:$0xff] }
 0x3c9   :  { %1895 = vmatpush.msrb.mxu0 %v10316_v56  ;;  %1935 = vmatpush.msrb.mxu2 %v10317_v4  ;;  %v7182_v11 = vld [vmem:[#allocation5 + $0x3b0] sm:$0xff]  ;;  %10323 = vst [vmem:[#allocation78_spill] sm:$0xff] %v7185_v20  ;;  %v10325_v4 = vld [vmem:[#allocation66_spill] sm:$0xff] }
 0x3ca   :  { %2089 = vmatpush.msrb.mxu1 %v7174_v3  ;;  %2129 = vmatpush.msrb.mxu3 %v7177_v38  ;;  %10322 = vst [vmem:[#allocation61_spill] sm:$0xff] %v7182_v11  ;;  %v10324_v56 = vld [vmem:[#allocation99_spill] sm:$0xff]  ;;  %v7193_v38 = vld [vmem:[#allocation5 + $0x398] sm:$0xff] }
 0x3cb   :  { %1896 = vmatpush.msrb.mxu0 %v10320_v50  ;;  %1936 = vmatpush.msrb.mxu2 %v10321_v17  ;;  %v7190_v3 = vld [vmem:[#allocation5 + $0x390] sm:$0xff]  ;;  %10327 = vst [vmem:[#allocation107_spill] sm:$0xff] %v7193_v38  ;;  %v10329_v17 = vld [vmem:[#allocation70_spill] sm:$0xff] }
 0x3cc   :  { %2090 = vmatpush.msrb.mxu1 %v7182_v11  ;;  %2130 = vmatpush.msrb.mxu3 %v7185_v20  ;;  %10326 = vst [vmem:[#allocation106_spill] sm:$0xff] %v7190_v3  ;;  %v10328_v50 = vld [vmem:[#allocation67_spill] sm:$0xff]  ;;  %v7201_v20 = vld [vmem:[#allocation5 + $0x378] sm:$0xff] }
 0x3cd   :  { %1897 = vmatpush.msrb.mxu0 %v10324_v56  ;;  %1937 = vmatpush.msrb.mxu2 %v10325_v4  ;;  %v7198_v11 = vld [vmem:[#allocation5 + $0x370] sm:$0xff]  ;;  %10331 = vst [vmem:[#allocation109_spill] sm:$0xff] %v7201_v20  ;;  %v10332_v56 = vld [vmem:[#allocation72_spill] sm:$0xff]  ;;  %v10333_v4 = vld [vmem:[#allocation74_spill] sm:$0xff] }
 0x3ce   :  { %2091 = vmatpush.msrb.mxu1 %v7190_v3  ;;  %2131 = vmatpush.msrb.mxu3 %v7193_v38  ;;  %10330 = vst [vmem:[#allocation108_spill] sm:$0xff] %v7198_v11  ;;  %v7206_v3 = vld [vmem:[#allocation5 + $0x350] sm:$0xff]  ;;  %v7209_v38 = vld [vmem:[#allocation5 + $0x358] sm:$0xff] }
 0x3cf   :  { %1898 = vmatpush.msrb.mxu0 %v10328_v50  ;;  %1938 = vmatpush.msrb.mxu2 %v10329_v17  ;;  %10334 = vst [vmem:[#allocation110_spill] sm:$0xff] %v7206_v3  ;;  %v10336_v50 = vld [vmem:[#allocation77_spill] sm:$0xff]  ;;  %v10337_v17 = vld [vmem:[#allocation79_spill] sm:$0xff] }
 0x3d0   :  { %2092 = vmatpush.msrb.mxu1 %v7198_v11  ;;  %2132 = vmatpush.msrb.mxu3 %v7201_v20  ;;  %10335 = vst [vmem:[#allocation111_spill] sm:$0xff] %v7209_v38  ;;  %v7214_v11 = vld [vmem:[#allocation5 + $0x330] sm:$0xff]  ;;  %v7217_v20 = vld [vmem:[#allocation5 + $0x338] sm:$0xff] }
 0x3d1   :  { %1899 = vmatpush.msrb.mxu0 %v10332_v56  ;;  %1939 = vmatpush.msrb.mxu2 %v10333_v4  ;;  %10338 = vst [vmem:[#allocation112_spill] sm:$0xff] %v7214_v11  ;;  %v7220_v56 = vld [vmem:[#allocation3 + $0x30] sm:$0xff]  ;;  %v10341_v4 = vld [vmem:[#allocation81_spill] sm:$0xff] }
 0x3d2   :  { %2093 = vmatpush.msrb.mxu1 %v7206_v3  ;;  %2133 = vmatpush.msrb.mxu3 %v7209_v38  ;;  %10339 = vst [vmem:[#allocation113_spill] sm:$0xff] %v7217_v20  ;;  %v7224_v3 = vld [vmem:[#allocation5 + $0x310] sm:$0xff] }
 0x3d3   :  { %1900 = vmatpush.msrb.mxu0 %v10336_v50  ;;  %1940 = vmatpush.msrb.mxu2 %v10337_v17  ;;  %10340 = vst [vmem:[#allocation114_spill] sm:$0xff] %v7220_v56  ;;  %v7227_v50 = vld [vmem:[#allocation5 + $0x318] sm:$0xff]  ;;  %v7230_v17 = vld [vmem:[#allocation3 + $0x10] sm:$0xff] }
 0x3d4   :  { %2094 = vmatpush.msrb.mxu1 %v7214_v11  ;;  %2134 = vmatpush.msrb.mxu3 %v7217_v20  ;;  %10342 = vst [vmem:[#allocation115_spill] sm:$0xff] %v7224_v3  ;;  %v10345_v11 = vld [vmem:[#allocation83_spill] sm:$0xff] }
 0x3d5   :  { %1901 = vmatpush.msrb.mxu0 %v7220_v56  ;;  %1941 = vmatpush.msrb.mxu2 %v10341_v4  ;;  %10343 = vst [vmem:[#allocation116_spill] sm:$0xff] %v7227_v50  ;;  %v7236_v56 = vld [vmem:[#allocation5 + $0x2f0] sm:$0xff]  ;;  %v7239_v4 = vld [vmem:[#allocation5 + $0x2f8] sm:$0xff] }
 0x3d6   :  { %2095 = vmatpush.msrb.mxu1 %v7224_v3  ;;  %2135 = vmatpush.msrb.mxu3 %v7227_v50  ;;  %10344 = vst [vmem:[#allocation117_spill] sm:$0xff] %v7230_v17  ;;  %v7242_v3 = vld [vmem:[#allocation5 + $0x1e0] sm:$0xff]  ;;  %v7245_v50 = vld [vmem:[#allocation5 + $0x1e8] sm:$0xff] }
 0x3d7   :  { %1902 = vmatpush.msrb.mxu0 %v7230_v17  ;;  %1942 = vmatpush.msrb.mxu2 %v10345_v11  ;;  %10346 = vst [vmem:[#allocation118_spill] sm:$0xff] %v7236_v56  ;;  %v7248_v11 = vld [vmem:[#allocation5 + $0x2d0] sm:$0xff]  ;;  %v10422_v17 = vld [vmem:[#allocation65_spill] sm:$0xff] }
 0x3d8   :  { %1903 = vmatmul.f32.vlgmr.msrb.gmra.mxu0 %v7096_v39  ;;  %1943 = vmatmul.f32.vlgmr.msrb.gmra.mxu2 %v7096_v39  ;;  %10347 = vst [vmem:[#allocation119_spill] sm:$0xff] %v7239_v4  ;;  %v7251_v39 = vld [vmem:[#allocation5 + $0x2d8] sm:$0xff] }
 0x3d9   :  { %2096 = vmatpush.msrb.mxu1 %v7236_v56  ;;  %2136 = vmatpush.msrb.mxu3 %v7239_v4  ;;  %10348 = vst [vmem:[#allocation120_spill] sm:$0xff] %v7242_v3  ;;  %v7254_v56 = vld [vmem:[#allocation5 + $0x1c0] sm:$0xff]  ;;  %v7257_v4 = vld [vmem:[#allocation5 + $0x1c8] sm:$0xff] }
 0x3da   :  { %1988 = vmatpush.msra.mxu0 %v7242_v3  ;;  %10349 = vst [vmem:[#allocation121_spill] sm:$0xff] %v7245_v50  ;;  %2028 = vmatpush.msra.mxu2 %v7245_v50  ;;  %v7260_v3 = vld [vmem:[#allocation5 + $0x2b0] sm:$0xff]  ;;  %v7263_v50 = vld [vmem:[#allocation5 + $0x2b8] sm:$0xff] }
 0x3db   :  { %10350 = vst [vmem:[#allocation122_spill] sm:$0xff] %v7248_v11  ;;  %2097 = vmatpush.msrb.mxu1 %v7248_v11  ;;  %2137 = vmatpush.msrb.mxu3 %v7251_v39  ;;  %v7266_v11 = vld [vmem:[#allocation5 + $0x1a0] sm:$0xff] }
 0x3dc   :  { %10351 = vst [vmem:[#allocation123_spill] sm:$0xff] %v7251_v39  ;;  %1989 = vmatpush.msra.mxu0 %v7254_v56  ;;  %2029 = vmatpush.msra.mxu2 %v7257_v4  ;;  %v7269_v39 = vld [vmem:[#allocation5 + $0x1a8] sm:$0xff] }
 0x3dd   :  { %10352 = vst [vmem:[#allocation124_spill] sm:$0xff] %v7254_v56  ;;  %2098 = vmatpush.msrb.mxu1 %v7260_v3  ;;  %2138 = vmatpush.msrb.mxu3 %v7263_v50  ;;  %v7272_v56 = vld [vmem:[#allocation5 + $0x290] sm:$0xff] }
 0x3de   :  { %10353 = vst [vmem:[#allocation125_spill] sm:$0xff] %v7257_v4  ;;  %1990 = vmatpush.msra.mxu0 %v7266_v11  ;;  %2030 = vmatpush.msra.mxu2 %v7269_v39  ;;  %v7275_v4 = vld [vmem:[#allocation5 + $0x298] sm:$0xff] }
 0x3df   :  { %10354 = vst [vmem:[#allocation126_spill] sm:$0xff] %v7260_v3  ;;  %2099 = vmatpush.msrb.mxu1 %v7272_v56  ;;  %2139 = vmatpush.msrb.mxu3 %v7275_v4  ;;  %v7278_v3 = vld [vmem:[#allocation5 + $0x180] sm:$0xff] }
 0x3e0   :  { %10355 = vst [vmem:[#allocation127_spill] sm:$0xff] %v7263_v50  ;;  %1991 = vmatpush.msra.mxu0 %v7278_v3  ;;  %v7281_v50 = vld [vmem:[#allocation5 + $0x188] sm:$0xff] }
 0x3e1   :  { %10356 = vst [vmem:[#allocation128_spill] sm:$0xff] %v7266_v11  ;;  %2031 = vmatpush.msra.mxu2 %v7281_v50  ;;  %v7284_v11 = vld [vmem:[#allocation5 + $0x270] sm:$0xff] }
 0x3e2   :  { %10357 = vst [vmem:[#allocation129_spill] sm:$0xff] %v7269_v39  ;;  %2100 = vmatpush.msrb.mxu1 %v7284_v11  ;;  %v7287_v39 = vld [vmem:[#allocation5 + $0x278] sm:$0xff] }
 0x3e3   :  { %10358 = vst [vmem:[#allocation130_spill] sm:$0xff] %v7272_v56  ;;  %2140 = vmatpush.msrb.mxu3 %v7287_v39  ;;  %v7290_v56 = vld [vmem:[#allocation5 + $0x160] sm:$0xff] }
 0x3e4   :  { %10359 = vst [vmem:[#allocation131_spill] sm:$0xff] %v7275_v4  ;;  %1992 = vmatpush.msra.mxu0 %v7290_v56  ;;  %v7293_v4 = vld [vmem:[#allocation5 + $0x168] sm:$0xff] }
 0x3e5   :  { %10360 = vst [vmem:[#allocation132_spill] sm:$0xff] %v7278_v3  ;;  %2032 = vmatpush.msra.mxu2 %v7293_v4  ;;  %v7296_v3 = vld [vmem:[#allocation5 + $0x250] sm:$0xff] }
 0x3e6   :  { %10361 = vst [vmem:[#allocation133_spill] sm:$0xff] %v7281_v50  ;;  %2101 = vmatpush.msrb.mxu1 %v7296_v3  ;;  %v7299_v50 = vld [vmem:[#allocation5 + $0x258] sm:$0xff] }
 0x3e7   :  { %10362 = vst [vmem:[#allocation134_spill] sm:$0xff] %v7284_v11  ;;  %2141 = vmatpush.msrb.mxu3 %v7299_v50  ;;  %v7302_v11 = vld [vmem:[#allocation5 + $0x140] sm:$0xff] }
 0x3e8   :  { %10363 = vst [vmem:[#allocation135_spill] sm:$0xff] %v7287_v39  ;;  %1993 = vmatpush.msra.mxu0 %v7302_v11  ;;  %v7305_v39 = vld [vmem:[#allocation5 + $0x148] sm:$0xff] }
 0x3e9   :  { %10364 = vst [vmem:[#allocation136_spill] sm:$0xff] %v7290_v56  ;;  %2033 = vmatpush.msra.mxu2 %v7305_v39  ;;  %v7308_v56 = vld [vmem:[#allocation5 + $0x230] sm:$0xff] }
 0x3ea   :  { %10365 = vst [vmem:[#allocation137_spill] sm:$0xff] %v7293_v4  ;;  %2102 = vmatpush.msrb.mxu1 %v7308_v56  ;;  %v7311_v4 = vld [vmem:[#allocation5 + $0x238] sm:$0xff] }
 0x3eb   :  { %10366 = vst [vmem:[#allocation138_spill] sm:$0xff] %v7296_v3  ;;  %2142 = vmatpush.msrb.mxu3 %v7311_v4  ;;  %v7314_v3 = vld [vmem:[#allocation5 + $0x120] sm:$0xff] }
 0x3ec   :  { %10367 = vst [vmem:[#allocation139_spill] sm:$0xff] %v7299_v50  ;;  %1994 = vmatpush.msra.mxu0 %v7314_v3  ;;  %v7317_v50 = vld [vmem:[#allocation5 + $0x128] sm:$0xff] }
 0x3ed   :  { %10368 = vst [vmem:[#allocation140_spill] sm:$0xff] %v7302_v11  ;;  %2034 = vmatpush.msra.mxu2 %v7317_v50  ;;  %v7320_v11 = vld [vmem:[#allocation5 + $0x210] sm:$0xff] }
 0x3ee   :  { %10369 = vst [vmem:[#allocation141_spill] sm:$0xff] %v7305_v39  ;;  %2103 = vmatpush.msrb.mxu1 %v7320_v11  ;;  %v7323_v39 = vld [vmem:[#allocation5 + $0x218] sm:$0xff] }
 0x3ef   :  { %10370 = vst [vmem:[#allocation142_spill] sm:$0xff] %v7308_v56  ;;  %2143 = vmatpush.msrb.mxu3 %v7323_v39  ;;  %v7326_v56 = vld [vmem:[#allocation5 + $0x100] sm:$0xff] }
 0x3f0   :  { %10371 = vst [vmem:[#allocation143_spill] sm:$0xff] %v7311_v4  ;;  %1995 = vmatpush.msra.mxu0 %v7326_v56  ;;  %v7329_v4 = vld [vmem:[#allocation5 + $0x108] sm:$0xff] }
 0x3f1   :  { %10372 = vst [vmem:[#allocation144_spill] sm:$0xff] %v7314_v3  ;;  %2035 = vmatpush.msra.mxu2 %v7329_v4  ;;  %v7332_v3 = vld [vmem:[#allocation5 + $0xe0] sm:$0xff] }
 0x3f2   :  { %10373 = vst [vmem:[#allocation145_spill] sm:$0xff] %v7317_v50  ;;  %1996 = vmatpush.msra.mxu0 %v7332_v3  ;;  %v7335_v50 = vld [vmem:[#allocation5 + $0xe8] sm:$0xff] }
 0x3f3   :  { %10374 = vst [vmem:[#allocation146_spill] sm:$0xff] %v7320_v11  ;;  %2036 = vmatpush.msra.mxu2 %v7335_v50  ;;  %v7338_v11 = vld [vmem:[#allocation5 + $0xc0] sm:$0xff] }
 0x3f4   :  { %10375 = vst [vmem:[#allocation147_spill] sm:$0xff] %v7323_v39  ;;  %1997 = vmatpush.msra.mxu0 %v7338_v11  ;;  %v7341_v39 = vld [vmem:[#allocation5 + $0xc8] sm:$0xff] }
 0x3f5   :  { %10376 = vst [vmem:[#allocation148_spill] sm:$0xff] %v7326_v56  ;;  %2037 = vmatpush.msra.mxu2 %v7341_v39  ;;  %v7344_v56 = vld [vmem:[#allocation5 + $0xa0] sm:$0xff] }
 0x3f6   :  { %10377 = vst [vmem:[#allocation149_spill] sm:$0xff] %v7329_v4  ;;  %1998 = vmatpush.msra.mxu0 %v7344_v56  ;;  %v7347_v4 = vld [vmem:[#allocation5 + $0xa8] sm:$0xff] }
 0x3f7   :  { %10378 = vst [vmem:[#allocation150_spill] sm:$0xff] %v7332_v3  ;;  %2038 = vmatpush.msra.mxu2 %v7347_v4  ;;  %v7350_v3 = vld [vmem:[#allocation5 + $0x80] sm:$0xff] }
 0x3f8   :  { %10379 = vst [vmem:[#allocation151_spill] sm:$0xff] %v7335_v50  ;;  %1999 = vmatpush.msra.mxu0 %v7350_v3  ;;  %v7353_v50 = vld [vmem:[#allocation5 + $0x88] sm:$0xff] }
 0x3f9   :  { %10380 = vst [vmem:[#allocation152_spill] sm:$0xff] %v7338_v11  ;;  %2039 = vmatpush.msra.mxu2 %v7353_v50  ;;  %v7356_v11 = vld [vmem:[#allocation5 + $0x60] sm:$0xff] }
 0x3fa   :  { %10381 = vst [vmem:[#allocation153_spill] sm:$0xff] %v7341_v39  ;;  %2000 = vmatpush.msra.mxu0 %v7356_v11  ;;  %v7359_v39 = vld [vmem:[#allocation5 + $0x68] sm:$0xff] }
 0x3fb   :  { %10382 = vst [vmem:[#allocation154_spill] sm:$0xff] %v7344_v56  ;;  %2040 = vmatpush.msra.mxu2 %v7359_v39  ;;  %v7362_v56 = vld [vmem:[#allocation5 + $0x40] sm:$0xff] }
 0x3fc   :  { %10383 = vst [vmem:[#allocation155_spill] sm:$0xff] %v7347_v4  ;;  %2001 = vmatpush.msra.mxu0 %v7362_v56  ;;  %v7365_v4 = vld [vmem:[#allocation5 + $0x48] sm:$0xff] }
 0x3fd   :  { %10384 = vst [vmem:[#allocation156_spill] sm:$0xff] %v7350_v3  ;;  %2041 = vmatpush.msra.mxu2 %v7365_v4  ;;  %v7368_v3 = vld [vmem:[#allocation5 + $0x20] sm:$0xff] }
 0x3fe   :  { %10385 = vst [vmem:[#allocation157_spill] sm:$0xff] %v7353_v50  ;;  %2002 = vmatpush.msra.mxu0 %v7368_v3  ;;  %v7371_v50 = vld [vmem:[#allocation5 + $0x28] sm:$0xff] }
 0x3ff   :  { %10386 = vst [vmem:[#allocation158_spill] sm:$0xff] %v7356_v11  ;;  %2042 = vmatpush.msra.mxu2 %v7371_v50  ;;  %v7374_v11 = vld [vmem:[#allocation5] sm:$0xff] }
 0x400   :  { %10387 = vst [vmem:[#allocation159_spill] sm:$0xff] %v7359_v39  ;;  %2003 = vmatpush.msra.mxu0 %v7374_v11  ;;  %v7377_v39 = vld [vmem:[#allocation5 + $0x8] sm:$0xff] }
 0x401   :  { %10388 = vst [vmem:[#allocation160_spill] sm:$0xff] %v7362_v56  ;;  %2043 = vmatpush.msra.mxu2 %v7377_v39  ;;  %v7380_v56 = vld [vmem:[#allocation5 + $0x1f0] sm:$0xff] }
 0x402   :  { %10389 = vst [vmem:[#allocation161_spill] sm:$0xff] %v7365_v4  ;;  %2068 = vmatpush.msrb.mxu0 %v7380_v56  ;;  %v7383_v4 = vld [vmem:[#allocation5 + $0x1f8] sm:$0xff] }
 0x403   :  { %10390 = vst [vmem:[#allocation162_spill] sm:$0xff] %v7368_v3  ;;  %2108 = vmatpush.msrb.mxu2 %v7383_v4  ;;  %v7386_v3 = vld [vmem:[#allocation5 + $0x1d0] sm:$0xff] }
 0x404   :  { %10391 = vst [vmem:[#allocation163_spill] sm:$0xff] %v7371_v50  ;;  %2069 = vmatpush.msrb.mxu0 %v7386_v3  ;;  %v7389_v50 = vld [vmem:[#allocation5 + $0x1d8] sm:$0xff] }
 0x405   :  { %10392 = vst [vmem:[#allocation164_spill] sm:$0xff] %v7374_v11  ;;  %2109 = vmatpush.msrb.mxu2 %v7389_v50  ;;  %v7392_v11 = vld [vmem:[#allocation5 + $0x1b0] sm:$0xff] }
 0x406   :  { %10393 = vst [vmem:[#allocation165_spill] sm:$0xff] %v7377_v39  ;;  %2070 = vmatpush.msrb.mxu0 %v7392_v11  ;;  %v7395_v39 = vld [vmem:[#allocation5 + $0x1b8] sm:$0xff] }
 0x407   :  { %10394 = vst [vmem:[#allocation166_spill] sm:$0xff] %v7380_v56  ;;  %2110 = vmatpush.msrb.mxu2 %v7395_v39  ;;  %v7398_v56 = vld [vmem:[#allocation5 + $0x190] sm:$0xff] }
 0x408   :  { %10395 = vst [vmem:[#allocation167_spill] sm:$0xff] %v7383_v4  ;;  %2071 = vmatpush.msrb.mxu0 %v7398_v56  ;;  %v7401_v4 = vld [vmem:[#allocation5 + $0x198] sm:$0xff] }
 0x409   :  { %10396 = vst [vmem:[#allocation168_spill] sm:$0xff] %v7386_v3  ;;  %2111 = vmatpush.msrb.mxu2 %v7401_v4  ;;  %v7404_v3 = vld [vmem:[#allocation5 + $0x170] sm:$0xff] }
 0x40a   :  { %10397 = vst [vmem:[#allocation169_spill] sm:$0xff] %v7389_v50  ;;  %2072 = vmatpush.msrb.mxu0 %v7404_v3  ;;  %v7407_v50 = vld [vmem:[#allocation5 + $0x178] sm:$0xff] }
 0x40b   :  { %10398 = vst [vmem:[#allocation170_spill] sm:$0xff] %v7392_v11  ;;  %2112 = vmatpush.msrb.mxu2 %v7407_v50  ;;  %v7410_v11 = vld [vmem:[#allocation5 + $0x150] sm:$0xff] }
 0x40c   :  { %10399 = vst [vmem:[#allocation171_spill] sm:$0xff] %v7395_v39  ;;  %2073 = vmatpush.msrb.mxu0 %v7410_v11  ;;  %v7413_v39 = vld [vmem:[#allocation5 + $0x158] sm:$0xff] }
 0x40d   :  { %10400 = vst [vmem:[#allocation69_spill] sm:$0xff] %v7398_v56  ;;  %2113 = vmatpush.msrb.mxu2 %v7413_v39  ;;  %v7416_v56 = vld [vmem:[#allocation5 + $0x130] sm:$0xff] }
 0x40e   :  { %10401 = vst [vmem:[#allocation86_spill] sm:$0xff] %v7401_v4  ;;  %2074 = vmatpush.msrb.mxu0 %v7416_v56  ;;  %v7419_v4 = vld [vmem:[#allocation5 + $0x138] sm:$0xff] }
 0x40f   :  { %10402 = vst [vmem:[#allocation73_spill] sm:$0xff] %v7404_v3  ;;  %2114 = vmatpush.msrb.mxu2 %v7419_v4  ;;  %v7422_v3 = vld [vmem:[#allocation5 + $0x110] sm:$0xff] }
 0x410   :  { %10403 = vst [vmem:[#allocation90_spill] sm:$0xff] %v7407_v50  ;;  %2075 = vmatpush.msrb.mxu0 %v7422_v3  ;;  %v7425_v50 = vld [vmem:[#allocation5 + $0x118] sm:$0xff] }
 0x411   :  { %10404 = vst [vmem:[#allocation76_spill] sm:$0xff] %v7410_v11  ;;  %2115 = vmatpush.msrb.mxu2 %v7425_v50  ;;  %v7428_v11 = vld [vmem:[#allocation5 + $0xf0] sm:$0xff] }
 0x412   :  { %10405 = vst [vmem:[#allocation80_spill] sm:$0xff] %v7413_v39  ;;  %2076 = vmatpush.msrb.mxu0 %v7428_v11  ;;  %v7431_v39 = vld [vmem:[#allocation5 + $0xf8] sm:$0xff] }
 0x413   :  { %10406 = vst [vmem:[#allocation84_spill] sm:$0xff] %v7416_v56  ;;  %2116 = vmatpush.msrb.mxu2 %v7431_v39  ;;  %v7434_v56 = vld [vmem:[#allocation5 + $0xd0] sm:$0xff] }
 0x414   :  { %10407 = vst [vmem:[#allocation88_spill] sm:$0xff] %v7419_v4  ;;  %2077 = vmatpush.msrb.mxu0 %v7434_v56  ;;  %v7437_v4 = vld [vmem:[#allocation5 + $0xd8] sm:$0xff] }
 0x415   :  { %10408 = vst [vmem:[#allocation20_spill] sm:$0xff] %v7422_v3  ;;  %2117 = vmatpush.msrb.mxu2 %v7437_v4  ;;  %v7440_v3 = vld [vmem:[#allocation5 + $0xb0] sm:$0xff] }
 0x416   :  { %10409 = vst [vmem:[#allocation92_spill] sm:$0xff] %v7425_v50  ;;  %2078 = vmatpush.msrb.mxu0 %v7440_v3  ;;  %v7443_v50 = vld [vmem:[#allocation5 + $0xb8] sm:$0xff] }
 0x417   :  { %10410 = vst [vmem:[#allocation23_spill] sm:$0xff] %v7428_v11  ;;  %2118 = vmatpush.msrb.mxu2 %v7443_v50  ;;  %v7446_v11 = vld [vmem:[#allocation5 + $0x90] sm:$0xff] }
 0x418   :  { %10411 = vst [vmem:[#allocation54_spill] sm:$0xff] %v7431_v39  ;;  %2079 = vmatpush.msrb.mxu0 %v7446_v11  ;;  %v7449_v39 = vld [vmem:[#allocation5 + $0x98] sm:$0xff] }
 0x419   :  { %10412 = vst [vmem:[#allocation55_spill] sm:$0xff] %v7434_v56  ;;  %2119 = vmatpush.msrb.mxu2 %v7449_v39  ;;  %v7452_v56 = vld [vmem:[#allocation5 + $0x70] sm:$0xff] }
 0x41a   :  { %10413 = vst [vmem:[#allocation95_spill] sm:$0xff] %v7437_v4  ;;  %2080 = vmatpush.msrb.mxu0 %v7452_v56  ;;  %v7455_v4 = vld [vmem:[#allocation5 + $0x78] sm:$0xff] }
 0x41b   :  { %10414 = vst [vmem:[#allocation58_spill] sm:$0xff] %v7440_v3  ;;  %2120 = vmatpush.msrb.mxu2 %v7455_v4  ;;  %v7458_v3 = vld [vmem:[#allocation5 + $0x50] sm:$0xff] }
 0x41c   :  { %10415 = vst [vmem:[#allocation59_spill] sm:$0xff] %v7443_v50  ;;  %2081 = vmatpush.msrb.mxu0 %v7458_v3  ;;  %v7461_v50 = vld [vmem:[#allocation5 + $0x58] sm:$0xff] }
 0x41d   :  { %10416 = vst [vmem:[#allocation62_spill] sm:$0xff] %v7446_v11  ;;  %2121 = vmatpush.msrb.mxu2 %v7461_v50  ;;  %v1642_v11 = vpop.f32.mrf.mxu0 }
 0x41e   :  { %10417 = vst [vmem:[#allocation63_spill] sm:$0xff] %v7449_v39  ;;  %v1643_v20 = vadd.f32 %v1642_v11, %v10422_v17  ;;  %v7465_v39 = vld [vmem:[#allocation5 + $0x30] sm:$0xff]  ;;  %v1682_v11 = vpop.f32.mrf.mxu2  ;;  %v1702_v17 = vpop.f32.mrf.mxu3 }
 0x41f   :  { %10418 = vst [vmem:[#allocation99_spill] sm:$0xff] %v7452_v56  ;;  %2082 = vmatpush.msrb.mxu0 %v7465_v39  ;;  %v7468_v56 = vld [vmem:[#allocation5 + $0x38] sm:$0xff] }
 0x420   :  { %10419 = vst [vmem:[#allocation66_spill] sm:$0xff] %v7455_v4  ;;  %2122 = vmatpush.msrb.mxu2 %v7468_v56  ;;  %v1662_v4 = vpop.f32.mrf.mxu1 }
 0x421   :  { %10420 = vst [vmem:[#allocation67_spill] sm:$0xff] %v7458_v3  ;;  %v1663_v38 = vadd.f32 %v1662_v4, %v1643_v20  ;;  %2083 = vmatpush.msrb.mxu0 %v7471_v41  ;;  %v7474_v3 = vld [vmem:[#allocation5 + $0x18] sm:$0xff] }
 0x422   :  { %10421 = vst [vmem:[#allocation70_spill] sm:$0xff] %v7461_v50  ;;  %2123 = vmatpush.msrb.mxu2 %v7474_v3 }
 0x423   :  { %10423 = vst [vmem:[#allocation72_spill] sm:$0xff] %v7465_v39  ;;  %v1785_v50 = vsub.f32 0.0, %v1663_v38  ;;  %v1683_v39 = vadd.f32 %v1682_v11, %v5713_v30 }
 0x424   :  { %10424 = vst [vmem:[#allocation74_spill] sm:$0xff] %v7468_v56 }
 0x425   :  { %10425 = vst [vmem:[#allocation77_spill] sm:$0xff] %v7471_v41  ;;  %v1786_v51 = vmul.f32 1.442695, %v1785_v50  ;;  %v1703_v33 = vadd.f32 %v1702_v17, %v1683_v39  ;;  %v1722_v56 = vpop.f32.mrf.mxu0 }
 0x426   :  { %10426 = vst [vmem:[#allocation79_spill] sm:$0xff] %v7474_v3  ;;  %v1723_v4 = vadd.f32 %v1722_v56, %v5716_v48  ;;  %v1762_v41 = vpop.f32.mrf.mxu2  ;;  %v1782_v36 = vpop.f32.mrf.mxu3 }
 0x427   :  { %3580 = vpow2.f32 %v1786_v51  ;;  %v1790_v54 = vsub.f32 0.0, %v1703_v33  ;;  %v1763_v31 = vadd.f32 %v1762_v41, %v10427_v49 }
 0x428   :  { %v1742_v3 = vpop.f32.mrf.mxu1 }
 0x429   :  { %v1791_v21 = vmul.f32 1.442695, %v1790_v54  ;;  %v1783_v34 = vadd.f32 %v1782_v36, %v1763_v31  ;;  %v1743_v12 = vadd.f32 %v1742_v3, %v1723_v4 }
 0x42b   :  { %3582 = vpow2.f32 %v1791_v21  ;;  %v1796_v50 = vsub.f32 0.0, %v1783_v34 }
 0x42d   :  { %v3581_v20 = vpop.eup %3580  ;;  %v1797_v17 = vmul.f32 1.442695, %v1796_v50 }
 0x42e   :  { %v1788_v38 = vadd.f32 1.0, %v3581_v20  ;;  %v1884_v50 = vpop.f32.mrf.mxu3 }
 0x430   :  { %3584 = vrcp.f32 %v1788_v38  ;;  %v1844_v4 = vpop.f32.mrf.mxu1 }
 0x431   :  { %v3583_v62 = vpop.eup %3582  ;;  %3586 = vtanh.f32 %v1743_v12 }
 0x432   :  { %v1793_v51 = vadd.f32 1.0, %v3583_v62 }
 0x434   :  { %3588 = vrcp.f32 %v1793_v51 }
 0x435   :  { %3590 = vpow2.f32 %v1797_v17  ;;  %v1824_v36 = vpop.f32.mrf.mxu0 }
 0x436   :  { %v3585_v54 = vpop.eup %3584  ;;  %v1825_v3 = vadd.f32 %v1824_v36, %v9846_v15  ;;  %v10440_v36 = vld [vmem:[#allocation105_spill] sm:$0xff] }
 0x437   :  { %v3587_v21 = vpop.eup %3586 }
 0x438   :  { %v1802_v41 = vmul.f32 %v3587_v21, %v3585_v54  ;;  %v1845_v51 = vadd.f32 %v1844_v4, %v1825_v3  ;;  %v10431_v21 = vld [vmem:[#allocation91_spill] sm:$0xff]  ;;  %v1924_v3 = vpop.f32.mrf.mxu1 }
 0x43a   :  { %v3589_v33 = vpop.eup %3588  ;;  %v1967_v54 = vsub.f32 0.0, %v1845_v51  ;;  %v10443_v51 = vld [vmem:[#allocation12_spill] sm:$0xff] }
 0x43b   :  { %v3591_v56 = vpop.eup %3590  ;;  %v1801_v39 = vmul.f32 %v3589_v33, %v6808_v7  ;;  %v1864_v31 = vpop.f32.mrf.mxu2  ;;  %v10435_v33 = vld [vmem:[#allocation97_spill] sm:$0xff] }
 0x43c   :  { %v1799_v11 = vadd.f32 1.0, %v3591_v56  ;;  %v1865_v20 = vadd.f32 %v1864_v31, %v9847_v18  ;;  %v10437_v56 = vld [vmem:[#allocation102_spill] sm:$0xff]  ;;  %v10441_v31 = vld [vmem:[#allocation16_spill] sm:$0xff] }
 0x43d   :  { %v7481_v49 = vadd.f32 %v1802_v41, %v1801_v39  ;;  %v10438_v39 = vld [vmem:[#allocation103_spill] sm:$0xff] }
 0x43e   :  { %3592 = vrcp.f32 %v1799_v11  ;;  %v1885_v17 = vadd.f32 %v1884_v50, %v1865_v20  ;;  %v10442_v20 = vld [vmem:[#allocation9_spill] sm:$0xff] }
 0x43f   :  { %3594 = vtanh.f32 %v7481_v49 }
 0x444   :  { %v3593_v34 = vpop.eup %3592 }
 0x445   :  { %v3595_v62 = vpop.eup %3594 }
 0x446   :  { %v1805_v12 = vmul.f32 %v3595_v62, %v3593_v34  ;;  %v10439_v34 = vld [vmem:[#allocation104_spill] sm:$0xff] }
 0x448   :  { %2024 = vmatmul.f32.vlgmr.msra.gmra.mxu1 %v1805_v12  ;;  %2064 = vmatmul.f32.vlgmr.msra.gmra.mxu3 %v1805_v12  ;;  %v3265_v7 = vrot.slane %v1805_v12, 5 }
 0x449   :  { %2190 = vmatpush.msra.mxu1 %v6814_v53  ;;  %2230 = vmatpush.msra.mxu3 %v6817_v19  ;;  %v1972_v53 = vsub.f32 0.0, %v1885_v17  ;;  %v10428_v19 = vld [vmem:[#allocation85_spill] sm:$0xff]  ;;  %v10444_v17 = vld [vmem:[#allocation10_spill] sm:$0xff] }
 0x44a   :  { %v7489_v38 = vsel %vm3283_vm2, %v6821_v23, %v3265_v7  ;;  %v1968_v23 = vmul.f32 1.442695, %v1967_v54 }
 0x44b   :  { %2191 = vmatpush.msra.mxu1 %v6823_v29  ;;  %2231 = vmatpush.msra.mxu3 %v6826_v27  ;;  %v10429_v29 = vld [vmem:[#allocation87_spill] sm:$0xff]  ;;  %v10430_v27 = vld [vmem:[#allocation89_spill] sm:$0xff] }
 0x44c   :  { %3596 = vpow2.f32 %v1968_v23 }
 0x44d   :  { %2192 = vmatpush.msra.mxu1 %v6829_v25  ;;  %2232 = vmatpush.msra.mxu3 %v6832_v16  ;;  %v1973_v25 = vmul.f32 1.442695, %v1972_v53  ;;  %v10432_v16 = vld [vmem:[#allocation93_spill] sm:$0xff]  ;;  %v10445_v53 = vld [vmem:[#allocation14_spill] sm:$0xff] }
 0x44f   :  { %2193 = vmatpush.msra.mxu1 %v6835_v37  ;;  %2233 = vmatpush.msra.mxu3 %v6838_v0  ;;  %v10433_v37 = vld [vmem:[#allocation94_spill] sm:$0xff]  ;;  %v10434_v0 = vld [vmem:[#allocation96_spill] sm:$0xff]  ;;  %3598 = vpow2.f32 %v1973_v25 }
 0x450   :  { %2104 = vmatmul.f32.vlgmr.msrb.gmra.mxu1 %v1805_v12  ;;  %2144 = vmatmul.f32.vlgmr.msrb.gmra.mxu3 %v1805_v12 }
 0x451   :  { %2194 = vmatpush.msra.mxu1 %v6841_v58  ;;  %2234 = vmatpush.msra.mxu3 %v10428_v19  ;;  %v10436_v58 = vld [vmem:[#allocation98_spill] sm:$0xff]  ;;  %v10446_v19 = vld [vmem:[#allocation11_spill] sm:$0xff] }
 0x452   :  { %v3597_v41 = vpop.eup %3596 }
 0x453   :  { %2195 = vmatpush.msra.mxu1 %v10429_v29  ;;  %2235 = vmatpush.msra.mxu3 %v10430_v27  ;;  %v1970_v7 = vadd.f32 1.0, %v3597_v41  ;;  %v1964_v29 = vpop.f32.mrf.mxu3  ;;  %v10447_v27 = vld [vmem:[#allocation101_spill] sm:$0xff]  ;;  %v10454_v41 = vld [vmem:[#allocation24_spill] sm:$0xff] }
 0x455   :  { %2196 = vmatpush.msra.mxu1 %v10431_v21  ;;  %2236 = vmatpush.msra.mxu3 %v10432_v16  ;;  %v1904_v11 = vpop.f32.mrf.mxu0  ;;  %v3599_v62 = vpop.eup %3598  ;;  %v10449_v21 = vld [vmem:[#allocation13_spill] sm:$0xff]  ;;  %v10450_v16 = vld [vmem:[#allocation18_spill] sm:$0xff] }
 0x456   :  { %v1905_v12 = vadd.f32 %v1904_v11, %v10441_v31  ;;  %v1975_v50 = vadd.f32 1.0, %v3599_v62 }
 0x457   :  { %2197 = vmatpush.msra.mxu1 %v10433_v37  ;;  %2237 = vmatpush.msra.mxu3 %v10434_v0  ;;  %v10451_v0 = vld [vmem:[#allocation15_spill] sm:$0xff] }
 0x458   :  { %v1925_v4 = vadd.f32 %v1924_v3, %v1905_v12  ;;  %v10456_v12 = vld [vmem:[#allocation28_spill] sm:$0xff] }
 0x459   :  { %2198 = vmatpush.msra.mxu1 %v10435_v33  ;;  %2238 = vmatpush.msra.mxu3 %v10436_v58  ;;  %v10452_v33 = vld [vmem:[#allocation21_spill] sm:$0xff] }
 0x45a   :  { %3600 = vtanh.f32 %v1925_v4  ;;  %v10458_v4 = vld [vmem:[#allocation30_spill] sm:$0xff] }
 0x45b   :  { %2199 = vmatpush.msra.mxu1 %v10437_v56  ;;  %2239 = vmatpush.msra.mxu3 %v10438_v39  ;;  %v1944_v54 = vpop.f32.mrf.mxu2  ;;  %3602 = vrcp.f32 %v1970_v7  ;;  %v10453_v39 = vld [vmem:[#allocation17_spill] sm:$0xff] }
 0x45c   :  { %v1945_v23 = vadd.f32 %v1944_v54, %v10446_v19  ;;  %3604 = vrcp.f32 %v1975_v50  ;;  %v10459_v50 = vld [vmem:[#allocation22_spill] sm:$0xff]  ;;  %v10464_v54 = vld [vmem:[#allocation36_spill] sm:$0xff] }
 0x45d   :  { %2200 = vmatpush.msra.mxu1 %v10439_v34  ;;  %2240 = vmatpush.msra.mxu3 %v10440_v36  ;;  %v10455_v36 = vld [vmem:[#allocation26_spill] sm:$0xff] }
 0x45e   :  { %v1965_v25 = vadd.f32 %v1964_v29, %v1945_v23  ;;  %v10466_v23 = vld [vmem:[#allocation38_spill] sm:$0xff] }
 0x45f   :  { %2201 = vmatpush.msra.mxu1 %v10442_v20  ;;  %2241 = vmatpush.msra.mxu3 %v6887_v13  ;;  %v10448_v13 = vld [vmem:[#allocation100_spill] sm:$0xff]  ;;  %v10457_v20 = vld [vmem:[#allocation19_spill] sm:$0xff] }
 0x460   :  { %v1978_v37 = vsub.f32 0.0, %v1965_v25  ;;  %v7549_v25 = vld [vmem:[#allocation3 + $0x1e0] sm:$0xff] }
 0x461   :  { %2202 = vmatpush.msra.mxu1 %v10443_v51  ;;  %2242 = vmatpush.msra.mxu3 %v10444_v17  ;;  %v10463_v17 = vld [vmem:[#allocation27_spill] sm:$0xff] }
 0x462   :  { %v1979_v56 = vmul.f32 1.442695, %v1978_v37  ;;  %v7567_v37 = vld [vmem:[#allocation3 + $0x1a8] sm:$0xff] }
 0x463   :  { %2203 = vmatpush.msra.mxu1 %v10445_v53  ;;  %2243 = vmatpush.msra.mxu3 %v6899_v43  ;;  %v3601_v43 = vpop.eup %3600 }
 0x464   :  { %v3603_v58 = vpop.eup %3602  ;;  %3606 = vpow2.f32 %v1979_v56  ;;  %v7654_v56 = vld [vmem:[#allocation3 + $0x48] sm:$0xff] }
 0x465   :  { %2204 = vmatpush.msra.mxu1 %v10447_v27  ;;  %2244 = vmatpush.msra.mxu3 %v10448_v13  ;;  %v3605_v11 = vpop.eup %3604  ;;  %v1984_v34 = vmul.f32 %v3603_v58, %v3601_v43  ;;  %v10467_v13 = vld [vmem:[#allocation31_spill] sm:$0xff]  ;;  %v7646_v43 = vld [vmem:[#allocation3 + $0x68] sm:$0xff]  ;;  %v7651_v58 = vld [vmem:[#allocation3 + $0x40] sm:$0xff] }
 0x466   :  { %v1983_v62 = vmul.f32 %v3605_v11, %v6946_v10  ;;  %v10461_v10 = vld [vmem:[#allocation25_spill] sm:$0xff]  ;;  %v7662_v11 = vld [vmem:[#allocation3 + $0x28] sm:$0xff] }
 0x467   :  { %2205 = vmatpush.msra.mxu1 %v10449_v21  ;;  %2245 = vmatpush.msra.mxu3 %v10450_v16  ;;  %v7552_v21 = vld [vmem:[#allocation3 + $0x1e8] sm:$0xff]  ;;  %v7555_v16 = vld [vmem:[#allocation3 + $0x1c0] sm:$0xff] }
 0x468   :  { %v7532_v3 = vadd.f32 %v1984_v34, %v1983_v62  ;;  %v7668_v34 = vld [vmem:[%s8890_s0 + $0x5] sm:$0x1]  ;;  %v10474_v62 = vld [vmem:[#allocation46_spill] sm:$0xff] }
 0x469   :  { %2270 = vmatpush.msrb.mxu1 %v10451_v0  ;;  %2310 = vmatpush.msrb.mxu3 %v10452_v33  ;;  %v7571_v0 = vld [vmem:[#allocation3 + $0x180] sm:$0xff]  ;;  %v7614_v33 = vld [vmem:[#allocation3 + $0xe8] sm:$0xff] }
 0x46a   :  { %v3607_v7 = vpop.eup %3606  ;;  %3608 = vtanh.f32 %v7532_v3 }
 0x46b   :  { %2271 = vmatpush.msrb.mxu1 %v10453_v39  ;;  %2311 = vmatpush.msrb.mxu3 %v10454_v41  ;;  %v1981_v51 = vadd.f32 1.0, %v3607_v7  ;;  %v10472_v39 = vld [vmem:[#allocation44_spill] sm:$0xff]  ;;  %v7659_v41 = vld [vmem:[#allocation3 + $0x20] sm:$0xff]  ;;  %v7680_v7 = vld [vmem:[#allocation3 + $0x1f0] sm:$0xff] }
 0x46d   :  { %2272 = vmatpush.msrb.mxu1 %v10455_v36  ;;  %2312 = vmatpush.msrb.mxu3 %v6930_v9  ;;  %v10460_v9 = vld [vmem:[#allocation32_spill] sm:$0xff]  ;;  %3610 = vrcp.f32 %v1981_v51  ;;  %v10473_v36 = vld [vmem:[#allocation37_spill] sm:$0xff] }
 0x46e   :  { %v10476_v51 = vld [vmem:[#allocation48_spill] sm:$0xff] }
 0x46f   :  { %2273 = vmatpush.msrb.mxu1 %v6933_v14  ;;  %2313 = vmatpush.msrb.mxu3 %v10456_v12  ;;  %v10462_v14 = vld [vmem:[#allocation34_spill] sm:$0xff]  ;;  %v7672_v12 = vld [vmem:[#allocation3] sm:$0xff] }
 0x470   :  { %v3609_v53 = vpop.eup %3608 }
 0x471   :  { %2274 = vmatpush.msrb.mxu1 %v10457_v20  ;;  %2314 = vmatpush.msrb.mxu3 %v6943_v47  ;;  %v10465_v47 = vld [vmem:[#allocation29_spill] sm:$0xff]  ;;  %v7675_v20 = vld [vmem:[#allocation3 + $0x8] sm:$0xff] }
 0x473   :  { %2275 = vmatpush.msrb.mxu1 %v10458_v4  ;;  %2315 = vmatpush.msrb.mxu3 %v10459_v50  ;;  %v3611_v29 = vpop.eup %3610  ;;  %v7683_v4 = vld [vmem:[#allocation3 + $0x1f8] sm:$0xff]  ;;  %v10475_v50 = vld [vmem:[#allocation39_spill] sm:$0xff] }
 0x474   :  { %v1987_v27 = vmul.f32 %v3611_v29, %v3609_v53  ;;  %v10482_v53 = vld [vmem:[#allocation43_spill] sm:$0xff] }
 0x475   :  { %2276 = vmatpush.msrb.mxu1 %v10460_v9  ;;  %2316 = vmatpush.msrb.mxu3 %v10461_v10  ;;  %v7688_v9 = vld [vmem:[#allocation3 + $0x1d0] sm:$0xff]  ;;  %v7691_v10 = vld [vmem:[#allocation3 + $0x1d8] sm:$0xff] }
 0x476   :  { %2004 = vmatmul.f32.vlgmr.msra.gmra.mxu0 %v1987_v27  ;;  %2044 = vmatmul.f32.vlgmr.msra.gmra.mxu2 %v1987_v27  ;;  %10477 = vst [vmem:[#allocation81_spill] sm:$0xff] %v7691_v10  ;;  %v7704_v29 = vld [vmem:[#allocation3 + $0x190] sm:$0xff] }
 0x477   :  { %2277 = vmatpush.msrb.mxu1 %v10462_v14  ;;  %2317 = vmatpush.msrb.mxu3 %v10463_v17  ;;  %v10478_v14 = vld [vmem:[#allocation41_spill] sm:$0xff]  ;;  %v10479_v17 = vld [vmem:[#allocation50_spill] sm:$0xff]  ;;  %10484 = vst [vmem:[#allocation87_spill] sm:$0xff] %v7704_v29 }
 0x478   :  { %2170 = vmatpush.msra.mxu0 %v7549_v25  ;;  %2206 = vmatmul.f32.vlgmr.msra.gmra.mxu1 %v1987_v27 }
 0x479   :  { %2278 = vmatpush.msrb.mxu1 %v10464_v54  ;;  %2318 = vmatpush.msrb.mxu3 %v10465_v47  ;;  %v7696_v54 = vld [vmem:[#allocation3 + $0x1b0] sm:$0xff]  ;;  %v7699_v47 = vld [vmem:[#allocation3 + $0x1b8] sm:$0xff] }
 0x47a   :  { %2210 = vmatpush.msra.mxu2 %v7552_v21  ;;  %2246 = vmatmul.f32.vlgmr.msra.gmra.mxu3 %v1987_v27  ;;  %10480 = vst [vmem:[#allocation83_spill] sm:$0xff] %v7696_v54 }
 0x47b   :  { %2279 = vmatpush.msrb.mxu1 %v10466_v23  ;;  %2319 = vmatpush.msrb.mxu3 %v6976_v63  ;;  %v7563_v63 = vld [vmem:[#allocation3 + $0x1a0] sm:$0xff]  ;;  %10481 = vst [vmem:[#allocation85_spill] sm:$0xff] %v7699_v47  ;;  %v10483_v23 = vld [vmem:[#allocation51_spill] sm:$0xff] }
 0x47c   :  { %2171 = vmatpush.msra.mxu0 %v7555_v16 }
 0x47d   :  { %2280 = vmatpush.msrb.mxu1 %v6979_v35  ;;  %2320 = vmatpush.msrb.mxu3 %v10467_v13  ;;  %v7559_v35 = vld [vmem:[#allocation3 + $0x1c8] sm:$0xff]  ;;  %v10486_v13 = vld [vmem:[#allocation45_spill] sm:$0xff] }
 0x47e   :  { %2211 = vmatpush.msra.mxu2 %v7559_v35  ;;  %2172 = vmatpush.msra.mxu0 %v7563_v63 }
 0x47f   :  { %2281 = vmatpush.msrb.mxu1 %v6985_v26  ;;  %2321 = vmatpush.msrb.mxu3 %v6988_v45  ;;  %v7575_v26 = vld [vmem:[#allocation3 + $0x188] sm:$0xff]  ;;  %v7579_v45 = vld [vmem:[#allocation3 + $0x160] sm:$0xff] }
 0x480   :  { %2212 = vmatpush.msra.mxu2 %v7567_v37  ;;  %2173 = vmatpush.msra.mxu0 %v7571_v0 }
 0x481   :  { %2282 = vmatpush.msrb.mxu1 %v6994_v52  ;;  %2322 = vmatpush.msrb.mxu3 %v6998_v57  ;;  %v7582_v52 = vld [vmem:[#allocation3 + $0x168] sm:$0xff]  ;;  %v7587_v57 = vld [vmem:[#allocation3 + $0x140] sm:$0xff] }
 0x482   :  { %2213 = vmatpush.msra.mxu2 %v7575_v26  ;;  %2084 = vmatmul.f32.vlgmr.msrb.gmra.mxu0 %v1987_v27 }
 0x483   :  { %2283 = vmatpush.msrb.mxu1 %v7002_v5  ;;  %2323 = vmatpush.msrb.mxu3 %v7006_v22  ;;  %v7590_v5 = vld [vmem:[#allocation3 + $0x148] sm:$0xff]  ;;  %v7595_v22 = vld [vmem:[#allocation3 + $0x120] sm:$0xff] }
 0x484   :  { %2124 = vmatmul.f32.vlgmr.msrb.gmra.mxu2 %v1987_v27  ;;  %2174 = vmatpush.msra.mxu0 %v7579_v45 }
 0x485   :  { %2214 = vmatpush.msra.mxu2 %v7582_v52  ;;  %2284 = vmatpush.msrb.mxu1 %v7010_v24  ;;  %v7598_v24 = vld [vmem:[#allocation3 + $0x128] sm:$0xff] }
 0x486   :  { %2324 = vmatpush.msrb.mxu3 %v7016_v28  ;;  %2175 = vmatpush.msra.mxu0 %v7587_v57  ;;  %v7603_v28 = vld [vmem:[#allocation3 + $0x100] sm:$0xff] }
 0x487   :  { %2215 = vmatpush.msra.mxu2 %v7590_v5  ;;  %2285 = vmatpush.msrb.mxu1 %v7020_v6  ;;  %v7606_v6 = vld [vmem:[#allocation3 + $0x108] sm:$0xff] }
 0x488   :  { %2325 = vmatpush.msrb.mxu3 %v7024_v46  ;;  %2286 = vmatmul.f32.vlgmr.msrb.gmra.mxu1 %v1987_v27  ;;  %v7611_v46 = vld [vmem:[#allocation3 + $0xe0] sm:$0xff] }
 0x489   :  { %2326 = vmatmul.f32.vlgmr.msrb.gmra.mxu3 %v1987_v27  ;;  %2176 = vmatpush.msra.mxu0 %v7595_v22  ;;  %v7707_v27 = vld [vmem:[#allocation3 + $0x198] sm:$0xff] }
 0x48a   :  { %2216 = vmatpush.msra.mxu2 %v7598_v24  ;;  %2371 = vmatpush.msra.mxu1 %v7029_v32  ;;  %v7619_v32 = vld [vmem:[#allocation3 + $0xc0] sm:$0xff]  ;;  %10485 = vst [vmem:[#allocation89_spill] sm:$0xff] %v7707_v27 }
 0x48b   :  { %2411 = vmatpush.msra.mxu3 %v7032_v40  ;;  %2177 = vmatpush.msra.mxu0 %v7603_v28  ;;  %v7622_v40 = vld [vmem:[#allocation3 + $0xc8] sm:$0xff] }
 0x48c   :  { %2217 = vmatpush.msra.mxu2 %v7606_v6  ;;  %2372 = vmatpush.msra.mxu1 %v7037_v42  ;;  %v7627_v42 = vld [vmem:[#allocation3 + $0xa0] sm:$0xff] }
 0x48d   :  { %2412 = vmatpush.msra.mxu3 %v7040_v59  ;;  %2178 = vmatpush.msra.mxu0 %v7611_v46  ;;  %v7630_v59 = vld [vmem:[#allocation3 + $0xa8] sm:$0xff] }
 0x48e   :  { %2218 = vmatpush.msra.mxu2 %v7614_v33  ;;  %2373 = vmatpush.msra.mxu1 %v7045_v44  ;;  %v7635_v44 = vld [vmem:[#allocation3 + $0x80] sm:$0xff] }
 0x48f   :  { %2413 = vmatpush.msra.mxu3 %v7048_v60  ;;  %2179 = vmatpush.msra.mxu0 %v7619_v32  ;;  %v7638_v60 = vld [vmem:[#allocation3 + $0x88] sm:$0xff] }
 0x490   :  { %2219 = vmatpush.msra.mxu2 %v7622_v40  ;;  %2374 = vmatpush.msra.mxu1 %v7053_v2  ;;  %v10468_v2 = vld [vmem:[#allocation40_spill] sm:$0xff] }
 0x491   :  { %2414 = vmatpush.msra.mxu3 %v7056_v8  ;;  %2180 = vmatpush.msra.mxu0 %v7627_v42  ;;  %v7643_v8 = vld [vmem:[#allocation3 + $0x60] sm:$0xff] }
 0x492   :  { %2220 = vmatpush.msra.mxu2 %v7630_v59  ;;  %2375 = vmatpush.msra.mxu1 %v7061_v55  ;;  %v10469_v55 = vld [vmem:[#allocation33_spill] sm:$0xff] }
 0x493   :  { %2415 = vmatpush.msra.mxu3 %v7064_v61  ;;  %2181 = vmatpush.msra.mxu0 %v7635_v44  ;;  %v10470_v61 = vld [vmem:[#allocation42_spill] sm:$0xff] }
 0x494   :  { %2221 = vmatpush.msra.mxu2 %v7638_v60  ;;  %2376 = vmatpush.msra.mxu1 %v7069_v1  ;;  %v10471_v1 = vld [vmem:[#allocation35_spill] sm:$0xff] }
 0x495   :  { %2416 = vmatpush.msra.mxu3 %v10468_v2  ;;  %2182 = vmatpush.msra.mxu0 %v7643_v8  ;;  %v10487_v2 = vld [vmem:[#allocation56_spill] sm:$0xff] }
 0x496   :  { %2222 = vmatpush.msra.mxu2 %v7646_v43  ;;  %2377 = vmatpush.msra.mxu1 %v10469_v55  ;;  %v7712_v55 = vld [vmem:[#allocation3 + $0x170] sm:$0xff] }
 0x497   :  { %2417 = vmatpush.msra.mxu3 %v10470_v61  ;;  %2183 = vmatpush.msra.mxu0 %v7651_v58  ;;  %10488 = vst [vmem:[#allocation91_spill] sm:$0xff] %v7712_v55  ;;  %v7715_v61 = vld [vmem:[#allocation3 + $0x178] sm:$0xff] }
 0x498   :  { %2223 = vmatpush.msra.mxu2 %v7654_v56  ;;  %2378 = vmatpush.msra.mxu1 %v10471_v1  ;;  %10489 = vst [vmem:[#allocation93_spill] sm:$0xff] %v7715_v61  ;;  %v10490_v1 = vld [vmem:[#allocation47_spill] sm:$0xff] }
 0x499   :  { %2418 = vmatpush.msra.mxu3 %v10472_v39  ;;  %2184 = vmatpush.msra.mxu0 %v7659_v41  ;;  %v10491_v39 = vld [vmem:[#allocation60_spill] sm:$0xff] }
 0x49a   :  { %2224 = vmatpush.msra.mxu2 %v7662_v11  ;;  %2379 = vmatpush.msra.mxu1 %v10473_v36  ;;  %v7720_v36 = vld [vmem:[#allocation3 + $0x150] sm:$0xff] }
 0x49b   :  { %2419 = vmatpush.msra.mxu3 %v10474_v62  ;;  %2185 = vmatpush.msra.mxu0 %v7672_v12  ;;  %10492 = vst [vmem:[#allocation94_spill] sm:$0xff] %v7720_v36  ;;  %v7723_v62 = vld [vmem:[#allocation3 + $0x158] sm:$0xff] }
 0x49c   :  { %2225 = vmatpush.msra.mxu2 %v7675_v20  ;;  %2186 = vmatmul.f32.vlgmr.msra.gmra.mxu0 %v7668_v34  ;;  %10493 = vst [vmem:[#allocation96_spill] sm:$0xff] %v7723_v62 }
 0x49d   :  { %2226 = vmatmul.f32.vlgmr.msra.gmra.mxu2 %v7668_v34  ;;  %2250 = vmatpush.msrb.mxu0 %v7680_v7 }
 0x49e   :  { %2290 = vmatpush.msrb.mxu2 %v7683_v4  ;;  %2380 = vmatpush.msra.mxu1 %v10475_v50  ;;  %v10494_v50 = vld [vmem:[#allocation49_spill] sm:$0xff] }
 0x49f   :  { %2420 = vmatpush.msra.mxu3 %v10476_v51  ;;  %2251 = vmatpush.msrb.mxu0 %v7688_v9  ;;  %v10495_v51 = vld [vmem:[#allocation64_spill] sm:$0xff] }
 0x4a0   :  { %2291 = vmatpush.msrb.mxu2 %v7691_v10  ;;  %2381 = vmatpush.msra.mxu1 %v10478_v14  ;;  %v7728_v14 = vld [vmem:[#allocation3 + $0x130] sm:$0xff] }
 0x4a1   :  { %2421 = vmatpush.msra.mxu3 %v10479_v17  ;;  %2252 = vmatpush.msrb.mxu0 %v7696_v54  ;;  %10496 = vst [vmem:[#allocation97_spill] sm:$0xff] %v7728_v14  ;;  %v7731_v17 = vld [vmem:[#allocation3 + $0x138] sm:$0xff] }
 0x4a2   :  { %2292 = vmatpush.msrb.mxu2 %v7699_v47  ;;  %2382 = vmatpush.msra.mxu1 %v10482_v53  ;;  %10497 = vst [vmem:[#allocation98_spill] sm:$0xff] %v7731_v17  ;;  %v10498_v53 = vld [vmem:[#allocation52_spill] sm:$0xff] }
 0x4a3   :  { %2422 = vmatpush.msra.mxu3 %v10483_v23  ;;  %2253 = vmatpush.msrb.mxu0 %v7704_v29  ;;  %v10499_v23 = vld [vmem:[#allocation68_spill] sm:$0xff] }
 0x4a4   :  { %2293 = vmatpush.msrb.mxu2 %v7707_v27  ;;  %2383 = vmatpush.msra.mxu1 %v10486_v13  ;;  %v7736_v13 = vld [vmem:[#allocation3 + $0x110] sm:$0xff] }
 0x4a5   :  { %2423 = vmatpush.msra.mxu3 %v10487_v2  ;;  %2254 = vmatpush.msrb.mxu0 %v7712_v55  ;;  %10500 = vst [vmem:[#allocation102_spill] sm:$0xff] %v7736_v13  ;;  %v7739_v2 = vld [vmem:[#allocation3 + $0x118] sm:$0xff] }
 0x4a6   :  { %2294 = vmatpush.msrb.mxu2 %v7715_v61  ;;  %2384 = vmatpush.msra.mxu1 %v10490_v1  ;;  %10501 = vst [vmem:[#allocation103_spill] sm:$0xff] %v7739_v2  ;;  %v10502_v1 = vld [vmem:[#allocation53_spill] sm:$0xff] }
 0x4a7   :  { %2424 = vmatpush.msra.mxu3 %v10491_v39  ;;  %2255 = vmatpush.msrb.mxu0 %v7720_v36  ;;  %v10503_v39 = vld [vmem:[#allocation71_spill] sm:$0xff]  ;;  %v10611_v36 = vld [vmem:[#allocation72_spill] sm:$0xff] }
 0x4a8   :  { %2295 = vmatpush.msrb.mxu2 %v7723_v62  ;;  %2385 = vmatpush.msra.mxu1 %v10494_v50  ;;  %v7744_v50 = vld [vmem:[#allocation3 + $0xf0] sm:$0xff] }
 0x4a9   :  { %2425 = vmatpush.msra.mxu3 %v10495_v51  ;;  %2256 = vmatpush.msrb.mxu0 %v7728_v14  ;;  %10504 = vst [vmem:[#allocation104_spill] sm:$0xff] %v7744_v50  ;;  %v7747_v51 = vld [vmem:[#allocation3 + $0xf8] sm:$0xff]  ;;  %v10543_v14 = vld [vmem:[#allocation127_spill] sm:$0xff] }
 0x4aa   :  { %2296 = vmatpush.msrb.mxu2 %v7731_v17  ;;  %2386 = vmatpush.msra.mxu1 %v10498_v53  ;;  %10505 = vst [vmem:[#allocation105_spill] sm:$0xff] %v7747_v51  ;;  %v10506_v53 = vld [vmem:[#allocation57_spill] sm:$0xff]  ;;  %v7793_v17 = vld [vmem:[#allocation3 + $0x38] sm:$0xff] }
 0x4ab   :  { %2426 = vmatpush.msra.mxu3 %v10499_v23  ;;  %2257 = vmatpush.msrb.mxu0 %v7736_v13  ;;  %v10507_v23 = vld [vmem:[#allocation75_spill] sm:$0xff]  ;;  %10529 = vst [vmem:[#allocation17_spill] sm:$0xff] %v7793_v17 }
 0x4ac   :  { %2297 = vmatpush.msrb.mxu2 %v7739_v2  ;;  %2451 = vmatpush.msrb.mxu1 %v10502_v1  ;;  %v7752_v13 = vld [vmem:[#allocation3 + $0xd0] sm:$0xff]  ;;  %v7755_v2 = vld [vmem:[#allocation3 + $0xd8] sm:$0xff]  ;;  %v10510_v1 = vld [vmem:[#allocation61_spill] sm:$0xff] }
 0x4ad   :  { %2491 = vmatpush.msrb.mxu3 %v10503_v39  ;;  %2258 = vmatpush.msrb.mxu0 %v7744_v50  ;;  %10508 = vst [vmem:[#allocation9_spill] sm:$0xff] %v7752_v13  ;;  %v10511_v39 = vld [vmem:[#allocation78_spill] sm:$0xff]  ;;  %v7760_v50 = vld [vmem:[#allocation3 + $0xb0] sm:$0xff] }
 0x4ae   :  { %2298 = vmatpush.msrb.mxu2 %v7747_v51  ;;  %2452 = vmatpush.msrb.mxu1 %v10506_v53  ;;  %10509 = vst [vmem:[#allocation12_spill] sm:$0xff] %v7755_v2  ;;  %v7763_v51 = vld [vmem:[#allocation3 + $0xb8] sm:$0xff]  ;;  %v10514_v53 = vld [vmem:[#allocation106_spill] sm:$0xff] }
 0x4af   :  { %2492 = vmatpush.msrb.mxu3 %v10507_v23  ;;  %2259 = vmatpush.msrb.mxu0 %v7752_v13  ;;  %10512 = vst [vmem:[#allocation10_spill] sm:$0xff] %v7760_v50  ;;  %v10515_v23 = vld [vmem:[#allocation107_spill] sm:$0xff] }
 0x4b0   :  { %2299 = vmatpush.msrb.mxu2 %v7755_v2  ;;  %2453 = vmatpush.msrb.mxu1 %v10510_v1  ;;  %10513 = vst [vmem:[#allocation14_spill] sm:$0xff] %v7763_v51  ;;  %v7768_v13 = vld [vmem:[#allocation3 + $0x90] sm:$0xff]  ;;  %v7771_v2 = vld [vmem:[#allocation3 + $0x98] sm:$0xff] }
 0x4b1   :  { %2493 = vmatpush.msrb.mxu3 %v10511_v39  ;;  %2260 = vmatpush.msrb.mxu0 %v7760_v50  ;;  %10516 = vst [vmem:[#allocation101_spill] sm:$0xff] %v7768_v13  ;;  %v10518_v1 = vld [vmem:[#allocation108_spill] sm:$0xff]  ;;  %v10519_v39 = vld [vmem:[#allocation109_spill] sm:$0xff]  ;;  %v7776_v50 = vld [vmem:[#allocation3 + $0x70] sm:$0xff] }
 0x4b2   :  { %2300 = vmatpush.msrb.mxu2 %v7763_v51  ;;  %2454 = vmatpush.msrb.mxu1 %v10514_v53  ;;  %10517 = vst [vmem:[#allocation100_spill] sm:$0xff] %v7771_v2  ;;  %v7779_v51 = vld [vmem:[#allocation3 + $0x78] sm:$0xff]  ;;  %v10522_v53 = vld [vmem:[#allocation110_spill] sm:$0xff] }
 0x4b3   :  { %2494 = vmatpush.msrb.mxu3 %v10515_v23  ;;  %2261 = vmatpush.msrb.mxu0 %v7768_v13  ;;  %10520 = vst [vmem:[#allocation13_spill] sm:$0xff] %v7776_v50  ;;  %v10523_v23 = vld [vmem:[#allocation111_spill] sm:$0xff] }
 0x4b4   :  { %2301 = vmatpush.msrb.mxu2 %v7771_v2  ;;  %2455 = vmatpush.msrb.mxu1 %v10518_v1  ;;  %10521 = vst [vmem:[#allocation18_spill] sm:$0xff] %v7779_v51  ;;  %v7784_v13 = vld [vmem:[#allocation3 + $0x50] sm:$0xff]  ;;  %v7787_v2 = vld [vmem:[#allocation3 + $0x58] sm:$0xff] }
 0x4b5   :  { %2495 = vmatpush.msrb.mxu3 %v10519_v39  ;;  %2262 = vmatpush.msrb.mxu0 %v7776_v50  ;;  %10524 = vst [vmem:[#allocation15_spill] sm:$0xff] %v7784_v13  ;;  %v10526_v1 = vld [vmem:[#allocation112_spill] sm:$0xff]  ;;  %v10527_v39 = vld [vmem:[#allocation113_spill] sm:$0xff]  ;;  %v10528_v50 = vld [vmem:[#allocation114_spill] sm:$0xff] }
 0x4b6   :  { %2302 = vmatpush.msrb.mxu2 %v7779_v51  ;;  %2456 = vmatpush.msrb.mxu1 %v10522_v53  ;;  %10525 = vst [vmem:[#allocation21_spill] sm:$0xff] %v7787_v2  ;;  %v10530_v53 = vld [vmem:[#allocation115_spill] sm:$0xff]  ;;  %v10532_v51 = vld [vmem:[#allocation117_spill] sm:$0xff] }
 0x4b7   :  { %2496 = vmatpush.msrb.mxu3 %v10523_v23  ;;  %2263 = vmatpush.msrb.mxu0 %v7784_v13  ;;  %v10531_v23 = vld [vmem:[#allocation116_spill] sm:$0xff] }
 0x4b8   :  { %2303 = vmatpush.msrb.mxu2 %v7787_v2  ;;  %2457 = vmatpush.msrb.mxu1 %v10526_v1  ;;  %v7799_v13 = vld [vmem:[#allocation3 + $0x18] sm:$0xff]  ;;  %v10534_v1 = vld [vmem:[#allocation118_spill] sm:$0xff]  ;;  %v10541_v2 = vld [vmem:[#allocation125_spill] sm:$0xff] }
 0x4b9   :  { %2497 = vmatpush.msrb.mxu3 %v10527_v39  ;;  %2264 = vmatpush.msrb.mxu0 %v10528_v50  ;;  %10533 = vst [vmem:[#allocation24_spill] sm:$0xff] %v7799_v13  ;;  %v10535_v50 = vld [vmem:[#allocation119_spill] sm:$0xff]  ;;  %v10536_v39 = vld [vmem:[#allocation120_spill] sm:$0xff] }
 0x4ba   :  { %2304 = vmatpush.msrb.mxu2 %v7793_v17  ;;  %2458 = vmatpush.msrb.mxu1 %v10530_v53  ;;  %v10537_v17 = vld [vmem:[#allocation121_spill] sm:$0xff]  ;;  %v10538_v53 = vld [vmem:[#allocation122_spill] sm:$0xff] }
 0x4bb   :  { %2498 = vmatpush.msrb.mxu3 %v10531_v23  ;;  %2265 = vmatpush.msrb.mxu0 %v10532_v51  ;;  %v10539_v23 = vld [vmem:[#allocation123_spill] sm:$0xff]  ;;  %v10540_v51 = vld [vmem:[#allocation124_spill] sm:$0xff] }
 0x4bc   :  { %2305 = vmatpush.msrb.mxu2 %v7799_v13  ;;  %2266 = vmatmul.f32.vlgmr.msrb.gmra.mxu0 %v7668_v34  ;;  %v10542_v13 = vld [vmem:[#allocation126_spill] sm:$0xff] }
 0x4bd   :  { %2306 = vmatmul.f32.vlgmr.msrb.gmra.mxu2 %v7668_v34  ;;  %2459 = vmatpush.msrb.mxu1 %v10534_v1  ;;  %v10544_v34 = vld [vmem:[#allocation128_spill] sm:$0xff]  ;;  %v10545_v1 = vld [vmem:[#allocation129_spill] sm:$0xff] }
 0x4be   :  { %2499 = vmatpush.msrb.mxu3 %v10535_v50  ;;  %2351 = vmatpush.msra.mxu0 %v10536_v39  ;;  %v10546_v50 = vld [vmem:[#allocation130_spill] sm:$0xff]  ;;  %v10547_v39 = vld [vmem:[#allocation131_spill] sm:$0xff] }
 0x4bf   :  { %2391 = vmatpush.msra.mxu2 %v10537_v17  ;;  %2460 = vmatpush.msrb.mxu1 %v10538_v53  ;;  %v10548_v17 = vld [vmem:[#allocation132_spill] sm:$0xff]  ;;  %v10549_v53 = vld [vmem:[#allocation133_spill] sm:$0xff] }
 0x4c0   :  { %2500 = vmatpush.msrb.mxu3 %v10539_v23  ;;  %2352 = vmatpush.msra.mxu0 %v10540_v51  ;;  %v10550_v23 = vld [vmem:[#allocation134_spill] sm:$0xff]  ;;  %v10551_v51 = vld [vmem:[#allocation135_spill] sm:$0xff] }
 0x4c1   :  { %2392 = vmatpush.msra.mxu2 %v10541_v2  ;;  %2461 = vmatpush.msrb.mxu1 %v10542_v13  ;;  %v10552_v2 = vld [vmem:[#allocation136_spill] sm:$0xff]  ;;  %v10553_v13 = vld [vmem:[#allocation137_spill] sm:$0xff] }
 0x4c2   :  { %2501 = vmatpush.msrb.mxu3 %v10543_v14  ;;  %2353 = vmatpush.msra.mxu0 %v10544_v34  ;;  %v10554_v14 = vld [vmem:[#allocation138_spill] sm:$0xff]  ;;  %v10555_v34 = vld [vmem:[#allocation139_spill] sm:$0xff] }
 0x4c3   :  { %2393 = vmatpush.msra.mxu2 %v10545_v1  ;;  %2462 = vmatpush.msrb.mxu1 %v10546_v50  ;;  %v10556_v1 = vld [vmem:[#allocation140_spill] sm:$0xff]  ;;  %v10557_v50 = vld [vmem:[#allocation141_spill] sm:$0xff] }
 0x4c4   :  { %2502 = vmatpush.msrb.mxu3 %v10547_v39  ;;  %2354 = vmatpush.msra.mxu0 %v10548_v17  ;;  %v10558_v39 = vld [vmem:[#allocation142_spill] sm:$0xff]  ;;  %v10559_v17 = vld [vmem:[#allocation143_spill] sm:$0xff] }
 0x4c5   :  { %2394 = vmatpush.msra.mxu2 %v10549_v53  ;;  %2463 = vmatpush.msrb.mxu1 %v10550_v23  ;;  %v10560_v53 = vld [vmem:[#allocation144_spill] sm:$0xff]  ;;  %v10561_v23 = vld [vmem:[#allocation145_spill] sm:$0xff] }
 0x4c6   :  { %2503 = vmatpush.msrb.mxu3 %v10551_v51  ;;  %2355 = vmatpush.msra.mxu0 %v10552_v2  ;;  %v10562_v51 = vld [vmem:[#allocation146_spill] sm:$0xff]  ;;  %v10563_v2 = vld [vmem:[#allocation147_spill] sm:$0xff] }
 0x4c7   :  { %2395 = vmatpush.msra.mxu2 %v10553_v13  ;;  %2464 = vmatpush.msrb.mxu1 %v10554_v14  ;;  %v10564_v13 = vld [vmem:[#allocation148_spill] sm:$0xff]  ;;  %v10565_v14 = vld [vmem:[#allocation149_spill] sm:$0xff] }
 0x4c8   :  { %2504 = vmatpush.msrb.mxu3 %v10555_v34  ;;  %2356 = vmatpush.msra.mxu0 %v10556_v1  ;;  %v10566_v34 = vld [vmem:[#allocation150_spill] sm:$0xff]  ;;  %v10567_v1 = vld [vmem:[#allocation151_spill] sm:$0xff] }
 0x4c9   :  { %2396 = vmatpush.msra.mxu2 %v10557_v50  ;;  %2465 = vmatpush.msrb.mxu1 %v10558_v39  ;;  %v10568_v50 = vld [vmem:[#allocation152_spill] sm:$0xff]  ;;  %v10569_v39 = vld [vmem:[#allocation153_spill] sm:$0xff] }
 0x4ca   :  { %2505 = vmatpush.msrb.mxu3 %v10559_v17  ;;  %2357 = vmatpush.msra.mxu0 %v10560_v53  ;;  %v10570_v17 = vld [vmem:[#allocation154_spill] sm:$0xff]  ;;  %v10571_v53 = vld [vmem:[#allocation155_spill] sm:$0xff] }
 0x4cb   :  { %2397 = vmatpush.msra.mxu2 %v10561_v23  ;;  %2466 = vmatpush.msrb.mxu1 %v10562_v51  ;;  %v10572_v23 = vld [vmem:[#allocation156_spill] sm:$0xff]  ;;  %v10573_v51 = vld [vmem:[#allocation157_spill] sm:$0xff] }
 0x4cc   :  { %2506 = vmatpush.msrb.mxu3 %v10563_v2  ;;  %2358 = vmatpush.msra.mxu0 %v10564_v13  ;;  %v10574_v2 = vld [vmem:[#allocation158_spill] sm:$0xff]  ;;  %v10575_v13 = vld [vmem:[#allocation159_spill] sm:$0xff] }
 0x4cd   :  { %2398 = vmatpush.msra.mxu2 %v10565_v14  ;;  %v10576_v14 = vld [vmem:[#allocation160_spill] sm:$0xff] }
 0x4ce   :  { %2359 = vmatpush.msra.mxu0 %v10566_v34  ;;  %v10577_v34 = vld [vmem:[#allocation161_spill] sm:$0xff] }
 0x4cf   :  { %2399 = vmatpush.msra.mxu2 %v10567_v1  ;;  %v10578_v1 = vld [vmem:[#allocation162_spill] sm:$0xff] }
 0x4d0   :  { %2360 = vmatpush.msra.mxu0 %v10568_v50  ;;  %v10579_v50 = vld [vmem:[#allocation163_spill] sm:$0xff] }
 0x4d1   :  { %2400 = vmatpush.msra.mxu2 %v10569_v39  ;;  %v10580_v39 = vld [vmem:[#allocation164_spill] sm:$0xff] }
 0x4d2   :  { %2361 = vmatpush.msra.mxu0 %v10570_v17  ;;  %v10581_v17 = vld [vmem:[#allocation165_spill] sm:$0xff] }
 0x4d3   :  { %2401 = vmatpush.msra.mxu2 %v10571_v53  ;;  %v10582_v53 = vld [vmem:[#allocation166_spill] sm:$0xff] }
 0x4d4   :  { %2362 = vmatpush.msra.mxu0 %v10572_v23  ;;  %v10583_v23 = vld [vmem:[#allocation167_spill] sm:$0xff] }
 0x4d5   :  { %2402 = vmatpush.msra.mxu2 %v10573_v51  ;;  %v10584_v51 = vld [vmem:[#allocation168_spill] sm:$0xff] }
 0x4d6   :  { %2363 = vmatpush.msra.mxu0 %v10574_v2  ;;  %v10585_v2 = vld [vmem:[#allocation169_spill] sm:$0xff] }
 0x4d7   :  { %2403 = vmatpush.msra.mxu2 %v10575_v13  ;;  %v10586_v13 = vld [vmem:[#allocation170_spill] sm:$0xff] }
 0x4d8   :  { %2364 = vmatpush.msra.mxu0 %v10576_v14  ;;  %v10587_v14 = vld [vmem:[#allocation171_spill] sm:$0xff] }
 0x4d9   :  { %2404 = vmatpush.msra.mxu2 %v10577_v34  ;;  %v10588_v34 = vld [vmem:[#allocation69_spill] sm:$0xff] }
 0x4da   :  { %2365 = vmatpush.msra.mxu0 %v10578_v1  ;;  %v10589_v1 = vld [vmem:[#allocation86_spill] sm:$0xff] }
 0x4db   :  { %2405 = vmatpush.msra.mxu2 %v10579_v50  ;;  %v10590_v50 = vld [vmem:[#allocation73_spill] sm:$0xff] }
 0x4dc   :  { %2366 = vmatpush.msra.mxu0 %v10580_v39  ;;  %v10591_v39 = vld [vmem:[#allocation90_spill] sm:$0xff] }
 0x4dd   :  { %2406 = vmatpush.msra.mxu2 %v10581_v17  ;;  %v10592_v17 = vld [vmem:[#allocation76_spill] sm:$0xff] }
 0x4de   :  { %2431 = vmatpush.msrb.mxu0 %v10582_v53  ;;  %v10593_v53 = vld [vmem:[#allocation80_spill] sm:$0xff] }
 0x4df   :  { %2471 = vmatpush.msrb.mxu2 %v10583_v23  ;;  %v10594_v23 = vld [vmem:[#allocation84_spill] sm:$0xff] }
 0x4e0   :  { %2432 = vmatpush.msrb.mxu0 %v10584_v51  ;;  %v10595_v51 = vld [vmem:[#allocation88_spill] sm:$0xff] }
 0x4e1   :  { %2472 = vmatpush.msrb.mxu2 %v10585_v2  ;;  %v10596_v2 = vld [vmem:[#allocation20_spill] sm:$0xff] }
 0x4e2   :  { %2433 = vmatpush.msrb.mxu0 %v10586_v13  ;;  %v10597_v13 = vld [vmem:[#allocation92_spill] sm:$0xff] }
 0x4e3   :  { %2473 = vmatpush.msrb.mxu2 %v10587_v14  ;;  %v10598_v14 = vld [vmem:[#allocation23_spill] sm:$0xff] }
 0x4e4   :  { %2434 = vmatpush.msrb.mxu0 %v10588_v34  ;;  %v10599_v34 = vld [vmem:[#allocation54_spill] sm:$0xff] }
 0x4e5   :  { %2474 = vmatpush.msrb.mxu2 %v10589_v1  ;;  %v10600_v1 = vld [vmem:[#allocation55_spill] sm:$0xff] }
 0x4e6   :  { %2435 = vmatpush.msrb.mxu0 %v10590_v50  ;;  %v10601_v50 = vld [vmem:[#allocation95_spill] sm:$0xff] }
 0x4e7   :  { %2475 = vmatpush.msrb.mxu2 %v10591_v39  ;;  %v10602_v39 = vld [vmem:[#allocation58_spill] sm:$0xff] }
 0x4e8   :  { %2436 = vmatpush.msrb.mxu0 %v10592_v17  ;;  %v10603_v17 = vld [vmem:[#allocation59_spill] sm:$0xff] }
 0x4e9   :  { %2476 = vmatpush.msrb.mxu2 %v10593_v53  ;;  %v10604_v53 = vld [vmem:[#allocation62_spill] sm:$0xff] }
 0x4ea   :  { %2437 = vmatpush.msrb.mxu0 %v10594_v23  ;;  %v10605_v23 = vld [vmem:[#allocation63_spill] sm:$0xff] }
 0x4eb   :  { %2477 = vmatpush.msrb.mxu2 %v10595_v51  ;;  %v10606_v51 = vld [vmem:[#allocation99_spill] sm:$0xff] }
 0x4ec   :  { %2438 = vmatpush.msrb.mxu0 %v10596_v2  ;;  %v10607_v2 = vld [vmem:[#allocation66_spill] sm:$0xff] }
 0x4ed   :  { %2478 = vmatpush.msrb.mxu2 %v10597_v13 }
 0x4ee   :  { %2439 = vmatpush.msrb.mxu0 %v10598_v14  ;;  %v10608_v14 = vld [vmem:[#allocation67_spill] sm:$0xff] }
 0x4ef   :  { %2479 = vmatpush.msrb.mxu2 %v10599_v34  ;;  %v10609_v34 = vld [vmem:[#allocation70_spill] sm:$0xff] }
 0x4f0   :  { %2440 = vmatpush.msrb.mxu0 %v10600_v1  ;;  %v10610_v1 = vld [vmem:[#allocation65_spill] sm:$0xff] }
 0x4f1   :  { %2480 = vmatpush.msrb.mxu2 %v10601_v50  ;;  %v2025_v50 = vpop.f32.mrf.mxu1 }
 0x4f2   :  { %2441 = vmatpush.msrb.mxu0 %v10602_v39  ;;  %v10612_v39 = vld [vmem:[#allocation74_spill] sm:$0xff] }
 0x4f3   :  { %2481 = vmatpush.msrb.mxu2 %v10603_v17  ;;  %v2005_v13 = vpop.f32.mrf.mxu0 }
 0x4f4   :  { %2442 = vmatpush.msrb.mxu0 %v10604_v53  ;;  %v2006_v62 = vadd.f32 %v2005_v13, %v10610_v1  ;;  %v10613_v53 = vld [vmem:[#allocation77_spill] sm:$0xff] }
 0x4f5   :  { %2482 = vmatpush.msrb.mxu2 %v10605_v23  ;;  %v10614_v23 = vld [vmem:[#allocation79_spill] sm:$0xff] }
 0x4f6   :  { %2443 = vmatpush.msrb.mxu0 %v10606_v51  ;;  %v2026_v17 = vadd.f32 %v2025_v50, %v2006_v62  ;;  %v10615_v50 = vld [vmem:[#allocation82_spill] sm:$0xff] }
 0x4f7   :  { %2483 = vmatpush.msrb.mxu2 %v10607_v2  ;;  %v2065_v2 = vpop.f32.mrf.mxu3 }
 0x4f8   :  { %2444 = vmatpush.msrb.mxu0 %v10608_v14  ;;  %v2148_v51 = vsub.f32 0.0, %v2026_v17 }
 0x4f9   :  { %2484 = vmatpush.msrb.mxu2 %v10609_v34  ;;  %v2045_v61 = vpop.f32.mrf.mxu2 }
 0x4fa   :  { %2445 = vmatpush.msrb.mxu0 %v10611_v36  ;;  %v2149_v55 = vmul.f32 1.442695, %v2148_v51  ;;  %v2046_v14 = vadd.f32 %v2045_v61, %v5713_v30 }
 0x4fb   :  { %2485 = vmatpush.msrb.mxu2 %v10612_v39 }
 0x4fc   :  { %2446 = vmatpush.msrb.mxu0 %v10613_v53  ;;  %3612 = vpow2.f32 %v2149_v55  ;;  %v2066_v34 = vadd.f32 %v2065_v2, %v2046_v14 }
 0x4fd   :  { %2486 = vmatpush.msrb.mxu2 %v10614_v23  ;;  %v2105_v23 = vpop.f32.mrf.mxu1 }
 0x4fe   :  { %v2153_v27 = vsub.f32 0.0, %v2066_v34 }
 0x4ff   :  { %v2085_v13 = vpop.f32.mrf.mxu0  ;;  %v2145_v53 = vpop.f32.mrf.mxu3 }
 0x500   :  { %v2154_v1 = vmul.f32 1.442695, %v2153_v27  ;;  %v2086_v36 = vadd.f32 %v2085_v13, %v5716_v48 }
 0x502   :  { %v3613_v29 = vpop.eup %3612  ;;  %3614 = vpow2.f32 %v2154_v1  ;;  %v2106_v54 = vadd.f32 %v2105_v23, %v2086_v36  ;;  %v7894_v23 = vld [vmem:[#allocation3 + $0x3e0] sm:$0xff] }
 0x503   :  { %v2151_v17 = vadd.f32 1.0, %v3613_v29 }
 0x505   :  { %3616 = vrcp.f32 %v2151_v17  ;;  %v7897_v17 = vld [vmem:[#allocation3 + $0x3e8] sm:$0xff] }
 0x506   :  { %3618 = vtanh.f32 %v2106_v54 }
 0x507   :  { %v2125_v62 = vpop.f32.mrf.mxu2 }
 0x508   :  { %v2126_v39 = vadd.f32 %v2125_v62, %v10615_v50  ;;  %v3615_v10 = vpop.eup %3614 }
 0x509   :  { %v2156_v55 = vadd.f32 1.0, %v3615_v10 }
 0x50a   :  { %v2146_v47 = vadd.f32 %v2145_v53, %v2126_v39 }
 0x50b   :  { %3620 = vrcp.f32 %v2156_v55  ;;  %v3617_v27 = vpop.eup %3616  ;;  %v2207_v55 = vpop.f32.mrf.mxu1 }
 0x50c   :  { %v2159_v51 = vsub.f32 0.0, %v2146_v47  ;;  %v3619_v1 = vpop.eup %3618 }
 0x50d   :  { %v2165_v13 = vmul.f32 %v3619_v1, %v3617_v27  ;;  %v7906_v27 = vld [vmem:[#allocation3 + $0x3c8] sm:$0xff]  ;;  %v2247_v1 = vpop.f32.mrf.mxu3 }
 0x50e   :  { %v2160_v61 = vmul.f32 1.442695, %v2159_v51 }
 0x510   :  { %3622 = vpow2.f32 %v2160_v61  ;;  %v7903_v61 = vld [vmem:[#allocation3 + $0x3c0] sm:$0xff] }
 0x511   :  { %v3621_v2 = vpop.eup %3620 }
 0x512   :  { %v2164_v34 = vmul.f32 %v3621_v2, %v7481_v49 }
 0x514   :  { %v7889_v50 = vadd.f32 %v2165_v13, %v2164_v34  ;;  %v7909_v34 = vld [vmem:[#allocation3 + $0x3a0] sm:$0xff]  ;;  %v7912_v13 = vld [vmem:[#allocation3 + $0x3a8] sm:$0xff] }
 0x516   :  { %v3623_v14 = vpop.eup %3622 }
 0x517   :  { %v2162_v62 = vadd.f32 1.0, %v3623_v14 }
 0x519   :  { %3624 = vrcp.f32 %v2162_v62  ;;  %v2187_v10 = vpop.f32.mrf.mxu0  ;;  %v7918_v62 = vld [vmem:[#allocation3 + $0x388] sm:$0xff] }
 0x51a   :  { %3626 = vtanh.f32 %v7889_v50  ;;  %v2188_v39 = vadd.f32 %v2187_v10, %v9846_v15  ;;  %v7921_v10 = vld [vmem:[#allocation3 + $0x360] sm:$0xff] }
 0x51c   :  { %v2208_v2 = vadd.f32 %v2207_v55, %v2188_v39  ;;  %v7927_v39 = vld [vmem:[#allocation3 + $0x340] sm:$0xff] }
 0x51d   :  { %10617 = vst [vmem:[#allocation28_spill] sm:$0xff] %v7927_v39 }
 0x51f   :  { %v3625_v47 = vpop.eup %3624 }
 0x520   :  { %v3627_v29 = vpop.eup %3626  ;;  %v2227_v36 = vpop.f32.mrf.mxu2 }
 0x521   :  { %v2168_v54 = vmul.f32 %v3627_v29, %v3625_v47  ;;  %v2228_v49 = vadd.f32 %v2227_v36, %v9847_v18  ;;  %v2330_v47 = vsub.f32 0.0, %v2208_v2  ;;  %v7924_v36 = vld [vmem:[#allocation3 + $0x368] sm:$0xff]  ;;  %v7939_v2 = vld [vmem:[#allocation3 + $0x300] sm:$0xff] }
 0x522   :  { %10616 = vst [vmem:[#allocation26_spill] sm:$0xff] %v7924_v36 }
 0x523   :  { %2387 = vmatmul.f32.vlgmr.msra.gmra.mxu1 %v2168_v54  ;;  %2427 = vmatmul.f32.vlgmr.msra.gmra.mxu3 %v2168_v54  ;;  %v3268_v53 = vrot.slane %v2168_v54, 4  ;;  %v2248_v14 = vadd.f32 %v2247_v1, %v2228_v49  ;;  %v2331_v49 = vmul.f32 1.442695, %v2330_v47  ;;  %v7936_v1 = vld [vmem:[#allocation3 + $0x328] sm:$0xff]  ;;  %10621 = vst [vmem:[#allocation32_spill] sm:$0xff] %v7939_v2  ;;  %v7945_v47 = vld [vmem:[#allocation3 + $0x2e0] sm:$0xff] }
 0x524   :  { %2553 = vmatpush.msra.mxu1 %v7894_v23  ;;  %2593 = vmatpush.msra.mxu3 %v7897_v17  ;;  %10620 = vst [vmem:[#allocation22_spill] sm:$0xff] %v7936_v1 }
 0x525   :  { %v7901_v51 = vsel %vm3285_vm3, %v7489_v38, %v3268_v53  ;;  %v7915_v38 = vld [vmem:[#allocation3 + $0x380] sm:$0xff]  ;;  %v2335_v29 = vsub.f32 0.0, %v2248_v14  ;;  %v7930_v53 = vld [vmem:[#allocation3 + $0x348] sm:$0xff]  ;;  %3628 = vpow2.f32 %v2331_v49  ;;  %10623 = vst [vmem:[#allocation34_spill] sm:$0xff] %v7945_v47 }
 0x526   :  { %2554 = vmatpush.msra.mxu1 %v7903_v61  ;;  %2594 = vmatpush.msra.mxu3 %v7906_v27  ;;  %10618 = vst [vmem:[#allocation19_spill] sm:$0xff] %v7930_v53  ;;  %v7942_v14 = vld [vmem:[#allocation3 + $0x308] sm:$0xff] }
 0x527   :  { %v2336_v55 = vmul.f32 1.442695, %v2335_v29  ;;  %10622 = vst [vmem:[#allocation25_spill] sm:$0xff] %v7942_v14  ;;  %v7948_v29 = vld [vmem:[#allocation3 + $0x2e8] sm:$0xff] }
 0x528   :  { %2555 = vmatpush.msra.mxu1 %v7909_v34  ;;  %2595 = vmatpush.msra.mxu3 %v7912_v13  ;;  %10624 = vst [vmem:[#allocation27_spill] sm:$0xff] %v7948_v29  ;;  %v7960_v49 = vld [vmem:[#allocation3 + $0x2a8] sm:$0xff] }
 0x529   :  { %3630 = vpow2.f32 %v2336_v55  ;;  %10628 = vst [vmem:[#allocation31_spill] sm:$0xff] %v7960_v49 }
 0x52a   :  { %2556 = vmatpush.msra.mxu1 %v7915_v38  ;;  %2596 = vmatpush.msra.mxu3 %v7918_v62 }
 0x52b   :  { %2467 = vmatmul.f32.vlgmr.msrb.gmra.mxu1 %v2168_v54  ;;  %2507 = vmatmul.f32.vlgmr.msrb.gmra.mxu3 %v2168_v54  ;;  %v7933_v54 = vld [vmem:[#allocation3 + $0x320] sm:$0xff]  ;;  %v3629_v55 = vpop.eup %3628 }
 0x52c   :  { %2557 = vmatpush.msra.mxu1 %v7921_v10  ;;  %2597 = vmatpush.msra.mxu3 %v7924_v36  ;;  %10619 = vst [vmem:[#allocation30_spill] sm:$0xff] %v7933_v54  ;;  %v7970_v36 = vld [vmem:[#allocation3 + $0x260] sm:$0xff] }
 0x52d   :  { %10630 = vst [vmem:[#allocation33_spill] sm:$0xff] %v7970_v36 }
 0x52e   :  { %2558 = vmatpush.msra.mxu1 %v7927_v39  ;;  %2598 = vmatpush.msra.mxu3 %v7930_v53  ;;  %v7964_v53 = vld [vmem:[#allocation3 + $0x280] sm:$0xff]  ;;  %v2333_v39 = vadd.f32 1.0, %v3629_v55 }
 0x52f   :  { %10629 = vst [vmem:[#allocation40_spill] sm:$0xff] %v7964_v53 }
 0x530   :  { %2559 = vmatpush.msra.mxu1 %v7933_v54  ;;  %2599 = vmatpush.msra.mxu3 %v7936_v1  ;;  %v7951_v54 = vld [vmem:[#allocation3 + $0x2c0] sm:$0xff]  ;;  %v7954_v1 = vld [vmem:[#allocation3 + $0x2c8] sm:$0xff] }
 0x531   :  { %10625 = vst [vmem:[#allocation36_spill] sm:$0xff] %v7951_v54 }
 0x532   :  { %2560 = vmatpush.msra.mxu1 %v7939_v2  ;;  %2600 = vmatpush.msra.mxu3 %v7942_v14  ;;  %10626 = vst [vmem:[#allocation29_spill] sm:$0xff] %v7954_v1  ;;  %v7957_v2 = vld [vmem:[#allocation3 + $0x2a0] sm:$0xff]  ;;  %v3631_v14 = vpop.eup %3630 }
 0x533   :  { %10627 = vst [vmem:[#allocation38_spill] sm:$0xff] %v7957_v2 }
 0x534   :  { %2561 = vmatpush.msra.mxu1 %v7945_v47  ;;  %2601 = vmatpush.msra.mxu3 %v7948_v29 }
 0x536   :  { %2562 = vmatpush.msra.mxu1 %v7951_v54  ;;  %2602 = vmatpush.msra.mxu3 %v7954_v1  ;;  %v7967_v54 = vld [vmem:[#allocation3 + $0x288] sm:$0xff]  ;;  %v2287_v1 = vpop.f32.mrf.mxu1 }
 0x538   :  { %2563 = vmatpush.msra.mxu1 %v7957_v2  ;;  %2603 = vmatpush.msra.mxu3 %v7960_v49  ;;  %v7973_v49 = vld [vmem:[#allocation3 + $0x268] sm:$0xff] }
 0x539   :  { %v2267_v47 = vpop.f32.mrf.mxu0  ;;  %10631 = vst [vmem:[#allocation42_spill] sm:$0xff] %v7973_v49 }
 0x53a   :  { %v2268_v29 = vadd.f32 %v2267_v47, %v10441_v31  ;;  %2564 = vmatpush.msra.mxu1 %v7964_v53  ;;  %2604 = vmatpush.msra.mxu3 %v7967_v54  ;;  %v2338_v47 = vadd.f32 1.0, %v3631_v14  ;;  %v7976_v31 = vld [vmem:[#allocation3 + $0x240] sm:$0xff]  ;;  %v7979_v53 = vld [vmem:[#allocation3 + $0x248] sm:$0xff]  ;;  %v2327_v14 = vpop.f32.mrf.mxu3 }
 0x53b   :  { %10632 = vst [vmem:[#allocation35_spill] sm:$0xff] %v7976_v31 }
 0x53c   :  { %v2288_v2 = vadd.f32 %v2287_v1, %v2268_v29  ;;  %2565 = vmatpush.msra.mxu1 %v7970_v36  ;;  %2605 = vmatpush.msra.mxu3 %v7973_v49  ;;  %v7983_v29 = vld [vmem:[#allocation3 + $0x220] sm:$0xff]  ;;  %v7986_v36 = vld [vmem:[#allocation3 + $0x228] sm:$0xff] }
 0x53d   :  { %10633 = vst [vmem:[#allocation44_spill] sm:$0xff] %v7983_v29  ;;  %v7989_v49 = vld [vmem:[#allocation3 + $0x200] sm:$0xff] }
 0x53e   :  { %2566 = vmatpush.msra.mxu1 %v7976_v31  ;;  %2606 = vmatpush.msra.mxu3 %v7979_v53  ;;  %3632 = vtanh.f32 %v2288_v2  ;;  %10634 = vst [vmem:[#allocation37_spill] sm:$0xff] %v7986_v36  ;;  %v7992_v2 = vld [vmem:[#allocation3 + $0x208] sm:$0xff] }
 0x53f   :  { %3634 = vrcp.f32 %v2333_v39  ;;  %10635 = vst [vmem:[#allocation46_spill] sm:$0xff] %v7989_v49  ;;  %v7995_v39 = vld [vmem:[#allocation3 + $0x3f0] sm:$0xff] }
 0x540   :  { %v2307_v55 = vpop.f32.mrf.mxu2  ;;  %2567 = vmatpush.msra.mxu1 %v7983_v29  ;;  %2607 = vmatpush.msra.mxu3 %v7986_v36  ;;  %3636 = vrcp.f32 %v2338_v47  ;;  %10636 = vst [vmem:[#allocation39_spill] sm:$0xff] %v7992_v2  ;;  %v8001_v47 = vld [vmem:[#allocation3 + $0x3d0] sm:$0xff] }
 0x541   :  { %v2308_v1 = vadd.f32 %v2307_v55, %v10446_v19  ;;  %10637 = vst [vmem:[#allocation48_spill] sm:$0xff] %v7995_v39  ;;  %v7998_v55 = vld [vmem:[#allocation3 + $0x3f8] sm:$0xff]  ;;  %v8007_v19 = vld [vmem:[#allocation3 + $0x3b0] sm:$0xff] }
 0x542   :  { %2568 = vmatpush.msra.mxu1 %v7989_v49  ;;  %2608 = vmatpush.msra.mxu3 %v7992_v2  ;;  %10638 = vst [vmem:[#allocation41_spill] sm:$0xff] %v7998_v55 }
 0x543   :  { %v2328_v31 = vadd.f32 %v2327_v14, %v2308_v1  ;;  %10639 = vst [vmem:[#allocation50_spill] sm:$0xff] %v8001_v47  ;;  %v8004_v1 = vld [vmem:[#allocation3 + $0x3d8] sm:$0xff] }
 0x544   :  { %2633 = vmatpush.msrb.mxu1 %v7995_v39  ;;  %2673 = vmatpush.msrb.mxu3 %v7998_v55  ;;  %v3633_v29 = vpop.eup %3632  ;;  %10640 = vst [vmem:[#allocation43_spill] sm:$0xff] %v8004_v1  ;;  %v8010_v39 = vld [vmem:[#allocation3 + $0x3b8] sm:$0xff]  ;;  %v8013_v55 = vld [vmem:[#allocation3 + $0x390] sm:$0xff] }
 0x545   :  { %v2341_v36 = vsub.f32 0.0, %v2328_v31  ;;  %v3635_v14 = vpop.eup %3634  ;;  %10641 = vst [vmem:[#allocation51_spill] sm:$0xff] %v8007_v19 }
 0x546   :  { %2634 = vmatpush.msrb.mxu1 %v8001_v47  ;;  %2674 = vmatpush.msrb.mxu3 %v8004_v1  ;;  %v3637_v49 = vpop.eup %3636  ;;  %v2347_v31 = vmul.f32 %v3635_v14, %v3633_v29  ;;  %v8016_v47 = vld [vmem:[#allocation3 + $0x398] sm:$0xff]  ;;  %v8020_v1 = vld [vmem:[#allocation3 + $0x370] sm:$0xff] }
 0x547   :  { %v2342_v2 = vmul.f32 1.442695, %v2341_v36  ;;  %10642 = vst [vmem:[#allocation45_spill] sm:$0xff] %v8016_v47  ;;  %v2346_v36 = vmul.f32 %v3637_v49, %v7532_v3  ;;  %v8031_v14 = vld [vmem:[#allocation3 + $0x358] sm:$0xff]  ;;  %v8034_v49 = vld [vmem:[#allocation3 + $0x330] sm:$0xff] }
 0x548   :  { %2635 = vmatpush.msrb.mxu1 %v8007_v19  ;;  %2675 = vmatpush.msrb.mxu3 %v8010_v39  ;;  %10643 = vst [vmem:[#allocation56_spill] sm:$0xff] %v8020_v1  ;;  %v8023_v19 = vld [vmem:[#allocation3 + $0x378] sm:$0xff] }
 0x549   :  { %3638 = vpow2.f32 %v2342_v2  ;;  %v8026_v29 = vadd.f32 %v2347_v31, %v2346_v36  ;;  %v8028_v2 = vld [vmem:[#allocation3 + $0x350] sm:$0xff]  ;;  %10645 = vst [vmem:[#allocation60_spill] sm:$0xff] %v8031_v14  ;;  %v8044_v36 = vld [vmem:[#allocation3 + $0x318] sm:$0xff] }
 0x54a   :  { %2636 = vmatpush.msrb.mxu1 %v8013_v55  ;;  %2676 = vmatpush.msrb.mxu3 %v8016_v47  ;;  %10644 = vst [vmem:[#allocation47_spill] sm:$0xff] %v8028_v2  ;;  %v8041_v31 = vld [vmem:[#allocation3 + $0x310] sm:$0xff] }
 0x54b   :  { %10646 = vst [vmem:[#allocation49_spill] sm:$0xff] %v8034_v49  ;;  %3640 = vtanh.f32 %v8026_v29 }
 0x54c   :  { %2637 = vmatpush.msrb.mxu1 %v8020_v1  ;;  %2677 = vmatpush.msrb.mxu3 %v8023_v19  ;;  %v8037_v1 = vld [vmem:[#allocation3 + $0x338] sm:$0xff]  ;;  %10648 = vst [vmem:[#allocation52_spill] sm:$0xff] %v8041_v31 }
 0x54d   :  { %10647 = vst [vmem:[#allocation64_spill] sm:$0xff] %v8037_v1 }
 0x54e   :  { %2638 = vmatpush.msrb.mxu1 %v8028_v2  ;;  %2678 = vmatpush.msrb.mxu3 %v8031_v14  ;;  %10649 = vst [vmem:[#allocation68_spill] sm:$0xff] %v8044_v36  ;;  %v8059_v2 = vld [vmem:[#allocation3 + $0x2b0] sm:$0xff] }
 0x54f   :  { %v3639_v47 = vpop.eup %3638 }
 0x550   :  { %v2344_v3 = vadd.f32 1.0, %v3639_v47  ;;  %2639 = vmatpush.msrb.mxu1 %v8034_v49  ;;  %2679 = vmatpush.msrb.mxu3 %v8037_v1  ;;  %v8047_v47 = vld [vmem:[#allocation3 + $0x2f0] sm:$0xff]  ;;  %v8050_v49 = vld [vmem:[#allocation3 + $0x2f8] sm:$0xff] }
 0x551   :  { %10650 = vst [vmem:[#allocation53_spill] sm:$0xff] %v8047_v47  ;;  %v8053_v1 = vld [vmem:[#allocation3 + $0x2d0] sm:$0xff] }
 0x552   :  { %3642 = vrcp.f32 %v2344_v3  ;;  %2640 = vmatpush.msrb.mxu1 %v8041_v31  ;;  %2680 = vmatpush.msrb.mxu3 %v8044_v36  ;;  %10651 = vst [vmem:[#allocation71_spill] sm:$0xff] %v8050_v49  ;;  %v8056_v3 = vld [vmem:[#allocation3 + $0x2d8] sm:$0xff]  ;;  %v3641_v31 = vpop.eup %3640 }
 0x553   :  { %10652 = vst [vmem:[#allocation57_spill] sm:$0xff] %v8053_v1  ;;  %v8062_v36 = vld [vmem:[#allocation3 + $0x2b8] sm:$0xff] }
 0x554   :  { %2641 = vmatpush.msrb.mxu1 %v8047_v47  ;;  %2681 = vmatpush.msrb.mxu3 %v8050_v49  ;;  %10653 = vst [vmem:[#allocation75_spill] sm:$0xff] %v8062_v36  ;;  %v8065_v49 = vld [vmem:[#allocation3 + $0x290] sm:$0xff] }
 0x556   :  { %2642 = vmatpush.msrb.mxu1 %v8053_v1  ;;  %2682 = vmatpush.msrb.mxu3 %v8056_v3  ;;  %v8068_v1 = vld [vmem:[#allocation3 + $0x298] sm:$0xff] }
 0x558   :  { %v3643_v14 = vpop.eup %3642  ;;  %2643 = vmatpush.msrb.mxu1 %v8059_v2  ;;  %2683 = vmatpush.msrb.mxu3 %v8062_v36  ;;  %v8074_v36 = vld [vmem:[#allocation3 + $0x270] sm:$0xff] }
 0x559   :  { %v2350_v47 = vmul.f32 %v3643_v14, %v3641_v31  ;;  %v8078_v14 = vld [vmem:[#allocation3 + $0x278] sm:$0xff]  ;;  %v8082_v31 = vld [vmem:[#allocation3 + $0x250] sm:$0xff] }
 0x55a   :  { %2644 = vmatpush.msrb.mxu1 %v8065_v49  ;;  %2684 = vmatpush.msrb.mxu3 %v8068_v1 }
 0x55b   :  { %2367 = vmatmul.f32.vlgmr.msra.gmra.mxu0 %v2350_v47  ;;  %2407 = vmatmul.f32.vlgmr.msra.gmra.mxu2 %v2350_v47 }
 0x55c   :  { %2533 = vmatpush.msra.mxu0 %v7549_v25  ;;  %2569 = vmatmul.f32.vlgmr.msra.gmra.mxu1 %v2350_v47  ;;  %v8086_v25 = vld [vmem:[#allocation3 + $0x258] sm:$0xff] }
 0x55d   :  { %2573 = vmatpush.msra.mxu2 %v7552_v21  ;;  %2609 = vmatmul.f32.vlgmr.msra.gmra.mxu3 %v2350_v47  ;;  %v8090_v21 = vld [vmem:[#allocation3 + $0x230] sm:$0xff] }
 0x55e   :  { %2534 = vmatpush.msra.mxu0 %v7555_v16  ;;  %2645 = vmatpush.msrb.mxu1 %v8074_v36  ;;  %v8096_v16 = vld [vmem:[#allocation3 + $0x238] sm:$0xff] }
 0x55f   :  { %2574 = vmatpush.msra.mxu2 %v7559_v35  ;;  %2685 = vmatpush.msrb.mxu3 %v8078_v14  ;;  %v8100_v35 = vld [vmem:[#allocation3 + $0x210] sm:$0xff] }
 0x560   :  { %2535 = vmatpush.msra.mxu0 %v7563_v63  ;;  %2646 = vmatpush.msrb.mxu1 %v8082_v31  ;;  %v8104_v63 = vld [vmem:[#allocation3 + $0x218] sm:$0xff] }
 0x561   :  { %2575 = vmatpush.msra.mxu2 %v7567_v37  ;;  %2686 = vmatpush.msrb.mxu3 %v8086_v25  ;;  %v8109_v37 = vld [vmem:[#allocation5 + $0x3e0] sm:$0xff] }
 0x562   :  { %2536 = vmatpush.msra.mxu0 %v7571_v0  ;;  %2647 = vmatpush.msrb.mxu1 %v8090_v21  ;;  %v8112_v0 = vld [vmem:[#allocation5 + $0x3e8] sm:$0xff] }
 0x563   :  { %2576 = vmatpush.msra.mxu2 %v7575_v26  ;;  %2447 = vmatmul.f32.vlgmr.msrb.gmra.mxu0 %v2350_v47  ;;  %v8117_v26 = vld [vmem:[#allocation5 + $0x3c0] sm:$0xff] }
 0x564   :  { %2487 = vmatmul.f32.vlgmr.msrb.gmra.mxu2 %v2350_v47  ;;  %2537 = vmatpush.msra.mxu0 %v7579_v45  ;;  %v8120_v45 = vld [vmem:[#allocation5 + $0x3c8] sm:$0xff] }
 0x565   :  { %2577 = vmatpush.msra.mxu2 %v7582_v52  ;;  %2687 = vmatpush.msrb.mxu3 %v8096_v16  ;;  %v8125_v52 = vld [vmem:[#allocation5 + $0x3a0] sm:$0xff] }
 0x566   :  { %2538 = vmatpush.msra.mxu0 %v7587_v57  ;;  %2648 = vmatpush.msrb.mxu1 %v8100_v35  ;;  %v8128_v57 = vld [vmem:[#allocation5 + $0x3a8] sm:$0xff] }
 0x567   :  { %2578 = vmatpush.msra.mxu2 %v7590_v5  ;;  %2688 = vmatpush.msrb.mxu3 %v8104_v63  ;;  %v8133_v5 = vld [vmem:[#allocation5 + $0x380] sm:$0xff] }
 0x568   :  { %2649 = vmatmul.f32.vlgmr.msrb.gmra.mxu1 %v2350_v47  ;;  %2689 = vmatmul.f32.vlgmr.msrb.gmra.mxu3 %v2350_v47  ;;  %v8214_v47 = vld [vmem:[#allocation5 + $0x260] sm:$0xff] }
 0x569   :  { %2539 = vmatpush.msra.mxu0 %v7595_v22  ;;  %2579 = vmatpush.msra.mxu2 %v7598_v24  ;;  %v8136_v22 = vld [vmem:[#allocation5 + $0x388] sm:$0xff]  ;;  %v8141_v24 = vld [vmem:[#allocation5 + $0x360] sm:$0xff]  ;;  %10672 = vst [vmem:[#allocation117_spill] sm:$0xff] %v8214_v47 }
 0x56a   :  { %2734 = vmatpush.msra.mxu1 %v8109_v37  ;;  %2774 = vmatpush.msra.mxu3 %v8112_v0 }
 0x56b   :  { %2540 = vmatpush.msra.mxu0 %v7603_v28  ;;  %2580 = vmatpush.msra.mxu2 %v7606_v6  ;;  %v8144_v28 = vld [vmem:[#allocation5 + $0x368] sm:$0xff]  ;;  %v8149_v6 = vld [vmem:[#allocation5 + $0x340] sm:$0xff] }
 0x56c   :  { %2735 = vmatpush.msra.mxu1 %v8117_v26  ;;  %2775 = vmatpush.msra.mxu3 %v8120_v45 }
 0x56d   :  { %2541 = vmatpush.msra.mxu0 %v7611_v46  ;;  %2581 = vmatpush.msra.mxu2 %v7614_v33  ;;  %v8152_v46 = vld [vmem:[#allocation5 + $0x348] sm:$0xff]  ;;  %v8157_v33 = vld [vmem:[#allocation5 + $0x320] sm:$0xff] }
 0x56e   :  { %2736 = vmatpush.msra.mxu1 %v8125_v52  ;;  %2776 = vmatpush.msra.mxu3 %v8128_v57  ;;  %10654 = vst [vmem:[#allocation61_spill] sm:$0xff] %v8152_v46 }
 0x56f   :  { %2542 = vmatpush.msra.mxu0 %v7619_v32  ;;  %2582 = vmatpush.msra.mxu2 %v7622_v40  ;;  %10655 = vst [vmem:[#allocation78_spill] sm:$0xff] %v8157_v33  ;;  %v8160_v32 = vld [vmem:[#allocation5 + $0x328] sm:$0xff]  ;;  %v8165_v40 = vld [vmem:[#allocation5 + $0x300] sm:$0xff] }
 0x570   :  { %2737 = vmatpush.msra.mxu1 %v8133_v5  ;;  %2777 = vmatpush.msra.mxu3 %v8136_v22  ;;  %10656 = vst [vmem:[#allocation106_spill] sm:$0xff] %v8160_v32 }
 0x571   :  { %2543 = vmatpush.msra.mxu0 %v7627_v42  ;;  %2583 = vmatpush.msra.mxu2 %v7630_v59  ;;  %10657 = vst [vmem:[#allocation107_spill] sm:$0xff] %v8165_v40  ;;  %v8168_v42 = vld [vmem:[#allocation5 + $0x308] sm:$0xff]  ;;  %v8176_v59 = vld [vmem:[%s8890_s0 + $0x6] sm:$0x1] }
 0x572   :  { %2738 = vmatpush.msra.mxu1 %v8141_v24  ;;  %2778 = vmatpush.msra.mxu3 %v8144_v28  ;;  %10658 = vst [vmem:[#allocation108_spill] sm:$0xff] %v8168_v42 }
 0x573   :  { %2544 = vmatpush.msra.mxu0 %v7635_v44  ;;  %2584 = vmatpush.msra.mxu2 %v7638_v60  ;;  %v8178_v44 = vld [vmem:[#allocation5 + $0x2e0] sm:$0xff]  ;;  %v8181_v60 = vld [vmem:[#allocation5 + $0x2e8] sm:$0xff] }
 0x574   :  { %2739 = vmatpush.msra.mxu1 %v8149_v6  ;;  %2779 = vmatpush.msra.mxu3 %v8152_v46  ;;  %10659 = vst [vmem:[#allocation109_spill] sm:$0xff] %v8178_v44 }
 0x575   :  { %2545 = vmatpush.msra.mxu0 %v7643_v8  ;;  %2585 = vmatpush.msra.mxu2 %v7646_v43  ;;  %10660 = vst [vmem:[#allocation110_spill] sm:$0xff] %v8181_v60  ;;  %v8190_v8 = vld [vmem:[#allocation5 + $0x2c0] sm:$0xff]  ;;  %v8193_v43 = vld [vmem:[#allocation5 + $0x2c8] sm:$0xff] }
 0x576   :  { %2740 = vmatpush.msra.mxu1 %v8157_v33  ;;  %2780 = vmatpush.msra.mxu3 %v8160_v32  ;;  %10661 = vst [vmem:[#allocation111_spill] sm:$0xff] %v8190_v8 }
 0x577   :  { %2546 = vmatpush.msra.mxu0 %v7651_v58  ;;  %2586 = vmatpush.msra.mxu2 %v7654_v56  ;;  %10662 = vst [vmem:[#allocation112_spill] sm:$0xff] %v8193_v43  ;;  %v10663_v58 = vld [vmem:[#allocation81_spill] sm:$0xff] }
 0x578   :  { %2741 = vmatpush.msra.mxu1 %v8165_v40  ;;  %2781 = vmatpush.msra.mxu3 %v8168_v42  ;;  %v8198_v56 = vld [vmem:[#allocation5 + $0x2a0] sm:$0xff] }
 0x579   :  { %2547 = vmatpush.msra.mxu0 %v7659_v41  ;;  %2587 = vmatpush.msra.mxu2 %v7662_v11  ;;  %10664 = vst [vmem:[#allocation113_spill] sm:$0xff] %v8198_v56  ;;  %v8201_v41 = vld [vmem:[#allocation5 + $0x2a8] sm:$0xff]  ;;  %v10666_v11 = vld [vmem:[#allocation83_spill] sm:$0xff] }
 0x57a   :  { %2742 = vmatpush.msra.mxu1 %v8178_v44  ;;  %2782 = vmatpush.msra.mxu3 %v8181_v60  ;;  %10665 = vst [vmem:[#allocation114_spill] sm:$0xff] %v8201_v41  ;;  %v10801_v44 = vld [vmem:[#allocation82_spill] sm:$0xff] }
 0x57b   :  { %2548 = vmatpush.msra.mxu0 %v7672_v12  ;;  %2588 = vmatpush.msra.mxu2 %v7675_v20  ;;  %v10667_v12 = vld [vmem:[#allocation85_spill] sm:$0xff] }
 0x57c   :  { %2549 = vmatmul.f32.vlgmr.msra.gmra.mxu0 %v8176_v59  ;;  %2589 = vmatmul.f32.vlgmr.msra.gmra.mxu2 %v8176_v59  ;;  %v8206_v20 = vld [vmem:[#allocation5 + $0x280] sm:$0xff] }
 0x57d   :  { %2613 = vmatpush.msrb.mxu0 %v7680_v7  ;;  %2653 = vmatpush.msrb.mxu2 %v7683_v4  ;;  %10668 = vst [vmem:[#allocation115_spill] sm:$0xff] %v8206_v20  ;;  %v8209_v7 = vld [vmem:[#allocation5 + $0x288] sm:$0xff]  ;;  %v10670_v4 = vld [vmem:[#allocation87_spill] sm:$0xff] }
 0x57e   :  { %2743 = vmatpush.msra.mxu1 %v8190_v8  ;;  %2783 = vmatpush.msra.mxu3 %v8193_v43  ;;  %10669 = vst [vmem:[#allocation116_spill] sm:$0xff] %v8209_v7 }
 0x57f   :  { %2614 = vmatpush.msrb.mxu0 %v7688_v9  ;;  %2654 = vmatpush.msrb.mxu2 %v10663_v58  ;;  %v10671_v9 = vld [vmem:[#allocation89_spill] sm:$0xff]  ;;  %v8217_v58 = vld [vmem:[#allocation5 + $0x268] sm:$0xff] }
 0x580   :  { %2744 = vmatpush.msra.mxu1 %v8198_v56  ;;  %2784 = vmatpush.msra.mxu3 %v8201_v41  ;;  %10673 = vst [vmem:[#allocation118_spill] sm:$0xff] %v8217_v58  ;;  %v8551_v41 = vld [vmem:[#allocation5 + $0x10] sm:$0xff] }
 0x581   :  { %2615 = vmatpush.msrb.mxu0 %v10666_v11  ;;  %2655 = vmatpush.msrb.mxu2 %v10667_v12  ;;  %v10674_v11 = vld [vmem:[#allocation91_spill] sm:$0xff]  ;;  %v10675_v12 = vld [vmem:[#allocation93_spill] sm:$0xff] }
 0x582   :  { %2745 = vmatpush.msra.mxu1 %v8206_v20  ;;  %2785 = vmatpush.msra.mxu3 %v8209_v7  ;;  %v8222_v20 = vld [vmem:[#allocation5 + $0x240] sm:$0xff]  ;;  %v8225_v7 = vld [vmem:[#allocation5 + $0x248] sm:$0xff] }
 0x583   :  { %2616 = vmatpush.msrb.mxu0 %v10670_v4  ;;  %2656 = vmatpush.msrb.mxu2 %v10671_v9  ;;  %10676 = vst [vmem:[#allocation119_spill] sm:$0xff] %v8222_v20  ;;  %v10678_v4 = vld [vmem:[#allocation94_spill] sm:$0xff]  ;;  %v10679_v9 = vld [vmem:[#allocation96_spill] sm:$0xff] }
 0x584   :  { %2746 = vmatpush.msra.mxu1 %v8214_v47  ;;  %2786 = vmatpush.msra.mxu3 %v8217_v58  ;;  %10677 = vst [vmem:[#allocation120_spill] sm:$0xff] %v8225_v7  ;;  %v8230_v47 = vld [vmem:[#allocation5 + $0x220] sm:$0xff]  ;;  %v8233_v58 = vld [vmem:[#allocation5 + $0x228] sm:$0xff] }
 0x585   :  { %2617 = vmatpush.msrb.mxu0 %v10674_v11  ;;  %2657 = vmatpush.msrb.mxu2 %v10675_v12  ;;  %10680 = vst [vmem:[#allocation121_spill] sm:$0xff] %v8230_v47  ;;  %v10682_v11 = vld [vmem:[#allocation97_spill] sm:$0xff]  ;;  %v10683_v12 = vld [vmem:[#allocation98_spill] sm:$0xff] }
 0x586   :  { %2747 = vmatpush.msra.mxu1 %v8222_v20  ;;  %2787 = vmatpush.msra.mxu3 %v8225_v7  ;;  %10681 = vst [vmem:[#allocation122_spill] sm:$0xff] %v8233_v58  ;;  %v8238_v20 = vld [vmem:[#allocation5 + $0x200] sm:$0xff]  ;;  %v8241_v7 = vld [vmem:[#allocation5 + $0x208] sm:$0xff] }
 0x587   :  { %2618 = vmatpush.msrb.mxu0 %v10678_v4  ;;  %2658 = vmatpush.msrb.mxu2 %v10679_v9  ;;  %10684 = vst [vmem:[#allocation123_spill] sm:$0xff] %v8238_v20  ;;  %v10686_v4 = vld [vmem:[#allocation102_spill] sm:$0xff]  ;;  %v10687_v9 = vld [vmem:[#allocation103_spill] sm:$0xff] }
 0x588   :  { %2748 = vmatpush.msra.mxu1 %v8230_v47  ;;  %2788 = vmatpush.msra.mxu3 %v8233_v58  ;;  %10685 = vst [vmem:[#allocation124_spill] sm:$0xff] %v8241_v7  ;;  %v8246_v47 = vld [vmem:[#allocation5 + $0x3f0] sm:$0xff]  ;;  %v8249_v58 = vld [vmem:[#allocation5 + $0x3f8] sm:$0xff] }
 0x589   :  { %2619 = vmatpush.msrb.mxu0 %v10682_v11  ;;  %2659 = vmatpush.msrb.mxu2 %v10683_v12  ;;  %10688 = vst [vmem:[#allocation125_spill] sm:$0xff] %v8246_v47  ;;  %v10690_v11 = vld [vmem:[#allocation104_spill] sm:$0xff]  ;;  %v10691_v12 = vld [vmem:[#allocation105_spill] sm:$0xff] }
 0x58a   :  { %2749 = vmatpush.msra.mxu1 %v8238_v20  ;;  %2789 = vmatpush.msra.mxu3 %v8241_v7  ;;  %10689 = vst [vmem:[#allocation126_spill] sm:$0xff] %v8249_v58  ;;  %v8254_v20 = vld [vmem:[#allocation5 + $0x3d0] sm:$0xff]  ;;  %v8257_v7 = vld [vmem:[#allocation5 + $0x3d8] sm:$0xff] }
 0x58b   :  { %2620 = vmatpush.msrb.mxu0 %v10686_v4  ;;  %2660 = vmatpush.msrb.mxu2 %v10687_v9  ;;  %10692 = vst [vmem:[#allocation127_spill] sm:$0xff] %v8254_v20  ;;  %v10694_v4 = vld [vmem:[#allocation9_spill] sm:$0xff]  ;;  %v10695_v9 = vld [vmem:[#allocation12_spill] sm:$0xff] }
 0x58c   :  { %2814 = vmatpush.msrb.mxu1 %v8246_v47  ;;  %2854 = vmatpush.msrb.mxu3 %v8249_v58  ;;  %10693 = vst [vmem:[#allocation128_spill] sm:$0xff] %v8257_v7  ;;  %v8262_v47 = vld [vmem:[#allocation5 + $0x3b0] sm:$0xff]  ;;  %v8265_v58 = vld [vmem:[#allocation5 + $0x3b8] sm:$0xff] }
 0x58d   :  { %2621 = vmatpush.msrb.mxu0 %v10690_v11  ;;  %2661 = vmatpush.msrb.mxu2 %v10691_v12  ;;  %10696 = vst [vmem:[#allocation129_spill] sm:$0xff] %v8262_v47  ;;  %v10698_v11 = vld [vmem:[#allocation10_spill] sm:$0xff] }
 0x58e   :  { %2815 = vmatpush.msrb.mxu1 %v8254_v20  ;;  %2855 = vmatpush.msrb.mxu3 %v8257_v7  ;;  %10697 = vst [vmem:[#allocation130_spill] sm:$0xff] %v8265_v58  ;;  %v10699_v12 = vld [vmem:[#allocation14_spill] sm:$0xff]  ;;  %v8270_v20 = vld [vmem:[#allocation5 + $0x390] sm:$0xff]  ;;  %v8273_v7 = vld [vmem:[#allocation5 + $0x398] sm:$0xff] }
 0x58f   :  { %2622 = vmatpush.msrb.mxu0 %v10694_v4  ;;  %2662 = vmatpush.msrb.mxu2 %v10695_v9  ;;  %10700 = vst [vmem:[#allocation131_spill] sm:$0xff] %v8270_v20  ;;  %v10702_v4 = vld [vmem:[#allocation101_spill] sm:$0xff]  ;;  %v10703_v9 = vld [vmem:[#allocation100_spill] sm:$0xff] }
 0x590   :  { %2816 = vmatpush.msrb.mxu1 %v8262_v47  ;;  %2856 = vmatpush.msrb.mxu3 %v8265_v58  ;;  %10701 = vst [vmem:[#allocation132_spill] sm:$0xff] %v8273_v7  ;;  %v8278_v47 = vld [vmem:[#allocation5 + $0x370] sm:$0xff]  ;;  %v8281_v58 = vld [vmem:[#allocation5 + $0x378] sm:$0xff] }
 0x591   :  { %2623 = vmatpush.msrb.mxu0 %v10698_v11  ;;  %2663 = vmatpush.msrb.mxu2 %v10699_v12  ;;  %10704 = vst [vmem:[#allocation133_spill] sm:$0xff] %v8278_v47  ;;  %v10706_v11 = vld [vmem:[#allocation13_spill] sm:$0xff]  ;;  %v10707_v12 = vld [vmem:[#allocation18_spill] sm:$0xff] }
 0x592   :  { %2817 = vmatpush.msrb.mxu1 %v8270_v20  ;;  %2857 = vmatpush.msrb.mxu3 %v8273_v7  ;;  %10705 = vst [vmem:[#allocation134_spill] sm:$0xff] %v8281_v58  ;;  %v8286_v20 = vld [vmem:[#allocation5 + $0x350] sm:$0xff]  ;;  %v8289_v7 = vld [vmem:[#allocation5 + $0x358] sm:$0xff] }
 0x593   :  { %2624 = vmatpush.msrb.mxu0 %v10702_v4  ;;  %2664 = vmatpush.msrb.mxu2 %v10703_v9  ;;  %10708 = vst [vmem:[#allocation135_spill] sm:$0xff] %v8286_v20  ;;  %v10710_v4 = vld [vmem:[#allocation15_spill] sm:$0xff]  ;;  %v10711_v9 = vld [vmem:[#allocation21_spill] sm:$0xff] }
 0x594   :  { %2818 = vmatpush.msrb.mxu1 %v8278_v47  ;;  %2858 = vmatpush.msrb.mxu3 %v8281_v58  ;;  %10709 = vst [vmem:[#allocation136_spill] sm:$0xff] %v8289_v7  ;;  %v8294_v47 = vld [vmem:[#allocation5 + $0x330] sm:$0xff]  ;;  %v8297_v58 = vld [vmem:[#allocation5 + $0x338] sm:$0xff] }
 0x595   :  { %2625 = vmatpush.msrb.mxu0 %v10706_v11  ;;  %2665 = vmatpush.msrb.mxu2 %v10707_v12  ;;  %10712 = vst [vmem:[#allocation137_spill] sm:$0xff] %v8294_v47  ;;  %v8300_v11 = vld [vmem:[#allocation3 + $0x30] sm:$0xff]  ;;  %v10715_v12 = vld [vmem:[#allocation17_spill] sm:$0xff] }
 0x596   :  { %2819 = vmatpush.msrb.mxu1 %v8286_v20  ;;  %2859 = vmatpush.msrb.mxu3 %v8289_v7  ;;  %10713 = vst [vmem:[#allocation138_spill] sm:$0xff] %v8297_v58  ;;  %v8304_v20 = vld [vmem:[#allocation5 + $0x310] sm:$0xff] }
 0x597   :  { %2626 = vmatpush.msrb.mxu0 %v10710_v4  ;;  %2666 = vmatpush.msrb.mxu2 %v10711_v9  ;;  %10714 = vst [vmem:[#allocation139_spill] sm:$0xff] %v8300_v11  ;;  %v8307_v4 = vld [vmem:[#allocation5 + $0x318] sm:$0xff]  ;;  %v8310_v9 = vld [vmem:[#allocation3 + $0x10] sm:$0xff] }
 0x598   :  { %2820 = vmatpush.msrb.mxu1 %v8294_v47  ;;  %2860 = vmatpush.msrb.mxu3 %v8297_v58  ;;  %10716 = vst [vmem:[#allocation140_spill] sm:$0xff] %v8304_v20  ;;  %v10719_v47 = vld [vmem:[#allocation24_spill] sm:$0xff] }
 0x599   :  { %2627 = vmatpush.msrb.mxu0 %v8300_v11  ;;  %2667 = vmatpush.msrb.mxu2 %v10715_v12  ;;  %10717 = vst [vmem:[#allocation141_spill] sm:$0xff] %v8307_v4  ;;  %v8316_v11 = vld [vmem:[#allocation5 + $0x2f0] sm:$0xff]  ;;  %v8319_v12 = vld [vmem:[#allocation5 + $0x2f8] sm:$0xff] }
 0x59a   :  { %2821 = vmatpush.msrb.mxu1 %v8304_v20  ;;  %2861 = vmatpush.msrb.mxu3 %v8307_v4  ;;  %10718 = vst [vmem:[#allocation142_spill] sm:$0xff] %v8310_v9  ;;  %v8322_v20 = vld [vmem:[#allocation5 + $0x1e0] sm:$0xff]  ;;  %v8325_v4 = vld [vmem:[#allocation5 + $0x1e8] sm:$0xff] }
 0x59b   :  { %2628 = vmatpush.msrb.mxu0 %v8310_v9  ;;  %2668 = vmatpush.msrb.mxu2 %v10719_v47  ;;  %10720 = vst [vmem:[#allocation143_spill] sm:$0xff] %v8316_v11  ;;  %v8328_v47 = vld [vmem:[#allocation5 + $0x2d0] sm:$0xff]  ;;  %v10796_v9 = vld [vmem:[#allocation65_spill] sm:$0xff] }
 0x59c   :  { %2629 = vmatmul.f32.vlgmr.msrb.gmra.mxu0 %v8176_v59  ;;  %2669 = vmatmul.f32.vlgmr.msrb.gmra.mxu2 %v8176_v59  ;;  %10721 = vst [vmem:[#allocation144_spill] sm:$0xff] %v8319_v12  ;;  %v8331_v59 = vld [vmem:[#allocation5 + $0x2d8] sm:$0xff] }
 0x59d   :  { %2822 = vmatpush.msrb.mxu1 %v8316_v11  ;;  %2862 = vmatpush.msrb.mxu3 %v8319_v12  ;;  %10722 = vst [vmem:[#allocation145_spill] sm:$0xff] %v8322_v20  ;;  %v8334_v11 = vld [vmem:[#allocation5 + $0x1c0] sm:$0xff]  ;;  %v8337_v12 = vld [vmem:[#allocation5 + $0x1c8] sm:$0xff] }
 0x59e   :  { %2714 = vmatpush.msra.mxu0 %v8322_v20  ;;  %10723 = vst [vmem:[#allocation146_spill] sm:$0xff] %v8325_v4  ;;  %2754 = vmatpush.msra.mxu2 %v8325_v4  ;;  %v8340_v20 = vld [vmem:[#allocation5 + $0x2b0] sm:$0xff]  ;;  %v8343_v4 = vld [vmem:[#allocation5 + $0x2b8] sm:$0xff] }
 0x59f   :  { %10724 = vst [vmem:[#allocation147_spill] sm:$0xff] %v8328_v47  ;;  %2823 = vmatpush.msrb.mxu1 %v8328_v47  ;;  %2863 = vmatpush.msrb.mxu3 %v8331_v59  ;;  %v8346_v47 = vld [vmem:[#allocation5 + $0x1a0] sm:$0xff] }
 0x5a0   :  { %10725 = vst [vmem:[#allocation148_spill] sm:$0xff] %v8331_v59  ;;  %2715 = vmatpush.msra.mxu0 %v8334_v11  ;;  %2755 = vmatpush.msra.mxu2 %v8337_v12  ;;  %v8349_v59 = vld [vmem:[#allocation5 + $0x1a8] sm:$0xff] }
 0x5a1   :  { %10726 = vst [vmem:[#allocation149_spill] sm:$0xff] %v8334_v11  ;;  %2824 = vmatpush.msrb.mxu1 %v8340_v20  ;;  %2864 = vmatpush.msrb.mxu3 %v8343_v4  ;;  %v8352_v11 = vld [vmem:[#allocation5 + $0x290] sm:$0xff] }
 0x5a2   :  { %10727 = vst [vmem:[#allocation150_spill] sm:$0xff] %v8337_v12  ;;  %2716 = vmatpush.msra.mxu0 %v8346_v47  ;;  %2756 = vmatpush.msra.mxu2 %v8349_v59  ;;  %v8355_v12 = vld [vmem:[#allocation5 + $0x298] sm:$0xff] }
 0x5a3   :  { %10728 = vst [vmem:[#allocation151_spill] sm:$0xff] %v8340_v20  ;;  %2825 = vmatpush.msrb.mxu1 %v8352_v11  ;;  %2865 = vmatpush.msrb.mxu3 %v8355_v12  ;;  %v8358_v20 = vld [vmem:[#allocation5 + $0x180] sm:$0xff] }
 0x5a4   :  { %10729 = vst [vmem:[#allocation152_spill] sm:$0xff] %v8343_v4  ;;  %2717 = vmatpush.msra.mxu0 %v8358_v20  ;;  %v8361_v4 = vld [vmem:[#allocation5 + $0x188] sm:$0xff] }
 0x5a5   :  { %10730 = vst [vmem:[#allocation153_spill] sm:$0xff] %v8346_v47  ;;  %2757 = vmatpush.msra.mxu2 %v8361_v4  ;;  %v8364_v47 = vld [vmem:[#allocation5 + $0x270] sm:$0xff] }
 0x5a6   :  { %10731 = vst [vmem:[#allocation154_spill] sm:$0xff] %v8349_v59  ;;  %2826 = vmatpush.msrb.mxu1 %v8364_v47  ;;  %v8367_v59 = vld [vmem:[#allocation5 + $0x278] sm:$0xff] }
 0x5a7   :  { %10732 = vst [vmem:[#allocation155_spill] sm:$0xff] %v8352_v11  ;;  %2866 = vmatpush.msrb.mxu3 %v8367_v59  ;;  %v8370_v11 = vld [vmem:[#allocation5 + $0x160] sm:$0xff] }
 0x5a8   :  { %10733 = vst [vmem:[#allocation156_spill] sm:$0xff] %v8355_v12  ;;  %2718 = vmatpush.msra.mxu0 %v8370_v11  ;;  %v8373_v12 = vld [vmem:[#allocation5 + $0x168] sm:$0xff] }
 0x5a9   :  { %10734 = vst [vmem:[#allocation157_spill] sm:$0xff] %v8358_v20  ;;  %2758 = vmatpush.msra.mxu2 %v8373_v12  ;;  %v8376_v20 = vld [vmem:[#allocation5 + $0x250] sm:$0xff] }
 0x5aa   :  { %10735 = vst [vmem:[#allocation158_spill] sm:$0xff] %v8361_v4  ;;  %2827 = vmatpush.msrb.mxu1 %v8376_v20  ;;  %v8379_v4 = vld [vmem:[#allocation5 + $0x258] sm:$0xff] }
 0x5ab   :  { %10736 = vst [vmem:[#allocation159_spill] sm:$0xff] %v8364_v47  ;;  %2867 = vmatpush.msrb.mxu3 %v8379_v4  ;;  %v8382_v47 = vld [vmem:[#allocation5 + $0x140] sm:$0xff] }
 0x5ac   :  { %10737 = vst [vmem:[#allocation160_spill] sm:$0xff] %v8367_v59  ;;  %2719 = vmatpush.msra.mxu0 %v8382_v47  ;;  %v8385_v59 = vld [vmem:[#allocation5 + $0x148] sm:$0xff] }
 0x5ad   :  { %10738 = vst [vmem:[#allocation161_spill] sm:$0xff] %v8370_v11  ;;  %2759 = vmatpush.msra.mxu2 %v8385_v59  ;;  %v8388_v11 = vld [vmem:[#allocation5 + $0x230] sm:$0xff] }
 0x5ae   :  { %10739 = vst [vmem:[#allocation162_spill] sm:$0xff] %v8373_v12  ;;  %2828 = vmatpush.msrb.mxu1 %v8388_v11  ;;  %v8391_v12 = vld [vmem:[#allocation5 + $0x238] sm:$0xff] }
 0x5af   :  { %10740 = vst [vmem:[#allocation163_spill] sm:$0xff] %v8376_v20  ;;  %2868 = vmatpush.msrb.mxu3 %v8391_v12  ;;  %v8394_v20 = vld [vmem:[#allocation5 + $0x120] sm:$0xff] }
 0x5b0   :  { %10741 = vst [vmem:[#allocation164_spill] sm:$0xff] %v8379_v4  ;;  %2720 = vmatpush.msra.mxu0 %v8394_v20  ;;  %v8397_v4 = vld [vmem:[#allocation5 + $0x128] sm:$0xff] }
 0x5b1   :  { %10742 = vst [vmem:[#allocation165_spill] sm:$0xff] %v8382_v47  ;;  %2760 = vmatpush.msra.mxu2 %v8397_v4  ;;  %v8400_v47 = vld [vmem:[#allocation5 + $0x210] sm:$0xff] }
 0x5b2   :  { %10743 = vst [vmem:[#allocation166_spill] sm:$0xff] %v8385_v59  ;;  %2829 = vmatpush.msrb.mxu1 %v8400_v47  ;;  %v8403_v59 = vld [vmem:[#allocation5 + $0x218] sm:$0xff] }
 0x5b3   :  { %10744 = vst [vmem:[#allocation167_spill] sm:$0xff] %v8388_v11  ;;  %2869 = vmatpush.msrb.mxu3 %v8403_v59  ;;  %v8406_v11 = vld [vmem:[#allocation5 + $0x100] sm:$0xff] }
 0x5b4   :  { %10745 = vst [vmem:[#allocation168_spill] sm:$0xff] %v8391_v12  ;;  %2721 = vmatpush.msra.mxu0 %v8406_v11  ;;  %v8409_v12 = vld [vmem:[#allocation5 + $0x108] sm:$0xff] }
 0x5b5   :  { %10746 = vst [vmem:[#allocation169_spill] sm:$0xff] %v8394_v20  ;;  %2761 = vmatpush.msra.mxu2 %v8409_v12  ;;  %v8412_v20 = vld [vmem:[#allocation5 + $0xe0] sm:$0xff] }
 0x5b6   :  { %10747 = vst [vmem:[#allocation170_spill] sm:$0xff] %v8397_v4  ;;  %2722 = vmatpush.msra.mxu0 %v8412_v20  ;;  %v8415_v4 = vld [vmem:[#allocation5 + $0xe8] sm:$0xff] }
 0x5b7   :  { %10748 = vst [vmem:[#allocation171_spill] sm:$0xff] %v8400_v47  ;;  %2762 = vmatpush.msra.mxu2 %v8415_v4  ;;  %v8418_v47 = vld [vmem:[#allocation5 + $0xc0] sm:$0xff] }
 0x5b8   :  { %10749 = vst [vmem:[#allocation69_spill] sm:$0xff] %v8403_v59  ;;  %2723 = vmatpush.msra.mxu0 %v8418_v47  ;;  %v8421_v59 = vld [vmem:[#allocation5 + $0xc8] sm:$0xff] }
 0x5b9   :  { %10750 = vst [vmem:[#allocation86_spill] sm:$0xff] %v8406_v11  ;;  %2763 = vmatpush.msra.mxu2 %v8421_v59  ;;  %v8424_v11 = vld [vmem:[#allocation5 + $0xa0] sm:$0xff] }
 0x5ba   :  { %10751 = vst [vmem:[#allocation73_spill] sm:$0xff] %v8409_v12  ;;  %2724 = vmatpush.msra.mxu0 %v8424_v11  ;;  %v8427_v12 = vld [vmem:[#allocation5 + $0xa8] sm:$0xff] }
 0x5bb   :  { %10752 = vst [vmem:[#allocation90_spill] sm:$0xff] %v8412_v20  ;;  %2764 = vmatpush.msra.mxu2 %v8427_v12  ;;  %v8430_v20 = vld [vmem:[#allocation5 + $0x80] sm:$0xff] }
 0x5bc   :  { %10753 = vst [vmem:[#allocation76_spill] sm:$0xff] %v8415_v4  ;;  %2725 = vmatpush.msra.mxu0 %v8430_v20  ;;  %v8433_v4 = vld [vmem:[#allocation5 + $0x88] sm:$0xff] }
 0x5bd   :  { %10754 = vst [vmem:[#allocation80_spill] sm:$0xff] %v8418_v47  ;;  %2765 = vmatpush.msra.mxu2 %v8433_v4  ;;  %v8436_v47 = vld [vmem:[#allocation5 + $0x60] sm:$0xff] }
 0x5be   :  { %10755 = vst [vmem:[#allocation84_spill] sm:$0xff] %v8421_v59  ;;  %2726 = vmatpush.msra.mxu0 %v8436_v47  ;;  %v8439_v59 = vld [vmem:[#allocation5 + $0x68] sm:$0xff] }
 0x5bf   :  { %10756 = vst [vmem:[#allocation88_spill] sm:$0xff] %v8424_v11  ;;  %2766 = vmatpush.msra.mxu2 %v8439_v59  ;;  %v8442_v11 = vld [vmem:[#allocation5 + $0x40] sm:$0xff] }
 0x5c0   :  { %10757 = vst [vmem:[#allocation20_spill] sm:$0xff] %v8427_v12  ;;  %2727 = vmatpush.msra.mxu0 %v8442_v11  ;;  %v8445_v12 = vld [vmem:[#allocation5 + $0x48] sm:$0xff] }
 0x5c1   :  { %10758 = vst [vmem:[#allocation92_spill] sm:$0xff] %v8430_v20  ;;  %2767 = vmatpush.msra.mxu2 %v8445_v12  ;;  %v8448_v20 = vld [vmem:[#allocation5 + $0x20] sm:$0xff] }
 0x5c2   :  { %10759 = vst [vmem:[#allocation23_spill] sm:$0xff] %v8433_v4  ;;  %2728 = vmatpush.msra.mxu0 %v8448_v20  ;;  %v8451_v4 = vld [vmem:[#allocation5 + $0x28] sm:$0xff] }
 0x5c3   :  { %10760 = vst [vmem:[#allocation54_spill] sm:$0xff] %v8436_v47  ;;  %2768 = vmatpush.msra.mxu2 %v8451_v4  ;;  %v8454_v47 = vld [vmem:[#allocation5] sm:$0xff] }
 0x5c4   :  { %10761 = vst [vmem:[#allocation55_spill] sm:$0xff] %v8439_v59  ;;  %2729 = vmatpush.msra.mxu0 %v8454_v47  ;;  %v8457_v59 = vld [vmem:[#allocation5 + $0x8] sm:$0xff] }
 0x5c5   :  { %10762 = vst [vmem:[#allocation95_spill] sm:$0xff] %v8442_v11  ;;  %2769 = vmatpush.msra.mxu2 %v8457_v59  ;;  %v8460_v11 = vld [vmem:[#allocation5 + $0x1f0] sm:$0xff] }
 0x5c6   :  { %10763 = vst [vmem:[#allocation58_spill] sm:$0xff] %v8445_v12  ;;  %2794 = vmatpush.msrb.mxu0 %v8460_v11  ;;  %v8463_v12 = vld [vmem:[#allocation5 + $0x1f8] sm:$0xff] }
 0x5c7   :  { %10764 = vst [vmem:[#allocation59_spill] sm:$0xff] %v8448_v20  ;;  %2834 = vmatpush.msrb.mxu2 %v8463_v12  ;;  %v8466_v20 = vld [vmem:[#allocation5 + $0x1d0] sm:$0xff] }
 0x5c8   :  { %10765 = vst [vmem:[#allocation62_spill] sm:$0xff] %v8451_v4  ;;  %2795 = vmatpush.msrb.mxu0 %v8466_v20  ;;  %v8469_v4 = vld [vmem:[#allocation5 + $0x1d8] sm:$0xff] }
 0x5c9   :  { %10766 = vst [vmem:[#allocation63_spill] sm:$0xff] %v8454_v47  ;;  %2835 = vmatpush.msrb.mxu2 %v8469_v4  ;;  %v8472_v47 = vld [vmem:[#allocation5 + $0x1b0] sm:$0xff] }
 0x5ca   :  { %10767 = vst [vmem:[#allocation99_spill] sm:$0xff] %v8457_v59  ;;  %2796 = vmatpush.msrb.mxu0 %v8472_v47  ;;  %v8475_v59 = vld [vmem:[#allocation5 + $0x1b8] sm:$0xff] }
 0x5cb   :  { %10768 = vst [vmem:[#allocation66_spill] sm:$0xff] %v8460_v11  ;;  %2836 = vmatpush.msrb.mxu2 %v8475_v59  ;;  %v8478_v11 = vld [vmem:[#allocation5 + $0x190] sm:$0xff] }
 0x5cc   :  { %10769 = vst [vmem:[#allocation67_spill] sm:$0xff] %v8463_v12  ;;  %2797 = vmatpush.msrb.mxu0 %v8478_v11  ;;  %v8481_v12 = vld [vmem:[#allocation5 + $0x198] sm:$0xff] }
 0x5cd   :  { %10770 = vst [vmem:[#allocation70_spill] sm:$0xff] %v8466_v20  ;;  %2837 = vmatpush.msrb.mxu2 %v8481_v12  ;;  %v8484_v20 = vld [vmem:[#allocation5 + $0x170] sm:$0xff] }
 0x5ce   :  { %10771 = vst [vmem:[#allocation72_spill] sm:$0xff] %v8469_v4  ;;  %2798 = vmatpush.msrb.mxu0 %v8484_v20  ;;  %v8487_v4 = vld [vmem:[#allocation5 + $0x178] sm:$0xff] }
 0x5cf   :  { %10772 = vst [vmem:[#allocation74_spill] sm:$0xff] %v8472_v47  ;;  %2838 = vmatpush.msrb.mxu2 %v8487_v4  ;;  %v8490_v47 = vld [vmem:[#allocation5 + $0x150] sm:$0xff] }
 0x5d0   :  { %10773 = vst [vmem:[#allocation77_spill] sm:$0xff] %v8475_v59  ;;  %2799 = vmatpush.msrb.mxu0 %v8490_v47  ;;  %v8493_v59 = vld [vmem:[#allocation5 + $0x158] sm:$0xff] }
 0x5d1   :  { %10774 = vst [vmem:[#allocation79_spill] sm:$0xff] %v8478_v11  ;;  %2839 = vmatpush.msrb.mxu2 %v8493_v59  ;;  %v8496_v11 = vld [vmem:[#allocation5 + $0x130] sm:$0xff] }
 0x5d2   :  { %10775 = vst [vmem:[#allocation81_spill] sm:$0xff] %v8481_v12  ;;  %2800 = vmatpush.msrb.mxu0 %v8496_v11  ;;  %v8499_v12 = vld [vmem:[#allocation5 + $0x138] sm:$0xff] }
 0x5d3   :  { %10776 = vst [vmem:[#allocation83_spill] sm:$0xff] %v8484_v20  ;;  %2840 = vmatpush.msrb.mxu2 %v8499_v12  ;;  %v8502_v20 = vld [vmem:[#allocation5 + $0x110] sm:$0xff] }
 0x5d4   :  { %10777 = vst [vmem:[#allocation85_spill] sm:$0xff] %v8487_v4  ;;  %2801 = vmatpush.msrb.mxu0 %v8502_v20  ;;  %v8505_v4 = vld [vmem:[#allocation5 + $0x118] sm:$0xff] }
 0x5d5   :  { %10778 = vst [vmem:[#allocation87_spill] sm:$0xff] %v8490_v47  ;;  %2841 = vmatpush.msrb.mxu2 %v8505_v4  ;;  %v8508_v47 = vld [vmem:[#allocation5 + $0xf0] sm:$0xff] }
 0x5d6   :  { %10779 = vst [vmem:[#allocation89_spill] sm:$0xff] %v8493_v59  ;;  %2802 = vmatpush.msrb.mxu0 %v8508_v47  ;;  %v8511_v59 = vld [vmem:[#allocation5 + $0xf8] sm:$0xff] }
 0x5d7   :  { %10780 = vst [vmem:[#allocation91_spill] sm:$0xff] %v8496_v11  ;;  %2842 = vmatpush.msrb.mxu2 %v8511_v59  ;;  %v8514_v11 = vld [vmem:[#allocation5 + $0xd0] sm:$0xff] }
 0x5d8   :  { %10781 = vst [vmem:[#allocation93_spill] sm:$0xff] %v8499_v12  ;;  %2803 = vmatpush.msrb.mxu0 %v8514_v11  ;;  %v8517_v12 = vld [vmem:[#allocation5 + $0xd8] sm:$0xff] }
 0x5d9   :  { %10782 = vst [vmem:[#allocation94_spill] sm:$0xff] %v8502_v20  ;;  %2843 = vmatpush.msrb.mxu2 %v8517_v12  ;;  %v8520_v20 = vld [vmem:[#allocation5 + $0xb0] sm:$0xff] }
 0x5da   :  { %10783 = vst [vmem:[#allocation96_spill] sm:$0xff] %v8505_v4  ;;  %2804 = vmatpush.msrb.mxu0 %v8520_v20  ;;  %v8523_v4 = vld [vmem:[#allocation5 + $0xb8] sm:$0xff] }
 0x5db   :  { %10784 = vst [vmem:[#allocation97_spill] sm:$0xff] %v8508_v47  ;;  %2844 = vmatpush.msrb.mxu2 %v8523_v4  ;;  %v8526_v47 = vld [vmem:[#allocation5 + $0x90] sm:$0xff] }
 0x5dc   :  { %10785 = vst [vmem:[#allocation98_spill] sm:$0xff] %v8511_v59  ;;  %2805 = vmatpush.msrb.mxu0 %v8526_v47  ;;  %v8529_v59 = vld [vmem:[#allocation5 + $0x98] sm:$0xff] }
 0x5dd   :  { %10786 = vst [vmem:[#allocation102_spill] sm:$0xff] %v8514_v11  ;;  %2845 = vmatpush.msrb.mxu2 %v8529_v59  ;;  %v8532_v11 = vld [vmem:[#allocation5 + $0x70] sm:$0xff] }
 0x5de   :  { %10787 = vst [vmem:[#allocation103_spill] sm:$0xff] %v8517_v12  ;;  %2806 = vmatpush.msrb.mxu0 %v8532_v11  ;;  %v8535_v12 = vld [vmem:[#allocation5 + $0x78] sm:$0xff] }
 0x5df   :  { %10788 = vst [vmem:[#allocation104_spill] sm:$0xff] %v8520_v20  ;;  %2846 = vmatpush.msrb.mxu2 %v8535_v12  ;;  %v8538_v20 = vld [vmem:[#allocation5 + $0x50] sm:$0xff] }
 0x5e0   :  { %10789 = vst [vmem:[#allocation105_spill] sm:$0xff] %v8523_v4  ;;  %2807 = vmatpush.msrb.mxu0 %v8538_v20  ;;  %v8541_v4 = vld [vmem:[#allocation5 + $0x58] sm:$0xff] }
 0x5e1   :  { %10790 = vst [vmem:[#allocation9_spill] sm:$0xff] %v8526_v47  ;;  %2847 = vmatpush.msrb.mxu2 %v8541_v4  ;;  %v2368_v47 = vpop.f32.mrf.mxu0 }
 0x5e2   :  { %10791 = vst [vmem:[#allocation12_spill] sm:$0xff] %v8529_v59  ;;  %v2369_v58 = vadd.f32 %v2368_v47, %v10796_v9  ;;  %v8545_v59 = vld [vmem:[#allocation5 + $0x30] sm:$0xff]  ;;  %v2408_v47 = vpop.f32.mrf.mxu2  ;;  %v2428_v9 = vpop.f32.mrf.mxu3 }
 0x5e3   :  { %10792 = vst [vmem:[#allocation10_spill] sm:$0xff] %v8532_v11  ;;  %2808 = vmatpush.msrb.mxu0 %v8545_v59  ;;  %v8548_v11 = vld [vmem:[#allocation5 + $0x38] sm:$0xff] }
 0x5e4   :  { %10793 = vst [vmem:[#allocation14_spill] sm:$0xff] %v8535_v12  ;;  %2848 = vmatpush.msrb.mxu2 %v8548_v11  ;;  %v2388_v12 = vpop.f32.mrf.mxu1 }
 0x5e5   :  { %10794 = vst [vmem:[#allocation101_spill] sm:$0xff] %v8538_v20  ;;  %v2389_v7 = vadd.f32 %v2388_v12, %v2369_v58  ;;  %2809 = vmatpush.msrb.mxu0 %v8551_v41  ;;  %v8554_v20 = vld [vmem:[#allocation5 + $0x18] sm:$0xff] }
 0x5e6   :  { %10795 = vst [vmem:[#allocation100_spill] sm:$0xff] %v8541_v4  ;;  %2849 = vmatpush.msrb.mxu2 %v8554_v20 }
 0x5e7   :  { %10797 = vst [vmem:[#allocation13_spill] sm:$0xff] %v8545_v59  ;;  %v2511_v4 = vsub.f32 0.0, %v2389_v7  ;;  %v2409_v59 = vadd.f32 %v2408_v47, %v5713_v30 }
 0x5e8   :  { %10798 = vst [vmem:[#allocation18_spill] sm:$0xff] %v8548_v11 }
 0x5e9   :  { %10799 = vst [vmem:[#allocation15_spill] sm:$0xff] %v8551_v41  ;;  %v2512_v56 = vmul.f32 1.442695, %v2511_v4  ;;  %v2429_v43 = vadd.f32 %v2428_v9, %v2409_v59  ;;  %v2448_v11 = vpop.f32.mrf.mxu0 }
 0x5ea   :  { %10800 = vst [vmem:[#allocation21_spill] sm:$0xff] %v8554_v20  ;;  %v2449_v12 = vadd.f32 %v2448_v11, %v5716_v48  ;;  %v2488_v41 = vpop.f32.mrf.mxu2  ;;  %v2508_v40 = vpop.f32.mrf.mxu3 }
 0x5eb   :  { %3644 = vpow2.f32 %v2512_v56  ;;  %v2516_v8 = vsub.f32 0.0, %v2429_v43  ;;  %v2489_v42 = vadd.f32 %v2488_v41, %v10801_v44 }
 0x5ec   :  { %v2468_v20 = vpop.f32.mrf.mxu1 }
 0x5ed   :  { %v2517_v60 = vmul.f32 1.442695, %v2516_v8  ;;  %v2509_v32 = vadd.f32 %v2508_v40, %v2489_v42  ;;  %v2469_v33 = vadd.f32 %v2468_v20, %v2449_v12 }
 0x5ef   :  { %3646 = vpow2.f32 %v2517_v60  ;;  %v2522_v4 = vsub.f32 0.0, %v2509_v32 }
 0x5f1   :  { %v3645_v58 = vpop.eup %3644  ;;  %v2523_v9 = vmul.f32 1.442695, %v2522_v4 }
 0x5f2   :  { %v2514_v7 = vadd.f32 1.0, %v3645_v58  ;;  %v2610_v4 = vpop.f32.mrf.mxu3 }
 0x5f4   :  { %3648 = vrcp.f32 %v2514_v7  ;;  %v2570_v12 = vpop.f32.mrf.mxu1 }
 0x5f5   :  { %v3647_v46 = vpop.eup %3646  ;;  %3650 = vtanh.f32 %v2469_v33 }
 0x5f6   :  { %v2519_v56 = vadd.f32 1.0, %v3647_v46 }
 0x5f8   :  { %3652 = vrcp.f32 %v2519_v56 }
 0x5f9   :  { %3654 = vpow2.f32 %v2523_v9  ;;  %v2550_v40 = vpop.f32.mrf.mxu0 }
 0x5fa   :  { %v3649_v8 = vpop.eup %3648  ;;  %v2551_v20 = vadd.f32 %v2550_v40, %v9846_v15  ;;  %v10814_v40 = vld [vmem:[#allocation31_spill] sm:$0xff] }
 0x5fb   :  { %v3651_v60 = vpop.eup %3650 }
 0x5fc   :  { %v2528_v41 = vmul.f32 %v3651_v60, %v3649_v8  ;;  %v2571_v56 = vadd.f32 %v2570_v12, %v2551_v20  ;;  %v10805_v60 = vld [vmem:[#allocation30_spill] sm:$0xff]  ;;  %v2650_v20 = vpop.f32.mrf.mxu1 }
 0x5fe   :  { %v3653_v43 = vpop.eup %3652  ;;  %v2693_v8 = vsub.f32 0.0, %v2571_v56  ;;  %v10817_v56 = vld [vmem:[#allocation33_spill] sm:$0xff] }
 0x5ff   :  { %v3655_v11 = vpop.eup %3654  ;;  %v2527_v59 = vmul.f32 %v3653_v43, %v7889_v50  ;;  %v2590_v42 = vpop.f32.mrf.mxu2  ;;  %v10809_v43 = vld [vmem:[#allocation34_spill] sm:$0xff] }
 0x600   :  { %v2525_v47 = vadd.f32 1.0, %v3655_v11  ;;  %v2591_v58 = vadd.f32 %v2590_v42, %v9847_v18  ;;  %v10811_v11 = vld [vmem:[#allocation36_spill] sm:$0xff] }
 0x601   :  { %v8561_v44 = vadd.f32 %v2528_v41, %v2527_v59  ;;  %v10812_v59 = vld [vmem:[#allocation29_spill] sm:$0xff]  ;;  %v10815_v42 = vld [vmem:[#allocation16_spill] sm:$0xff] }
 0x602   :  { %3656 = vrcp.f32 %v2525_v47  ;;  %v2611_v9 = vadd.f32 %v2610_v4, %v2591_v58  ;;  %v10816_v58 = vld [vmem:[#allocation40_spill] sm:$0xff] }
 0x603   :  { %3658 = vtanh.f32 %v8561_v44 }
 0x608   :  { %v3657_v32 = vpop.eup %3656 }
 0x609   :  { %v3659_v46 = vpop.eup %3658 }
 0x60a   :  { %v2531_v33 = vmul.f32 %v3659_v46, %v3657_v32  ;;  %v10813_v32 = vld [vmem:[#allocation38_spill] sm:$0xff] }
 0x60c   :  { %2750 = vmatmul.f32.vlgmr.msra.gmra.mxu1 %v2531_v33  ;;  %2790 = vmatmul.f32.vlgmr.msra.gmra.mxu3 %v2531_v33  ;;  %v3271_v50 = vrot.slane %v2531_v33, 3 }
 0x60d   :  { %2916 = vmatpush.msra.mxu1 %v7894_v23  ;;  %2956 = vmatpush.msra.mxu3 %v7897_v17  ;;  %v2698_v23 = vsub.f32 0.0, %v2611_v9  ;;  %v10802_v17 = vld [vmem:[#allocation26_spill] sm:$0xff] }
 0x60e   :  { %v8569_v7 = vsel %vm3287_vm4, %v7901_v51, %v3271_v50  ;;  %v2694_v51 = vmul.f32 1.442695, %v2693_v8  ;;  %v10818_v9 = vld [vmem:[#allocation42_spill] sm:$0xff] }
 0x60f   :  { %2917 = vmatpush.msra.mxu1 %v7903_v61  ;;  %2957 = vmatpush.msra.mxu3 %v7906_v27  ;;  %v10803_v61 = vld [vmem:[#allocation28_spill] sm:$0xff]  ;;  %v10804_v27 = vld [vmem:[#allocation19_spill] sm:$0xff] }
 0x610   :  { %3660 = vpow2.f32 %v2694_v51 }
 0x611   :  { %2918 = vmatpush.msra.mxu1 %v7909_v34  ;;  %2958 = vmatpush.msra.mxu3 %v7912_v13  ;;  %v2699_v34 = vmul.f32 1.442695, %v2698_v23  ;;  %v10806_v13 = vld [vmem:[#allocation22_spill] sm:$0xff]  ;;  %v10819_v23 = vld [vmem:[#allocation35_spill] sm:$0xff] }
 0x613   :  { %2919 = vmatpush.msra.mxu1 %v7915_v38  ;;  %2959 = vmatpush.msra.mxu3 %v7918_v62  ;;  %v10807_v38 = vld [vmem:[#allocation32_spill] sm:$0xff]  ;;  %v10808_v62 = vld [vmem:[#allocation25_spill] sm:$0xff]  ;;  %3662 = vpow2.f32 %v2699_v34 }
 0x614   :  { %2830 = vmatmul.f32.vlgmr.msrb.gmra.mxu1 %v2531_v33  ;;  %2870 = vmatmul.f32.vlgmr.msrb.gmra.mxu3 %v2531_v33 }
 0x615   :  { %2920 = vmatpush.msra.mxu1 %v7921_v10  ;;  %2960 = vmatpush.msra.mxu3 %v10802_v17  ;;  %v10810_v10 = vld [vmem:[#allocation27_spill] sm:$0xff] }
 0x616   :  { %v3661_v41 = vpop.eup %3660  ;;  %v10820_v17 = vld [vmem:[#allocation11_spill] sm:$0xff] }
 0x617   :  { %2921 = vmatpush.msra.mxu1 %v10803_v61  ;;  %2961 = vmatpush.msra.mxu3 %v10804_v27  ;;  %v2696_v50 = vadd.f32 1.0, %v3661_v41  ;;  %v2690_v61 = vpop.f32.mrf.mxu3  ;;  %v10821_v27 = vld [vmem:[#allocation44_spill] sm:$0xff]  ;;  %v10828_v41 = vld [vmem:[#allocation43_spill] sm:$0xff] }
 0x619   :  { %2922 = vmatpush.msra.mxu1 %v10805_v60  ;;  %2962 = vmatpush.msra.mxu3 %v10806_v13  ;;  %v2630_v47 = vpop.f32.mrf.mxu0  ;;  %v3663_v46 = vpop.eup %3662  ;;  %v10823_v60 = vld [vmem:[#allocation46_spill] sm:$0xff]  ;;  %v10824_v13 = vld [vmem:[#allocation39_spill] sm:$0xff] }
 0x61a   :  { %v2631_v33 = vadd.f32 %v2630_v47, %v10815_v42  ;;  %v2701_v4 = vadd.f32 1.0, %v3663_v46 }
 0x61b   :  { %2923 = vmatpush.msra.mxu1 %v10807_v38  ;;  %2963 = vmatpush.msra.mxu3 %v10808_v62  ;;  %v10825_v62 = vld [vmem:[#allocation48_spill] sm:$0xff] }
 0x61c   :  { %v2651_v12 = vadd.f32 %v2650_v20, %v2631_v33  ;;  %v10830_v33 = vld [vmem:[#allocation45_spill] sm:$0xff] }
 0x61d   :  { %2924 = vmatpush.msra.mxu1 %v10809_v43  ;;  %2964 = vmatpush.msra.mxu3 %v10810_v10  ;;  %v10826_v43 = vld [vmem:[#allocation41_spill] sm:$0xff] }
 0x61e   :  { %3664 = vtanh.f32 %v2651_v12  ;;  %v10832_v12 = vld [vmem:[#allocation47_spill] sm:$0xff] }
 0x61f   :  { %2925 = vmatpush.msra.mxu1 %v10811_v11  ;;  %2965 = vmatpush.msra.mxu3 %v10812_v59  ;;  %v2670_v8 = vpop.f32.mrf.mxu2  ;;  %3666 = vrcp.f32 %v2696_v50  ;;  %v10827_v59 = vld [vmem:[#allocation50_spill] sm:$0xff] }
 0x620   :  { %v2671_v51 = vadd.f32 %v2670_v8, %v10820_v17  ;;  %3668 = vrcp.f32 %v2701_v4  ;;  %v10833_v4 = vld [vmem:[#allocation60_spill] sm:$0xff]  ;;  %v10838_v8 = vld [vmem:[#allocation53_spill] sm:$0xff] }
 0x621   :  { %2926 = vmatpush.msra.mxu1 %v10813_v32  ;;  %2966 = vmatpush.msra.mxu3 %v10814_v40  ;;  %v10829_v40 = vld [vmem:[#allocation51_spill] sm:$0xff] }
 0x622   :  { %v2691_v34 = vadd.f32 %v2690_v61, %v2671_v51  ;;  %v10840_v51 = vld [vmem:[#allocation57_spill] sm:$0xff] }
 0x623   :  { %2927 = vmatpush.msra.mxu1 %v10816_v58  ;;  %2967 = vmatpush.msra.mxu3 %v7967_v54  ;;  %v10822_v54 = vld [vmem:[#allocation37_spill] sm:$0xff]  ;;  %v10831_v58 = vld [vmem:[#allocation56_spill] sm:$0xff] }
 0x624   :  { %v2704_v38 = vsub.f32 0.0, %v2691_v34  ;;  %v4496_v34 = vld [vmem:[#allocation3 + $0x1e0] sm:$0xff] }
 0x625   :  { %2928 = vmatpush.msra.mxu1 %v10817_v56  ;;  %2968 = vmatpush.msra.mxu3 %v10818_v9  ;;  %v10837_v9 = vld [vmem:[#allocation68_spill] sm:$0xff] }
 0x626   :  { %v2705_v11 = vmul.f32 1.442695, %v2704_v38  ;;  %v4499_v38 = vld [vmem:[#allocation3 + $0x1c8] sm:$0xff] }
 0x627   :  { %2929 = vmatpush.msra.mxu1 %v10819_v23  ;;  %2969 = vmatpush.msra.mxu3 %v7979_v53  ;;  %v3665_v53 = vpop.eup %3664 }
 0x628   :  { %v3667_v10 = vpop.eup %3666  ;;  %3670 = vpow2.f32 %v2705_v11  ;;  %v10844_v11 = vld [vmem:[#allocation106_spill] sm:$0xff] }
 0x629   :  { %2930 = vmatpush.msra.mxu1 %v10821_v27  ;;  %2970 = vmatpush.msra.mxu3 %v10822_v54  ;;  %v3669_v47 = vpop.eup %3668  ;;  %v2710_v32 = vmul.f32 %v3667_v10, %v3665_v53  ;;  %v10841_v54 = vld [vmem:[#allocation75_spill] sm:$0xff]  ;;  %v4514_v53 = vld [vmem:[#allocation3 + $0xc0] sm:$0xff] }
 0x62a   :  { %v2709_v46 = vmul.f32 %v3669_v47, %v8026_v29  ;;  %v10835_v29 = vld [vmem:[#allocation64_spill] sm:$0xff]  ;;  %v4520_v10 = vld [vmem:[#allocation3 + $0x60] sm:$0xff] }
 0x62b   :  { %2931 = vmatpush.msra.mxu1 %v10823_v60  ;;  %2971 = vmatpush.msra.mxu3 %v10824_v13  ;;  %v4497_v60 = vld [vmem:[#allocation3 + $0x1e8] sm:$0xff]  ;;  %v4498_v13 = vld [vmem:[#allocation3 + $0x1c0] sm:$0xff] }
 0x62c   :  { %v8612_v20 = vadd.f32 %v2710_v32, %v2709_v46  ;;  %v4524_v47 = vld [vmem:[#allocation3 + $0x20] sm:$0xff]  ;;  %v10848_v46 = vld [vmem:[#allocation110_spill] sm:$0xff] }
 0x62d   :  { %2996 = vmatpush.msrb.mxu1 %v10825_v62  ;;  %3036 = vmatpush.msrb.mxu3 %v10826_v43  ;;  %v4502_v62 = vld [vmem:[#allocation3 + $0x180] sm:$0xff]  ;;  %v4503_v43 = vld [vmem:[#allocation3 + $0x188] sm:$0xff] }
 0x62e   :  { %v3671_v50 = vpop.eup %3670  ;;  %3672 = vtanh.f32 %v8612_v20  ;;  %v8658_v32 = vld [vmem:[%s8890_s0 + $0x7] sm:$0x1] }
 0x62f   :  { %2997 = vmatpush.msrb.mxu1 %v10827_v59  ;;  %3037 = vmatpush.msrb.mxu3 %v10828_v41  ;;  %v2707_v56 = vadd.f32 1.0, %v3671_v50  ;;  %v4522_v59 = vld [vmem:[#allocation3 + $0x40] sm:$0xff]  ;;  %v10846_v41 = vld [vmem:[#allocation108_spill] sm:$0xff]  ;;  %v4528_v50 = vld [vmem:[#allocation3 + $0x1f0] sm:$0xff] }
 0x631   :  { %2998 = vmatpush.msrb.mxu1 %v10829_v40  ;;  %3038 = vmatpush.msrb.mxu3 %v8010_v39  ;;  %v10834_v39 = vld [vmem:[#allocation49_spill] sm:$0xff]  ;;  %3674 = vrcp.f32 %v2707_v56  ;;  %v10850_v56 = vld [vmem:[#allocation112_spill] sm:$0xff] }
 0x632   :  { %v10847_v40 = vld [vmem:[#allocation109_spill] sm:$0xff] }
 0x633   :  { %2999 = vmatpush.msrb.mxu1 %v8013_v55  ;;  %3039 = vmatpush.msrb.mxu3 %v10830_v33  ;;  %v10836_v55 = vld [vmem:[#allocation52_spill] sm:$0xff]  ;;  %v4526_v33 = vld [vmem:[#allocation3] sm:$0xff] }
 0x634   :  { %v3673_v23 = vpop.eup %3672 }
 0x635   :  { %3000 = vmatpush.msrb.mxu1 %v10831_v58  ;;  %3040 = vmatpush.msrb.mxu3 %v8023_v19  ;;  %v10839_v19 = vld [vmem:[#allocation71_spill] sm:$0xff]  ;;  %v4527_v58 = vld [vmem:[#allocation3 + $0x8] sm:$0xff] }
 0x637   :  { %3001 = vmatpush.msrb.mxu1 %v10832_v12  ;;  %3041 = vmatpush.msrb.mxu3 %v10833_v4  ;;  %v3675_v61 = vpop.eup %3674  ;;  %v4529_v12 = vld [vmem:[#allocation3 + $0x1f8] sm:$0xff]  ;;  %v10849_v4 = vld [vmem:[#allocation111_spill] sm:$0xff] }
 0x638   :  { %v2713_v27 = vmul.f32 %v3675_v61, %v3673_v23  ;;  %v10853_v23 = vld [vmem:[#allocation115_spill] sm:$0xff] }
 0x639   :  { %3002 = vmatpush.msrb.mxu1 %v10834_v39  ;;  %3042 = vmatpush.msrb.mxu3 %v10835_v29  ;;  %v4530_v39 = vld [vmem:[#allocation3 + $0x1d0] sm:$0xff]  ;;  %v4531_v29 = vld [vmem:[#allocation3 + $0x1d8] sm:$0xff] }
 0x63a   :  { %2730 = vmatmul.f32.vlgmr.msra.gmra.mxu0 %v2713_v27  ;;  %2770 = vmatmul.f32.vlgmr.msra.gmra.mxu2 %v2713_v27  ;;  %v4534_v61 = vld [vmem:[#allocation3 + $0x190] sm:$0xff] }
 0x63b   :  { %3003 = vmatpush.msrb.mxu1 %v10836_v55  ;;  %3043 = vmatpush.msrb.mxu3 %v10837_v9  ;;  %v10851_v55 = vld [vmem:[#allocation113_spill] sm:$0xff]  ;;  %v10852_v9 = vld [vmem:[#allocation114_spill] sm:$0xff] }
 0x63c   :  { %2896 = vmatpush.msra.mxu0 %v4496_v34  ;;  %2932 = vmatmul.f32.vlgmr.msra.gmra.mxu1 %v2713_v27  ;;  %v10856_v34 = vld [vmem:[#allocation118_spill] sm:$0xff] }
 0x63d   :  { %3004 = vmatpush.msrb.mxu1 %v10838_v8  ;;  %3044 = vmatpush.msrb.mxu3 %v10839_v19  ;;  %v4532_v8 = vld [vmem:[#allocation3 + $0x1b0] sm:$0xff]  ;;  %v4533_v19 = vld [vmem:[#allocation3 + $0x1b8] sm:$0xff] }
 0x63e   :  { %2936 = vmatpush.msra.mxu2 %v4497_v60  ;;  %2972 = vmatmul.f32.vlgmr.msra.gmra.mxu3 %v2713_v27  ;;  %v4536_v60 = vld [vmem:[#allocation3 + $0x170] sm:$0xff] }
 0x63f   :  { %3005 = vmatpush.msrb.mxu1 %v10840_v51  ;;  %3045 = vmatpush.msrb.mxu3 %v8056_v3  ;;  %v4500_v3 = vld [vmem:[#allocation3 + $0x1a0] sm:$0xff]  ;;  %v10854_v51 = vld [vmem:[#allocation116_spill] sm:$0xff] }
 0x640   :  { %2897 = vmatpush.msra.mxu0 %v4498_v13  ;;  %2937 = vmatpush.msra.mxu2 %v4499_v38  ;;  %v4537_v13 = vld [vmem:[#allocation3 + $0x178] sm:$0xff]  ;;  %v10857_v38 = vld [vmem:[#allocation119_spill] sm:$0xff] }
 0x641   :  { %3006 = vmatpush.msrb.mxu1 %v8059_v2  ;;  %3046 = vmatpush.msrb.mxu3 %v10841_v54  ;;  %v4501_v2 = vld [vmem:[#allocation3 + $0x1a8] sm:$0xff]  ;;  %v10855_v54 = vld [vmem:[#allocation117_spill] sm:$0xff] }
 0x642   :  { %2898 = vmatpush.msra.mxu0 %v4500_v3  ;;  %2938 = vmatpush.msra.mxu2 %v4501_v2  ;;  %v10858_v3 = vld [vmem:[#allocation120_spill] sm:$0xff]  ;;  %v4538_v2 = vld [vmem:[#allocation3 + $0x150] sm:$0xff] }
 0x643   :  { %3007 = vmatpush.msrb.mxu1 %v8065_v49  ;;  %3047 = vmatpush.msrb.mxu3 %v8068_v1  ;;  %v4504_v49 = vld [vmem:[#allocation3 + $0x160] sm:$0xff]  ;;  %v4505_v1 = vld [vmem:[#allocation3 + $0x168] sm:$0xff] }
 0x644   :  { %2899 = vmatpush.msra.mxu0 %v4502_v62  ;;  %2939 = vmatpush.msra.mxu2 %v4503_v43  ;;  %v4539_v62 = vld [vmem:[#allocation3 + $0x158] sm:$0xff]  ;;  %v10859_v43 = vld [vmem:[#allocation121_spill] sm:$0xff] }
 0x645   :  { %3008 = vmatpush.msrb.mxu1 %v8074_v36  ;;  %3048 = vmatpush.msrb.mxu3 %v8078_v14  ;;  %v4506_v36 = vld [vmem:[#allocation3 + $0x140] sm:$0xff]  ;;  %v4507_v14 = vld [vmem:[#allocation3 + $0x148] sm:$0xff] }
 0x646   :  { %2810 = vmatmul.f32.vlgmr.msrb.gmra.mxu0 %v2713_v27  ;;  %2850 = vmatmul.f32.vlgmr.msrb.gmra.mxu2 %v2713_v27 }
 0x647   :  { %3009 = vmatpush.msrb.mxu1 %v8082_v31  ;;  %3049 = vmatpush.msrb.mxu3 %v8086_v25  ;;  %v4508_v31 = vld [vmem:[#allocation3 + $0x120] sm:$0xff]  ;;  %v4509_v25 = vld [vmem:[#allocation3 + $0x128] sm:$0xff] }
 0x648   :  { %2900 = vmatpush.msra.mxu0 %v4504_v49  ;;  %2940 = vmatpush.msra.mxu2 %v4505_v1  ;;  %v10860_v49 = vld [vmem:[#allocation122_spill] sm:$0xff]  ;;  %v4540_v1 = vld [vmem:[#allocation3 + $0x130] sm:$0xff] }
 0x649   :  { %3010 = vmatpush.msrb.mxu1 %v8090_v21  ;;  %3050 = vmatpush.msrb.mxu3 %v8096_v16  ;;  %v4510_v21 = vld [vmem:[#allocation3 + $0x100] sm:$0xff]  ;;  %v4511_v16 = vld [vmem:[#allocation3 + $0x108] sm:$0xff] }
 0x64a   :  { %2901 = vmatpush.msra.mxu0 %v4506_v36  ;;  %2941 = vmatpush.msra.mxu2 %v4507_v14  ;;  %v4541_v36 = vld [vmem:[#allocation3 + $0x138] sm:$0xff]  ;;  %v10861_v14 = vld [vmem:[#allocation123_spill] sm:$0xff] }
 0x64b   :  { %3011 = vmatpush.msrb.mxu1 %v8100_v35  ;;  %3051 = vmatpush.msrb.mxu3 %v8104_v63  ;;  %v4512_v35 = vld [vmem:[#allocation3 + $0xe0] sm:$0xff]  ;;  %v4513_v63 = vld [vmem:[#allocation3 + $0xe8] sm:$0xff] }
 0x64c   :  { %3012 = vmatmul.f32.vlgmr.msrb.gmra.mxu1 %v2713_v27  ;;  %3052 = vmatmul.f32.vlgmr.msrb.gmra.mxu3 %v2713_v27  ;;  %v4535_v27 = vld [vmem:[#allocation3 + $0x198] sm:$0xff] }
 0x64d   :  { %2902 = vmatpush.msra.mxu0 %v4508_v31  ;;  %2942 = vmatpush.msra.mxu2 %v4509_v25  ;;  %v10862_v31 = vld [vmem:[#allocation124_spill] sm:$0xff]  ;;  %v4542_v25 = vld [vmem:[#allocation3 + $0x110] sm:$0xff] }
 0x64e   :  { %3097 = vmatpush.msra.mxu1 %v8109_v37  ;;  %3137 = vmatpush.msra.mxu3 %v8112_v0  ;;  %v4515_v37 = vld [vmem:[#allocation3 + $0xc8] sm:$0xff]  ;;  %v4516_v0 = vld [vmem:[#allocation3 + $0xa0] sm:$0xff] }
 0x64f   :  { %2903 = vmatpush.msra.mxu0 %v4510_v21  ;;  %2943 = vmatpush.msra.mxu2 %v4511_v16  ;;  %v4543_v21 = vld [vmem:[#allocation3 + $0x118] sm:$0xff]  ;;  %v10863_v16 = vld [vmem:[#allocation125_spill] sm:$0xff] }
 0x650   :  { %3098 = vmatpush.msra.mxu1 %v8117_v26  ;;  %3138 = vmatpush.msra.mxu3 %v8120_v45  ;;  %v4517_v26 = vld [vmem:[#allocation3 + $0xa8] sm:$0xff]  ;;  %v4518_v45 = vld [vmem:[#allocation3 + $0x80] sm:$0xff] }
 0x651   :  { %2904 = vmatpush.msra.mxu0 %v4512_v35  ;;  %2944 = vmatpush.msra.mxu2 %v4513_v63  ;;  %v10864_v35 = vld [vmem:[#allocation126_spill] sm:$0xff]  ;;  %v4544_v63 = vld [vmem:[#allocation3 + $0xf0] sm:$0xff] }
 0x652   :  { %3099 = vmatpush.msra.mxu1 %v8125_v52  ;;  %3139 = vmatpush.msra.mxu3 %v8128_v57  ;;  %v4519_v52 = vld [vmem:[#allocation3 + $0x88] sm:$0xff]  ;;  %v10842_v57 = vld [vmem:[#allocation61_spill] sm:$0xff] }
 0x653   :  { %2905 = vmatpush.msra.mxu0 %v4514_v53  ;;  %2945 = vmatpush.msra.mxu2 %v4515_v37  ;;  %v4545_v53 = vld [vmem:[#allocation3 + $0xf8] sm:$0xff]  ;;  %v10865_v37 = vld [vmem:[#allocation127_spill] sm:$0xff] }
 0x654   :  { %3100 = vmatpush.msra.mxu1 %v8133_v5  ;;  %3140 = vmatpush.msra.mxu3 %v8136_v22  ;;  %v4521_v5 = vld [vmem:[#allocation3 + $0x68] sm:$0xff] }
 0x655   :  { %2906 = vmatpush.msra.mxu0 %v4516_v0  ;;  %2946 = vmatpush.msra.mxu2 %v4517_v26  ;;  %v10843_v22 = vld [vmem:[#allocation78_spill] sm:$0xff]  ;;  %v10866_v0 = vld [vmem:[#allocation128_spill] sm:$0xff]  ;;  %v4546_v26 = vld [vmem:[#allocation3 + $0xd0] sm:$0xff] }
 0x656   :  { %3101 = vmatpush.msra.mxu1 %v8141_v24  ;;  %3141 = vmatpush.msra.mxu3 %v8144_v28  ;;  %v4523_v24 = vld [vmem:[#allocation3 + $0x48] sm:$0xff]  ;;  %v10845_v28 = vld [vmem:[#allocation107_spill] sm:$0xff] }
 0x657   :  { %2907 = vmatpush.msra.mxu0 %v4518_v45  ;;  %2947 = vmatpush.msra.mxu2 %v4519_v52  ;;  %v4547_v45 = vld [vmem:[#allocation3 + $0xd8] sm:$0xff]  ;;  %v10867_v52 = vld [vmem:[#allocation129_spill] sm:$0xff] }
 0x658   :  { %3102 = vmatpush.msra.mxu1 %v8149_v6  ;;  %3142 = vmatpush.msra.mxu3 %v10842_v57  ;;  %v4525_v6 = vld [vmem:[#allocation3 + $0x28] sm:$0xff] }
 0x659   :  { %2908 = vmatpush.msra.mxu0 %v4520_v10  ;;  %2948 = vmatpush.msra.mxu2 %v4521_v5  ;;  %v10868_v57 = vld [vmem:[#allocation130_spill] sm:$0xff]  ;;  %v4548_v10 = vld [vmem:[#allocation3 + $0xb0] sm:$0xff]  ;;  %v4549_v5 = vld [vmem:[#allocation3 + $0xb8] sm:$0xff] }
 0x65a   :  { %3103 = vmatpush.msra.mxu1 %v10843_v22  ;;  %3143 = vmatpush.msra.mxu3 %v10844_v11  ;;  %v10869_v22 = vld [vmem:[#allocation131_spill] sm:$0xff]  ;;  %v10870_v11 = vld [vmem:[#allocation132_spill] sm:$0xff] }
 0x65b   :  { %2909 = vmatpush.msra.mxu0 %v4522_v59  ;;  %2949 = vmatpush.msra.mxu2 %v4523_v24  ;;  %v4550_v59 = vld [vmem:[#allocation3 + $0x90] sm:$0xff]  ;;  %v4551_v24 = vld [vmem:[#allocation3 + $0x98] sm:$0xff] }
 0x65c   :  { %3104 = vmatpush.msra.mxu1 %v10845_v28  ;;  %3144 = vmatpush.msra.mxu3 %v10846_v41  ;;  %v10871_v28 = vld [vmem:[#allocation133_spill] sm:$0xff]  ;;  %v10872_v41 = vld [vmem:[#allocation134_spill] sm:$0xff] }
 0x65d   :  { %2910 = vmatpush.msra.mxu0 %v4524_v47  ;;  %2950 = vmatpush.msra.mxu2 %v4525_v6  ;;  %v4552_v47 = vld [vmem:[#allocation3 + $0x70] sm:$0xff]  ;;  %v4553_v6 = vld [vmem:[#allocation3 + $0x78] sm:$0xff] }
 0x65e   :  { %3105 = vmatpush.msra.mxu1 %v10847_v40  ;;  %3145 = vmatpush.msra.mxu3 %v10848_v46  ;;  %v10873_v40 = vld [vmem:[#allocation135_spill] sm:$0xff]  ;;  %v10874_v46 = vld [vmem:[#allocation136_spill] sm:$0xff] }
 0x65f   :  { %2911 = vmatpush.msra.mxu0 %v4526_v33  ;;  %2951 = vmatpush.msra.mxu2 %v4527_v58  ;;  %v4554_v33 = vld [vmem:[#allocation3 + $0x50] sm:$0xff]  ;;  %v4555_v58 = vld [vmem:[#allocation3 + $0x58] sm:$0xff] }
 0x660   :  { %2912 = vmatmul.f32.vlgmr.msra.gmra.mxu0 %v8658_v32  ;;  %2952 = vmatmul.f32.vlgmr.msra.gmra.mxu2 %v8658_v32 }
 0x661   :  { %2976 = vmatpush.msrb.mxu0 %v4528_v50  ;;  %3016 = vmatpush.msrb.mxu2 %v4529_v12  ;;  %v10875_v50 = vld [vmem:[#allocation137_spill] sm:$0xff]  ;;  %v10876_v12 = vld [vmem:[#allocation138_spill] sm:$0xff] }
 0x662   :  { %3106 = vmatpush.msra.mxu1 %v10849_v4  ;;  %3146 = vmatpush.msra.mxu3 %v10850_v56  ;;  %v10877_v4 = vld [vmem:[#allocation139_spill] sm:$0xff]  ;;  %v4556_v56 = vld [vmem:[#allocation3 + $0x38] sm:$0xff] }
 0x663   :  { %2977 = vmatpush.msrb.mxu0 %v4530_v39  ;;  %3017 = vmatpush.msrb.mxu2 %v4531_v29  ;;  %v10878_v39 = vld [vmem:[#allocation140_spill] sm:$0xff]  ;;  %v10879_v29 = vld [vmem:[#allocation141_spill] sm:$0xff] }
 0x664   :  { %3107 = vmatpush.msra.mxu1 %v10851_v55  ;;  %3147 = vmatpush.msra.mxu3 %v10852_v9  ;;  %v10880_v55 = vld [vmem:[#allocation142_spill] sm:$0xff]  ;;  %v4557_v9 = vld [vmem:[#allocation3 + $0x18] sm:$0xff] }
 0x665   :  { %2978 = vmatpush.msrb.mxu0 %v4532_v8  ;;  %3018 = vmatpush.msrb.mxu2 %v4533_v19  ;;  %v10881_v8 = vld [vmem:[#allocation143_spill] sm:$0xff]  ;;  %v10882_v19 = vld [vmem:[#allocation144_spill] sm:$0xff] }
 0x666   :  { %3108 = vmatpush.msra.mxu1 %v10853_v23  ;;  %3148 = vmatpush.msra.mxu3 %v10854_v51  ;;  %v10883_v23 = vld [vmem:[#allocation145_spill] sm:$0xff]  ;;  %v10884_v51 = vld [vmem:[#allocation146_spill] sm:$0xff] }
 0x667   :  { %2979 = vmatpush.msrb.mxu0 %v4534_v61  ;;  %3019 = vmatpush.msrb.mxu2 %v4535_v27  ;;  %v10885_v61 = vld [vmem:[#allocation147_spill] sm:$0xff]  ;;  %v10886_v27 = vld [vmem:[#allocation148_spill] sm:$0xff] }
 0x668   :  { %3109 = vmatpush.msra.mxu1 %v10855_v54  ;;  %3149 = vmatpush.msra.mxu3 %v10856_v34  ;;  %v10887_v54 = vld [vmem:[#allocation149_spill] sm:$0xff]  ;;  %v10888_v34 = vld [vmem:[#allocation150_spill] sm:$0xff] }
 0x669   :  { %2980 = vmatpush.msrb.mxu0 %v4536_v60  ;;  %3020 = vmatpush.msrb.mxu2 %v4537_v13  ;;  %v10889_v60 = vld [vmem:[#allocation151_spill] sm:$0xff]  ;;  %v10890_v13 = vld [vmem:[#allocation152_spill] sm:$0xff] }
 0x66a   :  { %3110 = vmatpush.msra.mxu1 %v10857_v38  ;;  %3150 = vmatpush.msra.mxu3 %v10858_v3  ;;  %v10892_v38 = vld [vmem:[#allocation154_spill] sm:$0xff]  ;;  %v10893_v3 = vld [vmem:[#allocation155_spill] sm:$0xff] }
 0x66b   :  { %2981 = vmatpush.msrb.mxu0 %v4538_v2  ;;  %3021 = vmatpush.msrb.mxu2 %v4539_v62  ;;  %v10894_v2 = vld [vmem:[#allocation156_spill] sm:$0xff]  ;;  %v10895_v62 = vld [vmem:[#allocation157_spill] sm:$0xff] }
 0x66c   :  { %3111 = vmatpush.msra.mxu1 %v10859_v43  ;;  %3151 = vmatpush.msra.mxu3 %v10860_v49  ;;  %v10896_v43 = vld [vmem:[#allocation158_spill] sm:$0xff]  ;;  %v10897_v49 = vld [vmem:[#allocation159_spill] sm:$0xff] }
 0x66d   :  { %2982 = vmatpush.msrb.mxu0 %v4540_v1  ;;  %3022 = vmatpush.msrb.mxu2 %v4541_v36  ;;  %v10898_v1 = vld [vmem:[#allocation160_spill] sm:$0xff]  ;;  %v10899_v36 = vld [vmem:[#allocation161_spill] sm:$0xff] }
 0x66e   :  { %3112 = vmatpush.msra.mxu1 %v10861_v14  ;;  %3152 = vmatpush.msra.mxu3 %v10862_v31  ;;  %v10900_v14 = vld [vmem:[#allocation162_spill] sm:$0xff]  ;;  %v10901_v31 = vld [vmem:[#allocation163_spill] sm:$0xff] }
 0x66f   :  { %2983 = vmatpush.msrb.mxu0 %v4542_v25  ;;  %3023 = vmatpush.msrb.mxu2 %v4543_v21  ;;  %v10902_v25 = vld [vmem:[#allocation164_spill] sm:$0xff]  ;;  %v10903_v21 = vld [vmem:[#allocation165_spill] sm:$0xff] }
 0x670   :  { %3177 = vmatpush.msrb.mxu1 %v10863_v16  ;;  %3217 = vmatpush.msrb.mxu3 %v10864_v35  ;;  %v10904_v16 = vld [vmem:[#allocation166_spill] sm:$0xff]  ;;  %v10905_v35 = vld [vmem:[#allocation167_spill] sm:$0xff] }
 0x671   :  { %2984 = vmatpush.msrb.mxu0 %v4544_v63  ;;  %3024 = vmatpush.msrb.mxu2 %v4545_v53  ;;  %v10906_v63 = vld [vmem:[#allocation168_spill] sm:$0xff]  ;;  %v10907_v53 = vld [vmem:[#allocation169_spill] sm:$0xff] }
 0x672   :  { %3178 = vmatpush.msrb.mxu1 %v10865_v37  ;;  %3218 = vmatpush.msrb.mxu3 %v10866_v0  ;;  %v10908_v37 = vld [vmem:[#allocation170_spill] sm:$0xff]  ;;  %v10909_v0 = vld [vmem:[#allocation171_spill] sm:$0xff] }
 0x673   :  { %2985 = vmatpush.msrb.mxu0 %v4546_v26  ;;  %3025 = vmatpush.msrb.mxu2 %v4547_v45  ;;  %v10910_v26 = vld [vmem:[#allocation69_spill] sm:$0xff]  ;;  %v10911_v45 = vld [vmem:[#allocation86_spill] sm:$0xff] }
 0x674   :  { %3179 = vmatpush.msrb.mxu1 %v10867_v52  ;;  %3219 = vmatpush.msrb.mxu3 %v10868_v57  ;;  %v10912_v52 = vld [vmem:[#allocation73_spill] sm:$0xff]  ;;  %v10913_v57 = vld [vmem:[#allocation90_spill] sm:$0xff] }
 0x675   :  { %2986 = vmatpush.msrb.mxu0 %v4548_v10  ;;  %3026 = vmatpush.msrb.mxu2 %v4549_v5  ;;  %v10914_v10 = vld [vmem:[#allocation76_spill] sm:$0xff] }
 0x676   :  { %3180 = vmatpush.msrb.mxu1 %v10869_v22  ;;  %3220 = vmatpush.msrb.mxu3 %v10870_v11  ;;  %v10915_v5 = vld [vmem:[#allocation80_spill] sm:$0xff] }
 0x677   :  { %2987 = vmatpush.msrb.mxu0 %v4550_v59  ;;  %3027 = vmatpush.msrb.mxu2 %v4551_v24  ;;  %v10916_v22 = vld [vmem:[#allocation84_spill] sm:$0xff] }
 0x678   :  { %3181 = vmatpush.msrb.mxu1 %v10871_v28  ;;  %3221 = vmatpush.msrb.mxu3 %v10872_v41  ;;  %v10917_v11 = vld [vmem:[#allocation88_spill] sm:$0xff]  ;;  %v10920_v28 = vld [vmem:[#allocation23_spill] sm:$0xff]  ;;  %v10921_v41 = vld [vmem:[#allocation54_spill] sm:$0xff] }
 0x679   :  { %2988 = vmatpush.msrb.mxu0 %v4552_v47  ;;  %3028 = vmatpush.msrb.mxu2 %v4553_v6  ;;  %v10918_v59 = vld [vmem:[#allocation20_spill] sm:$0xff]  ;;  %v10922_v47 = vld [vmem:[#allocation55_spill] sm:$0xff] }
 0x67a   :  { %3182 = vmatpush.msrb.mxu1 %v10873_v40  ;;  %3222 = vmatpush.msrb.mxu3 %v10874_v46  ;;  %v10919_v24 = vld [vmem:[#allocation92_spill] sm:$0xff]  ;;  %v10923_v6 = vld [vmem:[#allocation95_spill] sm:$0xff]  ;;  %v10924_v40 = vld [vmem:[#allocation58_spill] sm:$0xff] }
 0x67b   :  { %2989 = vmatpush.msrb.mxu0 %v4554_v33  ;;  %3029 = vmatpush.msrb.mxu2 %v4555_v58  ;;  %v10925_v46 = vld [vmem:[#allocation59_spill] sm:$0xff]  ;;  %v10926_v33 = vld [vmem:[#allocation62_spill] sm:$0xff] }
 0x67c   :  { %3183 = vmatpush.msrb.mxu1 %v10875_v50  ;;  %3223 = vmatpush.msrb.mxu3 %v10876_v12  ;;  %v10927_v58 = vld [vmem:[#allocation63_spill] sm:$0xff]  ;;  %v10929_v12 = vld [vmem:[#allocation66_spill] sm:$0xff] }
 0x67d   :  { %2990 = vmatpush.msrb.mxu0 %v10877_v4  ;;  %3030 = vmatpush.msrb.mxu2 %v4556_v56  ;;  %v10928_v50 = vld [vmem:[#allocation99_spill] sm:$0xff]  ;;  %v10931_v56 = vld [vmem:[#allocation70_spill] sm:$0xff] }
 0x67e   :  { %3184 = vmatpush.msrb.mxu1 %v10878_v39  ;;  %3224 = vmatpush.msrb.mxu3 %v10879_v29  ;;  %v10930_v4 = vld [vmem:[#allocation67_spill] sm:$0xff]  ;;  %v10932_v39 = vld [vmem:[#allocation72_spill] sm:$0xff]  ;;  %v10933_v29 = vld [vmem:[#allocation74_spill] sm:$0xff] }
 0x67f   :  { %2991 = vmatpush.msrb.mxu0 %v10880_v55  ;;  %3031 = vmatpush.msrb.mxu2 %v4557_v9  ;;  %v10934_v55 = vld [vmem:[#allocation77_spill] sm:$0xff]  ;;  %v10935_v9 = vld [vmem:[#allocation79_spill] sm:$0xff] }
 0x680   :  { %2992 = vmatmul.f32.vlgmr.msrb.gmra.mxu0 %v8658_v32  ;;  %3032 = vmatmul.f32.vlgmr.msrb.gmra.mxu2 %v8658_v32  ;;  %v10891_v32 = vld [vmem:[#allocation153_spill] sm:$0xff] }
 0x681   :  { %3185 = vmatpush.msrb.mxu1 %v10881_v8  ;;  %3225 = vmatpush.msrb.mxu3 %v10882_v19  ;;  %v10936_v8 = vld [vmem:[#allocation81_spill] sm:$0xff]  ;;  %v10937_v19 = vld [vmem:[#allocation83_spill] sm:$0xff] }
 0x682   :  { %3077 = vmatpush.msra.mxu0 %v10883_v23  ;;  %3117 = vmatpush.msra.mxu2 %v10884_v51  ;;  %v10938_v23 = vld [vmem:[#allocation85_spill] sm:$0xff]  ;;  %v10939_v51 = vld [vmem:[#allocation87_spill] sm:$0xff] }
 0x683   :  { %3186 = vmatpush.msrb.mxu1 %v10885_v61  ;;  %3226 = vmatpush.msrb.mxu3 %v10886_v27  ;;  %v10940_v61 = vld [vmem:[#allocation89_spill] sm:$0xff]  ;;  %v10941_v27 = vld [vmem:[#allocation91_spill] sm:$0xff] }
 0x684   :  { %3078 = vmatpush.msra.mxu0 %v10887_v54  ;;  %3118 = vmatpush.msra.mxu2 %v10888_v34  ;;  %v10942_v54 = vld [vmem:[#allocation93_spill] sm:$0xff]  ;;  %v10943_v34 = vld [vmem:[#allocation94_spill] sm:$0xff] }
 0x685   :  { %3187 = vmatpush.msrb.mxu1 %v10889_v60  ;;  %3227 = vmatpush.msrb.mxu3 %v10890_v13  ;;  %v10944_v60 = vld [vmem:[#allocation96_spill] sm:$0xff]  ;;  %v10945_v13 = vld [vmem:[#allocation97_spill] sm:$0xff] }
 0x686   :  { %3079 = vmatpush.msra.mxu0 %v10891_v32  ;;  %3119 = vmatpush.msra.mxu2 %v10892_v38  ;;  %v10946_v32 = vld [vmem:[#allocation98_spill] sm:$0xff] }
 0x687   :  { %3188 = vmatpush.msrb.mxu1 %v10893_v3  ;;  %3228 = vmatpush.msrb.mxu3 %v10894_v2  ;;  %v10947_v38 = vld [vmem:[#allocation102_spill] sm:$0xff]  ;;  %v10948_v3 = vld [vmem:[#allocation103_spill] sm:$0xff]  ;;  %v10949_v2 = vld [vmem:[#allocation104_spill] sm:$0xff] }
 0x688   :  { %3080 = vmatpush.msra.mxu0 %v10895_v62  ;;  %3120 = vmatpush.msra.mxu2 %v10896_v43  ;;  %v10950_v62 = vld [vmem:[#allocation105_spill] sm:$0xff] }
 0x689   :  { %3189 = vmatpush.msrb.mxu1 %v10897_v49  ;;  %3229 = vmatpush.msrb.mxu3 %v10898_v1  ;;  %v10951_v43 = vld [vmem:[#allocation9_spill] sm:$0xff]  ;;  %v10952_v49 = vld [vmem:[#allocation12_spill] sm:$0xff]  ;;  %v10953_v1 = vld [vmem:[#allocation10_spill] sm:$0xff] }
 0x68a   :  { %3081 = vmatpush.msra.mxu0 %v10899_v36  ;;  %3121 = vmatpush.msra.mxu2 %v10900_v14  ;;  %v10954_v36 = vld [vmem:[#allocation14_spill] sm:$0xff] }
 0x68b   :  { %3190 = vmatpush.msrb.mxu1 %v10901_v31  ;;  %3230 = vmatpush.msrb.mxu3 %v10902_v25  ;;  %v10955_v31 = vld [vmem:[#allocation101_spill] sm:$0xff]  ;;  %v10956_v25 = vld [vmem:[#allocation100_spill] sm:$0xff] }
 0x68c   :  { %3082 = vmatpush.msra.mxu0 %v10903_v21  ;;  %3122 = vmatpush.msra.mxu2 %v10904_v16  ;;  %v10957_v21 = vld [vmem:[#allocation65_spill] sm:$0xff] }
 0x68d   :  { %3191 = vmatpush.msrb.mxu1 %v10905_v35  ;;  %3231 = vmatpush.msrb.mxu3 %v10906_v63  ;;  %v2751_v35 = vpop.f32.mrf.mxu1  ;;  %v10958_v63 = vld [vmem:[#allocation13_spill] sm:$0xff] }
 0x68e   :  { %3083 = vmatpush.msra.mxu0 %v10907_v53  ;;  %3123 = vmatpush.msra.mxu2 %v10908_v37  ;;  %v10959_v53 = vld [vmem:[#allocation18_spill] sm:$0xff] }
 0x68f   :  { %3192 = vmatpush.msrb.mxu1 %v10909_v0  ;;  %3232 = vmatpush.msrb.mxu3 %v10910_v26  ;;  %v10960_v0 = vld [vmem:[#allocation15_spill] sm:$0xff]  ;;  %v10961_v26 = vld [vmem:[#allocation21_spill] sm:$0xff] }
 0x690   :  { %3084 = vmatpush.msra.mxu0 %v10911_v45  ;;  %3124 = vmatpush.msra.mxu2 %v10912_v52 }
 0x692   :  { %3085 = vmatpush.msra.mxu0 %v10913_v57  ;;  %3125 = vmatpush.msra.mxu2 %v10914_v10  ;;  %v2791_v57 = vpop.f32.mrf.mxu3 }
 0x694   :  { %3086 = vmatpush.msra.mxu0 %v10915_v5  ;;  %3126 = vmatpush.msra.mxu2 %v10916_v22 }
 0x696   :  { %3087 = vmatpush.msra.mxu0 %v10917_v11  ;;  %3127 = vmatpush.msra.mxu2 %v10918_v59 }
 0x698   :  { %3088 = vmatpush.msra.mxu0 %v10919_v24  ;;  %3128 = vmatpush.msra.mxu2 %v10920_v28 }
 0x69a   :  { %3089 = vmatpush.msra.mxu0 %v10921_v41  ;;  %3129 = vmatpush.msra.mxu2 %v10922_v47 }
 0x69c   :  { %3090 = vmatpush.msra.mxu0 %v10923_v6  ;;  %3130 = vmatpush.msra.mxu2 %v10924_v40  ;;  %v10962_v6 = vld [vmem:[#allocation82_spill] sm:$0xff] }
 0x69e   :  { %3091 = vmatpush.msra.mxu0 %v10925_v46  ;;  %3131 = vmatpush.msra.mxu2 %v10926_v33  ;;  %v2871_v46 = vpop.f32.mrf.mxu3  ;;  %v2831_v33 = vpop.f32.mrf.mxu1 }
 0x6a0   :  { %3092 = vmatpush.msra.mxu0 %v10927_v58  ;;  %3132 = vmatpush.msra.mxu2 %v10928_v50 }
 0x6a2   :  { %3157 = vmatpush.msrb.mxu0 %v10929_v12  ;;  %3197 = vmatpush.msrb.mxu2 %v10930_v4 }
 0x6a4   :  { %3158 = vmatpush.msrb.mxu0 %v10931_v56  ;;  %3198 = vmatpush.msrb.mxu2 %v10932_v39 }
 0x6a6   :  { %3159 = vmatpush.msrb.mxu0 %v10933_v29  ;;  %3199 = vmatpush.msrb.mxu2 %v10934_v55 }
 0x6a8   :  { %3160 = vmatpush.msrb.mxu0 %v10935_v9  ;;  %3200 = vmatpush.msrb.mxu2 %v10936_v8 }
 0x6aa   :  { %3161 = vmatpush.msrb.mxu0 %v10937_v19  ;;  %3201 = vmatpush.msrb.mxu2 %v10938_v23 }
 0x6ac   :  { %3162 = vmatpush.msrb.mxu0 %v10939_v51  ;;  %3202 = vmatpush.msrb.mxu2 %v10940_v61 }
 0x6ae   :  { %3163 = vmatpush.msrb.mxu0 %v10941_v27  ;;  %3203 = vmatpush.msrb.mxu2 %v10942_v54 }
 0x6b0   :  { %3164 = vmatpush.msrb.mxu0 %v10943_v34  ;;  %3204 = vmatpush.msrb.mxu2 %v10944_v60 }
 0x6b2   :  { %3165 = vmatpush.msrb.mxu0 %v10945_v13  ;;  %3205 = vmatpush.msrb.mxu2 %v10946_v32 }
 0x6b4   :  { %3166 = vmatpush.msrb.mxu0 %v10947_v38  ;;  %3206 = vmatpush.msrb.mxu2 %v10948_v3 }
 0x6b6   :  { %3167 = vmatpush.msrb.mxu0 %v10949_v2  ;;  %3207 = vmatpush.msrb.mxu2 %v10950_v62 }
 0x6b7   :  { %v2731_v14 = vpop.f32.mrf.mxu0 }
 0x6b8   :  { %3168 = vmatpush.msrb.mxu0 %v10951_v43  ;;  %3208 = vmatpush.msrb.mxu2 %v10952_v49  ;;  %v2732_v16 = vadd.f32 %v2731_v14, %v10957_v21 }
 0x6b9   :  { %v2933_v62 = vpop.f32.mrf.mxu1 }
 0x6ba   :  { %3169 = vmatpush.msrb.mxu0 %v10953_v1  ;;  %3209 = vmatpush.msrb.mxu2 %v10954_v36  ;;  %v2752_v37 = vadd.f32 %v2751_v35, %v2732_v16 }
 0x6bc   :  { %3170 = vmatpush.msrb.mxu0 %v10955_v31  ;;  %3210 = vmatpush.msrb.mxu2 %v10956_v25  ;;  %v2874_v45 = vsub.f32 0.0, %v2752_v37 }
 0x6bd   :  { %v2771_v52 = vpop.f32.mrf.mxu2 }
 0x6be   :  { %3171 = vmatpush.msrb.mxu0 %v10958_v63  ;;  %3211 = vmatpush.msrb.mxu2 %v10959_v53  ;;  %v2875_v10 = vmul.f32 1.442695, %v2874_v45  ;;  %v2772_v5 = vadd.f32 %v2771_v52, %v5713_v30 }
 0x6c0   :  { %3172 = vmatpush.msrb.mxu0 %v10960_v0  ;;  %3212 = vmatpush.msrb.mxu2 %v10961_v26  ;;  %3676 = vpow2.f32 %v2875_v10  ;;  %v2792_v22 = vadd.f32 %v2791_v57, %v2772_v5 }
 0x6c1   :  { %v2973_v43 = vpop.f32.mrf.mxu3 }
 0x6c2   :  { %v2879_v11 = vsub.f32 0.0, %v2792_v22 }
 0x6c3   :  { %v2811_v59 = vpop.f32.mrf.mxu0 }
 0x6c4   :  { %v2880_v24 = vmul.f32 1.442695, %v2879_v11  ;;  %v2812_v41 = vadd.f32 %v2811_v59, %v5716_v48 }
 0x6c6   :  { %v3677_v28 = vpop.eup %3676  ;;  %3678 = vpow2.f32 %v2880_v24  ;;  %v2832_v12 = vadd.f32 %v2831_v33, %v2812_v41  ;;  %v3306_v33 = vld [vmem:[%s8895_s5 + $0x68] sm:$0xff] }
 0x6c7   :  { %v2877_v58 = vadd.f32 1.0, %v3677_v28 }
 0x6c9   :  { %v2851_v47 = vpop.f32.mrf.mxu2  ;;  %3680 = vrcp.f32 %v2877_v58  ;;  %v3013_v63 = vpop.f32.mrf.mxu1  ;;  %v3305_v58 = vld [vmem:[%s8895_s5 + $0x60] sm:$0xff] }
 0x6ca   :  { %v2852_v40 = vadd.f32 %v2851_v47, %v10962_v6  ;;  %3682 = vtanh.f32 %v2832_v12  ;;  %v3303_v12 = vld [vmem:[%s8895_s5 + $0x50] sm:$0xff] }
 0x6cc   :  { %v2872_v50 = vadd.f32 %v2871_v46, %v2852_v40  ;;  %v3679_v56 = vpop.eup %3678  ;;  %v3308_v46 = vld [vmem:[%s8895_s5 + $0x78] sm:$0xff] }
 0x6cd   :  { %v2882_v39 = vadd.f32 1.0, %v3679_v56  ;;  %v3301_v56 = vld [vmem:[%s8895_s5 + $0x40] sm:$0xff] }
 0x6ce   :  { %v2885_v4 = vsub.f32 0.0, %v2872_v50  ;;  %v3304_v50 = vld [vmem:[%s8895_s5 + $0x58] sm:$0xff] }
 0x6cf   :  { %3684 = vrcp.f32 %v2882_v39  ;;  %v3681_v55 = vpop.eup %3680  ;;  %v3053_v45 = vpop.f32.mrf.mxu3  ;;  %v3300_v39 = vld [vmem:[%s8895_s5 + $0x38] sm:$0xff] }
 0x6d0   :  { %v2886_v29 = vmul.f32 1.442695, %v2885_v4  ;;  %v3683_v9 = vpop.eup %3682  ;;  %v3302_v4 = vld [vmem:[%s8895_s5 + $0x48] sm:$0xff] }
 0x6d1   :  { %v2891_v51 = vmul.f32 %v3683_v9, %v3681_v55  ;;  %v3299_v9 = vld [vmem:[%s8895_s5 + $0x30] sm:$0xff] }
 0x6d2   :  { %3686 = vpow2.f32 %v2886_v29 }
 0x6d5   :  { %v3685_v8 = vpop.eup %3684 }
 0x6d6   :  { %v2890_v23 = vmul.f32 %v3685_v8, %v8561_v44 }
 0x6d8   :  { %v3687_v19 = vpop.eup %3686  ;;  %v8783_v27 = vadd.f32 %v2891_v51, %v2890_v23  ;;  %v3298_v23 = vld [vmem:[%s8895_s5 + $0x28] sm:$0xff]  ;;  %v3297_v51 = vld [vmem:[%s8895_s5 + $0x20] sm:$0xff] }
 0x6d9   :  { %v2888_v61 = vadd.f32 1.0, %v3687_v19 }
 0x6db   :  { %3688 = vrcp.f32 %v2888_v61 }
 0x6dc   :  { %3690 = vtanh.f32 %v8783_v27 }
 0x6dd   :  { %v2913_v60 = vpop.f32.mrf.mxu0 }
 0x6de   :  { %v2914_v38 = vadd.f32 %v2913_v60, %v9846_v15 }
 0x6e0   :  { %v2934_v49 = vadd.f32 %v2933_v62, %v2914_v38 }
 0x6e1   :  { %v3689_v54 = vpop.eup %3688 }
 0x6e2   :  { %v3691_v34 = vpop.eup %3690  ;;  %v3056_v36 = vsub.f32 0.0, %v2934_v49 }
 0x6e3   :  { %v2953_v13 = vpop.f32.mrf.mxu2  ;;  %v2894_v32 = vmul.f32 %v3691_v34, %v3689_v54 }
 0x6e4   :  { %v2954_v44 = vadd.f32 %v2953_v13, %v9847_v18  ;;  %v3057_v31 = vmul.f32 1.442695, %v3056_v36 }
 0x6e5   :  { %3113 = vmatmul.f32.vlgmr.msra.gmra.mxu1 %v2894_v32  ;;  %3153 = vmatmul.f32.vlgmr.msra.gmra.mxu3 %v2894_v32  ;;  %v3274_v3 = vrot.slane %v2894_v32, 2 }
 0x6e6   :  { %v2974_v1 = vadd.f32 %v2973_v43, %v2954_v44  ;;  %3692 = vpow2.f32 %v3057_v31  ;;  %v3293_v43 = vld [vmem:[%s8895_s5] sm:$0xff]  ;;  %v3337_v31 = vld [vmem:[%s8897_s7 + $0x18] sm:$0xff] }
 0x6e7   :  { %v8789_v2 = vsel %vm3289_vm5, %v8569_v7, %v3274_v3  ;;  %v3294_v3 = vld [vmem:[%s8895_s5 + $0x8] sm:$0xff]  ;;  %3358 = vmatpush.msra.mxu1 %v3337_v31 }
 0x6e8   :  { %v3061_v14 = vsub.f32 0.0, %v2974_v1 }
 0x6ea   :  { %v3062_v25 = vmul.f32 1.442695, %v3061_v14 }
 0x6ec   :  { %3694 = vpow2.f32 %v3062_v25  ;;  %v3693_v15 = vpop.eup %3692  ;;  %v3400_v25 = vld [vmem:[%s8901_s11 + $0x18] sm:$0xff] }
 0x6ed   :  { %3193 = vmatmul.f32.vlgmr.msrb.gmra.mxu1 %v2894_v32  ;;  %3233 = vmatmul.f32.vlgmr.msrb.gmra.mxu3 %v2894_v32  ;;  %v3059_v7 = vadd.f32 1.0, %v3693_v15  ;;  %v3295_v32 = vld [vmem:[%s8895_s5 + $0x10] sm:$0xff] }
 0x6ee   :  { %v3336_v15 = vld [vmem:[%s8897_s7 + $0x10] sm:$0xff]  ;;  %3417 = vmatpush.msra.mxu3 %v3400_v25 }
 0x6ef   :  { %3359 = vmatpush.msra.mxu1 %v3336_v15 }
 0x6f2   :  { %v3695_v35 = vpop.eup %3694 }
 0x6f3   :  { %v3064_v37 = vadd.f32 1.0, %v3695_v35 }
 0x6fd   :  { %v2993_v16 = vpop.f32.mrf.mxu0 }
 0x6fe   :  { %v2994_v18 = vadd.f32 %v2993_v16, %v10815_v42 }
 0x700   :  { %v3014_v53 = vadd.f32 %v3013_v63, %v2994_v18 }
 0x702   :  { %3696 = vtanh.f32 %v3014_v53 }
 0x703   :  { %v3033_v0 = vpop.f32.mrf.mxu2  ;;  %3698 = vrcp.f32 %v3059_v7 }
 0x704   :  { %v3034_v26 = vadd.f32 %v3033_v0, %v10820_v17  ;;  %3700 = vrcp.f32 %v3064_v37 }
 0x706   :  { %v3054_v52 = vadd.f32 %v3053_v45, %v3034_v26 }
 0x708   :  { %v3067_v57 = vsub.f32 0.0, %v3054_v52  ;;  %v3697_v10 = vpop.eup %3696 }
 0x709   :  { %v3699_v5 = vpop.eup %3698 }
 0x70a   :  { %v3068_v22 = vmul.f32 1.442695, %v3067_v57  ;;  %v3701_v11 = vpop.eup %3700  ;;  %v3073_v59 = vmul.f32 %v3699_v5, %v3697_v10 }
 0x70b   :  { %v3072_v42 = vmul.f32 %v3701_v11, %v8612_v20  ;;  %v3307_v20 = vld [vmem:[%s8895_s5 + $0x70] sm:$0xff] }
 0x70c   :  { %3702 = vpow2.f32 %v3068_v22 }
 0x70d   :  { %v3074_v24 = vadd.f32 %v3073_v59, %v3072_v42 }
 0x70f   :  { %3704 = vtanh.f32 %v3074_v24 }
 0x712   :  { %v3703_v28 = vpop.eup %3702 }
 0x713   :  { %v3070_v41 = vadd.f32 1.0, %v3703_v28 }
 0x715   :  { %3706 = vrcp.f32 %v3070_v41  ;;  %v3705_v47 = vpop.eup %3704  ;;  %v3399_v41 = vld [vmem:[%s8901_s11 + $0x10] sm:$0xff] }
 0x716   :  { %3418 = vmatpush.msra.mxu3 %v3399_v41 }
 0x71b   :  { %v3707_v40 = vpop.eup %3706 }
 0x71c   :  { %v3076_v17 = vmul.f32 %v3707_v40, %v3705_v47  ;;  %v3398_v47 = vld [vmem:[%s8901_s11 + $0x8] sm:$0xff]  ;;  %v3397_v40 = vld [vmem:[%s8901_s11] sm:$0xff] }
 0x71d   :  { %3419 = vmatpush.msra.mxu3 %v3398_v47 }
 0x71e   :  { %3093 = vmatmul.f32.vlgmr.msra.gmra.mxu0 %v3076_v17  ;;  %3133 = vmatmul.f32.vlgmr.msra.gmra.mxu2 %v3076_v17 }
 0x71f   :  { %3313 = vmatpush.msra.mxu0 %v3308_v46  ;;  %3420 = vmatpush.msra.mxu3 %v3397_v40  ;;  %v3464_v46 = vld [vmem:[%s8896_s6] ss:$0 sm:$0xff]  ;;  %s4615_s6 = smov 6  }
 0x721   :  { %3314 = vmatpush.msra.mxu0 %v3307_v20 }
 0x723   :  { %3315 = vmatpush.msra.mxu0 %v3306_v33 }
 0x725   :  { %3316 = vmatpush.msra.mxu0 %v3305_v58 }
 0x726   :  { %3173 = vmatmul.f32.vlgmr.msrb.gmra.mxu0 %v3076_v17  ;;  %3213 = vmatmul.f32.vlgmr.msrb.gmra.mxu2 %v3076_v17  ;;  %v3368_v17 = vld [vmem:[%s8899_s9 + $0x8] sm:$0xff] }
 0x727   :  { %3317 = vmatpush.msra.mxu0 %v3304_v50  ;;  %3391 = vmatpush.msra.mxu2 %v3368_v17  ;;  %v3367_v50 = vld [vmem:[%s8899_s9] sm:$0xff] }
 0x729   :  { %3318 = vmatpush.msra.mxu0 %v3303_v12  ;;  %3392 = vmatpush.msra.mxu2 %v3367_v50  ;;  %v3465_v12 = vld [vmem:[%s8898_s8] ss:$0 sm:$0xff] }
 0x72b   :  { %3319 = vmatpush.msra.mxu0 %v3302_v4 }
 0x72d   :  { %3320 = vmatpush.msra.mxu0 %v3301_v56 }
 0x72f   :  { %3321 = vmatpush.msra.mxu0 %v3300_v39 }
 0x731   :  { %3322 = vmatpush.msra.mxu0 %v3299_v9 }
 0x733   :  { %3323 = vmatpush.msra.mxu0 %v3298_v23 }
 0x735   :  { %3324 = vmatpush.msra.mxu0 %v3297_v51 }
 0x762   :  { %v3114_v8 = vpop.f32.mrf.mxu1 }
 0x768   :  { %v3154_v54 = vpop.f32.mrf.mxu3 }
 0x76a   :  { %v3194_v16 = vpop.f32.mrf.mxu1 }
 0x79b   :  { %v3094_v29 = vpop.f32.mrf.mxu0 }
 0x79c   :  { %v3095_v55 = vadd.f32 %v3094_v29, %v10957_v21  ;;  %v3296_v21 = vld [vmem:[%s8895_s5 + $0x18] sm:$0xff]  ;;  %v3467_v29 = vld [vmem:[#allocation2] ss:$0 sm:$0xff] }
 0x79d   :  { %3325 = vmatpush.msra.mxu0 %v3296_v21 }
 0x79e   :  { %v3115_v19 = vadd.f32 %v3114_v8, %v3095_v55  ;;  %v3466_v8 = vld [vmem:[%s8902_s12] ss:$0 sm:$0xff] }
 0x79f   :  { %3326 = vmatpush.msra.mxu0 %v3295_v32 }
 0x7a0   :  { %v3237_v61 = vsub.f32 0.0, %v3115_v19 }
 0x7a1   :  { %v3134_v34 = vpop.f32.mrf.mxu2  ;;  %3327 = vmatpush.msra.mxu0 %v3294_v3 }
 0x7a2   :  { %v3238_v60 = vmul.f32 1.442695, %v3237_v61  ;;  %v3135_v13 = vadd.f32 %v3134_v34, %v5713_v30 }
 0x7a3   :  { %v3174_v44 = vpop.f32.mrf.mxu0  ;;  %3328 = vmatpush.msra.mxu0 %v3293_v43 }
 0x7a4   :  { %3708 = vpow2.f32 %v3238_v60  ;;  %v3155_v38 = vadd.f32 %v3154_v54, %v3135_v13  ;;  %v3175_v49 = vadd.f32 %v3174_v44, %v5716_v48  ;;  %v3234_v48 = vpop.f32.mrf.mxu3 }
 0x7a6   :  { %v3242_v62 = vsub.f32 0.0, %v3155_v38  ;;  %v3195_v35 = vadd.f32 %v3194_v16, %v3175_v49 }
 0x7a8   :  { %v3243_v30 = vmul.f32 1.442695, %v3242_v62 }
 0x7a9   :  { %v3214_v1 = vpop.f32.mrf.mxu2 }
 0x7aa   :  { %v3709_v36 = vpop.eup %3708  ;;  %3710 = vpow2.f32 %v3243_v30  ;;  %v3215_v14 = vadd.f32 %v3214_v1, %v10962_v6 }
 0x7ab   :  { %v3240_v63 = vadd.f32 1.0, %v3709_v36  ;;  %3712 = vtanh.f32 %v3195_v35 }
 0x7ac   :  { %v3235_v18 = vadd.f32 %v3234_v48, %v3215_v14 }
 0x7ad   :  { %3714 = vrcp.f32 %v3240_v63 }
 0x7ae   :  { %v3248_v6 = vsub.f32 0.0, %v3235_v18 }
 0x7b0   :  { %v3711_v7 = vpop.eup %3710  ;;  %v3249_v53 = vmul.f32 1.442695, %v3248_v6 }
 0x7b1   :  { %v3245_v37 = vadd.f32 1.0, %v3711_v7  ;;  %v3713_v0 = vpop.eup %3712 }
 0x7b2   :  { %3716 = vpow2.f32 %v3249_v53 }
 0x7b3   :  { %3718 = vrcp.f32 %v3245_v37  ;;  %v3715_v26 = vpop.eup %3714 }
 0x7b4   :  { %v3254_v5 = vmul.f32 %v3715_v26, %v3713_v0 }
 0x7b8   :  { %v3717_v45 = vpop.eup %3716 }
 0x7b9   :  { %v3719_v52 = vpop.eup %3718  ;;  %v3251_v57 = vadd.f32 1.0, %v3717_v45 }
 0x7ba   :  { %v3253_v10 = vmul.f32 %v3719_v52, %v8783_v27  ;;  %v3335_v27 = vld [vmem:[%s8897_s7 + $0x8] sm:$0xff] }
 0x7bb   :  { %3720 = vrcp.f32 %v3251_v57  ;;  %3360 = vmatpush.msra.mxu1 %v3335_v27 }
 0x7bc   :  { %v3255_v22 = vadd.f32 %v3254_v5, %v3253_v10 }
 0x7be   :  { %3722 = vtanh.f32 %v3255_v22 }
 0x7c1   :  { %v3721_v11 = vpop.eup %3720 }
 0x7c4   :  { %v3723_v59 = vpop.eup %3722 }
 0x7c5   :  { %v3257_v42 = vmul.f32 %v3723_v59, %v3721_v11 }
 0x7c7   :  { %v3277_v24 = vrot.slane %v3257_v42, 1 }
 0x7c9   :  { %v3292_v28 = vsel %vm3291_vm6, %v8789_v2, %v3277_v24  ;;  %v3334_v2 = vld [vmem:[%s8897_s7] sm:$0xff] }
 0x7ca   :  { %3329 = vmatmul.f32.vlgmr.msra.gmra.mxu0 %v3292_v28  ;;  %3361 = vmatpush.msra.mxu1 %v3334_v2 }
 0x847   :  { %v3330_v20 = vpop.f32.mrf.mxu0 }
 0x848   :  { %v3331_v33 = vadd.f32 %v3464_v46, %v3330_v20 }
 0x84a   :  { %v3333_v58 = vmax.f32 %v3331_v33, 0.0 }
 0x84c   :  { %3455 = vmatmul.msk.f32.vlgmr.msra.gmra.mxu1 %vm3342_vm7, %v3333_v58  ;;  %3457 = vmatmul.msk.f32.vlgmr.msra.gmra.mxu3 %vm3342_vm7, %v3333_v58 }
 0x8c9   :  { %v3363_v4 = vpop.f32.mrf.mxu1 }
 0x8ca   :  { %v3364_v56 = vadd.f32 %v3465_v12, %v3363_v4 }
 0x8cc   :  { %v3366_v39 = vmax.f32 %v3364_v56, 0.0 }
 0x8ce   :  { %3456 = vmatmul.msk.f32.vlgmr.msra.gmra.mxu2 %vm3373_vm8, %v3366_v39 }
 0x8cf   :  { %v3422_v19 = vpop.f32.mrf.mxu3 }
 0x8d0   :  { %v3423_v23 = vadd.f32 %v3466_v8, %v3422_v19 }
 0x8d2   :  { %v3426_v51 = vmin.f32 %v3423_v23, 20.0  ;;  %vm3425_vm10 = vcmp.gt.f32.partialorder %v3423_v23, 20.0 }
 0x8d4   :  { %v3427_v61 = vmul.f32 1.442695, %v3426_v51 }
 0x8d6   :  { %3724 = vpow2.f32 %v3427_v61 }
 0x8dc   :  { %v3725_v21 = vpop.eup %3724 }
 0x8dd   :  { %v3429_v54 = vadd.f32 1.0, %v3725_v21  ;;  %v3432_v34 = vmul.f32 -0.5, %v3725_v21  ;;  %v3435_v32 = vand.u32 2147483647, %v3725_v21 }
 0x8df   :  { %3726 = vlog2.f32 %v3429_v54  ;;  %v3433_v13 = vadd.f32 1.0, %v3432_v34  ;;  %vm3436_vm9 = vcmp.lt.f32.partialorder %v3435_v32, 0.0004427343 }
 0x8e1   :  { %v3434_v3 = vmul.f32 %v3725_v21, %v3433_v13 }
 0x8e5   :  { %v3727_v60 = vpop.eup %3726 }
 0x8e6   :  { %v3431_v38 = vmul.f32 0.6931472, %v3727_v60 }
 0x8e8   :  { %v3437_v44 = vsel %vm3436_vm9, %v3434_v3, %v3431_v38 }
 0x8e9   :  { %v3438_v62 = vsel %vm3425_vm10, %v3423_v23, %v3437_v44 }
 0x8ea   :  { %v3439_v43 = vadd.f32 1.0, %v3438_v62 }
 0x951   :  { %v3394_v55 = vpop.f32.mrf.mxu2 }
 0x952   :  { %v3395_v9 = vadd.f32 %v3467_v29, %v3394_v55 }
 0x954   :  { %3441 = vrot.lane.b32.xlu0 %v3395_v9, %s4615_s6 }
 0x9c6   :  { %v3442_v30 = vpop.permute.xlu0 %3441 }
 0x9c7   :  { %v3445_v49 = vsel %vm3444_vm11, %v3439_v43, %v3442_v30 }
 0x9c8   :  { %v3447_v1 = vsel %vm3446_vm12, %v3445_v49, 0.0 }
 0x9c9   :  { %3448 = vst [vmem:[%s8903_s13] sm:$0xff] %v3447_v1 }
 0x9ca   :  { %3453 = vsyncpa [#allocation4], 1 }
 0x9cb   :  { %3454 = vsyncpa [#allocation6], 1 }

</bundles_post_ra>
